<compile_context>
chip_gen: v6e
topology: v6e:2x2x1
jax: 0.10.0
libtpu: 0.0.40
codegen_flags: <defaults>
</compile_context>

<pallas_src>
import functools

import jax
import jax.numpy as jnp
from jax.experimental import pallas as pl
from jax.experimental.pallas import tpu as pltpu


def _round_up(x, m):
    return (x + m - 1) // m * m


def _pick_batch_tile(n):
    """Images per grid step: batch enough to amortize per-step overhead, but
    keep >=2 grid steps when possible so both v7x TensorCores get work."""
    if n <= 1:
        return 1
    return min(8, (n + 1) // 2)


# ------------------------- fully fused forward kernel ------------------------

def _lizard_kernel(x_ref, w1_ref, b1_ref, w2_ref, b2_ref,
                   wf1_ref, bf1_ref, wf2_ref, bf2_ref, wf3_ref, bf3_ref,
                   o_ref, act1_ref, act2_ref, row1_ref, row2_ref, *, batch):
    """Whole LizardCnn forward for one tile of `batch` images, VMEM-resident.

    x_ref   : (batch*1024, 3)  flat NHWC input  (row = b*1024 + y*32 + x)
    w1_ref  : (25, 3, 6)       conv1 per-tap weights (tap = di*5 + dj)
    w2_ref  : (25, 6, 12)      conv2 per-tap weights
    wf1_ref : (25, 12, 120)    fc1 weights per conv2 spatial position r = h*5+w
    wf2_ref : (120, 60)        fc2 weights;  wf3_ref: (60, 10) output head
    o_ref   : (1, batch, 10)   logits
    act1_ref: (batch*196, 6)   conv1 pooled activations (row = b*196 + p*14 + q)
    act2_ref: (batch*25, 12)   conv2 pooled activations (row = b*25  + p*5  + q)
    row1_ref/(row2_ref): two consecutive conv output rows used for 2x2/2 pool
    """
    b1 = jnp.broadcast_to(b1_ref[...], (60, 6))     # hoisted out of the loops
    b2 = jnp.broadcast_to(b2_ref[...], (24, 12))

    def conv_image(b, carry):
        x0 = b * 1024
        a0 = b * 196
        f0 = b * 25

        # ---- conv1 (5x5, 3->6) + ReLU + 2x2/2 max-pool : 32x32 -> 14x14 ----
        def c1_row(p, inner_carry):
            # conv output rows 2p, 2p+1 as one flat (60, 3) window per tap;
            # flat row y*32+x, so tap (di,dj) reads offset di*32+dj.  Columns
            # x >= 28 hold wrap-around garbage and are never read by the pool.
            base = pl.multiple_of(x0 + 2 * p * 32, 64)
            acc = jnp.zeros((60, 6), jnp.float32)
            for di in range(5):                      # taps fully unrolled
                for dj in range(5):
                    xt = x_ref[pl.ds(base + di * 32 + dj, 60), :]   # (60, 3)
                    acc = acc + jnp.dot(xt, w1_ref[di * 5 + dj],
                                        preferred_element_type=jnp.float32)
            row1_ref[...] = jnp.maximum(acc + b1, 0.0)
            pooled = jnp.maximum(                    # stride-2 sublane reads
                jnp.maximum(row1_ref[pl.ds(0, 14, 2), :],
                            row1_ref[pl.ds(1, 14, 2), :]),
                jnp.maximum(row1_ref[pl.ds(32, 14, 2), :],
                            row1_ref[pl.ds(33, 14, 2), :]))
            act1_ref[pl.ds(a0 + p * 14, 14), :] = pooled            # (14, 6)
            return inner_carry

        jax.lax.fori_loop(0, 14, c1_row, 0)

        # ---- conv2 (5x5, 6->12) + ReLU + 2x2/2 max-pool : 14x14 -> 5x5 -----
        for p in range(5):                           # short loop: unrolled
            base = a0 + 2 * p * 14
            acc = jnp.zeros((24, 12), jnp.float32)
            for di in range(5):
                for dj in range(5):
                    xt = act1_ref[pl.ds(base + di * 14 + dj, 24), :]  # (24, 6)
                    acc = acc + jnp.dot(xt, w2_ref[di * 5 + dj],
                                        preferred_element_type=jnp.float32)
            row2_ref[...] = jnp.maximum(acc + b2, 0.0)
            pooled = jnp.maximum(
                jnp.maximum(row2_ref[pl.ds(0, 5, 2), :],
                            row2_ref[pl.ds(1, 5, 2), :]),
                jnp.maximum(row2_ref[pl.ds(14, 5, 2), :],
                            row2_ref[pl.ds(15, 5, 2), :]))
            act2_ref[pl.ds(f0 + p * 5, 5), :] = pooled              # (5, 12)
        return carry

    if batch <= 2:
        for b in range(batch):                       # tiny tiles: unroll
            conv_image(b, 0)
    else:
        jax.lax.fori_loop(0, batch, conv_image, 0)

    # ---- fc1 as 25 per-position batched dots (no in-kernel reshapes), then
    # ---- fc2 and the output head, all on-chip; only logits go to HBM. ------
    h = jnp.zeros((batch, 120), jnp.float32)
    for r in range(25):
        h = h + jnp.dot(act2_ref[pl.ds(r, batch, 25), :], wf1_ref[r],
                        preferred_element_type=jnp.float32)
    h = jnp.maximum(h + bf1_ref[...], 0.0)
    h = jnp.dot(h, wf2_ref[...], preferred_element_type=jnp.float32)
    h = jnp.maximum(h + bf2_ref[...], 0.0)
    logits = jnp.dot(h, wf3_ref[...], preferred_element_type=jnp.float32)
    o_ref[0] = logits + bf3_ref[...]


# --------------------------------- wrappers ---------------------------------

def prepare_params(params):
    """One-time weight re-layout (hoisted out of the forward path)."""
    return {
        # conv weights -> per-tap (kh*kw, Cin, Cout) slices, tap = di*kw + dj
        "w1t": params["conv1_w"].transpose(2, 3, 1, 0).reshape(25, 3, 6),
        "b1": params["conv1_b"].reshape(1, 6),
        "w2t": params["conv2_w"].transpose(2, 3, 1, 0).reshape(25, 6, 12),
        "b2": params["conv2_b"].reshape(1, 12),
        # fc1: torch flattens (c, h, w); re-index to per-(h,w) (12, 120) slabs
        "wf1": params["fc1_w"].reshape(120, 12, 5, 5)
                              .transpose(2, 3, 1, 0).reshape(25, 12, 120),
        "bf1": params["fc1_b"].reshape(1, 120),
        "wf2": params["fc2_w"].T,                       # (120, 60)
        "bf2": params["fc2_b"].reshape(1, 60),
        "wf3": params["out_w"].T,                       # (60, 10)
        "bf3": params["out_b"].reshape(1, 10),
    }


def lizard_cnn_forward(prep, x_nchw, *, batch_tile=None):
    """Fused LizardCnn forward.  `prep` comes from prepare_params()."""
    n = x_nchw.shape[0]
    if batch_tile is None:
        batch_tile = _pick_batch_tile(n)
    n_pad = _round_up(n, batch_tile)
    grid = n_pad // batch_tile

    # one-time NCHW -> flat NHWC rows (row = b*1024 + y*32 + x, lanes = Cin)
    x = jnp.transpose(x_nchw, (0, 2, 3, 1))
    if n_pad != n:
        x = jnp.pad(x, ((0, n_pad - n), (0, 0), (0, 0), (0, 0)))
    x = x.reshape(n_pad * 1024, 3)

    kernel = functools.partial(_lizard_kernel, batch=batch_tile)
    out = pl.pallas_call(
        kernel,
        out_shape=jax.ShapeDtypeStruct((grid, batch_tile, 10), jnp.float32),
        grid=(grid,),
        in_specs=[
            pl.BlockSpec((batch_tile * 1024, 3), lambda i: (i, 0)),
            pl.BlockSpec((25, 3, 6), lambda i: (0, 0, 0)),
            pl.BlockSpec((1, 6), lambda i: (0, 0)),
            pl.BlockSpec((25, 6, 12), lambda i: (0, 0, 0)),
            pl.BlockSpec((1, 12), lambda i: (0, 0)),
            pl.BlockSpec((25, 12, 120), lambda i: (0, 0, 0)),
            pl.BlockSpec((1, 120), lambda i: (0, 0)),
            pl.BlockSpec((120, 60), lambda i: (0, 0)),
            pl.BlockSpec((1, 60), lambda i: (0, 0)),
            pl.BlockSpec((60, 10), lambda i: (0, 0)),
            pl.BlockSpec((1, 10), lambda i: (0, 0)),
        ],
        out_specs=pl.BlockSpec((1, batch_tile, 10), lambda i: (i, 0, 0)),
        scratch_shapes=[
            pltpu.VMEM((batch_tile * 196, 6), jnp.float32),   # conv1 pooled
            pltpu.VMEM((batch_tile * 25, 12), jnp.float32),   # conv2 pooled
            pltpu.VMEM((60, 6), jnp.float32),                 # conv1 row pair
            pltpu.VMEM((24, 12), jnp.float32),                # conv2 row pair
        ],
        compiler_params=pltpu.CompilerParams(
            dimension_semantics=("parallel",)),
    )(x, prep["w1t"], prep["b1"], prep["w2t"], prep["b2"],
      prep["wf1"], prep["bf1"], prep["wf2"], prep["bf2"],
      prep["wf3"], prep["bf3"])

    out = out.reshape(n_pad, 10)
    return out[:n] if n_pad != n else out


# ----------------------------- params & reference ----------------------------

def init_params(key):
    """PyTorch-default-style init: U(-1/sqrt(fan_in), 1/sqrt(fan_in))."""
    def uniform(k, shape, fan_in):
        bound = 1.0 / float(fan_in) ** 0.5
        return jax.random.uniform(k, shape, jnp.float32, -bound, bound)

    ks = jax.random.split(key, 10)
    return {
        "conv1_w": uniform(ks[0], (6, 3, 5, 5), 3 * 25),
        "conv1_b": uniform(ks[1], (6,), 3 * 25),
        "conv2_w": uniform(ks[2], (12, 6, 5, 5), 6 * 25),
        "conv2_b": uniform(ks[3], (12,), 6 * 25),
        "fc1_w": uniform(ks[4], (120, 300), 300),
        "fc1_b": uniform(ks[5], (120,), 300),
        "fc2_w": uniform(ks[6], (60, 120), 120),
        "fc2_b": uniform(ks[7], (60,), 120),
        "out_w": uniform(ks[8], (10, 60), 60),
        "out_b": uniform(ks[9], (10,), 60),
    }


def reference_forward(params, x_nchw):
    """Pure-JAX reference (same math) used only as a sanity check."""
    dn = ("NCHW", "OIHW", "NCHW")
    t = jax.lax.conv_general_dilated(x_nchw, params["conv1_w"], (1, 1), "VALID",
                                     dimension_numbers=dn)
    t = jax.nn.relu(t + params["conv1_b"][None, :, None, None])
    t = jax.lax.reduce_window(t, -jnp.inf, jax.lax.max,
                              (1, 1, 2, 2), (1, 1, 2, 2), "VALID")
    t = jax.lax.conv_general_dilated(t, params["conv2_w"], (1, 1), "VALID",
                                     dimension_numbers=dn)
    t = jax.nn.relu(t + params["conv2_b"][None, :, None, None])
    t = jax.lax.reduce_window(t, -jnp.inf, jax.lax.max,
                              (1, 1, 2, 2), (1, 1, 2, 2), "VALID")
    t = t.reshape(-1, 12 * 5 * 5)
    t = jax.nn.relu(t @ params["fc1_w"].T + params["fc1_b"])
    t = jax.nn.relu(t @ params["fc2_w"].T + params["fc2_b"])
    return t @ params["out_w"].T + params["out_b"]


if __name__ == "__main__":
    key = jax.random.PRNGKey(0)
    pkey, xkey = jax.random.split(key)
    params = init_params(pkey)
    prep = prepare_params(params)          # one-time weight re-layout
    # fc1 expects 12*5*5 features => 3x32x32 input; small batch = 2.
    x = jax.random.normal(xkey, (2, 3, 32, 32), dtype=jnp.float32)

    fwd = jax.jit(lizard_cnn_forward)
    out = jax.block_until_ready(fwd(prep, x))
    assert out.shape == (2, 10), out.shape

    ref = jax.block_until_ready(jax.jit(reference_forward)(params, x))
    assert jnp.allclose(out, ref, rtol=1e-2, atol=1e-2), (out, ref)

    print("KERNEL_OK")
</pallas_src>

<mosaic_0001>
module attributes {stable_mosaic.version = 11 : i64} {
  func.func @_lizard_kernel(%arg0: i32, %arg1: memref<1024x3xf32, #tpu.memory_space<vmem>>, %arg2: memref<25x3x6xf32, #tpu.memory_space<vmem>>, %arg3: memref<1x6xf32, #tpu.memory_space<vmem>>, %arg4: memref<25x6x12xf32, #tpu.memory_space<vmem>>, %arg5: memref<1x12xf32, #tpu.memory_space<vmem>>, %arg6: memref<25x12x120xf32, #tpu.memory_space<vmem>>, %arg7: memref<1x120xf32, #tpu.memory_space<vmem>>, %arg8: memref<120x60xf32, #tpu.memory_space<vmem>>, %arg9: memref<1x60xf32, #tpu.memory_space<vmem>>, %arg10: memref<60x10xf32, #tpu.memory_space<vmem>>, %arg11: memref<1x10xf32, #tpu.memory_space<vmem>>, %arg12: memref<1x1x10xf32, #tpu.memory_space<vmem>>, %arg13: memref<196x6xf32, #tpu.memory_space<vmem>>, %arg14: memref<25x12xf32, #tpu.memory_space<vmem>>, %arg15: memref<60x6xf32, #tpu.memory_space<vmem>>, %arg16: memref<24x12xf32, #tpu.memory_space<vmem>>) attributes {dimension_semantics = [#tpu.dimension_semantics<parallel>], iteration_bounds = array<i64: 2>, scalar_prefetch = 0 : i64, scratch_operands = 4 : i64, tpu.core_type = #tpu.core_type<tc>, window_params = [{transform_indices = @transform_0, window_bounds = array<i64: 1024, 3>}, {pipeline_mode = #tpu.pipeline_mode<synchronous>, transform_indices = @transform_1, window_bounds = array<i64: 25, 3, 6>}, {pipeline_mode = #tpu.pipeline_mode<synchronous>, transform_indices = @transform_2, window_bounds = array<i64: 1, 6>}, {pipeline_mode = #tpu.pipeline_mode<synchronous>, transform_indices = @transform_3, window_bounds = array<i64: 25, 6, 12>}, {pipeline_mode = #tpu.pipeline_mode<synchronous>, transform_indices = @transform_4, window_bounds = array<i64: 1, 12>}, {pipeline_mode = #tpu.pipeline_mode<synchronous>, transform_indices = @transform_5, window_bounds = array<i64: 25, 12, 120>}, {pipeline_mode = #tpu.pipeline_mode<synchronous>, transform_indices = @transform_6, window_bounds = array<i64: 1, 120>}, {pipeline_mode = #tpu.pipeline_mode<synchronous>, transform_indices = @transform_7, window_bounds = array<i64: 120, 60>}, {pipeline_mode = #tpu.pipeline_mode<synchronous>, transform_indices = @transform_8, window_bounds = array<i64: 1, 60>}, {pipeline_mode = #tpu.pipeline_mode<synchronous>, transform_indices = @transform_9, window_bounds = array<i64: 60, 10>}, {pipeline_mode = #tpu.pipeline_mode<synchronous>, transform_indices = @transform_10, window_bounds = array<i64: 1, 10>}, {transform_indices = @transform_11, window_bounds = array<i64: 1, 1, 10>}]} {
    %c0 = arith.constant 0 : index
    %c0_0 = arith.constant 0 : index
    %0 = vector.load %arg3[%c0, %c0_0] : memref<1x6xf32, #tpu.memory_space<vmem>>, vector<1x6xf32>
    %1 = vector.shape_cast %0 : vector<1x6xf32> to vector<1x6xf32>
    %2 = vector.broadcast %1 : vector<1x6xf32> to vector<60x6xf32>
    %c0_1 = arith.constant 0 : index
    %c0_2 = arith.constant 0 : index
    %3 = vector.load %arg5[%c0_1, %c0_2] : memref<1x12xf32, #tpu.memory_space<vmem>>, vector<1x12xf32>
    %4 = vector.shape_cast %3 : vector<1x12xf32> to vector<1x12xf32>
    %5 = vector.broadcast %4 : vector<1x12xf32> to vector<24x12xf32>
    %c0_i32 = arith.constant 0 : i32
    %c14_i32 = arith.constant 14 : i32
    %6 = arith.addi %c0_i32, %c14_i32 : i32
    %c1_i32 = arith.constant 1 : i32
    scf.for %arg17 = %c0_i32 to %6 step %c1_i32  : i32 {
      %c2_i32 = arith.constant 2 : i32
      %840 = arith.muli %c2_i32, %arg17 : i32
      %c32_i32 = arith.constant 32 : i32
      %841 = arith.muli %840, %c32_i32 : i32
      %c0_i32_912 = arith.constant 0 : i32
      %842 = arith.addi %c0_i32_912, %841 : i32
      %843 = tpu.assume_multiple %842, 64 : i32
      %cst_913 = arith.constant 0.000000e+00 : f32
      %844 = vector.broadcast %cst_913 : f32 to vector<60x6xf32>
      %c0_i32_914 = arith.constant 0 : i32
      %845 = arith.addi %843, %c0_i32_914 : i32
      %c0_i32_915 = arith.constant 0 : i32
      %846 = arith.addi %845, %c0_i32_915 : i32
      %847 = arith.index_cast %846 : i32 to index
      %c0_916 = arith.constant 0 : index
      %848 = vector.load %arg1[%847, %c0_916] : memref<1024x3xf32, #tpu.memory_space<vmem>>, vector<60x3xf32>
      %c0_917 = arith.constant 0 : index
      %c0_918 = arith.constant 0 : index
      %c0_919 = arith.constant 0 : index
      %849 = vector.load %arg2[%c0_917, %c0_918, %c0_919] : memref<25x3x6xf32, #tpu.memory_space<vmem>>, vector<1x3x6xf32>
      %850 = vector.shape_cast %849 : vector<1x3x6xf32> to vector<3x6xf32>
      %cst_920 = arith.constant dense<0.000000e+00> : vector<60x6xf32>
      %851 = tpu.matmul %848, %850, %cst_920 {dimension_numbers = #tpu.dot_dimension_numbers<[1], [0], [0], [1], [0, 0, 1, 1], [], []>} : vector<60x3xf32>, vector<3x6xf32>, vector<60x6xf32> -> vector<60x6xf32>
      %852 = arith.addf %844, %851 : vector<60x6xf32>
      %c0_i32_921 = arith.constant 0 : i32
      %853 = arith.addi %843, %c0_i32_921 : i32
      %c1_i32_922 = arith.constant 1 : i32
      %854 = arith.addi %853, %c1_i32_922 : i32
      %855 = arith.index_cast %854 : i32 to index
      %c0_923 = arith.constant 0 : index
      %856 = vector.load %arg1[%855, %c0_923] : memref<1024x3xf32, #tpu.memory_space<vmem>>, vector<60x3xf32>
      %c1_924 = arith.constant 1 : index
      %c0_925 = arith.constant 0 : index
      %c0_926 = arith.constant 0 : index
      %857 = vector.load %arg2[%c1_924, %c0_925, %c0_926] : memref<25x3x6xf32, #tpu.memory_space<vmem>>, vector<1x3x6xf32>
      %858 = vector.shape_cast %857 : vector<1x3x6xf32> to vector<3x6xf32>
      %cst_927 = arith.constant dense<0.000000e+00> : vector<60x6xf32>
      %859 = tpu.matmul %856, %858, %cst_927 {dimension_numbers = #tpu.dot_dimension_numbers<[1], [0], [0], [1], [0, 0, 1, 1], [], []>} : vector<60x3xf32>, vector<3x6xf32>, vector<60x6xf32> -> vector<60x6xf32>
      %860 = arith.addf %852, %859 : vector<60x6xf32>
      %c0_i32_928 = arith.constant 0 : i32
      %861 = arith.addi %843, %c0_i32_928 : i32
      %c2_i32_929 = arith.constant 2 : i32
      %862 = arith.addi %861, %c2_i32_929 : i32
      %863 = arith.index_cast %862 : i32 to index
      %c0_930 = arith.constant 0 : index
      %864 = vector.load %arg1[%863, %c0_930] : memref<1024x3xf32, #tpu.memory_space<vmem>>, vector<60x3xf32>
      %c2_931 = arith.constant 2 : index
      %c0_932 = arith.constant 0 : index
      %c0_933 = arith.constant 0 : index
      %865 = vector.load %arg2[%c2_931, %c0_932, %c0_933] : memref<25x3x6xf32, #tpu.memory_space<vmem>>, vector<1x3x6xf32>
      %866 = vector.shape_cast %865 : vector<1x3x6xf32> to vector<3x6xf32>
      %cst_934 = arith.constant dense<0.000000e+00> : vector<60x6xf32>
      %867 = tpu.matmul %864, %866, %cst_934 {dimension_numbers = #tpu.dot_dimension_numbers<[1], [0], [0], [1], [0, 0, 1, 1], [], []>} : vector<60x3xf32>, vector<3x6xf32>, vector<60x6xf32> -> vector<60x6xf32>
      %868 = arith.addf %860, %867 : vector<60x6xf32>
      %c0_i32_935 = arith.constant 0 : i32
      %869 = arith.addi %843, %c0_i32_935 : i32
      %c3_i32 = arith.constant 3 : i32
      %870 = arith.addi %869, %c3_i32 : i32
      %871 = arith.index_cast %870 : i32 to index
      %c0_936 = arith.constant 0 : index
      %872 = vector.load %arg1[%871, %c0_936] : memref<1024x3xf32, #tpu.memory_space<vmem>>, vector<60x3xf32>
      %c3_937 = arith.constant 3 : index
      %c0_938 = arith.constant 0 : index
      %c0_939 = arith.constant 0 : index
      %873 = vector.load %arg2[%c3_937, %c0_938, %c0_939] : memref<25x3x6xf32, #tpu.memory_space<vmem>>, vector<1x3x6xf32>
      %874 = vector.shape_cast %873 : vector<1x3x6xf32> to vector<3x6xf32>
      %cst_940 = arith.constant dense<0.000000e+00> : vector<60x6xf32>
      %875 = tpu.matmul %872, %874, %cst_940 {dimension_numbers = #tpu.dot_dimension_numbers<[1], [0], [0], [1], [0, 0, 1, 1], [], []>} : vector<60x3xf32>, vector<3x6xf32>, vector<60x6xf32> -> vector<60x6xf32>
      %876 = arith.addf %868, %875 : vector<60x6xf32>
      %c0_i32_941 = arith.constant 0 : i32
      %877 = arith.addi %843, %c0_i32_941 : i32
      %c4_i32 = arith.constant 4 : i32
      %878 = arith.addi %877, %c4_i32 : i32
      %879 = arith.index_cast %878 : i32 to index
      %c0_942 = arith.constant 0 : index
      %880 = vector.load %arg1[%879, %c0_942] : memref<1024x3xf32, #tpu.memory_space<vmem>>, vector<60x3xf32>
      %c4_943 = arith.constant 4 : index
      %c0_944 = arith.constant 0 : index
      %c0_945 = arith.constant 0 : index
      %881 = vector.load %arg2[%c4_943, %c0_944, %c0_945] : memref<25x3x6xf32, #tpu.memory_space<vmem>>, vector<1x3x6xf32>
      %882 = vector.shape_cast %881 : vector<1x3x6xf32> to vector<3x6xf32>
      %cst_946 = arith.constant dense<0.000000e+00> : vector<60x6xf32>
      %883 = tpu.matmul %880, %882, %cst_946 {dimension_numbers = #tpu.dot_dimension_numbers<[1], [0], [0], [1], [0, 0, 1, 1], [], []>} : vector<60x3xf32>, vector<3x6xf32>, vector<60x6xf32> -> vector<60x6xf32>
      %884 = arith.addf %876, %883 : vector<60x6xf32>
      %c32_i32_947 = arith.constant 32 : i32
      %885 = arith.addi %843, %c32_i32_947 : i32
      %c0_i32_948 = arith.constant 0 : i32
      %886 = arith.addi %885, %c0_i32_948 : i32
      %887 = arith.index_cast %886 : i32 to index
      %c0_949 = arith.constant 0 : index
      %888 = vector.load %arg1[%887, %c0_949] : memref<1024x3xf32, #tpu.memory_space<vmem>>, vector<60x3xf32>
      %c5_950 = arith.constant 5 : index
      %c0_951 = arith.constant 0 : index
      %c0_952 = arith.constant 0 : index
      %889 = vector.load %arg2[%c5_950, %c0_951, %c0_952] : memref<25x3x6xf32, #tpu.memory_space<vmem>>, vector<1x3x6xf32>
      %890 = vector.shape_cast %889 : vector<1x3x6xf32> to vector<3x6xf32>
      %cst_953 = arith.constant dense<0.000000e+00> : vector<60x6xf32>
      %891 = tpu.matmul %888, %890, %cst_953 {dimension_numbers = #tpu.dot_dimension_numbers<[1], [0], [0], [1], [0, 0, 1, 1], [], []>} : vector<60x3xf32>, vector<3x6xf32>, vector<60x6xf32> -> vector<60x6xf32>
      %892 = arith.addf %884, %891 : vector<60x6xf32>
      %c32_i32_954 = arith.constant 32 : i32
      %893 = arith.addi %843, %c32_i32_954 : i32
      %c1_i32_955 = arith.constant 1 : i32
      %894 = arith.addi %893, %c1_i32_955 : i32
      %895 = arith.index_cast %894 : i32 to index
      %c0_956 = arith.constant 0 : index
      %896 = vector.load %arg1[%895, %c0_956] : memref<1024x3xf32, #tpu.memory_space<vmem>>, vector<60x3xf32>
      %c6_957 = arith.constant 6 : index
      %c0_958 = arith.constant 0 : index
      %c0_959 = arith.constant 0 : index
      %897 = vector.load %arg2[%c6_957, %c0_958, %c0_959] : memref<25x3x6xf32, #tpu.memory_space<vmem>>, vector<1x3x6xf32>
      %898 = vector.shape_cast %897 : vector<1x3x6xf32> to vector<3x6xf32>
      %cst_960 = arith.constant dense<0.000000e+00> : vector<60x6xf32>
      %899 = tpu.matmul %896, %898, %cst_960 {dimension_numbers = #tpu.dot_dimension_numbers<[1], [0], [0], [1], [0, 0, 1, 1], [], []>} : vector<60x3xf32>, vector<3x6xf32>, vector<60x6xf32> -> vector<60x6xf32>
      %900 = arith.addf %892, %899 : vector<60x6xf32>
      %c32_i32_961 = arith.constant 32 : i32
      %901 = arith.addi %843, %c32_i32_961 : i32
      %c2_i32_962 = arith.constant 2 : i32
      %902 = arith.addi %901, %c2_i32_962 : i32
      %903 = arith.index_cast %902 : i32 to index
      %c0_963 = arith.constant 0 : index
      %904 = vector.load %arg1[%903, %c0_963] : memref<1024x3xf32, #tpu.memory_space<vmem>>, vector<60x3xf32>
      %c7_964 = arith.constant 7 : index
      %c0_965 = arith.constant 0 : index
      %c0_966 = arith.constant 0 : index
      %905 = vector.load %arg2[%c7_964, %c0_965, %c0_966] : memref<25x3x6xf32, #tpu.memory_space<vmem>>, vector<1x3x6xf32>
      %906 = vector.shape_cast %905 : vector<1x3x6xf32> to vector<3x6xf32>
      %cst_967 = arith.constant dense<0.000000e+00> : vector<60x6xf32>
      %907 = tpu.matmul %904, %906, %cst_967 {dimension_numbers = #tpu.dot_dimension_numbers<[1], [0], [0], [1], [0, 0, 1, 1], [], []>} : vector<60x3xf32>, vector<3x6xf32>, vector<60x6xf32> -> vector<60x6xf32>
      %908 = arith.addf %900, %907 : vector<60x6xf32>
      %c32_i32_968 = arith.constant 32 : i32
      %909 = arith.addi %843, %c32_i32_968 : i32
      %c3_i32_969 = arith.constant 3 : i32
      %910 = arith.addi %909, %c3_i32_969 : i32
      %911 = arith.index_cast %910 : i32 to index
      %c0_970 = arith.constant 0 : index
      %912 = vector.load %arg1[%911, %c0_970] : memref<1024x3xf32, #tpu.memory_space<vmem>>, vector<60x3xf32>
      %c8_971 = arith.constant 8 : index
      %c0_972 = arith.constant 0 : index
      %c0_973 = arith.constant 0 : index
      %913 = vector.load %arg2[%c8_971, %c0_972, %c0_973] : memref<25x3x6xf32, #tpu.memory_space<vmem>>, vector<1x3x6xf32>
      %914 = vector.shape_cast %913 : vector<1x3x6xf32> to vector<3x6xf32>
      %cst_974 = arith.constant dense<0.000000e+00> : vector<60x6xf32>
      %915 = tpu.matmul %912, %914, %cst_974 {dimension_numbers = #tpu.dot_dimension_numbers<[1], [0], [0], [1], [0, 0, 1, 1], [], []>} : vector<60x3xf32>, vector<3x6xf32>, vector<60x6xf32> -> vector<60x6xf32>
      %916 = arith.addf %908, %915 : vector<60x6xf32>
      %c32_i32_975 = arith.constant 32 : i32
      %917 = arith.addi %843, %c32_i32_975 : i32
      %c4_i32_976 = arith.constant 4 : i32
      %918 = arith.addi %917, %c4_i32_976 : i32
      %919 = arith.index_cast %918 : i32 to index
      %c0_977 = arith.constant 0 : index
      %920 = vector.load %arg1[%919, %c0_977] : memref<1024x3xf32, #tpu.memory_space<vmem>>, vector<60x3xf32>
      %c9_978 = arith.constant 9 : index
      %c0_979 = arith.constant 0 : index
      %c0_980 = arith.constant 0 : index
      %921 = vector.load %arg2[%c9_978, %c0_979, %c0_980] : memref<25x3x6xf32, #tpu.memory_space<vmem>>, vector<1x3x6xf32>
      %922 = vector.shape_cast %921 : vector<1x3x6xf32> to vector<3x6xf32>
      %cst_981 = arith.constant dense<0.000000e+00> : vector<60x6xf32>
      %923 = tpu.matmul %920, %922, %cst_981 {dimension_numbers = #tpu.dot_dimension_numbers<[1], [0], [0], [1], [0, 0, 1, 1], [], []>} : vector<60x3xf32>, vector<3x6xf32>, vector<60x6xf32> -> vector<60x6xf32>
      %924 = arith.addf %916, %923 : vector<60x6xf32>
      %c64_i32 = arith.constant 64 : i32
      %925 = arith.addi %843, %c64_i32 : i32
      %c0_i32_982 = arith.constant 0 : i32
      %926 = arith.addi %925, %c0_i32_982 : i32
      %927 = arith.index_cast %926 : i32 to index
      %c0_983 = arith.constant 0 : index
      %928 = vector.load %arg1[%927, %c0_983] : memref<1024x3xf32, #tpu.memory_space<vmem>>, vector<60x3xf32>
      %c10_984 = arith.constant 10 : index
      %c0_985 = arith.constant 0 : index
      %c0_986 = arith.constant 0 : index
      %929 = vector.load %arg2[%c10_984, %c0_985, %c0_986] : memref<25x3x6xf32, #tpu.memory_space<vmem>>, vector<1x3x6xf32>
      %930 = vector.shape_cast %929 : vector<1x3x6xf32> to vector<3x6xf32>
      %cst_987 = arith.constant dense<0.000000e+00> : vector<60x6xf32>
      %931 = tpu.matmul %928, %930, %cst_987 {dimension_numbers = #tpu.dot_dimension_numbers<[1], [0], [0], [1], [0, 0, 1, 1], [], []>} : vector<60x3xf32>, vector<3x6xf32>, vector<60x6xf32> -> vector<60x6xf32>
      %932 = arith.addf %924, %931 : vector<60x6xf32>
      %c64_i32_988 = arith.constant 64 : i32
      %933 = arith.addi %843, %c64_i32_988 : i32
      %c1_i32_989 = arith.constant 1 : i32
      %934 = arith.addi %933, %c1_i32_989 : i32
      %935 = arith.index_cast %934 : i32 to index
      %c0_990 = arith.constant 0 : index
      %936 = vector.load %arg1[%935, %c0_990] : memref<1024x3xf32, #tpu.memory_space<vmem>>, vector<60x3xf32>
      %c11_991 = arith.constant 11 : index
      %c0_992 = arith.constant 0 : index
      %c0_993 = arith.constant 0 : index
      %937 = vector.load %arg2[%c11_991, %c0_992, %c0_993] : memref<25x3x6xf32, #tpu.memory_space<vmem>>, vector<1x3x6xf32>
      %938 = vector.shape_cast %937 : vector<1x3x6xf32> to vector<3x6xf32>
      %cst_994 = arith.constant dense<0.000000e+00> : vector<60x6xf32>
      %939 = tpu.matmul %936, %938, %cst_994 {dimension_numbers = #tpu.dot_dimension_numbers<[1], [0], [0], [1], [0, 0, 1, 1], [], []>} : vector<60x3xf32>, vector<3x6xf32>, vector<60x6xf32> -> vector<60x6xf32>
      %940 = arith.addf %932, %939 : vector<60x6xf32>
      %c64_i32_995 = arith.constant 64 : i32
      %941 = arith.addi %843, %c64_i32_995 : i32
      %c2_i32_996 = arith.constant 2 : i32
      %942 = arith.addi %941, %c2_i32_996 : i32
      %943 = arith.index_cast %942 : i32 to index
      %c0_997 = arith.constant 0 : index
      %944 = vector.load %arg1[%943, %c0_997] : memref<1024x3xf32, #tpu.memory_space<vmem>>, vector<60x3xf32>
      %c12_998 = arith.constant 12 : index
      %c0_999 = arith.constant 0 : index
      %c0_1000 = arith.constant 0 : index
      %945 = vector.load %arg2[%c12_998, %c0_999, %c0_1000] : memref<25x3x6xf32, #tpu.memory_space<vmem>>, vector<1x3x6xf32>
      %946 = vector.shape_cast %945 : vector<1x3x6xf32> to vector<3x6xf32>
      %cst_1001 = arith.constant dense<0.000000e+00> : vector<60x6xf32>
      %947 = tpu.matmul %944, %946, %cst_1001 {dimension_numbers = #tpu.dot_dimension_numbers<[1], [0], [0], [1], [0, 0, 1, 1], [], []>} : vector<60x3xf32>, vector<3x6xf32>, vector<60x6xf32> -> vector<60x6xf32>
      %948 = arith.addf %940, %947 : vector<60x6xf32>
      %c64_i32_1002 = arith.constant 64 : i32
      %949 = arith.addi %843, %c64_i32_1002 : i32
      %c3_i32_1003 = arith.constant 3 : i32
      %950 = arith.addi %949, %c3_i32_1003 : i32
      %951 = arith.index_cast %950 : i32 to index
      %c0_1004 = arith.constant 0 : index
      %952 = vector.load %arg1[%951, %c0_1004] : memref<1024x3xf32, #tpu.memory_space<vmem>>, vector<60x3xf32>
      %c13_1005 = arith.constant 13 : index
      %c0_1006 = arith.constant 0 : index
      %c0_1007 = arith.constant 0 : index
      %953 = vector.load %arg2[%c13_1005, %c0_1006, %c0_1007] : memref<25x3x6xf32, #tpu.memory_space<vmem>>, vector<1x3x6xf32>
      %954 = vector.shape_cast %953 : vector<1x3x6xf32> to vector<3x6xf32>
      %cst_1008 = arith.constant dense<0.000000e+00> : vector<60x6xf32>
      %955 = tpu.matmul %952, %954, %cst_1008 {dimension_numbers = #tpu.dot_dimension_numbers<[1], [0], [0], [1], [0, 0, 1, 1], [], []>} : vector<60x3xf32>, vector<3x6xf32>, vector<60x6xf32> -> vector<60x6xf32>
      %956 = arith.addf %948, %955 : vector<60x6xf32>
      %c64_i32_1009 = arith.constant 64 : i32
      %957 = arith.addi %843, %c64_i32_1009 : i32
      %c4_i32_1010 = arith.constant 4 : i32
      %958 = arith.addi %957, %c4_i32_1010 : i32
      %959 = arith.index_cast %958 : i32 to index
      %c0_1011 = arith.constant 0 : index
      %960 = vector.load %arg1[%959, %c0_1011] : memref<1024x3xf32, #tpu.memory_space<vmem>>, vector<60x3xf32>
      %c14_1012 = arith.constant 14 : index
      %c0_1013 = arith.constant 0 : index
      %c0_1014 = arith.constant 0 : index
      %961 = vector.load %arg2[%c14_1012, %c0_1013, %c0_1014] : memref<25x3x6xf32, #tpu.memory_space<vmem>>, vector<1x3x6xf32>
      %962 = vector.shape_cast %961 : vector<1x3x6xf32> to vector<3x6xf32>
      %cst_1015 = arith.constant dense<0.000000e+00> : vector<60x6xf32>
      %963 = tpu.matmul %960, %962, %cst_1015 {dimension_numbers = #tpu.dot_dimension_numbers<[1], [0], [0], [1], [0, 0, 1, 1], [], []>} : vector<60x3xf32>, vector<3x6xf32>, vector<60x6xf32> -> vector<60x6xf32>
      %964 = arith.addf %956, %963 : vector<60x6xf32>
      %c96_i32 = arith.constant 96 : i32
      %965 = arith.addi %843, %c96_i32 : i32
      %c0_i32_1016 = arith.constant 0 : i32
      %966 = arith.addi %965, %c0_i32_1016 : i32
      %967 = arith.index_cast %966 : i32 to index
      %c0_1017 = arith.constant 0 : index
      %968 = vector.load %arg1[%967, %c0_1017] : memref<1024x3xf32, #tpu.memory_space<vmem>>, vector<60x3xf32>
      %c15_1018 = arith.constant 15 : index
      %c0_1019 = arith.constant 0 : index
      %c0_1020 = arith.constant 0 : index
      %969 = vector.load %arg2[%c15_1018, %c0_1019, %c0_1020] : memref<25x3x6xf32, #tpu.memory_space<vmem>>, vector<1x3x6xf32>
      %970 = vector.shape_cast %969 : vector<1x3x6xf32> to vector<3x6xf32>
      %cst_1021 = arith.constant dense<0.000000e+00> : vector<60x6xf32>
      %971 = tpu.matmul %968, %970, %cst_1021 {dimension_numbers = #tpu.dot_dimension_numbers<[1], [0], [0], [1], [0, 0, 1, 1], [], []>} : vector<60x3xf32>, vector<3x6xf32>, vector<60x6xf32> -> vector<60x6xf32>
      %972 = arith.addf %964, %971 : vector<60x6xf32>
      %c96_i32_1022 = arith.constant 96 : i32
      %973 = arith.addi %843, %c96_i32_1022 : i32
      %c1_i32_1023 = arith.constant 1 : i32
      %974 = arith.addi %973, %c1_i32_1023 : i32
      %975 = arith.index_cast %974 : i32 to index
      %c0_1024 = arith.constant 0 : index
      %976 = vector.load %arg1[%975, %c0_1024] : memref<1024x3xf32, #tpu.memory_space<vmem>>, vector<60x3xf32>
      %c16_1025 = arith.constant 16 : index
      %c0_1026 = arith.constant 0 : index
      %c0_1027 = arith.constant 0 : index
      %977 = vector.load %arg2[%c16_1025, %c0_1026, %c0_1027] : memref<25x3x6xf32, #tpu.memory_space<vmem>>, vector<1x3x6xf32>
      %978 = vector.shape_cast %977 : vector<1x3x6xf32> to vector<3x6xf32>
      %cst_1028 = arith.constant dense<0.000000e+00> : vector<60x6xf32>
      %979 = tpu.matmul %976, %978, %cst_1028 {dimension_numbers = #tpu.dot_dimension_numbers<[1], [0], [0], [1], [0, 0, 1, 1], [], []>} : vector<60x3xf32>, vector<3x6xf32>, vector<60x6xf32> -> vector<60x6xf32>
      %980 = arith.addf %972, %979 : vector<60x6xf32>
      %c96_i32_1029 = arith.constant 96 : i32
      %981 = arith.addi %843, %c96_i32_1029 : i32
      %c2_i32_1030 = arith.constant 2 : i32
      %982 = arith.addi %981, %c2_i32_1030 : i32
      %983 = arith.index_cast %982 : i32 to index
      %c0_1031 = arith.constant 0 : index
      %984 = vector.load %arg1[%983, %c0_1031] : memref<1024x3xf32, #tpu.memory_space<vmem>>, vector<60x3xf32>
      %c17_1032 = arith.constant 17 : index
      %c0_1033 = arith.constant 0 : index
      %c0_1034 = arith.constant 0 : index
      %985 = vector.load %arg2[%c17_1032, %c0_1033, %c0_1034] : memref<25x3x6xf32, #tpu.memory_space<vmem>>, vector<1x3x6xf32>
      %986 = vector.shape_cast %985 : vector<1x3x6xf32> to vector<3x6xf32>
      %cst_1035 = arith.constant dense<0.000000e+00> : vector<60x6xf32>
      %987 = tpu.matmul %984, %986, %cst_1035 {dimension_numbers = #tpu.dot_dimension_numbers<[1], [0], [0], [1], [0, 0, 1, 1], [], []>} : vector<60x3xf32>, vector<3x6xf32>, vector<60x6xf32> -> vector<60x6xf32>
      %988 = arith.addf %980, %987 : vector<60x6xf32>
      %c96_i32_1036 = arith.constant 96 : i32
      %989 = arith.addi %843, %c96_i32_1036 : i32
      %c3_i32_1037 = arith.constant 3 : i32
      %990 = arith.addi %989, %c3_i32_1037 : i32
      %991 = arith.index_cast %990 : i32 to index
      %c0_1038 = arith.constant 0 : index
      %992 = vector.load %arg1[%991, %c0_1038] : memref<1024x3xf32, #tpu.memory_space<vmem>>, vector<60x3xf32>
      %c18_1039 = arith.constant 18 : index
      %c0_1040 = arith.constant 0 : index
      %c0_1041 = arith.constant 0 : index
      %993 = vector.load %arg2[%c18_1039, %c0_1040, %c0_1041] : memref<25x3x6xf32, #tpu.memory_space<vmem>>, vector<1x3x6xf32>
      %994 = vector.shape_cast %993 : vector<1x3x6xf32> to vector<3x6xf32>
      %cst_1042 = arith.constant dense<0.000000e+00> : vector<60x6xf32>
      %995 = tpu.matmul %992, %994, %cst_1042 {dimension_numbers = #tpu.dot_dimension_numbers<[1], [0], [0], [1], [0, 0, 1, 1], [], []>} : vector<60x3xf32>, vector<3x6xf32>, vector<60x6xf32> -> vector<60x6xf32>
      %996 = arith.addf %988, %995 : vector<60x6xf32>
      %c96_i32_1043 = arith.constant 96 : i32
      %997 = arith.addi %843, %c96_i32_1043 : i32
      %c4_i32_1044 = arith.constant 4 : i32
      %998 = arith.addi %997, %c4_i32_1044 : i32
      %999 = arith.index_cast %998 : i32 to index
      %c0_1045 = arith.constant 0 : index
      %1000 = vector.load %arg1[%999, %c0_1045] : memref<1024x3xf32, #tpu.memory_space<vmem>>, vector<60x3xf32>
      %c19_1046 = arith.constant 19 : index
      %c0_1047 = arith.constant 0 : index
      %c0_1048 = arith.constant 0 : index
      %1001 = vector.load %arg2[%c19_1046, %c0_1047, %c0_1048] : memref<25x3x6xf32, #tpu.memory_space<vmem>>, vector<1x3x6xf32>
      %1002 = vector.shape_cast %1001 : vector<1x3x6xf32> to vector<3x6xf32>
      %cst_1049 = arith.constant dense<0.000000e+00> : vector<60x6xf32>
      %1003 = tpu.matmul %1000, %1002, %cst_1049 {dimension_numbers = #tpu.dot_dimension_numbers<[1], [0], [0], [1], [0, 0, 1, 1], [], []>} : vector<60x3xf32>, vector<3x6xf32>, vector<60x6xf32> -> vector<60x6xf32>
      %1004 = arith.addf %996, %1003 : vector<60x6xf32>
      %c128_i32 = arith.constant 128 : i32
      %1005 = arith.addi %843, %c128_i32 : i32
      %c0_i32_1050 = arith.constant 0 : i32
      %1006 = arith.addi %1005, %c0_i32_1050 : i32
      %1007 = arith.index_cast %1006 : i32 to index
      %c0_1051 = arith.constant 0 : index
      %1008 = vector.load %arg1[%1007, %c0_1051] : memref<1024x3xf32, #tpu.memory_space<vmem>>, vector<60x3xf32>
      %c20_1052 = arith.constant 20 : index
      %c0_1053 = arith.constant 0 : index
      %c0_1054 = arith.constant 0 : index
      %1009 = vector.load %arg2[%c20_1052, %c0_1053, %c0_1054] : memref<25x3x6xf32, #tpu.memory_space<vmem>>, vector<1x3x6xf32>
      %1010 = vector.shape_cast %1009 : vector<1x3x6xf32> to vector<3x6xf32>
      %cst_1055 = arith.constant dense<0.000000e+00> : vector<60x6xf32>
      %1011 = tpu.matmul %1008, %1010, %cst_1055 {dimension_numbers = #tpu.dot_dimension_numbers<[1], [0], [0], [1], [0, 0, 1, 1], [], []>} : vector<60x3xf32>, vector<3x6xf32>, vector<60x6xf32> -> vector<60x6xf32>
      %1012 = arith.addf %1004, %1011 : vector<60x6xf32>
      %c128_i32_1056 = arith.constant 128 : i32
      %1013 = arith.addi %843, %c128_i32_1056 : i32
      %c1_i32_1057 = arith.constant 1 : i32
      %1014 = arith.addi %1013, %c1_i32_1057 : i32
      %1015 = arith.index_cast %1014 : i32 to index
      %c0_1058 = arith.constant 0 : index
      %1016 = vector.load %arg1[%1015, %c0_1058] : memref<1024x3xf32, #tpu.memory_space<vmem>>, vector<60x3xf32>
      %c21_1059 = arith.constant 21 : index
      %c0_1060 = arith.constant 0 : index
      %c0_1061 = arith.constant 0 : index
      %1017 = vector.load %arg2[%c21_1059, %c0_1060, %c0_1061] : memref<25x3x6xf32, #tpu.memory_space<vmem>>, vector<1x3x6xf32>
      %1018 = vector.shape_cast %1017 : vector<1x3x6xf32> to vector<3x6xf32>
      %cst_1062 = arith.constant dense<0.000000e+00> : vector<60x6xf32>
      %1019 = tpu.matmul %1016, %1018, %cst_1062 {dimension_numbers = #tpu.dot_dimension_numbers<[1], [0], [0], [1], [0, 0, 1, 1], [], []>} : vector<60x3xf32>, vector<3x6xf32>, vector<60x6xf32> -> vector<60x6xf32>
      %1020 = arith.addf %1012, %1019 : vector<60x6xf32>
      %c128_i32_1063 = arith.constant 128 : i32
      %1021 = arith.addi %843, %c128_i32_1063 : i32
      %c2_i32_1064 = arith.constant 2 : i32
      %1022 = arith.addi %1021, %c2_i32_1064 : i32
      %1023 = arith.index_cast %1022 : i32 to index
      %c0_1065 = arith.constant 0 : index
      %1024 = vector.load %arg1[%1023, %c0_1065] : memref<1024x3xf32, #tpu.memory_space<vmem>>, vector<60x3xf32>
      %c22_1066 = arith.constant 22 : index
      %c0_1067 = arith.constant 0 : index
      %c0_1068 = arith.constant 0 : index
      %1025 = vector.load %arg2[%c22_1066, %c0_1067, %c0_1068] : memref<25x3x6xf32, #tpu.memory_space<vmem>>, vector<1x3x6xf32>
      %1026 = vector.shape_cast %1025 : vector<1x3x6xf32> to vector<3x6xf32>
      %cst_1069 = arith.constant dense<0.000000e+00> : vector<60x6xf32>
      %1027 = tpu.matmul %1024, %1026, %cst_1069 {dimension_numbers = #tpu.dot_dimension_numbers<[1], [0], [0], [1], [0, 0, 1, 1], [], []>} : vector<60x3xf32>, vector<3x6xf32>, vector<60x6xf32> -> vector<60x6xf32>
      %1028 = arith.addf %1020, %1027 : vector<60x6xf32>
      %c128_i32_1070 = arith.constant 128 : i32
      %1029 = arith.addi %843, %c128_i32_1070 : i32
      %c3_i32_1071 = arith.constant 3 : i32
      %1030 = arith.addi %1029, %c3_i32_1071 : i32
      %1031 = arith.index_cast %1030 : i32 to index
      %c0_1072 = arith.constant 0 : index
      %1032 = vector.load %arg1[%1031, %c0_1072] : memref<1024x3xf32, #tpu.memory_space<vmem>>, vector<60x3xf32>
      %c23_1073 = arith.constant 23 : index
      %c0_1074 = arith.constant 0 : index
      %c0_1075 = arith.constant 0 : index
      %1033 = vector.load %arg2[%c23_1073, %c0_1074, %c0_1075] : memref<25x3x6xf32, #tpu.memory_space<vmem>>, vector<1x3x6xf32>
      %1034 = vector.shape_cast %1033 : vector<1x3x6xf32> to vector<3x6xf32>
      %cst_1076 = arith.constant dense<0.000000e+00> : vector<60x6xf32>
      %1035 = tpu.matmul %1032, %1034, %cst_1076 {dimension_numbers = #tpu.dot_dimension_numbers<[1], [0], [0], [1], [0, 0, 1, 1], [], []>} : vector<60x3xf32>, vector<3x6xf32>, vector<60x6xf32> -> vector<60x6xf32>
      %1036 = arith.addf %1028, %1035 : vector<60x6xf32>
      %c128_i32_1077 = arith.constant 128 : i32
      %1037 = arith.addi %843, %c128_i32_1077 : i32
      %c4_i32_1078 = arith.constant 4 : i32
      %1038 = arith.addi %1037, %c4_i32_1078 : i32
      %1039 = arith.index_cast %1038 : i32 to index
      %c0_1079 = arith.constant 0 : index
      %1040 = vector.load %arg1[%1039, %c0_1079] : memref<1024x3xf32, #tpu.memory_space<vmem>>, vector<60x3xf32>
      %c24_1080 = arith.constant 24 : index
      %c0_1081 = arith.constant 0 : index
      %c0_1082 = arith.constant 0 : index
      %1041 = vector.load %arg2[%c24_1080, %c0_1081, %c0_1082] : memref<25x3x6xf32, #tpu.memory_space<vmem>>, vector<1x3x6xf32>
      %1042 = vector.shape_cast %1041 : vector<1x3x6xf32> to vector<3x6xf32>
      %cst_1083 = arith.constant dense<0.000000e+00> : vector<60x6xf32>
      %1043 = tpu.matmul %1040, %1042, %cst_1083 {dimension_numbers = #tpu.dot_dimension_numbers<[1], [0], [0], [1], [0, 0, 1, 1], [], []>} : vector<60x3xf32>, vector<3x6xf32>, vector<60x6xf32> -> vector<60x6xf32>
      %1044 = arith.addf %1036, %1043 : vector<60x6xf32>
      %1045 = arith.addf %1044, %2 : vector<60x6xf32>
      %cst_1084 = arith.constant 0.000000e+00 : f32
      %1046 = vector.broadcast %cst_1084 : f32 to vector<60x6xf32>
      %1047 = arith.maximumf %1045, %1046 : vector<60x6xf32>
      %c0_1085 = arith.constant 0 : index
      %c0_1086 = arith.constant 0 : index
      %1048 = vector.load %arg15[%c0_1085, %c0_1086] : memref<60x6xf32, #tpu.memory_space<vmem>>, vector<60x6xf32>
      tpu.vector_store %arg15[%c0_1085, %c0_1086], %1047 {strides = array<i32>} : memref<60x6xf32, #tpu.memory_space<vmem>>, vector<60x6xf32>,
      %c0_1087 = arith.constant 0 : index
      %c0_1088 = arith.constant 0 : index
      %1049 = tpu.strided_load %arg15[%c0_1087, %c0_1088] {strides = array<i32: 2, 1>} : memref<60x6xf32, #tpu.memory_space<vmem>>, vector<14x6xf32>
      %c1_1089 = arith.constant 1 : index
      %c0_1090 = arith.constant 0 : index
      %1050 = tpu.strided_load %arg15[%c1_1089, %c0_1090] {strides = array<i32: 2, 1>} : memref<60x6xf32, #tpu.memory_space<vmem>>, vector<14x6xf32>
      %1051 = arith.maximumf %1049, %1050 : vector<14x6xf32>
      %c32_1091 = arith.constant 32 : index
      %c0_1092 = arith.constant 0 : index
      %1052 = tpu.strided_load %arg15[%c32_1091, %c0_1092] {strides = array<i32: 2, 1>} : memref<60x6xf32, #tpu.memory_space<vmem>>, vector<14x6xf32>
      %c33 = arith.constant 33 : index
      %c0_1093 = arith.constant 0 : index
      %1053 = tpu.strided_load %arg15[%c33, %c0_1093] {strides = array<i32: 2, 1>} : memref<60x6xf32, #tpu.memory_space<vmem>>, vector<14x6xf32>
      %1054 = arith.maximumf %1052, %1053 : vector<14x6xf32>
      %1055 = arith.maximumf %1051, %1054 : vector<14x6xf32>
      %c14_i32_1094 = arith.constant 14 : i32
      %1056 = arith.muli %arg17, %c14_i32_1094 : i32
      %c0_i32_1095 = arith.constant 0 : i32
      %1057 = arith.addi %c0_i32_1095, %1056 : i32
      %1058 = arith.index_cast %1057 : i32 to index
      %c0_1096 = arith.constant 0 : index
      %1059 = vector.load %arg13[%1058, %c0_1096] : memref<196x6xf32, #tpu.memory_space<vmem>>, vector<14x6xf32>
      tpu.vector_store %arg13[%1058, %c0_1096], %1055 {strides = array<i32>} : memref<196x6xf32, #tpu.memory_space<vmem>>, vector<14x6xf32>,
    }
    %c14_i32_3 = arith.constant 14 : i32
    %cst = arith.constant 0.000000e+00 : f32
    %7 = vector.broadcast %cst : f32 to vector<24x12xf32>
    %c0_4 = arith.constant 0 : index
    %c0_5 = arith.constant 0 : index
    %8 = vector.load %arg13[%c0_4, %c0_5] : memref<196x6xf32, #tpu.memory_space<vmem>>, vector<24x6xf32>
    %c0_6 = arith.constant 0 : index
    %c0_7 = arith.constant 0 : index
    %c0_8 = arith.constant 0 : index
    %9 = vector.load %arg4[%c0_6, %c0_7, %c0_8] : memref<25x6x12xf32, #tpu.memory_space<vmem>>, vector<1x6x12xf32>
    %10 = vector.shape_cast %9 : vector<1x6x12xf32> to vector<6x12xf32>
    %cst_9 = arith.constant dense<0.000000e+00> : vector<24x12xf32>
    %11 = tpu.matmul %8, %10, %cst_9 {dimension_numbers = #tpu.dot_dimension_numbers<[1], [0], [0], [1], [0, 0, 1, 1], [], []>} : vector<24x6xf32>, vector<6x12xf32>, vector<24x12xf32> -> vector<24x12xf32>
    %12 = arith.addf %7, %11 : vector<24x12xf32>
    %c1 = arith.constant 1 : index
    %c0_10 = arith.constant 0 : index
    %13 = vector.load %arg13[%c1, %c0_10] : memref<196x6xf32, #tpu.memory_space<vmem>>, vector<24x6xf32>
    %c1_11 = arith.constant 1 : index
    %c0_12 = arith.constant 0 : index
    %c0_13 = arith.constant 0 : index
    %14 = vector.load %arg4[%c1_11, %c0_12, %c0_13] : memref<25x6x12xf32, #tpu.memory_space<vmem>>, vector<1x6x12xf32>
    %15 = vector.shape_cast %14 : vector<1x6x12xf32> to vector<6x12xf32>
    %cst_14 = arith.constant dense<0.000000e+00> : vector<24x12xf32>
    %16 = tpu.matmul %13, %15, %cst_14 {dimension_numbers = #tpu.dot_dimension_numbers<[1], [0], [0], [1], [0, 0, 1, 1], [], []>} : vector<24x6xf32>, vector<6x12xf32>, vector<24x12xf32> -> vector<24x12xf32>
    %17 = arith.addf %12, %16 : vector<24x12xf32>
    %c2 = arith.constant 2 : index
    %c0_15 = arith.constant 0 : index
    %18 = vector.load %arg13[%c2, %c0_15] : memref<196x6xf32, #tpu.memory_space<vmem>>, vector<24x6xf32>
    %c2_16 = arith.constant 2 : index
    %c0_17 = arith.constant 0 : index
    %c0_18 = arith.constant 0 : index
    %19 = vector.load %arg4[%c2_16, %c0_17, %c0_18] : memref<25x6x12xf32, #tpu.memory_space<vmem>>, vector<1x6x12xf32>
    %20 = vector.shape_cast %19 : vector<1x6x12xf32> to vector<6x12xf32>
    %cst_19 = arith.constant dense<0.000000e+00> : vector<24x12xf32>
    %21 = tpu.matmul %18, %20, %cst_19 {dimension_numbers = #tpu.dot_dimension_numbers<[1], [0], [0], [1], [0, 0, 1, 1], [], []>} : vector<24x6xf32>, vector<6x12xf32>, vector<24x12xf32> -> vector<24x12xf32>
    %22 = arith.addf %17, %21 : vector<24x12xf32>
    %c3 = arith.constant 3 : index
    %c0_20 = arith.constant 0 : index
    %23 = vector.load %arg13[%c3, %c0_20] : memref<196x6xf32, #tpu.memory_space<vmem>>, vector<24x6xf32>
    %c3_21 = arith.constant 3 : index
    %c0_22 = arith.constant 0 : index
    %c0_23 = arith.constant 0 : index
    %24 = vector.load %arg4[%c3_21, %c0_22, %c0_23] : memref<25x6x12xf32, #tpu.memory_space<vmem>>, vector<1x6x12xf32>
    %25 = vector.shape_cast %24 : vector<1x6x12xf32> to vector<6x12xf32>
    %cst_24 = arith.constant dense<0.000000e+00> : vector<24x12xf32>
    %26 = tpu.matmul %23, %25, %cst_24 {dimension_numbers = #tpu.dot_dimension_numbers<[1], [0], [0], [1], [0, 0, 1, 1], [], []>} : vector<24x6xf32>, vector<6x12xf32>, vector<24x12xf32> -> vector<24x12xf32>
    %27 = arith.addf %22, %26 : vector<24x12xf32>
    %c4 = arith.constant 4 : index
    %c0_25 = arith.constant 0 : index
    %28 = vector.load %arg13[%c4, %c0_25] : memref<196x6xf32, #tpu.memory_space<vmem>>, vector<24x6xf32>
    %c4_26 = arith.constant 4 : index
    %c0_27 = arith.constant 0 : index
    %c0_28 = arith.constant 0 : index
    %29 = vector.load %arg4[%c4_26, %c0_27, %c0_28] : memref<25x6x12xf32, #tpu.memory_space<vmem>>, vector<1x6x12xf32>
    %30 = vector.shape_cast %29 : vector<1x6x12xf32> to vector<6x12xf32>
    %cst_29 = arith.constant dense<0.000000e+00> : vector<24x12xf32>
    %31 = tpu.matmul %28, %30, %cst_29 {dimension_numbers = #tpu.dot_dimension_numbers<[1], [0], [0], [1], [0, 0, 1, 1], [], []>} : vector<24x6xf32>, vector<6x12xf32>, vector<24x12xf32> -> vector<24x12xf32>
    %32 = arith.addf %27, %31 : vector<24x12xf32>
    %c14 = arith.constant 14 : index
    %c0_30 = arith.constant 0 : index
    %33 = vector.load %arg13[%c14, %c0_30] : memref<196x6xf32, #tpu.memory_space<vmem>>, vector<24x6xf32>
    %c5 = arith.constant 5 : index
    %c0_31 = arith.constant 0 : index
    %c0_32 = arith.constant 0 : index
    %34 = vector.load %arg4[%c5, %c0_31, %c0_32] : memref<25x6x12xf32, #tpu.memory_space<vmem>>, vector<1x6x12xf32>
    %35 = vector.shape_cast %34 : vector<1x6x12xf32> to vector<6x12xf32>
    %cst_33 = arith.constant dense<0.000000e+00> : vector<24x12xf32>
    %36 = tpu.matmul %33, %35, %cst_33 {dimension_numbers = #tpu.dot_dimension_numbers<[1], [0], [0], [1], [0, 0, 1, 1], [], []>} : vector<24x6xf32>, vector<6x12xf32>, vector<24x12xf32> -> vector<24x12xf32>
    %37 = arith.addf %32, %36 : vector<24x12xf32>
    %c15 = arith.constant 15 : index
    %c0_34 = arith.constant 0 : index
    %38 = vector.load %arg13[%c15, %c0_34] : memref<196x6xf32, #tpu.memory_space<vmem>>, vector<24x6xf32>
    %c6 = arith.constant 6 : index
    %c0_35 = arith.constant 0 : index
    %c0_36 = arith.constant 0 : index
    %39 = vector.load %arg4[%c6, %c0_35, %c0_36] : memref<25x6x12xf32, #tpu.memory_space<vmem>>, vector<1x6x12xf32>
    %40 = vector.shape_cast %39 : vector<1x6x12xf32> to vector<6x12xf32>
    %cst_37 = arith.constant dense<0.000000e+00> : vector<24x12xf32>
    %41 = tpu.matmul %38, %40, %cst_37 {dimension_numbers = #tpu.dot_dimension_numbers<[1], [0], [0], [1], [0, 0, 1, 1], [], []>} : vector<24x6xf32>, vector<6x12xf32>, vector<24x12xf32> -> vector<24x12xf32>
    %42 = arith.addf %37, %41 : vector<24x12xf32>
    %c16 = arith.constant 16 : index
    %c0_38 = arith.constant 0 : index
    %43 = vector.load %arg13[%c16, %c0_38] : memref<196x6xf32, #tpu.memory_space<vmem>>, vector<24x6xf32>
    %c7 = arith.constant 7 : index
    %c0_39 = arith.constant 0 : index
    %c0_40 = arith.constant 0 : index
    %44 = vector.load %arg4[%c7, %c0_39, %c0_40] : memref<25x6x12xf32, #tpu.memory_space<vmem>>, vector<1x6x12xf32>
    %45 = vector.shape_cast %44 : vector<1x6x12xf32> to vector<6x12xf32>
    %cst_41 = arith.constant dense<0.000000e+00> : vector<24x12xf32>
    %46 = tpu.matmul %43, %45, %cst_41 {dimension_numbers = #tpu.dot_dimension_numbers<[1], [0], [0], [1], [0, 0, 1, 1], [], []>} : vector<24x6xf32>, vector<6x12xf32>, vector<24x12xf32> -> vector<24x12xf32>
    %47 = arith.addf %42, %46 : vector<24x12xf32>
    %c17 = arith.constant 17 : index
    %c0_42 = arith.constant 0 : index
    %48 = vector.load %arg13[%c17, %c0_42] : memref<196x6xf32, #tpu.memory_space<vmem>>, vector<24x6xf32>
    %c8 = arith.constant 8 : index
    %c0_43 = arith.constant 0 : index
    %c0_44 = arith.constant 0 : index
    %49 = vector.load %arg4[%c8, %c0_43, %c0_44] : memref<25x6x12xf32, #tpu.memory_space<vmem>>, vector<1x6x12xf32>
    %50 = vector.shape_cast %49 : vector<1x6x12xf32> to vector<6x12xf32>
    %cst_45 = arith.constant dense<0.000000e+00> : vector<24x12xf32>
    %51 = tpu.matmul %48, %50, %cst_45 {dimension_numbers = #tpu.dot_dimension_numbers<[1], [0], [0], [1], [0, 0, 1, 1], [], []>} : vector<24x6xf32>, vector<6x12xf32>, vector<24x12xf32> -> vector<24x12xf32>
    %52 = arith.addf %47, %51 : vector<24x12xf32>
    %c18 = arith.constant 18 : index
    %c0_46 = arith.constant 0 : index
    %53 = vector.load %arg13[%c18, %c0_46] : memref<196x6xf32, #tpu.memory_space<vmem>>, vector<24x6xf32>
    %c9 = arith.constant 9 : index
    %c0_47 = arith.constant 0 : index
    %c0_48 = arith.constant 0 : index
    %54 = vector.load %arg4[%c9, %c0_47, %c0_48] : memref<25x6x12xf32, #tpu.memory_space<vmem>>, vector<1x6x12xf32>
    %55 = vector.shape_cast %54 : vector<1x6x12xf32> to vector<6x12xf32>
    %cst_49 = arith.constant dense<0.000000e+00> : vector<24x12xf32>
    %56 = tpu.matmul %53, %55, %cst_49 {dimension_numbers = #tpu.dot_dimension_numbers<[1], [0], [0], [1], [0, 0, 1, 1], [], []>} : vector<24x6xf32>, vector<6x12xf32>, vector<24x12xf32> -> vector<24x12xf32>
    %57 = arith.addf %52, %56 : vector<24x12xf32>
    %c28 = arith.constant 28 : index
    %c0_50 = arith.constant 0 : index
    %58 = vector.load %arg13[%c28, %c0_50] : memref<196x6xf32, #tpu.memory_space<vmem>>, vector<24x6xf32>
    %c10 = arith.constant 10 : index
    %c0_51 = arith.constant 0 : index
    %c0_52 = arith.constant 0 : index
    %59 = vector.load %arg4[%c10, %c0_51, %c0_52] : memref<25x6x12xf32, #tpu.memory_space<vmem>>, vector<1x6x12xf32>
    %60 = vector.shape_cast %59 : vector<1x6x12xf32> to vector<6x12xf32>
    %cst_53 = arith.constant dense<0.000000e+00> : vector<24x12xf32>
    %61 = tpu.matmul %58, %60, %cst_53 {dimension_numbers = #tpu.dot_dimension_numbers<[1], [0], [0], [1], [0, 0, 1, 1], [], []>} : vector<24x6xf32>, vector<6x12xf32>, vector<24x12xf32> -> vector<24x12xf32>
    %62 = arith.addf %57, %61 : vector<24x12xf32>
    %c29 = arith.constant 29 : index
    %c0_54 = arith.constant 0 : index
    %63 = vector.load %arg13[%c29, %c0_54] : memref<196x6xf32, #tpu.memory_space<vmem>>, vector<24x6xf32>
    %c11 = arith.constant 11 : index
    %c0_55 = arith.constant 0 : index
    %c0_56 = arith.constant 0 : index
    %64 = vector.load %arg4[%c11, %c0_55, %c0_56] : memref<25x6x12xf32, #tpu.memory_space<vmem>>, vector<1x6x12xf32>
    %65 = vector.shape_cast %64 : vector<1x6x12xf32> to vector<6x12xf32>
    %cst_57 = arith.constant dense<0.000000e+00> : vector<24x12xf32>
    %66 = tpu.matmul %63, %65, %cst_57 {dimension_numbers = #tpu.dot_dimension_numbers<[1], [0], [0], [1], [0, 0, 1, 1], [], []>} : vector<24x6xf32>, vector<6x12xf32>, vector<24x12xf32> -> vector<24x12xf32>
    %67 = arith.addf %62, %66 : vector<24x12xf32>
    %c30 = arith.constant 30 : index
    %c0_58 = arith.constant 0 : index
    %68 = vector.load %arg13[%c30, %c0_58] : memref<196x6xf32, #tpu.memory_space<vmem>>, vector<24x6xf32>
    %c12 = arith.constant 12 : index
    %c0_59 = arith.constant 0 : index
    %c0_60 = arith.constant 0 : index
    %69 = vector.load %arg4[%c12, %c0_59, %c0_60] : memref<25x6x12xf32, #tpu.memory_space<vmem>>, vector<1x6x12xf32>
    %70 = vector.shape_cast %69 : vector<1x6x12xf32> to vector<6x12xf32>
    %cst_61 = arith.constant dense<0.000000e+00> : vector<24x12xf32>
    %71 = tpu.matmul %68, %70, %cst_61 {dimension_numbers = #tpu.dot_dimension_numbers<[1], [0], [0], [1], [0, 0, 1, 1], [], []>} : vector<24x6xf32>, vector<6x12xf32>, vector<24x12xf32> -> vector<24x12xf32>
    %72 = arith.addf %67, %71 : vector<24x12xf32>
    %c31 = arith.constant 31 : index
    %c0_62 = arith.constant 0 : index
    %73 = vector.load %arg13[%c31, %c0_62] : memref<196x6xf32, #tpu.memory_space<vmem>>, vector<24x6xf32>
    %c13 = arith.constant 13 : index
    %c0_63 = arith.constant 0 : index
    %c0_64 = arith.constant 0 : index
    %74 = vector.load %arg4[%c13, %c0_63, %c0_64] : memref<25x6x12xf32, #tpu.memory_space<vmem>>, vector<1x6x12xf32>
    %75 = vector.shape_cast %74 : vector<1x6x12xf32> to vector<6x12xf32>
    %cst_65 = arith.constant dense<0.000000e+00> : vector<24x12xf32>
    %76 = tpu.matmul %73, %75, %cst_65 {dimension_numbers = #tpu.dot_dimension_numbers<[1], [0], [0], [1], [0, 0, 1, 1], [], []>} : vector<24x6xf32>, vector<6x12xf32>, vector<24x12xf32> -> vector<24x12xf32>
    %77 = arith.addf %72, %76 : vector<24x12xf32>
    %c32 = arith.constant 32 : index
    %c0_66 = arith.constant 0 : index
    %78 = vector.load %arg13[%c32, %c0_66] : memref<196x6xf32, #tpu.memory_space<vmem>>, vector<24x6xf32>
    %c14_67 = arith.constant 14 : index
    %c0_68 = arith.constant 0 : index
    %c0_69 = arith.constant 0 : index
    %79 = vector.load %arg4[%c14_67, %c0_68, %c0_69] : memref<25x6x12xf32, #tpu.memory_space<vmem>>, vector<1x6x12xf32>
    %80 = vector.shape_cast %79 : vector<1x6x12xf32> to vector<6x12xf32>
    %cst_70 = arith.constant dense<0.000000e+00> : vector<24x12xf32>
    %81 = tpu.matmul %78, %80, %cst_70 {dimension_numbers = #tpu.dot_dimension_numbers<[1], [0], [0], [1], [0, 0, 1, 1], [], []>} : vector<24x6xf32>, vector<6x12xf32>, vector<24x12xf32> -> vector<24x12xf32>
    %82 = arith.addf %77, %81 : vector<24x12xf32>
    %c42 = arith.constant 42 : index
    %c0_71 = arith.constant 0 : index
    %83 = vector.load %arg13[%c42, %c0_71] : memref<196x6xf32, #tpu.memory_space<vmem>>, vector<24x6xf32>
    %c15_72 = arith.constant 15 : index
    %c0_73 = arith.constant 0 : index
    %c0_74 = arith.constant 0 : index
    %84 = vector.load %arg4[%c15_72, %c0_73, %c0_74] : memref<25x6x12xf32, #tpu.memory_space<vmem>>, vector<1x6x12xf32>
    %85 = vector.shape_cast %84 : vector<1x6x12xf32> to vector<6x12xf32>
    %cst_75 = arith.constant dense<0.000000e+00> : vector<24x12xf32>
    %86 = tpu.matmul %83, %85, %cst_75 {dimension_numbers = #tpu.dot_dimension_numbers<[1], [0], [0], [1], [0, 0, 1, 1], [], []>} : vector<24x6xf32>, vector<6x12xf32>, vector<24x12xf32> -> vector<24x12xf32>
    %87 = arith.addf %82, %86 : vector<24x12xf32>
    %c43 = arith.constant 43 : index
    %c0_76 = arith.constant 0 : index
    %88 = vector.load %arg13[%c43, %c0_76] : memref<196x6xf32, #tpu.memory_space<vmem>>, vector<24x6xf32>
    %c16_77 = arith.constant 16 : index
    %c0_78 = arith.constant 0 : index
    %c0_79 = arith.constant 0 : index
    %89 = vector.load %arg4[%c16_77, %c0_78, %c0_79] : memref<25x6x12xf32, #tpu.memory_space<vmem>>, vector<1x6x12xf32>
    %90 = vector.shape_cast %89 : vector<1x6x12xf32> to vector<6x12xf32>
    %cst_80 = arith.constant dense<0.000000e+00> : vector<24x12xf32>
    %91 = tpu.matmul %88, %90, %cst_80 {dimension_numbers = #tpu.dot_dimension_numbers<[1], [0], [0], [1], [0, 0, 1, 1], [], []>} : vector<24x6xf32>, vector<6x12xf32>, vector<24x12xf32> -> vector<24x12xf32>
    %92 = arith.addf %87, %91 : vector<24x12xf32>
    %c44 = arith.constant 44 : index
    %c0_81 = arith.constant 0 : index
    %93 = vector.load %arg13[%c44, %c0_81] : memref<196x6xf32, #tpu.memory_space<vmem>>, vector<24x6xf32>
    %c17_82 = arith.constant 17 : index
    %c0_83 = arith.constant 0 : index
    %c0_84 = arith.constant 0 : index
    %94 = vector.load %arg4[%c17_82, %c0_83, %c0_84] : memref<25x6x12xf32, #tpu.memory_space<vmem>>, vector<1x6x12xf32>
    %95 = vector.shape_cast %94 : vector<1x6x12xf32> to vector<6x12xf32>
    %cst_85 = arith.constant dense<0.000000e+00> : vector<24x12xf32>
    %96 = tpu.matmul %93, %95, %cst_85 {dimension_numbers = #tpu.dot_dimension_numbers<[1], [0], [0], [1], [0, 0, 1, 1], [], []>} : vector<24x6xf32>, vector<6x12xf32>, vector<24x12xf32> -> vector<24x12xf32>
    %97 = arith.addf %92, %96 : vector<24x12xf32>
    %c45 = arith.constant 45 : index
    %c0_86 = arith.constant 0 : index
    %98 = vector.load %arg13[%c45, %c0_86] : memref<196x6xf32, #tpu.memory_space<vmem>>, vector<24x6xf32>
    %c18_87 = arith.constant 18 : index
    %c0_88 = arith.constant 0 : index
    %c0_89 = arith.constant 0 : index
    %99 = vector.load %arg4[%c18_87, %c0_88, %c0_89] : memref<25x6x12xf32, #tpu.memory_space<vmem>>, vector<1x6x12xf32>
    %100 = vector.shape_cast %99 : vector<1x6x12xf32> to vector<6x12xf32>
    %cst_90 = arith.constant dense<0.000000e+00> : vector<24x12xf32>
    %101 = tpu.matmul %98, %100, %cst_90 {dimension_numbers = #tpu.dot_dimension_numbers<[1], [0], [0], [1], [0, 0, 1, 1], [], []>} : vector<24x6xf32>, vector<6x12xf32>, vector<24x12xf32> -> vector<24x12xf32>
    %102 = arith.addf %97, %101 : vector<24x12xf32>
    %c46 = arith.constant 46 : index
    %c0_91 = arith.constant 0 : index
    %103 = vector.load %arg13[%c46, %c0_91] : memref<196x6xf32, #tpu.memory_space<vmem>>, vector<24x6xf32>
    %c19 = arith.constant 19 : index
    %c0_92 = arith.constant 0 : index
    %c0_93 = arith.constant 0 : index
    %104 = vector.load %arg4[%c19, %c0_92, %c0_93] : memref<25x6x12xf32, #tpu.memory_space<vmem>>, vector<1x6x12xf32>
    %105 = vector.shape_cast %104 : vector<1x6x12xf32> to vector<6x12xf32>
    %cst_94 = arith.constant dense<0.000000e+00> : vector<24x12xf32>
    %106 = tpu.matmul %103, %105, %cst_94 {dimension_numbers = #tpu.dot_dimension_numbers<[1], [0], [0], [1], [0, 0, 1, 1], [], []>} : vector<24x6xf32>, vector<6x12xf32>, vector<24x12xf32> -> vector<24x12xf32>
    %107 = arith.addf %102, %106 : vector<24x12xf32>
    %c56 = arith.constant 56 : index
    %c0_95 = arith.constant 0 : index
    %108 = vector.load %arg13[%c56, %c0_95] : memref<196x6xf32, #tpu.memory_space<vmem>>, vector<24x6xf32>
    %c20 = arith.constant 20 : index
    %c0_96 = arith.constant 0 : index
    %c0_97 = arith.constant 0 : index
    %109 = vector.load %arg4[%c20, %c0_96, %c0_97] : memref<25x6x12xf32, #tpu.memory_space<vmem>>, vector<1x6x12xf32>
    %110 = vector.shape_cast %109 : vector<1x6x12xf32> to vector<6x12xf32>
    %cst_98 = arith.constant dense<0.000000e+00> : vector<24x12xf32>
    %111 = tpu.matmul %108, %110, %cst_98 {dimension_numbers = #tpu.dot_dimension_numbers<[1], [0], [0], [1], [0, 0, 1, 1], [], []>} : vector<24x6xf32>, vector<6x12xf32>, vector<24x12xf32> -> vector<24x12xf32>
    %112 = arith.addf %107, %111 : vector<24x12xf32>
    %c57 = arith.constant 57 : index
    %c0_99 = arith.constant 0 : index
    %113 = vector.load %arg13[%c57, %c0_99] : memref<196x6xf32, #tpu.memory_space<vmem>>, vector<24x6xf32>
    %c21 = arith.constant 21 : index
    %c0_100 = arith.constant 0 : index
    %c0_101 = arith.constant 0 : index
    %114 = vector.load %arg4[%c21, %c0_100, %c0_101] : memref<25x6x12xf32, #tpu.memory_space<vmem>>, vector<1x6x12xf32>
    %115 = vector.shape_cast %114 : vector<1x6x12xf32> to vector<6x12xf32>
    %cst_102 = arith.constant dense<0.000000e+00> : vector<24x12xf32>
    %116 = tpu.matmul %113, %115, %cst_102 {dimension_numbers = #tpu.dot_dimension_numbers<[1], [0], [0], [1], [0, 0, 1, 1], [], []>} : vector<24x6xf32>, vector<6x12xf32>, vector<24x12xf32> -> vector<24x12xf32>
    %117 = arith.addf %112, %116 : vector<24x12xf32>
    %c58 = arith.constant 58 : index
    %c0_103 = arith.constant 0 : index
    %118 = vector.load %arg13[%c58, %c0_103] : memref<196x6xf32, #tpu.memory_space<vmem>>, vector<24x6xf32>
    %c22 = arith.constant 22 : index
    %c0_104 = arith.constant 0 : index
    %c0_105 = arith.constant 0 : index
    %119 = vector.load %arg4[%c22, %c0_104, %c0_105] : memref<25x6x12xf32, #tpu.memory_space<vmem>>, vector<1x6x12xf32>
    %120 = vector.shape_cast %119 : vector<1x6x12xf32> to vector<6x12xf32>
    %cst_106 = arith.constant dense<0.000000e+00> : vector<24x12xf32>
    %121 = tpu.matmul %118, %120, %cst_106 {dimension_numbers = #tpu.dot_dimension_numbers<[1], [0], [0], [1], [0, 0, 1, 1], [], []>} : vector<24x6xf32>, vector<6x12xf32>, vector<24x12xf32> -> vector<24x12xf32>
    %122 = arith.addf %117, %121 : vector<24x12xf32>
    %c59 = arith.constant 59 : index
    %c0_107 = arith.constant 0 : index
    %123 = vector.load %arg13[%c59, %c0_107] : memref<196x6xf32, #tpu.memory_space<vmem>>, vector<24x6xf32>
    %c23 = arith.constant 23 : index
    %c0_108 = arith.constant 0 : index
    %c0_109 = arith.constant 0 : index
    %124 = vector.load %arg4[%c23, %c0_108, %c0_109] : memref<25x6x12xf32, #tpu.memory_space<vmem>>, vector<1x6x12xf32>
    %125 = vector.shape_cast %124 : vector<1x6x12xf32> to vector<6x12xf32>
    %cst_110 = arith.constant dense<0.000000e+00> : vector<24x12xf32>
    %126 = tpu.matmul %123, %125, %cst_110 {dimension_numbers = #tpu.dot_dimension_numbers<[1], [0], [0], [1], [0, 0, 1, 1], [], []>} : vector<24x6xf32>, vector<6x12xf32>, vector<24x12xf32> -> vector<24x12xf32>
    %127 = arith.addf %122, %126 : vector<24x12xf32>
    %c60 = arith.constant 60 : index
    %c0_111 = arith.constant 0 : index
    %128 = vector.load %arg13[%c60, %c0_111] : memref<196x6xf32, #tpu.memory_space<vmem>>, vector<24x6xf32>
    %c24 = arith.constant 24 : index
    %c0_112 = arith.constant 0 : index
    %c0_113 = arith.constant 0 : index
    %129 = vector.load %arg4[%c24, %c0_112, %c0_113] : memref<25x6x12xf32, #tpu.memory_space<vmem>>, vector<1x6x12xf32>
    %130 = vector.shape_cast %129 : vector<1x6x12xf32> to vector<6x12xf32>
    %cst_114 = arith.constant dense<0.000000e+00> : vector<24x12xf32>
    %131 = tpu.matmul %128, %130, %cst_114 {dimension_numbers = #tpu.dot_dimension_numbers<[1], [0], [0], [1], [0, 0, 1, 1], [], []>} : vector<24x6xf32>, vector<6x12xf32>, vector<24x12xf32> -> vector<24x12xf32>
    %132 = arith.addf %127, %131 : vector<24x12xf32>
    %133 = arith.addf %132, %5 : vector<24x12xf32>
    %cst_115 = arith.constant 0.000000e+00 : f32
    %134 = vector.broadcast %cst_115 : f32 to vector<24x12xf32>
    %135 = arith.maximumf %133, %134 : vector<24x12xf32>
    %c0_116 = arith.constant 0 : index
    %c0_117 = arith.constant 0 : index
    %136 = vector.load %arg16[%c0_116, %c0_117] : memref<24x12xf32, #tpu.memory_space<vmem>>, vector<24x12xf32>
    tpu.vector_store %arg16[%c0_116, %c0_117], %135 {strides = array<i32>} : memref<24x12xf32, #tpu.memory_space<vmem>>, vector<24x12xf32>,
    %c0_118 = arith.constant 0 : index
    %c0_119 = arith.constant 0 : index
    %137 = tpu.strided_load %arg16[%c0_118, %c0_119] {strides = array<i32: 2, 1>} : memref<24x12xf32, #tpu.memory_space<vmem>>, vector<5x12xf32>
    %c1_120 = arith.constant 1 : index
    %c0_121 = arith.constant 0 : index
    %138 = tpu.strided_load %arg16[%c1_120, %c0_121] {strides = array<i32: 2, 1>} : memref<24x12xf32, #tpu.memory_space<vmem>>, vector<5x12xf32>
    %139 = arith.maximumf %137, %138 : vector<5x12xf32>
    %c14_122 = arith.constant 14 : index
    %c0_123 = arith.constant 0 : index
    %140 = tpu.strided_load %arg16[%c14_122, %c0_123] {strides = array<i32: 2, 1>} : memref<24x12xf32, #tpu.memory_space<vmem>>, vector<5x12xf32>
    %c15_124 = arith.constant 15 : index
    %c0_125 = arith.constant 0 : index
    %141 = tpu.strided_load %arg16[%c15_124, %c0_125] {strides = array<i32: 2, 1>} : memref<24x12xf32, #tpu.memory_space<vmem>>, vector<5x12xf32>
    %142 = arith.maximumf %140, %141 : vector<5x12xf32>
    %143 = arith.maximumf %139, %142 : vector<5x12xf32>
    %c0_126 = arith.constant 0 : index
    %c0_127 = arith.constant 0 : index
    %144 = vector.load %arg14[%c0_126, %c0_127] : memref<25x12xf32, #tpu.memory_space<vmem>>, vector<5x12xf32>
    tpu.vector_store %arg14[%c0_126, %c0_127], %143 {strides = array<i32>} : memref<25x12xf32, #tpu.memory_space<vmem>>, vector<5x12xf32>,
    %cst_128 = arith.constant 0.000000e+00 : f32
    %145 = vector.broadcast %cst_128 : f32 to vector<24x12xf32>
    %c28_129 = arith.constant 28 : index
    %c0_130 = arith.constant 0 : index
    %146 = vector.load %arg13[%c28_129, %c0_130] : memref<196x6xf32, #tpu.memory_space<vmem>>, vector<24x6xf32>
    %c0_131 = arith.constant 0 : index
    %c0_132 = arith.constant 0 : index
    %c0_133 = arith.constant 0 : index
    %147 = vector.load %arg4[%c0_131, %c0_132, %c0_133] : memref<25x6x12xf32, #tpu.memory_space<vmem>>, vector<1x6x12xf32>
    %148 = vector.shape_cast %147 : vector<1x6x12xf32> to vector<6x12xf32>
    %cst_134 = arith.constant dense<0.000000e+00> : vector<24x12xf32>
    %149 = tpu.matmul %146, %148, %cst_134 {dimension_numbers = #tpu.dot_dimension_numbers<[1], [0], [0], [1], [0, 0, 1, 1], [], []>} : vector<24x6xf32>, vector<6x12xf32>, vector<24x12xf32> -> vector<24x12xf32>
    %150 = arith.addf %145, %149 : vector<24x12xf32>
    %c29_135 = arith.constant 29 : index
    %c0_136 = arith.constant 0 : index
    %151 = vector.load %arg13[%c29_135, %c0_136] : memref<196x6xf32, #tpu.memory_space<vmem>>, vector<24x6xf32>
    %c1_137 = arith.constant 1 : index
    %c0_138 = arith.constant 0 : index
    %c0_139 = arith.constant 0 : index
    %152 = vector.load %arg4[%c1_137, %c0_138, %c0_139] : memref<25x6x12xf32, #tpu.memory_space<vmem>>, vector<1x6x12xf32>
    %153 = vector.shape_cast %152 : vector<1x6x12xf32> to vector<6x12xf32>
    %cst_140 = arith.constant dense<0.000000e+00> : vector<24x12xf32>
    %154 = tpu.matmul %151, %153, %cst_140 {dimension_numbers = #tpu.dot_dimension_numbers<[1], [0], [0], [1], [0, 0, 1, 1], [], []>} : vector<24x6xf32>, vector<6x12xf32>, vector<24x12xf32> -> vector<24x12xf32>
    %155 = arith.addf %150, %154 : vector<24x12xf32>
    %c30_141 = arith.constant 30 : index
    %c0_142 = arith.constant 0 : index
    %156 = vector.load %arg13[%c30_141, %c0_142] : memref<196x6xf32, #tpu.memory_space<vmem>>, vector<24x6xf32>
    %c2_143 = arith.constant 2 : index
    %c0_144 = arith.constant 0 : index
    %c0_145 = arith.constant 0 : index
    %157 = vector.load %arg4[%c2_143, %c0_144, %c0_145] : memref<25x6x12xf32, #tpu.memory_space<vmem>>, vector<1x6x12xf32>
    %158 = vector.shape_cast %157 : vector<1x6x12xf32> to vector<6x12xf32>
    %cst_146 = arith.constant dense<0.000000e+00> : vector<24x12xf32>
    %159 = tpu.matmul %156, %158, %cst_146 {dimension_numbers = #tpu.dot_dimension_numbers<[1], [0], [0], [1], [0, 0, 1, 1], [], []>} : vector<24x6xf32>, vector<6x12xf32>, vector<24x12xf32> -> vector<24x12xf32>
    %160 = arith.addf %155, %159 : vector<24x12xf32>
    %c31_147 = arith.constant 31 : index
    %c0_148 = arith.constant 0 : index
    %161 = vector.load %arg13[%c31_147, %c0_148] : memref<196x6xf32, #tpu.memory_space<vmem>>, vector<24x6xf32>
    %c3_149 = arith.constant 3 : index
    %c0_150 = arith.constant 0 : index
    %c0_151 = arith.constant 0 : index
    %162 = vector.load %arg4[%c3_149, %c0_150, %c0_151] : memref<25x6x12xf32, #tpu.memory_space<vmem>>, vector<1x6x12xf32>
    %163 = vector.shape_cast %162 : vector<1x6x12xf32> to vector<6x12xf32>
    %cst_152 = arith.constant dense<0.000000e+00> : vector<24x12xf32>
    %164 = tpu.matmul %161, %163, %cst_152 {dimension_numbers = #tpu.dot_dimension_numbers<[1], [0], [0], [1], [0, 0, 1, 1], [], []>} : vector<24x6xf32>, vector<6x12xf32>, vector<24x12xf32> -> vector<24x12xf32>
    %165 = arith.addf %160, %164 : vector<24x12xf32>
    %c32_153 = arith.constant 32 : index
    %c0_154 = arith.constant 0 : index
    %166 = vector.load %arg13[%c32_153, %c0_154] : memref<196x6xf32, #tpu.memory_space<vmem>>, vector<24x6xf32>
    %c4_155 = arith.constant 4 : index
    %c0_156 = arith.constant 0 : index
    %c0_157 = arith.constant 0 : index
    %167 = vector.load %arg4[%c4_155, %c0_156, %c0_157] : memref<25x6x12xf32, #tpu.memory_space<vmem>>, vector<1x6x12xf32>
    %168 = vector.shape_cast %167 : vector<1x6x12xf32> to vector<6x12xf32>
    %cst_158 = arith.constant dense<0.000000e+00> : vector<24x12xf32>
    %169 = tpu.matmul %166, %168, %cst_158 {dimension_numbers = #tpu.dot_dimension_numbers<[1], [0], [0], [1], [0, 0, 1, 1], [], []>} : vector<24x6xf32>, vector<6x12xf32>, vector<24x12xf32> -> vector<24x12xf32>
    %170 = arith.addf %165, %169 : vector<24x12xf32>
    %c42_159 = arith.constant 42 : index
    %c0_160 = arith.constant 0 : index
    %171 = vector.load %arg13[%c42_159, %c0_160] : memref<196x6xf32, #tpu.memory_space<vmem>>, vector<24x6xf32>
    %c5_161 = arith.constant 5 : index
    %c0_162 = arith.constant 0 : index
    %c0_163 = arith.constant 0 : index
    %172 = vector.load %arg4[%c5_161, %c0_162, %c0_163] : memref<25x6x12xf32, #tpu.memory_space<vmem>>, vector<1x6x12xf32>
    %173 = vector.shape_cast %172 : vector<1x6x12xf32> to vector<6x12xf32>
    %cst_164 = arith.constant dense<0.000000e+00> : vector<24x12xf32>
    %174 = tpu.matmul %171, %173, %cst_164 {dimension_numbers = #tpu.dot_dimension_numbers<[1], [0], [0], [1], [0, 0, 1, 1], [], []>} : vector<24x6xf32>, vector<6x12xf32>, vector<24x12xf32> -> vector<24x12xf32>
    %175 = arith.addf %170, %174 : vector<24x12xf32>
    %c43_165 = arith.constant 43 : index
    %c0_166 = arith.constant 0 : index
    %176 = vector.load %arg13[%c43_165, %c0_166] : memref<196x6xf32, #tpu.memory_space<vmem>>, vector<24x6xf32>
    %c6_167 = arith.constant 6 : index
    %c0_168 = arith.constant 0 : index
    %c0_169 = arith.constant 0 : index
    %177 = vector.load %arg4[%c6_167, %c0_168, %c0_169] : memref<25x6x12xf32, #tpu.memory_space<vmem>>, vector<1x6x12xf32>
    %178 = vector.shape_cast %177 : vector<1x6x12xf32> to vector<6x12xf32>
    %cst_170 = arith.constant dense<0.000000e+00> : vector<24x12xf32>
    %179 = tpu.matmul %176, %178, %cst_170 {dimension_numbers = #tpu.dot_dimension_numbers<[1], [0], [0], [1], [0, 0, 1, 1], [], []>} : vector<24x6xf32>, vector<6x12xf32>, vector<24x12xf32> -> vector<24x12xf32>
    %180 = arith.addf %175, %179 : vector<24x12xf32>
    %c44_171 = arith.constant 44 : index
    %c0_172 = arith.constant 0 : index
    %181 = vector.load %arg13[%c44_171, %c0_172] : memref<196x6xf32, #tpu.memory_space<vmem>>, vector<24x6xf32>
    %c7_173 = arith.constant 7 : index
    %c0_174 = arith.constant 0 : index
    %c0_175 = arith.constant 0 : index
    %182 = vector.load %arg4[%c7_173, %c0_174, %c0_175] : memref<25x6x12xf32, #tpu.memory_space<vmem>>, vector<1x6x12xf32>
    %183 = vector.shape_cast %182 : vector<1x6x12xf32> to vector<6x12xf32>
    %cst_176 = arith.constant dense<0.000000e+00> : vector<24x12xf32>
    %184 = tpu.matmul %181, %183, %cst_176 {dimension_numbers = #tpu.dot_dimension_numbers<[1], [0], [0], [1], [0, 0, 1, 1], [], []>} : vector<24x6xf32>, vector<6x12xf32>, vector<24x12xf32> -> vector<24x12xf32>
    %185 = arith.addf %180, %184 : vector<24x12xf32>
    %c45_177 = arith.constant 45 : index
    %c0_178 = arith.constant 0 : index
    %186 = vector.load %arg13[%c45_177, %c0_178] : memref<196x6xf32, #tpu.memory_space<vmem>>, vector<24x6xf32>
    %c8_179 = arith.constant 8 : index
    %c0_180 = arith.constant 0 : index
    %c0_181 = arith.constant 0 : index
    %187 = vector.load %arg4[%c8_179, %c0_180, %c0_181] : memref<25x6x12xf32, #tpu.memory_space<vmem>>, vector<1x6x12xf32>
    %188 = vector.shape_cast %187 : vector<1x6x12xf32> to vector<6x12xf32>
    %cst_182 = arith.constant dense<0.000000e+00> : vector<24x12xf32>
    %189 = tpu.matmul %186, %188, %cst_182 {dimension_numbers = #tpu.dot_dimension_numbers<[1], [0], [0], [1], [0, 0, 1, 1], [], []>} : vector<24x6xf32>, vector<6x12xf32>, vector<24x12xf32> -> vector<24x12xf32>
    %190 = arith.addf %185, %189 : vector<24x12xf32>
    %c46_183 = arith.constant 46 : index
    %c0_184 = arith.constant 0 : index
    %191 = vector.load %arg13[%c46_183, %c0_184] : memref<196x6xf32, #tpu.memory_space<vmem>>, vector<24x6xf32>
    %c9_185 = arith.constant 9 : index
    %c0_186 = arith.constant 0 : index
    %c0_187 = arith.constant 0 : index
    %192 = vector.load %arg4[%c9_185, %c0_186, %c0_187] : memref<25x6x12xf32, #tpu.memory_space<vmem>>, vector<1x6x12xf32>
    %193 = vector.shape_cast %192 : vector<1x6x12xf32> to vector<6x12xf32>
    %cst_188 = arith.constant dense<0.000000e+00> : vector<24x12xf32>
    %194 = tpu.matmul %191, %193, %cst_188 {dimension_numbers = #tpu.dot_dimension_numbers<[1], [0], [0], [1], [0, 0, 1, 1], [], []>} : vector<24x6xf32>, vector<6x12xf32>, vector<24x12xf32> -> vector<24x12xf32>
    %195 = arith.addf %190, %194 : vector<24x12xf32>
    %c56_189 = arith.constant 56 : index
    %c0_190 = arith.constant 0 : index
    %196 = vector.load %arg13[%c56_189, %c0_190] : memref<196x6xf32, #tpu.memory_space<vmem>>, vector<24x6xf32>
    %c10_191 = arith.constant 10 : index
    %c0_192 = arith.constant 0 : index
    %c0_193 = arith.constant 0 : index
    %197 = vector.load %arg4[%c10_191, %c0_192, %c0_193] : memref<25x6x12xf32, #tpu.memory_space<vmem>>, vector<1x6x12xf32>
    %198 = vector.shape_cast %197 : vector<1x6x12xf32> to vector<6x12xf32>
    %cst_194 = arith.constant dense<0.000000e+00> : vector<24x12xf32>
    %199 = tpu.matmul %196, %198, %cst_194 {dimension_numbers = #tpu.dot_dimension_numbers<[1], [0], [0], [1], [0, 0, 1, 1], [], []>} : vector<24x6xf32>, vector<6x12xf32>, vector<24x12xf32> -> vector<24x12xf32>
    %200 = arith.addf %195, %199 : vector<24x12xf32>
    %c57_195 = arith.constant 57 : index
    %c0_196 = arith.constant 0 : index
    %201 = vector.load %arg13[%c57_195, %c0_196] : memref<196x6xf32, #tpu.memory_space<vmem>>, vector<24x6xf32>
    %c11_197 = arith.constant 11 : index
    %c0_198 = arith.constant 0 : index
    %c0_199 = arith.constant 0 : index
    %202 = vector.load %arg4[%c11_197, %c0_198, %c0_199] : memref<25x6x12xf32, #tpu.memory_space<vmem>>, vector<1x6x12xf32>
    %203 = vector.shape_cast %202 : vector<1x6x12xf32> to vector<6x12xf32>
    %cst_200 = arith.constant dense<0.000000e+00> : vector<24x12xf32>
    %204 = tpu.matmul %201, %203, %cst_200 {dimension_numbers = #tpu.dot_dimension_numbers<[1], [0], [0], [1], [0, 0, 1, 1], [], []>} : vector<24x6xf32>, vector<6x12xf32>, vector<24x12xf32> -> vector<24x12xf32>
    %205 = arith.addf %200, %204 : vector<24x12xf32>
    %c58_201 = arith.constant 58 : index
    %c0_202 = arith.constant 0 : index
    %206 = vector.load %arg13[%c58_201, %c0_202] : memref<196x6xf32, #tpu.memory_space<vmem>>, vector<24x6xf32>
    %c12_203 = arith.constant 12 : index
    %c0_204 = arith.constant 0 : index
    %c0_205 = arith.constant 0 : index
    %207 = vector.load %arg4[%c12_203, %c0_204, %c0_205] : memref<25x6x12xf32, #tpu.memory_space<vmem>>, vector<1x6x12xf32>
    %208 = vector.shape_cast %207 : vector<1x6x12xf32> to vector<6x12xf32>
    %cst_206 = arith.constant dense<0.000000e+00> : vector<24x12xf32>
    %209 = tpu.matmul %206, %208, %cst_206 {dimension_numbers = #tpu.dot_dimension_numbers<[1], [0], [0], [1], [0, 0, 1, 1], [], []>} : vector<24x6xf32>, vector<6x12xf32>, vector<24x12xf32> -> vector<24x12xf32>
    %210 = arith.addf %205, %209 : vector<24x12xf32>
    %c59_207 = arith.constant 59 : index
    %c0_208 = arith.constant 0 : index
    %211 = vector.load %arg13[%c59_207, %c0_208] : memref<196x6xf32, #tpu.memory_space<vmem>>, vector<24x6xf32>
    %c13_209 = arith.constant 13 : index
    %c0_210 = arith.constant 0 : index
    %c0_211 = arith.constant 0 : index
    %212 = vector.load %arg4[%c13_209, %c0_210, %c0_211] : memref<25x6x12xf32, #tpu.memory_space<vmem>>, vector<1x6x12xf32>
    %213 = vector.shape_cast %212 : vector<1x6x12xf32> to vector<6x12xf32>
    %cst_212 = arith.constant dense<0.000000e+00> : vector<24x12xf32>
    %214 = tpu.matmul %211, %213, %cst_212 {dimension_numbers = #tpu.dot_dimension_numbers<[1], [0], [0], [1], [0, 0, 1, 1], [], []>} : vector<24x6xf32>, vector<6x12xf32>, vector<24x12xf32> -> vector<24x12xf32>
    %215 = arith.addf %210, %214 : vector<24x12xf32>
    %c60_213 = arith.constant 60 : index
    %c0_214 = arith.constant 0 : index
    %216 = vector.load %arg13[%c60_213, %c0_214] : memref<196x6xf32, #tpu.memory_space<vmem>>, vector<24x6xf32>
    %c14_215 = arith.constant 14 : index
    %c0_216 = arith.constant 0 : index
    %c0_217 = arith.constant 0 : index
    %217 = vector.load %arg4[%c14_215, %c0_216, %c0_217] : memref<25x6x12xf32, #tpu.memory_space<vmem>>, vector<1x6x12xf32>
    %218 = vector.shape_cast %217 : vector<1x6x12xf32> to vector<6x12xf32>
    %cst_218 = arith.constant dense<0.000000e+00> : vector<24x12xf32>
    %219 = tpu.matmul %216, %218, %cst_218 {dimension_numbers = #tpu.dot_dimension_numbers<[1], [0], [0], [1], [0, 0, 1, 1], [], []>} : vector<24x6xf32>, vector<6x12xf32>, vector<24x12xf32> -> vector<24x12xf32>
    %220 = arith.addf %215, %219 : vector<24x12xf32>
    %c70 = arith.constant 70 : index
    %c0_219 = arith.constant 0 : index
    %221 = vector.load %arg13[%c70, %c0_219] : memref<196x6xf32, #tpu.memory_space<vmem>>, vector<24x6xf32>
    %c15_220 = arith.constant 15 : index
    %c0_221 = arith.constant 0 : index
    %c0_222 = arith.constant 0 : index
    %222 = vector.load %arg4[%c15_220, %c0_221, %c0_222] : memref<25x6x12xf32, #tpu.memory_space<vmem>>, vector<1x6x12xf32>
    %223 = vector.shape_cast %222 : vector<1x6x12xf32> to vector<6x12xf32>
    %cst_223 = arith.constant dense<0.000000e+00> : vector<24x12xf32>
    %224 = tpu.matmul %221, %223, %cst_223 {dimension_numbers = #tpu.dot_dimension_numbers<[1], [0], [0], [1], [0, 0, 1, 1], [], []>} : vector<24x6xf32>, vector<6x12xf32>, vector<24x12xf32> -> vector<24x12xf32>
    %225 = arith.addf %220, %224 : vector<24x12xf32>
    %c71 = arith.constant 71 : index
    %c0_224 = arith.constant 0 : index
    %226 = vector.load %arg13[%c71, %c0_224] : memref<196x6xf32, #tpu.memory_space<vmem>>, vector<24x6xf32>
    %c16_225 = arith.constant 16 : index
    %c0_226 = arith.constant 0 : index
    %c0_227 = arith.constant 0 : index
    %227 = vector.load %arg4[%c16_225, %c0_226, %c0_227] : memref<25x6x12xf32, #tpu.memory_space<vmem>>, vector<1x6x12xf32>
    %228 = vector.shape_cast %227 : vector<1x6x12xf32> to vector<6x12xf32>
    %cst_228 = arith.constant dense<0.000000e+00> : vector<24x12xf32>
    %229 = tpu.matmul %226, %228, %cst_228 {dimension_numbers = #tpu.dot_dimension_numbers<[1], [0], [0], [1], [0, 0, 1, 1], [], []>} : vector<24x6xf32>, vector<6x12xf32>, vector<24x12xf32> -> vector<24x12xf32>
    %230 = arith.addf %225, %229 : vector<24x12xf32>
    %c72 = arith.constant 72 : index
    %c0_229 = arith.constant 0 : index
    %231 = vector.load %arg13[%c72, %c0_229] : memref<196x6xf32, #tpu.memory_space<vmem>>, vector<24x6xf32>
    %c17_230 = arith.constant 17 : index
    %c0_231 = arith.constant 0 : index
    %c0_232 = arith.constant 0 : index
    %232 = vector.load %arg4[%c17_230, %c0_231, %c0_232] : memref<25x6x12xf32, #tpu.memory_space<vmem>>, vector<1x6x12xf32>
    %233 = vector.shape_cast %232 : vector<1x6x12xf32> to vector<6x12xf32>
    %cst_233 = arith.constant dense<0.000000e+00> : vector<24x12xf32>
    %234 = tpu.matmul %231, %233, %cst_233 {dimension_numbers = #tpu.dot_dimension_numbers<[1], [0], [0], [1], [0, 0, 1, 1], [], []>} : vector<24x6xf32>, vector<6x12xf32>, vector<24x12xf32> -> vector<24x12xf32>
    %235 = arith.addf %230, %234 : vector<24x12xf32>
    %c73 = arith.constant 73 : index
    %c0_234 = arith.constant 0 : index
    %236 = vector.load %arg13[%c73, %c0_234] : memref<196x6xf32, #tpu.memory_space<vmem>>, vector<24x6xf32>
    %c18_235 = arith.constant 18 : index
    %c0_236 = arith.constant 0 : index
    %c0_237 = arith.constant 0 : index
    %237 = vector.load %arg4[%c18_235, %c0_236, %c0_237] : memref<25x6x12xf32, #tpu.memory_space<vmem>>, vector<1x6x12xf32>
    %238 = vector.shape_cast %237 : vector<1x6x12xf32> to vector<6x12xf32>
    %cst_238 = arith.constant dense<0.000000e+00> : vector<24x12xf32>
    %239 = tpu.matmul %236, %238, %cst_238 {dimension_numbers = #tpu.dot_dimension_numbers<[1], [0], [0], [1], [0, 0, 1, 1], [], []>} : vector<24x6xf32>, vector<6x12xf32>, vector<24x12xf32> -> vector<24x12xf32>
    %240 = arith.addf %235, %239 : vector<24x12xf32>
    %c74 = arith.constant 74 : index
    %c0_239 = arith.constant 0 : index
    %241 = vector.load %arg13[%c74, %c0_239] : memref<196x6xf32, #tpu.memory_space<vmem>>, vector<24x6xf32>
    %c19_240 = arith.constant 19 : index
    %c0_241 = arith.constant 0 : index
    %c0_242 = arith.constant 0 : index
    %242 = vector.load %arg4[%c19_240, %c0_241, %c0_242] : memref<25x6x12xf32, #tpu.memory_space<vmem>>, vector<1x6x12xf32>
    %243 = vector.shape_cast %242 : vector<1x6x12xf32> to vector<6x12xf32>
    %cst_243 = arith.constant dense<0.000000e+00> : vector<24x12xf32>
    %244 = tpu.matmul %241, %243, %cst_243 {dimension_numbers = #tpu.dot_dimension_numbers<[1], [0], [0], [1], [0, 0, 1, 1], [], []>} : vector<24x6xf32>, vector<6x12xf32>, vector<24x12xf32> -> vector<24x12xf32>
    %245 = arith.addf %240, %244 : vector<24x12xf32>
    %c84 = arith.constant 84 : index
    %c0_244 = arith.constant 0 : index
    %246 = vector.load %arg13[%c84, %c0_244] : memref<196x6xf32, #tpu.memory_space<vmem>>, vector<24x6xf32>
    %c20_245 = arith.constant 20 : index
    %c0_246 = arith.constant 0 : index
    %c0_247 = arith.constant 0 : index
    %247 = vector.load %arg4[%c20_245, %c0_246, %c0_247] : memref<25x6x12xf32, #tpu.memory_space<vmem>>, vector<1x6x12xf32>
    %248 = vector.shape_cast %247 : vector<1x6x12xf32> to vector<6x12xf32>
    %cst_248 = arith.constant dense<0.000000e+00> : vector<24x12xf32>
    %249 = tpu.matmul %246, %248, %cst_248 {dimension_numbers = #tpu.dot_dimension_numbers<[1], [0], [0], [1], [0, 0, 1, 1], [], []>} : vector<24x6xf32>, vector<6x12xf32>, vector<24x12xf32> -> vector<24x12xf32>
    %250 = arith.addf %245, %249 : vector<24x12xf32>
    %c85 = arith.constant 85 : index
    %c0_249 = arith.constant 0 : index
    %251 = vector.load %arg13[%c85, %c0_249] : memref<196x6xf32, #tpu.memory_space<vmem>>, vector<24x6xf32>
    %c21_250 = arith.constant 21 : index
    %c0_251 = arith.constant 0 : index
    %c0_252 = arith.constant 0 : index
    %252 = vector.load %arg4[%c21_250, %c0_251, %c0_252] : memref<25x6x12xf32, #tpu.memory_space<vmem>>, vector<1x6x12xf32>
    %253 = vector.shape_cast %252 : vector<1x6x12xf32> to vector<6x12xf32>
    %cst_253 = arith.constant dense<0.000000e+00> : vector<24x12xf32>
    %254 = tpu.matmul %251, %253, %cst_253 {dimension_numbers = #tpu.dot_dimension_numbers<[1], [0], [0], [1], [0, 0, 1, 1], [], []>} : vector<24x6xf32>, vector<6x12xf32>, vector<24x12xf32> -> vector<24x12xf32>
    %255 = arith.addf %250, %254 : vector<24x12xf32>
    %c86 = arith.constant 86 : index
    %c0_254 = arith.constant 0 : index
    %256 = vector.load %arg13[%c86, %c0_254] : memref<196x6xf32, #tpu.memory_space<vmem>>, vector<24x6xf32>
    %c22_255 = arith.constant 22 : index
    %c0_256 = arith.constant 0 : index
    %c0_257 = arith.constant 0 : index
    %257 = vector.load %arg4[%c22_255, %c0_256, %c0_257] : memref<25x6x12xf32, #tpu.memory_space<vmem>>, vector<1x6x12xf32>
    %258 = vector.shape_cast %257 : vector<1x6x12xf32> to vector<6x12xf32>
    %cst_258 = arith.constant dense<0.000000e+00> : vector<24x12xf32>
    %259 = tpu.matmul %256, %258, %cst_258 {dimension_numbers = #tpu.dot_dimension_numbers<[1], [0], [0], [1], [0, 0, 1, 1], [], []>} : vector<24x6xf32>, vector<6x12xf32>, vector<24x12xf32> -> vector<24x12xf32>
    %260 = arith.addf %255, %259 : vector<24x12xf32>
    %c87 = arith.constant 87 : index
    %c0_259 = arith.constant 0 : index
    %261 = vector.load %arg13[%c87, %c0_259] : memref<196x6xf32, #tpu.memory_space<vmem>>, vector<24x6xf32>
    %c23_260 = arith.constant 23 : index
    %c0_261 = arith.constant 0 : index
    %c0_262 = arith.constant 0 : index
    %262 = vector.load %arg4[%c23_260, %c0_261, %c0_262] : memref<25x6x12xf32, #tpu.memory_space<vmem>>, vector<1x6x12xf32>
    %263 = vector.shape_cast %262 : vector<1x6x12xf32> to vector<6x12xf32>
    %cst_263 = arith.constant dense<0.000000e+00> : vector<24x12xf32>
    %264 = tpu.matmul %261, %263, %cst_263 {dimension_numbers = #tpu.dot_dimension_numbers<[1], [0], [0], [1], [0, 0, 1, 1], [], []>} : vector<24x6xf32>, vector<6x12xf32>, vector<24x12xf32> -> vector<24x12xf32>
    %265 = arith.addf %260, %264 : vector<24x12xf32>
    %c88 = arith.constant 88 : index
    %c0_264 = arith.constant 0 : index
    %266 = vector.load %arg13[%c88, %c0_264] : memref<196x6xf32, #tpu.memory_space<vmem>>, vector<24x6xf32>
    %c24_265 = arith.constant 24 : index
    %c0_266 = arith.constant 0 : index
    %c0_267 = arith.constant 0 : index
    %267 = vector.load %arg4[%c24_265, %c0_266, %c0_267] : memref<25x6x12xf32, #tpu.memory_space<vmem>>, vector<1x6x12xf32>
    %268 = vector.shape_cast %267 : vector<1x6x12xf32> to vector<6x12xf32>
    %cst_268 = arith.constant dense<0.000000e+00> : vector<24x12xf32>
    %269 = tpu.matmul %266, %268, %cst_268 {dimension_numbers = #tpu.dot_dimension_numbers<[1], [0], [0], [1], [0, 0, 1, 1], [], []>} : vector<24x6xf32>, vector<6x12xf32>, vector<24x12xf32> -> vector<24x12xf32>
    %270 = arith.addf %265, %269 : vector<24x12xf32>
    %271 = arith.addf %270, %5 : vector<24x12xf32>
    %cst_269 = arith.constant 0.000000e+00 : f32
    %272 = vector.broadcast %cst_269 : f32 to vector<24x12xf32>
    %273 = arith.maximumf %271, %272 : vector<24x12xf32>
    %c0_270 = arith.constant 0 : index
    %c0_271 = arith.constant 0 : index
    %274 = vector.load %arg16[%c0_270, %c0_271] : memref<24x12xf32, #tpu.memory_space<vmem>>, vector<24x12xf32>
    tpu.vector_store %arg16[%c0_270, %c0_271], %273 {strides = array<i32>} : memref<24x12xf32, #tpu.memory_space<vmem>>, vector<24x12xf32>,
    %c0_272 = arith.constant 0 : index
    %c0_273 = arith.constant 0 : index
    %275 = tpu.strided_load %arg16[%c0_272, %c0_273] {strides = array<i32: 2, 1>} : memref<24x12xf32, #tpu.memory_space<vmem>>, vector<5x12xf32>
    %c1_274 = arith.constant 1 : index
    %c0_275 = arith.constant 0 : index
    %276 = tpu.strided_load %arg16[%c1_274, %c0_275] {strides = array<i32: 2, 1>} : memref<24x12xf32, #tpu.memory_space<vmem>>, vector<5x12xf32>
    %277 = arith.maximumf %275, %276 : vector<5x12xf32>
    %c14_276 = arith.constant 14 : index
    %c0_277 = arith.constant 0 : index
    %278 = tpu.strided_load %arg16[%c14_276, %c0_277] {strides = array<i32: 2, 1>} : memref<24x12xf32, #tpu.memory_space<vmem>>, vector<5x12xf32>
    %c15_278 = arith.constant 15 : index
    %c0_279 = arith.constant 0 : index
    %279 = tpu.strided_load %arg16[%c15_278, %c0_279] {strides = array<i32: 2, 1>} : memref<24x12xf32, #tpu.memory_space<vmem>>, vector<5x12xf32>
    %280 = arith.maximumf %278, %279 : vector<5x12xf32>
    %281 = arith.maximumf %277, %280 : vector<5x12xf32>
    %c5_280 = arith.constant 5 : index
    %c0_281 = arith.constant 0 : index
    %282 = vector.load %arg14[%c5_280, %c0_281] : memref<25x12xf32, #tpu.memory_space<vmem>>, vector<5x12xf32>
    tpu.vector_store %arg14[%c5_280, %c0_281], %281 {strides = array<i32>} : memref<25x12xf32, #tpu.memory_space<vmem>>, vector<5x12xf32>,
    %cst_282 = arith.constant 0.000000e+00 : f32
    %283 = vector.broadcast %cst_282 : f32 to vector<24x12xf32>
    %c56_283 = arith.constant 56 : index
    %c0_284 = arith.constant 0 : index
    %284 = vector.load %arg13[%c56_283, %c0_284] : memref<196x6xf32, #tpu.memory_space<vmem>>, vector<24x6xf32>
    %c0_285 = arith.constant 0 : index
    %c0_286 = arith.constant 0 : index
    %c0_287 = arith.constant 0 : index
    %285 = vector.load %arg4[%c0_285, %c0_286, %c0_287] : memref<25x6x12xf32, #tpu.memory_space<vmem>>, vector<1x6x12xf32>
    %286 = vector.shape_cast %285 : vector<1x6x12xf32> to vector<6x12xf32>
    %cst_288 = arith.constant dense<0.000000e+00> : vector<24x12xf32>
    %287 = tpu.matmul %284, %286, %cst_288 {dimension_numbers = #tpu.dot_dimension_numbers<[1], [0], [0], [1], [0, 0, 1, 1], [], []>} : vector<24x6xf32>, vector<6x12xf32>, vector<24x12xf32> -> vector<24x12xf32>
    %288 = arith.addf %283, %287 : vector<24x12xf32>
    %c57_289 = arith.constant 57 : index
    %c0_290 = arith.constant 0 : index
    %289 = vector.load %arg13[%c57_289, %c0_290] : memref<196x6xf32, #tpu.memory_space<vmem>>, vector<24x6xf32>
    %c1_291 = arith.constant 1 : index
    %c0_292 = arith.constant 0 : index
    %c0_293 = arith.constant 0 : index
    %290 = vector.load %arg4[%c1_291, %c0_292, %c0_293] : memref<25x6x12xf32, #tpu.memory_space<vmem>>, vector<1x6x12xf32>
    %291 = vector.shape_cast %290 : vector<1x6x12xf32> to vector<6x12xf32>
    %cst_294 = arith.constant dense<0.000000e+00> : vector<24x12xf32>
    %292 = tpu.matmul %289, %291, %cst_294 {dimension_numbers = #tpu.dot_dimension_numbers<[1], [0], [0], [1], [0, 0, 1, 1], [], []>} : vector<24x6xf32>, vector<6x12xf32>, vector<24x12xf32> -> vector<24x12xf32>
    %293 = arith.addf %288, %292 : vector<24x12xf32>
    %c58_295 = arith.constant 58 : index
    %c0_296 = arith.constant 0 : index
    %294 = vector.load %arg13[%c58_295, %c0_296] : memref<196x6xf32, #tpu.memory_space<vmem>>, vector<24x6xf32>
    %c2_297 = arith.constant 2 : index
    %c0_298 = arith.constant 0 : index
    %c0_299 = arith.constant 0 : index
    %295 = vector.load %arg4[%c2_297, %c0_298, %c0_299] : memref<25x6x12xf32, #tpu.memory_space<vmem>>, vector<1x6x12xf32>
    %296 = vector.shape_cast %295 : vector<1x6x12xf32> to vector<6x12xf32>
    %cst_300 = arith.constant dense<0.000000e+00> : vector<24x12xf32>
    %297 = tpu.matmul %294, %296, %cst_300 {dimension_numbers = #tpu.dot_dimension_numbers<[1], [0], [0], [1], [0, 0, 1, 1], [], []>} : vector<24x6xf32>, vector<6x12xf32>, vector<24x12xf32> -> vector<24x12xf32>
    %298 = arith.addf %293, %297 : vector<24x12xf32>
    %c59_301 = arith.constant 59 : index
    %c0_302 = arith.constant 0 : index
    %299 = vector.load %arg13[%c59_301, %c0_302] : memref<196x6xf32, #tpu.memory_space<vmem>>, vector<24x6xf32>
    %c3_303 = arith.constant 3 : index
    %c0_304 = arith.constant 0 : index
    %c0_305 = arith.constant 0 : index
    %300 = vector.load %arg4[%c3_303, %c0_304, %c0_305] : memref<25x6x12xf32, #tpu.memory_space<vmem>>, vector<1x6x12xf32>
    %301 = vector.shape_cast %300 : vector<1x6x12xf32> to vector<6x12xf32>
    %cst_306 = arith.constant dense<0.000000e+00> : vector<24x12xf32>
    %302 = tpu.matmul %299, %301, %cst_306 {dimension_numbers = #tpu.dot_dimension_numbers<[1], [0], [0], [1], [0, 0, 1, 1], [], []>} : vector<24x6xf32>, vector<6x12xf32>, vector<24x12xf32> -> vector<24x12xf32>
    %303 = arith.addf %298, %302 : vector<24x12xf32>
    %c60_307 = arith.constant 60 : index
    %c0_308 = arith.constant 0 : index
    %304 = vector.load %arg13[%c60_307, %c0_308] : memref<196x6xf32, #tpu.memory_space<vmem>>, vector<24x6xf32>
    %c4_309 = arith.constant 4 : index
    %c0_310 = arith.constant 0 : index
    %c0_311 = arith.constant 0 : index
    %305 = vector.load %arg4[%c4_309, %c0_310, %c0_311] : memref<25x6x12xf32, #tpu.memory_space<vmem>>, vector<1x6x12xf32>
    %306 = vector.shape_cast %305 : vector<1x6x12xf32> to vector<6x12xf32>
    %cst_312 = arith.constant dense<0.000000e+00> : vector<24x12xf32>
    %307 = tpu.matmul %304, %306, %cst_312 {dimension_numbers = #tpu.dot_dimension_numbers<[1], [0], [0], [1], [0, 0, 1, 1], [], []>} : vector<24x6xf32>, vector<6x12xf32>, vector<24x12xf32> -> vector<24x12xf32>
    %308 = arith.addf %303, %307 : vector<24x12xf32>
    %c70_313 = arith.constant 70 : index
    %c0_314 = arith.constant 0 : index
    %309 = vector.load %arg13[%c70_313, %c0_314] : memref<196x6xf32, #tpu.memory_space<vmem>>, vector<24x6xf32>
    %c5_315 = arith.constant 5 : index
    %c0_316 = arith.constant 0 : index
    %c0_317 = arith.constant 0 : index
    %310 = vector.load %arg4[%c5_315, %c0_316, %c0_317] : memref<25x6x12xf32, #tpu.memory_space<vmem>>, vector<1x6x12xf32>
    %311 = vector.shape_cast %310 : vector<1x6x12xf32> to vector<6x12xf32>
    %cst_318 = arith.constant dense<0.000000e+00> : vector<24x12xf32>
    %312 = tpu.matmul %309, %311, %cst_318 {dimension_numbers = #tpu.dot_dimension_numbers<[1], [0], [0], [1], [0, 0, 1, 1], [], []>} : vector<24x6xf32>, vector<6x12xf32>, vector<24x12xf32> -> vector<24x12xf32>
    %313 = arith.addf %308, %312 : vector<24x12xf32>
    %c71_319 = arith.constant 71 : index
    %c0_320 = arith.constant 0 : index
    %314 = vector.load %arg13[%c71_319, %c0_320] : memref<196x6xf32, #tpu.memory_space<vmem>>, vector<24x6xf32>
    %c6_321 = arith.constant 6 : index
    %c0_322 = arith.constant 0 : index
    %c0_323 = arith.constant 0 : index
    %315 = vector.load %arg4[%c6_321, %c0_322, %c0_323] : memref<25x6x12xf32, #tpu.memory_space<vmem>>, vector<1x6x12xf32>
    %316 = vector.shape_cast %315 : vector<1x6x12xf32> to vector<6x12xf32>
    %cst_324 = arith.constant dense<0.000000e+00> : vector<24x12xf32>
    %317 = tpu.matmul %314, %316, %cst_324 {dimension_numbers = #tpu.dot_dimension_numbers<[1], [0], [0], [1], [0, 0, 1, 1], [], []>} : vector<24x6xf32>, vector<6x12xf32>, vector<24x12xf32> -> vector<24x12xf32>
    %318 = arith.addf %313, %317 : vector<24x12xf32>
    %c72_325 = arith.constant 72 : index
    %c0_326 = arith.constant 0 : index
    %319 = vector.load %arg13[%c72_325, %c0_326] : memref<196x6xf32, #tpu.memory_space<vmem>>, vector<24x6xf32>
    %c7_327 = arith.constant 7 : index
    %c0_328 = arith.constant 0 : index
    %c0_329 = arith.constant 0 : index
    %320 = vector.load %arg4[%c7_327, %c0_328, %c0_329] : memref<25x6x12xf32, #tpu.memory_space<vmem>>, vector<1x6x12xf32>
    %321 = vector.shape_cast %320 : vector<1x6x12xf32> to vector<6x12xf32>
    %cst_330 = arith.constant dense<0.000000e+00> : vector<24x12xf32>
    %322 = tpu.matmul %319, %321, %cst_330 {dimension_numbers = #tpu.dot_dimension_numbers<[1], [0], [0], [1], [0, 0, 1, 1], [], []>} : vector<24x6xf32>, vector<6x12xf32>, vector<24x12xf32> -> vector<24x12xf32>
    %323 = arith.addf %318, %322 : vector<24x12xf32>
    %c73_331 = arith.constant 73 : index
    %c0_332 = arith.constant 0 : index
    %324 = vector.load %arg13[%c73_331, %c0_332] : memref<196x6xf32, #tpu.memory_space<vmem>>, vector<24x6xf32>
    %c8_333 = arith.constant 8 : index
    %c0_334 = arith.constant 0 : index
    %c0_335 = arith.constant 0 : index
    %325 = vector.load %arg4[%c8_333, %c0_334, %c0_335] : memref<25x6x12xf32, #tpu.memory_space<vmem>>, vector<1x6x12xf32>
    %326 = vector.shape_cast %325 : vector<1x6x12xf32> to vector<6x12xf32>
    %cst_336 = arith.constant dense<0.000000e+00> : vector<24x12xf32>
    %327 = tpu.matmul %324, %326, %cst_336 {dimension_numbers = #tpu.dot_dimension_numbers<[1], [0], [0], [1], [0, 0, 1, 1], [], []>} : vector<24x6xf32>, vector<6x12xf32>, vector<24x12xf32> -> vector<24x12xf32>
    %328 = arith.addf %323, %327 : vector<24x12xf32>
    %c74_337 = arith.constant 74 : index
    %c0_338 = arith.constant 0 : index
    %329 = vector.load %arg13[%c74_337, %c0_338] : memref<196x6xf32, #tpu.memory_space<vmem>>, vector<24x6xf32>
    %c9_339 = arith.constant 9 : index
    %c0_340 = arith.constant 0 : index
    %c0_341 = arith.constant 0 : index
    %330 = vector.load %arg4[%c9_339, %c0_340, %c0_341] : memref<25x6x12xf32, #tpu.memory_space<vmem>>, vector<1x6x12xf32>
    %331 = vector.shape_cast %330 : vector<1x6x12xf32> to vector<6x12xf32>
    %cst_342 = arith.constant dense<0.000000e+00> : vector<24x12xf32>
    %332 = tpu.matmul %329, %331, %cst_342 {dimension_numbers = #tpu.dot_dimension_numbers<[1], [0], [0], [1], [0, 0, 1, 1], [], []>} : vector<24x6xf32>, vector<6x12xf32>, vector<24x12xf32> -> vector<24x12xf32>
    %333 = arith.addf %328, %332 : vector<24x12xf32>
    %c84_343 = arith.constant 84 : index
    %c0_344 = arith.constant 0 : index
    %334 = vector.load %arg13[%c84_343, %c0_344] : memref<196x6xf32, #tpu.memory_space<vmem>>, vector<24x6xf32>
    %c10_345 = arith.constant 10 : index
    %c0_346 = arith.constant 0 : index
    %c0_347 = arith.constant 0 : index
    %335 = vector.load %arg4[%c10_345, %c0_346, %c0_347] : memref<25x6x12xf32, #tpu.memory_space<vmem>>, vector<1x6x12xf32>
    %336 = vector.shape_cast %335 : vector<1x6x12xf32> to vector<6x12xf32>
    %cst_348 = arith.constant dense<0.000000e+00> : vector<24x12xf32>
    %337 = tpu.matmul %334, %336, %cst_348 {dimension_numbers = #tpu.dot_dimension_numbers<[1], [0], [0], [1], [0, 0, 1, 1], [], []>} : vector<24x6xf32>, vector<6x12xf32>, vector<24x12xf32> -> vector<24x12xf32>
    %338 = arith.addf %333, %337 : vector<24x12xf32>
    %c85_349 = arith.constant 85 : index
    %c0_350 = arith.constant 0 : index
    %339 = vector.load %arg13[%c85_349, %c0_350] : memref<196x6xf32, #tpu.memory_space<vmem>>, vector<24x6xf32>
    %c11_351 = arith.constant 11 : index
    %c0_352 = arith.constant 0 : index
    %c0_353 = arith.constant 0 : index
    %340 = vector.load %arg4[%c11_351, %c0_352, %c0_353] : memref<25x6x12xf32, #tpu.memory_space<vmem>>, vector<1x6x12xf32>
    %341 = vector.shape_cast %340 : vector<1x6x12xf32> to vector<6x12xf32>
    %cst_354 = arith.constant dense<0.000000e+00> : vector<24x12xf32>
    %342 = tpu.matmul %339, %341, %cst_354 {dimension_numbers = #tpu.dot_dimension_numbers<[1], [0], [0], [1], [0, 0, 1, 1], [], []>} : vector<24x6xf32>, vector<6x12xf32>, vector<24x12xf32> -> vector<24x12xf32>
    %343 = arith.addf %338, %342 : vector<24x12xf32>
    %c86_355 = arith.constant 86 : index
    %c0_356 = arith.constant 0 : index
    %344 = vector.load %arg13[%c86_355, %c0_356] : memref<196x6xf32, #tpu.memory_space<vmem>>, vector<24x6xf32>
    %c12_357 = arith.constant 12 : index
    %c0_358 = arith.constant 0 : index
    %c0_359 = arith.constant 0 : index
    %345 = vector.load %arg4[%c12_357, %c0_358, %c0_359] : memref<25x6x12xf32, #tpu.memory_space<vmem>>, vector<1x6x12xf32>
    %346 = vector.shape_cast %345 : vector<1x6x12xf32> to vector<6x12xf32>
    %cst_360 = arith.constant dense<0.000000e+00> : vector<24x12xf32>
    %347 = tpu.matmul %344, %346, %cst_360 {dimension_numbers = #tpu.dot_dimension_numbers<[1], [0], [0], [1], [0, 0, 1, 1], [], []>} : vector<24x6xf32>, vector<6x12xf32>, vector<24x12xf32> -> vector<24x12xf32>
    %348 = arith.addf %343, %347 : vector<24x12xf32>
    %c87_361 = arith.constant 87 : index
    %c0_362 = arith.constant 0 : index
    %349 = vector.load %arg13[%c87_361, %c0_362] : memref<196x6xf32, #tpu.memory_space<vmem>>, vector<24x6xf32>
    %c13_363 = arith.constant 13 : index
    %c0_364 = arith.constant 0 : index
    %c0_365 = arith.constant 0 : index
    %350 = vector.load %arg4[%c13_363, %c0_364, %c0_365] : memref<25x6x12xf32, #tpu.memory_space<vmem>>, vector<1x6x12xf32>
    %351 = vector.shape_cast %350 : vector<1x6x12xf32> to vector<6x12xf32>
    %cst_366 = arith.constant dense<0.000000e+00> : vector<24x12xf32>
    %352 = tpu.matmul %349, %351, %cst_366 {dimension_numbers = #tpu.dot_dimension_numbers<[1], [0], [0], [1], [0, 0, 1, 1], [], []>} : vector<24x6xf32>, vector<6x12xf32>, vector<24x12xf32> -> vector<24x12xf32>
    %353 = arith.addf %348, %352 : vector<24x12xf32>
    %c88_367 = arith.constant 88 : index
    %c0_368 = arith.constant 0 : index
    %354 = vector.load %arg13[%c88_367, %c0_368] : memref<196x6xf32, #tpu.memory_space<vmem>>, vector<24x6xf32>
    %c14_369 = arith.constant 14 : index
    %c0_370 = arith.constant 0 : index
    %c0_371 = arith.constant 0 : index
    %355 = vector.load %arg4[%c14_369, %c0_370, %c0_371] : memref<25x6x12xf32, #tpu.memory_space<vmem>>, vector<1x6x12xf32>
    %356 = vector.shape_cast %355 : vector<1x6x12xf32> to vector<6x12xf32>
    %cst_372 = arith.constant dense<0.000000e+00> : vector<24x12xf32>
    %357 = tpu.matmul %354, %356, %cst_372 {dimension_numbers = #tpu.dot_dimension_numbers<[1], [0], [0], [1], [0, 0, 1, 1], [], []>} : vector<24x6xf32>, vector<6x12xf32>, vector<24x12xf32> -> vector<24x12xf32>
    %358 = arith.addf %353, %357 : vector<24x12xf32>
    %c98 = arith.constant 98 : index
    %c0_373 = arith.constant 0 : index
    %359 = vector.load %arg13[%c98, %c0_373] : memref<196x6xf32, #tpu.memory_space<vmem>>, vector<24x6xf32>
    %c15_374 = arith.constant 15 : index
    %c0_375 = arith.constant 0 : index
    %c0_376 = arith.constant 0 : index
    %360 = vector.load %arg4[%c15_374, %c0_375, %c0_376] : memref<25x6x12xf32, #tpu.memory_space<vmem>>, vector<1x6x12xf32>
    %361 = vector.shape_cast %360 : vector<1x6x12xf32> to vector<6x12xf32>
    %cst_377 = arith.constant dense<0.000000e+00> : vector<24x12xf32>
    %362 = tpu.matmul %359, %361, %cst_377 {dimension_numbers = #tpu.dot_dimension_numbers<[1], [0], [0], [1], [0, 0, 1, 1], [], []>} : vector<24x6xf32>, vector<6x12xf32>, vector<24x12xf32> -> vector<24x12xf32>
    %363 = arith.addf %358, %362 : vector<24x12xf32>
    %c99 = arith.constant 99 : index
    %c0_378 = arith.constant 0 : index
    %364 = vector.load %arg13[%c99, %c0_378] : memref<196x6xf32, #tpu.memory_space<vmem>>, vector<24x6xf32>
    %c16_379 = arith.constant 16 : index
    %c0_380 = arith.constant 0 : index
    %c0_381 = arith.constant 0 : index
    %365 = vector.load %arg4[%c16_379, %c0_380, %c0_381] : memref<25x6x12xf32, #tpu.memory_space<vmem>>, vector<1x6x12xf32>
    %366 = vector.shape_cast %365 : vector<1x6x12xf32> to vector<6x12xf32>
    %cst_382 = arith.constant dense<0.000000e+00> : vector<24x12xf32>
    %367 = tpu.matmul %364, %366, %cst_382 {dimension_numbers = #tpu.dot_dimension_numbers<[1], [0], [0], [1], [0, 0, 1, 1], [], []>} : vector<24x6xf32>, vector<6x12xf32>, vector<24x12xf32> -> vector<24x12xf32>
    %368 = arith.addf %363, %367 : vector<24x12xf32>
    %c100 = arith.constant 100 : index
    %c0_383 = arith.constant 0 : index
    %369 = vector.load %arg13[%c100, %c0_383] : memref<196x6xf32, #tpu.memory_space<vmem>>, vector<24x6xf32>
    %c17_384 = arith.constant 17 : index
    %c0_385 = arith.constant 0 : index
    %c0_386 = arith.constant 0 : index
    %370 = vector.load %arg4[%c17_384, %c0_385, %c0_386] : memref<25x6x12xf32, #tpu.memory_space<vmem>>, vector<1x6x12xf32>
    %371 = vector.shape_cast %370 : vector<1x6x12xf32> to vector<6x12xf32>
    %cst_387 = arith.constant dense<0.000000e+00> : vector<24x12xf32>
    %372 = tpu.matmul %369, %371, %cst_387 {dimension_numbers = #tpu.dot_dimension_numbers<[1], [0], [0], [1], [0, 0, 1, 1], [], []>} : vector<24x6xf32>, vector<6x12xf32>, vector<24x12xf32> -> vector<24x12xf32>
    %373 = arith.addf %368, %372 : vector<24x12xf32>
    %c101 = arith.constant 101 : index
    %c0_388 = arith.constant 0 : index
    %374 = vector.load %arg13[%c101, %c0_388] : memref<196x6xf32, #tpu.memory_space<vmem>>, vector<24x6xf32>
    %c18_389 = arith.constant 18 : index
    %c0_390 = arith.constant 0 : index
    %c0_391 = arith.constant 0 : index
    %375 = vector.load %arg4[%c18_389, %c0_390, %c0_391] : memref<25x6x12xf32, #tpu.memory_space<vmem>>, vector<1x6x12xf32>
    %376 = vector.shape_cast %375 : vector<1x6x12xf32> to vector<6x12xf32>
    %cst_392 = arith.constant dense<0.000000e+00> : vector<24x12xf32>
    %377 = tpu.matmul %374, %376, %cst_392 {dimension_numbers = #tpu.dot_dimension_numbers<[1], [0], [0], [1], [0, 0, 1, 1], [], []>} : vector<24x6xf32>, vector<6x12xf32>, vector<24x12xf32> -> vector<24x12xf32>
    %378 = arith.addf %373, %377 : vector<24x12xf32>
    %c102 = arith.constant 102 : index
    %c0_393 = arith.constant 0 : index
    %379 = vector.load %arg13[%c102, %c0_393] : memref<196x6xf32, #tpu.memory_space<vmem>>, vector<24x6xf32>
    %c19_394 = arith.constant 19 : index
    %c0_395 = arith.constant 0 : index
    %c0_396 = arith.constant 0 : index
    %380 = vector.load %arg4[%c19_394, %c0_395, %c0_396] : memref<25x6x12xf32, #tpu.memory_space<vmem>>, vector<1x6x12xf32>
    %381 = vector.shape_cast %380 : vector<1x6x12xf32> to vector<6x12xf32>
    %cst_397 = arith.constant dense<0.000000e+00> : vector<24x12xf32>
    %382 = tpu.matmul %379, %381, %cst_397 {dimension_numbers = #tpu.dot_dimension_numbers<[1], [0], [0], [1], [0, 0, 1, 1], [], []>} : vector<24x6xf32>, vector<6x12xf32>, vector<24x12xf32> -> vector<24x12xf32>
    %383 = arith.addf %378, %382 : vector<24x12xf32>
    %c112 = arith.constant 112 : index
    %c0_398 = arith.constant 0 : index
    %384 = vector.load %arg13[%c112, %c0_398] : memref<196x6xf32, #tpu.memory_space<vmem>>, vector<24x6xf32>
    %c20_399 = arith.constant 20 : index
    %c0_400 = arith.constant 0 : index
    %c0_401 = arith.constant 0 : index
    %385 = vector.load %arg4[%c20_399, %c0_400, %c0_401] : memref<25x6x12xf32, #tpu.memory_space<vmem>>, vector<1x6x12xf32>
    %386 = vector.shape_cast %385 : vector<1x6x12xf32> to vector<6x12xf32>
    %cst_402 = arith.constant dense<0.000000e+00> : vector<24x12xf32>
    %387 = tpu.matmul %384, %386, %cst_402 {dimension_numbers = #tpu.dot_dimension_numbers<[1], [0], [0], [1], [0, 0, 1, 1], [], []>} : vector<24x6xf32>, vector<6x12xf32>, vector<24x12xf32> -> vector<24x12xf32>
    %388 = arith.addf %383, %387 : vector<24x12xf32>
    %c113 = arith.constant 113 : index
    %c0_403 = arith.constant 0 : index
    %389 = vector.load %arg13[%c113, %c0_403] : memref<196x6xf32, #tpu.memory_space<vmem>>, vector<24x6xf32>
    %c21_404 = arith.constant 21 : index
    %c0_405 = arith.constant 0 : index
    %c0_406 = arith.constant 0 : index
    %390 = vector.load %arg4[%c21_404, %c0_405, %c0_406] : memref<25x6x12xf32, #tpu.memory_space<vmem>>, vector<1x6x12xf32>
    %391 = vector.shape_cast %390 : vector<1x6x12xf32> to vector<6x12xf32>
    %cst_407 = arith.constant dense<0.000000e+00> : vector<24x12xf32>
    %392 = tpu.matmul %389, %391, %cst_407 {dimension_numbers = #tpu.dot_dimension_numbers<[1], [0], [0], [1], [0, 0, 1, 1], [], []>} : vector<24x6xf32>, vector<6x12xf32>, vector<24x12xf32> -> vector<24x12xf32>
    %393 = arith.addf %388, %392 : vector<24x12xf32>
    %c114 = arith.constant 114 : index
    %c0_408 = arith.constant 0 : index
    %394 = vector.load %arg13[%c114, %c0_408] : memref<196x6xf32, #tpu.memory_space<vmem>>, vector<24x6xf32>
    %c22_409 = arith.constant 22 : index
    %c0_410 = arith.constant 0 : index
    %c0_411 = arith.constant 0 : index
    %395 = vector.load %arg4[%c22_409, %c0_410, %c0_411] : memref<25x6x12xf32, #tpu.memory_space<vmem>>, vector<1x6x12xf32>
    %396 = vector.shape_cast %395 : vector<1x6x12xf32> to vector<6x12xf32>
    %cst_412 = arith.constant dense<0.000000e+00> : vector<24x12xf32>
    %397 = tpu.matmul %394, %396, %cst_412 {dimension_numbers = #tpu.dot_dimension_numbers<[1], [0], [0], [1], [0, 0, 1, 1], [], []>} : vector<24x6xf32>, vector<6x12xf32>, vector<24x12xf32> -> vector<24x12xf32>
    %398 = arith.addf %393, %397 : vector<24x12xf32>
    %c115 = arith.constant 115 : index
    %c0_413 = arith.constant 0 : index
    %399 = vector.load %arg13[%c115, %c0_413] : memref<196x6xf32, #tpu.memory_space<vmem>>, vector<24x6xf32>
    %c23_414 = arith.constant 23 : index
    %c0_415 = arith.constant 0 : index
    %c0_416 = arith.constant 0 : index
    %400 = vector.load %arg4[%c23_414, %c0_415, %c0_416] : memref<25x6x12xf32, #tpu.memory_space<vmem>>, vector<1x6x12xf32>
    %401 = vector.shape_cast %400 : vector<1x6x12xf32> to vector<6x12xf32>
    %cst_417 = arith.constant dense<0.000000e+00> : vector<24x12xf32>
    %402 = tpu.matmul %399, %401, %cst_417 {dimension_numbers = #tpu.dot_dimension_numbers<[1], [0], [0], [1], [0, 0, 1, 1], [], []>} : vector<24x6xf32>, vector<6x12xf32>, vector<24x12xf32> -> vector<24x12xf32>
    %403 = arith.addf %398, %402 : vector<24x12xf32>
    %c116 = arith.constant 116 : index
    %c0_418 = arith.constant 0 : index
    %404 = vector.load %arg13[%c116, %c0_418] : memref<196x6xf32, #tpu.memory_space<vmem>>, vector<24x6xf32>
    %c24_419 = arith.constant 24 : index
    %c0_420 = arith.constant 0 : index
    %c0_421 = arith.constant 0 : index
    %405 = vector.load %arg4[%c24_419, %c0_420, %c0_421] : memref<25x6x12xf32, #tpu.memory_space<vmem>>, vector<1x6x12xf32>
    %406 = vector.shape_cast %405 : vector<1x6x12xf32> to vector<6x12xf32>
    %cst_422 = arith.constant dense<0.000000e+00> : vector<24x12xf32>
    %407 = tpu.matmul %404, %406, %cst_422 {dimension_numbers = #tpu.dot_dimension_numbers<[1], [0], [0], [1], [0, 0, 1, 1], [], []>} : vector<24x6xf32>, vector<6x12xf32>, vector<24x12xf32> -> vector<24x12xf32>
    %408 = arith.addf %403, %407 : vector<24x12xf32>
    %409 = arith.addf %408, %5 : vector<24x12xf32>
    %cst_423 = arith.constant 0.000000e+00 : f32
    %410 = vector.broadcast %cst_423 : f32 to vector<24x12xf32>
    %411 = arith.maximumf %409, %410 : vector<24x12xf32>
    %c0_424 = arith.constant 0 : index
    %c0_425 = arith.constant 0 : index
    %412 = vector.load %arg16[%c0_424, %c0_425] : memref<24x12xf32, #tpu.memory_space<vmem>>, vector<24x12xf32>
    tpu.vector_store %arg16[%c0_424, %c0_425], %411 {strides = array<i32>} : memref<24x12xf32, #tpu.memory_space<vmem>>, vector<24x12xf32>,
    %c0_426 = arith.constant 0 : index
    %c0_427 = arith.constant 0 : index
    %413 = tpu.strided_load %arg16[%c0_426, %c0_427] {strides = array<i32: 2, 1>} : memref<24x12xf32, #tpu.memory_space<vmem>>, vector<5x12xf32>
    %c1_428 = arith.constant 1 : index
    %c0_429 = arith.constant 0 : index
    %414 = tpu.strided_load %arg16[%c1_428, %c0_429] {strides = array<i32: 2, 1>} : memref<24x12xf32, #tpu.memory_space<vmem>>, vector<5x12xf32>
    %415 = arith.maximumf %413, %414 : vector<5x12xf32>
    %c14_430 = arith.constant 14 : index
    %c0_431 = arith.constant 0 : index
    %416 = tpu.strided_load %arg16[%c14_430, %c0_431] {strides = array<i32: 2, 1>} : memref<24x12xf32, #tpu.memory_space<vmem>>, vector<5x12xf32>
    %c15_432 = arith.constant 15 : index
    %c0_433 = arith.constant 0 : index
    %417 = tpu.strided_load %arg16[%c15_432, %c0_433] {strides = array<i32: 2, 1>} : memref<24x12xf32, #tpu.memory_space<vmem>>, vector<5x12xf32>
    %418 = arith.maximumf %416, %417 : vector<5x12xf32>
    %419 = arith.maximumf %415, %418 : vector<5x12xf32>
    %c10_434 = arith.constant 10 : index
    %c0_435 = arith.constant 0 : index
    %420 = vector.load %arg14[%c10_434, %c0_435] : memref<25x12xf32, #tpu.memory_space<vmem>>, vector<5x12xf32>
    tpu.vector_store %arg14[%c10_434, %c0_435], %419 {strides = array<i32>} : memref<25x12xf32, #tpu.memory_space<vmem>>, vector<5x12xf32>,
    %cst_436 = arith.constant 0.000000e+00 : f32
    %421 = vector.broadcast %cst_436 : f32 to vector<24x12xf32>
    %c84_437 = arith.constant 84 : index
    %c0_438 = arith.constant 0 : index
    %422 = vector.load %arg13[%c84_437, %c0_438] : memref<196x6xf32, #tpu.memory_space<vmem>>, vector<24x6xf32>
    %c0_439 = arith.constant 0 : index
    %c0_440 = arith.constant 0 : index
    %c0_441 = arith.constant 0 : index
    %423 = vector.load %arg4[%c0_439, %c0_440, %c0_441] : memref<25x6x12xf32, #tpu.memory_space<vmem>>, vector<1x6x12xf32>
    %424 = vector.shape_cast %423 : vector<1x6x12xf32> to vector<6x12xf32>
    %cst_442 = arith.constant dense<0.000000e+00> : vector<24x12xf32>
    %425 = tpu.matmul %422, %424, %cst_442 {dimension_numbers = #tpu.dot_dimension_numbers<[1], [0], [0], [1], [0, 0, 1, 1], [], []>} : vector<24x6xf32>, vector<6x12xf32>, vector<24x12xf32> -> vector<24x12xf32>
    %426 = arith.addf %421, %425 : vector<24x12xf32>
    %c85_443 = arith.constant 85 : index
    %c0_444 = arith.constant 0 : index
    %427 = vector.load %arg13[%c85_443, %c0_444] : memref<196x6xf32, #tpu.memory_space<vmem>>, vector<24x6xf32>
    %c1_445 = arith.constant 1 : index
    %c0_446 = arith.constant 0 : index
    %c0_447 = arith.constant 0 : index
    %428 = vector.load %arg4[%c1_445, %c0_446, %c0_447] : memref<25x6x12xf32, #tpu.memory_space<vmem>>, vector<1x6x12xf32>
    %429 = vector.shape_cast %428 : vector<1x6x12xf32> to vector<6x12xf32>
    %cst_448 = arith.constant dense<0.000000e+00> : vector<24x12xf32>
    %430 = tpu.matmul %427, %429, %cst_448 {dimension_numbers = #tpu.dot_dimension_numbers<[1], [0], [0], [1], [0, 0, 1, 1], [], []>} : vector<24x6xf32>, vector<6x12xf32>, vector<24x12xf32> -> vector<24x12xf32>
    %431 = arith.addf %426, %430 : vector<24x12xf32>
    %c86_449 = arith.constant 86 : index
    %c0_450 = arith.constant 0 : index
    %432 = vector.load %arg13[%c86_449, %c0_450] : memref<196x6xf32, #tpu.memory_space<vmem>>, vector<24x6xf32>
    %c2_451 = arith.constant 2 : index
    %c0_452 = arith.constant 0 : index
    %c0_453 = arith.constant 0 : index
    %433 = vector.load %arg4[%c2_451, %c0_452, %c0_453] : memref<25x6x12xf32, #tpu.memory_space<vmem>>, vector<1x6x12xf32>
    %434 = vector.shape_cast %433 : vector<1x6x12xf32> to vector<6x12xf32>
    %cst_454 = arith.constant dense<0.000000e+00> : vector<24x12xf32>
    %435 = tpu.matmul %432, %434, %cst_454 {dimension_numbers = #tpu.dot_dimension_numbers<[1], [0], [0], [1], [0, 0, 1, 1], [], []>} : vector<24x6xf32>, vector<6x12xf32>, vector<24x12xf32> -> vector<24x12xf32>
    %436 = arith.addf %431, %435 : vector<24x12xf32>
    %c87_455 = arith.constant 87 : index
    %c0_456 = arith.constant 0 : index
    %437 = vector.load %arg13[%c87_455, %c0_456] : memref<196x6xf32, #tpu.memory_space<vmem>>, vector<24x6xf32>
    %c3_457 = arith.constant 3 : index
    %c0_458 = arith.constant 0 : index
    %c0_459 = arith.constant 0 : index
    %438 = vector.load %arg4[%c3_457, %c0_458, %c0_459] : memref<25x6x12xf32, #tpu.memory_space<vmem>>, vector<1x6x12xf32>
    %439 = vector.shape_cast %438 : vector<1x6x12xf32> to vector<6x12xf32>
    %cst_460 = arith.constant dense<0.000000e+00> : vector<24x12xf32>
    %440 = tpu.matmul %437, %439, %cst_460 {dimension_numbers = #tpu.dot_dimension_numbers<[1], [0], [0], [1], [0, 0, 1, 1], [], []>} : vector<24x6xf32>, vector<6x12xf32>, vector<24x12xf32> -> vector<24x12xf32>
    %441 = arith.addf %436, %440 : vector<24x12xf32>
    %c88_461 = arith.constant 88 : index
    %c0_462 = arith.constant 0 : index
    %442 = vector.load %arg13[%c88_461, %c0_462] : memref<196x6xf32, #tpu.memory_space<vmem>>, vector<24x6xf32>
    %c4_463 = arith.constant 4 : index
    %c0_464 = arith.constant 0 : index
    %c0_465 = arith.constant 0 : index
    %443 = vector.load %arg4[%c4_463, %c0_464, %c0_465] : memref<25x6x12xf32, #tpu.memory_space<vmem>>, vector<1x6x12xf32>
    %444 = vector.shape_cast %443 : vector<1x6x12xf32> to vector<6x12xf32>
    %cst_466 = arith.constant dense<0.000000e+00> : vector<24x12xf32>
    %445 = tpu.matmul %442, %444, %cst_466 {dimension_numbers = #tpu.dot_dimension_numbers<[1], [0], [0], [1], [0, 0, 1, 1], [], []>} : vector<24x6xf32>, vector<6x12xf32>, vector<24x12xf32> -> vector<24x12xf32>
    %446 = arith.addf %441, %445 : vector<24x12xf32>
    %c98_467 = arith.constant 98 : index
    %c0_468 = arith.constant 0 : index
    %447 = vector.load %arg13[%c98_467, %c0_468] : memref<196x6xf32, #tpu.memory_space<vmem>>, vector<24x6xf32>
    %c5_469 = arith.constant 5 : index
    %c0_470 = arith.constant 0 : index
    %c0_471 = arith.constant 0 : index
    %448 = vector.load %arg4[%c5_469, %c0_470, %c0_471] : memref<25x6x12xf32, #tpu.memory_space<vmem>>, vector<1x6x12xf32>
    %449 = vector.shape_cast %448 : vector<1x6x12xf32> to vector<6x12xf32>
    %cst_472 = arith.constant dense<0.000000e+00> : vector<24x12xf32>
    %450 = tpu.matmul %447, %449, %cst_472 {dimension_numbers = #tpu.dot_dimension_numbers<[1], [0], [0], [1], [0, 0, 1, 1], [], []>} : vector<24x6xf32>, vector<6x12xf32>, vector<24x12xf32> -> vector<24x12xf32>
    %451 = arith.addf %446, %450 : vector<24x12xf32>
    %c99_473 = arith.constant 99 : index
    %c0_474 = arith.constant 0 : index
    %452 = vector.load %arg13[%c99_473, %c0_474] : memref<196x6xf32, #tpu.memory_space<vmem>>, vector<24x6xf32>
    %c6_475 = arith.constant 6 : index
    %c0_476 = arith.constant 0 : index
    %c0_477 = arith.constant 0 : index
    %453 = vector.load %arg4[%c6_475, %c0_476, %c0_477] : memref<25x6x12xf32, #tpu.memory_space<vmem>>, vector<1x6x12xf32>
    %454 = vector.shape_cast %453 : vector<1x6x12xf32> to vector<6x12xf32>
    %cst_478 = arith.constant dense<0.000000e+00> : vector<24x12xf32>
    %455 = tpu.matmul %452, %454, %cst_478 {dimension_numbers = #tpu.dot_dimension_numbers<[1], [0], [0], [1], [0, 0, 1, 1], [], []>} : vector<24x6xf32>, vector<6x12xf32>, vector<24x12xf32> -> vector<24x12xf32>
    %456 = arith.addf %451, %455 : vector<24x12xf32>
    %c100_479 = arith.constant 100 : index
    %c0_480 = arith.constant 0 : index
    %457 = vector.load %arg13[%c100_479, %c0_480] : memref<196x6xf32, #tpu.memory_space<vmem>>, vector<24x6xf32>
    %c7_481 = arith.constant 7 : index
    %c0_482 = arith.constant 0 : index
    %c0_483 = arith.constant 0 : index
    %458 = vector.load %arg4[%c7_481, %c0_482, %c0_483] : memref<25x6x12xf32, #tpu.memory_space<vmem>>, vector<1x6x12xf32>
    %459 = vector.shape_cast %458 : vector<1x6x12xf32> to vector<6x12xf32>
    %cst_484 = arith.constant dense<0.000000e+00> : vector<24x12xf32>
    %460 = tpu.matmul %457, %459, %cst_484 {dimension_numbers = #tpu.dot_dimension_numbers<[1], [0], [0], [1], [0, 0, 1, 1], [], []>} : vector<24x6xf32>, vector<6x12xf32>, vector<24x12xf32> -> vector<24x12xf32>
    %461 = arith.addf %456, %460 : vector<24x12xf32>
    %c101_485 = arith.constant 101 : index
    %c0_486 = arith.constant 0 : index
    %462 = vector.load %arg13[%c101_485, %c0_486] : memref<196x6xf32, #tpu.memory_space<vmem>>, vector<24x6xf32>
    %c8_487 = arith.constant 8 : index
    %c0_488 = arith.constant 0 : index
    %c0_489 = arith.constant 0 : index
    %463 = vector.load %arg4[%c8_487, %c0_488, %c0_489] : memref<25x6x12xf32, #tpu.memory_space<vmem>>, vector<1x6x12xf32>
    %464 = vector.shape_cast %463 : vector<1x6x12xf32> to vector<6x12xf32>
    %cst_490 = arith.constant dense<0.000000e+00> : vector<24x12xf32>
    %465 = tpu.matmul %462, %464, %cst_490 {dimension_numbers = #tpu.dot_dimension_numbers<[1], [0], [0], [1], [0, 0, 1, 1], [], []>} : vector<24x6xf32>, vector<6x12xf32>, vector<24x12xf32> -> vector<24x12xf32>
    %466 = arith.addf %461, %465 : vector<24x12xf32>
    %c102_491 = arith.constant 102 : index
    %c0_492 = arith.constant 0 : index
    %467 = vector.load %arg13[%c102_491, %c0_492] : memref<196x6xf32, #tpu.memory_space<vmem>>, vector<24x6xf32>
    %c9_493 = arith.constant 9 : index
    %c0_494 = arith.constant 0 : index
    %c0_495 = arith.constant 0 : index
    %468 = vector.load %arg4[%c9_493, %c0_494, %c0_495] : memref<25x6x12xf32, #tpu.memory_space<vmem>>, vector<1x6x12xf32>
    %469 = vector.shape_cast %468 : vector<1x6x12xf32> to vector<6x12xf32>
    %cst_496 = arith.constant dense<0.000000e+00> : vector<24x12xf32>
    %470 = tpu.matmul %467, %469, %cst_496 {dimension_numbers = #tpu.dot_dimension_numbers<[1], [0], [0], [1], [0, 0, 1, 1], [], []>} : vector<24x6xf32>, vector<6x12xf32>, vector<24x12xf32> -> vector<24x12xf32>
    %471 = arith.addf %466, %470 : vector<24x12xf32>
    %c112_497 = arith.constant 112 : index
    %c0_498 = arith.constant 0 : index
    %472 = vector.load %arg13[%c112_497, %c0_498] : memref<196x6xf32, #tpu.memory_space<vmem>>, vector<24x6xf32>
    %c10_499 = arith.constant 10 : index
    %c0_500 = arith.constant 0 : index
    %c0_501 = arith.constant 0 : index
    %473 = vector.load %arg4[%c10_499, %c0_500, %c0_501] : memref<25x6x12xf32, #tpu.memory_space<vmem>>, vector<1x6x12xf32>
    %474 = vector.shape_cast %473 : vector<1x6x12xf32> to vector<6x12xf32>
    %cst_502 = arith.constant dense<0.000000e+00> : vector<24x12xf32>
    %475 = tpu.matmul %472, %474, %cst_502 {dimension_numbers = #tpu.dot_dimension_numbers<[1], [0], [0], [1], [0, 0, 1, 1], [], []>} : vector<24x6xf32>, vector<6x12xf32>, vector<24x12xf32> -> vector<24x12xf32>
    %476 = arith.addf %471, %475 : vector<24x12xf32>
    %c113_503 = arith.constant 113 : index
    %c0_504 = arith.constant 0 : index
    %477 = vector.load %arg13[%c113_503, %c0_504] : memref<196x6xf32, #tpu.memory_space<vmem>>, vector<24x6xf32>
    %c11_505 = arith.constant 11 : index
    %c0_506 = arith.constant 0 : index
    %c0_507 = arith.constant 0 : index
    %478 = vector.load %arg4[%c11_505, %c0_506, %c0_507] : memref<25x6x12xf32, #tpu.memory_space<vmem>>, vector<1x6x12xf32>
    %479 = vector.shape_cast %478 : vector<1x6x12xf32> to vector<6x12xf32>
    %cst_508 = arith.constant dense<0.000000e+00> : vector<24x12xf32>
    %480 = tpu.matmul %477, %479, %cst_508 {dimension_numbers = #tpu.dot_dimension_numbers<[1], [0], [0], [1], [0, 0, 1, 1], [], []>} : vector<24x6xf32>, vector<6x12xf32>, vector<24x12xf32> -> vector<24x12xf32>
    %481 = arith.addf %476, %480 : vector<24x12xf32>
    %c114_509 = arith.constant 114 : index
    %c0_510 = arith.constant 0 : index
    %482 = vector.load %arg13[%c114_509, %c0_510] : memref<196x6xf32, #tpu.memory_space<vmem>>, vector<24x6xf32>
    %c12_511 = arith.constant 12 : index
    %c0_512 = arith.constant 0 : index
    %c0_513 = arith.constant 0 : index
    %483 = vector.load %arg4[%c12_511, %c0_512, %c0_513] : memref<25x6x12xf32, #tpu.memory_space<vmem>>, vector<1x6x12xf32>
    %484 = vector.shape_cast %483 : vector<1x6x12xf32> to vector<6x12xf32>
    %cst_514 = arith.constant dense<0.000000e+00> : vector<24x12xf32>
    %485 = tpu.matmul %482, %484, %cst_514 {dimension_numbers = #tpu.dot_dimension_numbers<[1], [0], [0], [1], [0, 0, 1, 1], [], []>} : vector<24x6xf32>, vector<6x12xf32>, vector<24x12xf32> -> vector<24x12xf32>
    %486 = arith.addf %481, %485 : vector<24x12xf32>
    %c115_515 = arith.constant 115 : index
    %c0_516 = arith.constant 0 : index
    %487 = vector.load %arg13[%c115_515, %c0_516] : memref<196x6xf32, #tpu.memory_space<vmem>>, vector<24x6xf32>
    %c13_517 = arith.constant 13 : index
    %c0_518 = arith.constant 0 : index
    %c0_519 = arith.constant 0 : index
    %488 = vector.load %arg4[%c13_517, %c0_518, %c0_519] : memref<25x6x12xf32, #tpu.memory_space<vmem>>, vector<1x6x12xf32>
    %489 = vector.shape_cast %488 : vector<1x6x12xf32> to vector<6x12xf32>
    %cst_520 = arith.constant dense<0.000000e+00> : vector<24x12xf32>
    %490 = tpu.matmul %487, %489, %cst_520 {dimension_numbers = #tpu.dot_dimension_numbers<[1], [0], [0], [1], [0, 0, 1, 1], [], []>} : vector<24x6xf32>, vector<6x12xf32>, vector<24x12xf32> -> vector<24x12xf32>
    %491 = arith.addf %486, %490 : vector<24x12xf32>
    %c116_521 = arith.constant 116 : index
    %c0_522 = arith.constant 0 : index
    %492 = vector.load %arg13[%c116_521, %c0_522] : memref<196x6xf32, #tpu.memory_space<vmem>>, vector<24x6xf32>
    %c14_523 = arith.constant 14 : index
    %c0_524 = arith.constant 0 : index
    %c0_525 = arith.constant 0 : index
    %493 = vector.load %arg4[%c14_523, %c0_524, %c0_525] : memref<25x6x12xf32, #tpu.memory_space<vmem>>, vector<1x6x12xf32>
    %494 = vector.shape_cast %493 : vector<1x6x12xf32> to vector<6x12xf32>
    %cst_526 = arith.constant dense<0.000000e+00> : vector<24x12xf32>
    %495 = tpu.matmul %492, %494, %cst_526 {dimension_numbers = #tpu.dot_dimension_numbers<[1], [0], [0], [1], [0, 0, 1, 1], [], []>} : vector<24x6xf32>, vector<6x12xf32>, vector<24x12xf32> -> vector<24x12xf32>
    %496 = arith.addf %491, %495 : vector<24x12xf32>
    %c126 = arith.constant 126 : index
    %c0_527 = arith.constant 0 : index
    %497 = vector.load %arg13[%c126, %c0_527] : memref<196x6xf32, #tpu.memory_space<vmem>>, vector<24x6xf32>
    %c15_528 = arith.constant 15 : index
    %c0_529 = arith.constant 0 : index
    %c0_530 = arith.constant 0 : index
    %498 = vector.load %arg4[%c15_528, %c0_529, %c0_530] : memref<25x6x12xf32, #tpu.memory_space<vmem>>, vector<1x6x12xf32>
    %499 = vector.shape_cast %498 : vector<1x6x12xf32> to vector<6x12xf32>
    %cst_531 = arith.constant dense<0.000000e+00> : vector<24x12xf32>
    %500 = tpu.matmul %497, %499, %cst_531 {dimension_numbers = #tpu.dot_dimension_numbers<[1], [0], [0], [1], [0, 0, 1, 1], [], []>} : vector<24x6xf32>, vector<6x12xf32>, vector<24x12xf32> -> vector<24x12xf32>
    %501 = arith.addf %496, %500 : vector<24x12xf32>
    %c127 = arith.constant 127 : index
    %c0_532 = arith.constant 0 : index
    %502 = vector.load %arg13[%c127, %c0_532] : memref<196x6xf32, #tpu.memory_space<vmem>>, vector<24x6xf32>
    %c16_533 = arith.constant 16 : index
    %c0_534 = arith.constant 0 : index
    %c0_535 = arith.constant 0 : index
    %503 = vector.load %arg4[%c16_533, %c0_534, %c0_535] : memref<25x6x12xf32, #tpu.memory_space<vmem>>, vector<1x6x12xf32>
    %504 = vector.shape_cast %503 : vector<1x6x12xf32> to vector<6x12xf32>
    %cst_536 = arith.constant dense<0.000000e+00> : vector<24x12xf32>
    %505 = tpu.matmul %502, %504, %cst_536 {dimension_numbers = #tpu.dot_dimension_numbers<[1], [0], [0], [1], [0, 0, 1, 1], [], []>} : vector<24x6xf32>, vector<6x12xf32>, vector<24x12xf32> -> vector<24x12xf32>
    %506 = arith.addf %501, %505 : vector<24x12xf32>
    %c128 = arith.constant 128 : index
    %c0_537 = arith.constant 0 : index
    %507 = vector.load %arg13[%c128, %c0_537] : memref<196x6xf32, #tpu.memory_space<vmem>>, vector<24x6xf32>
    %c17_538 = arith.constant 17 : index
    %c0_539 = arith.constant 0 : index
    %c0_540 = arith.constant 0 : index
    %508 = vector.load %arg4[%c17_538, %c0_539, %c0_540] : memref<25x6x12xf32, #tpu.memory_space<vmem>>, vector<1x6x12xf32>
    %509 = vector.shape_cast %508 : vector<1x6x12xf32> to vector<6x12xf32>
    %cst_541 = arith.constant dense<0.000000e+00> : vector<24x12xf32>
    %510 = tpu.matmul %507, %509, %cst_541 {dimension_numbers = #tpu.dot_dimension_numbers<[1], [0], [0], [1], [0, 0, 1, 1], [], []>} : vector<24x6xf32>, vector<6x12xf32>, vector<24x12xf32> -> vector<24x12xf32>
    %511 = arith.addf %506, %510 : vector<24x12xf32>
    %c129 = arith.constant 129 : index
    %c0_542 = arith.constant 0 : index
    %512 = vector.load %arg13[%c129, %c0_542] : memref<196x6xf32, #tpu.memory_space<vmem>>, vector<24x6xf32>
    %c18_543 = arith.constant 18 : index
    %c0_544 = arith.constant 0 : index
    %c0_545 = arith.constant 0 : index
    %513 = vector.load %arg4[%c18_543, %c0_544, %c0_545] : memref<25x6x12xf32, #tpu.memory_space<vmem>>, vector<1x6x12xf32>
    %514 = vector.shape_cast %513 : vector<1x6x12xf32> to vector<6x12xf32>
    %cst_546 = arith.constant dense<0.000000e+00> : vector<24x12xf32>
    %515 = tpu.matmul %512, %514, %cst_546 {dimension_numbers = #tpu.dot_dimension_numbers<[1], [0], [0], [1], [0, 0, 1, 1], [], []>} : vector<24x6xf32>, vector<6x12xf32>, vector<24x12xf32> -> vector<24x12xf32>
    %516 = arith.addf %511, %515 : vector<24x12xf32>
    %c130 = arith.constant 130 : index
    %c0_547 = arith.constant 0 : index
    %517 = vector.load %arg13[%c130, %c0_547] : memref<196x6xf32, #tpu.memory_space<vmem>>, vector<24x6xf32>
    %c19_548 = arith.constant 19 : index
    %c0_549 = arith.constant 0 : index
    %c0_550 = arith.constant 0 : index
    %518 = vector.load %arg4[%c19_548, %c0_549, %c0_550] : memref<25x6x12xf32, #tpu.memory_space<vmem>>, vector<1x6x12xf32>
    %519 = vector.shape_cast %518 : vector<1x6x12xf32> to vector<6x12xf32>
    %cst_551 = arith.constant dense<0.000000e+00> : vector<24x12xf32>
    %520 = tpu.matmul %517, %519, %cst_551 {dimension_numbers = #tpu.dot_dimension_numbers<[1], [0], [0], [1], [0, 0, 1, 1], [], []>} : vector<24x6xf32>, vector<6x12xf32>, vector<24x12xf32> -> vector<24x12xf32>
    %521 = arith.addf %516, %520 : vector<24x12xf32>
    %c140 = arith.constant 140 : index
    %c0_552 = arith.constant 0 : index
    %522 = vector.load %arg13[%c140, %c0_552] : memref<196x6xf32, #tpu.memory_space<vmem>>, vector<24x6xf32>
    %c20_553 = arith.constant 20 : index
    %c0_554 = arith.constant 0 : index
    %c0_555 = arith.constant 0 : index
    %523 = vector.load %arg4[%c20_553, %c0_554, %c0_555] : memref<25x6x12xf32, #tpu.memory_space<vmem>>, vector<1x6x12xf32>
    %524 = vector.shape_cast %523 : vector<1x6x12xf32> to vector<6x12xf32>
    %cst_556 = arith.constant dense<0.000000e+00> : vector<24x12xf32>
    %525 = tpu.matmul %522, %524, %cst_556 {dimension_numbers = #tpu.dot_dimension_numbers<[1], [0], [0], [1], [0, 0, 1, 1], [], []>} : vector<24x6xf32>, vector<6x12xf32>, vector<24x12xf32> -> vector<24x12xf32>
    %526 = arith.addf %521, %525 : vector<24x12xf32>
    %c141 = arith.constant 141 : index
    %c0_557 = arith.constant 0 : index
    %527 = vector.load %arg13[%c141, %c0_557] : memref<196x6xf32, #tpu.memory_space<vmem>>, vector<24x6xf32>
    %c21_558 = arith.constant 21 : index
    %c0_559 = arith.constant 0 : index
    %c0_560 = arith.constant 0 : index
    %528 = vector.load %arg4[%c21_558, %c0_559, %c0_560] : memref<25x6x12xf32, #tpu.memory_space<vmem>>, vector<1x6x12xf32>
    %529 = vector.shape_cast %528 : vector<1x6x12xf32> to vector<6x12xf32>
    %cst_561 = arith.constant dense<0.000000e+00> : vector<24x12xf32>
    %530 = tpu.matmul %527, %529, %cst_561 {dimension_numbers = #tpu.dot_dimension_numbers<[1], [0], [0], [1], [0, 0, 1, 1], [], []>} : vector<24x6xf32>, vector<6x12xf32>, vector<24x12xf32> -> vector<24x12xf32>
    %531 = arith.addf %526, %530 : vector<24x12xf32>
    %c142 = arith.constant 142 : index
    %c0_562 = arith.constant 0 : index
    %532 = vector.load %arg13[%c142, %c0_562] : memref<196x6xf32, #tpu.memory_space<vmem>>, vector<24x6xf32>
    %c22_563 = arith.constant 22 : index
    %c0_564 = arith.constant 0 : index
    %c0_565 = arith.constant 0 : index
    %533 = vector.load %arg4[%c22_563, %c0_564, %c0_565] : memref<25x6x12xf32, #tpu.memory_space<vmem>>, vector<1x6x12xf32>
    %534 = vector.shape_cast %533 : vector<1x6x12xf32> to vector<6x12xf32>
    %cst_566 = arith.constant dense<0.000000e+00> : vector<24x12xf32>
    %535 = tpu.matmul %532, %534, %cst_566 {dimension_numbers = #tpu.dot_dimension_numbers<[1], [0], [0], [1], [0, 0, 1, 1], [], []>} : vector<24x6xf32>, vector<6x12xf32>, vector<24x12xf32> -> vector<24x12xf32>
    %536 = arith.addf %531, %535 : vector<24x12xf32>
    %c143 = arith.constant 143 : index
    %c0_567 = arith.constant 0 : index
    %537 = vector.load %arg13[%c143, %c0_567] : memref<196x6xf32, #tpu.memory_space<vmem>>, vector<24x6xf32>
    %c23_568 = arith.constant 23 : index
    %c0_569 = arith.constant 0 : index
    %c0_570 = arith.constant 0 : index
    %538 = vector.load %arg4[%c23_568, %c0_569, %c0_570] : memref<25x6x12xf32, #tpu.memory_space<vmem>>, vector<1x6x12xf32>
    %539 = vector.shape_cast %538 : vector<1x6x12xf32> to vector<6x12xf32>
    %cst_571 = arith.constant dense<0.000000e+00> : vector<24x12xf32>
    %540 = tpu.matmul %537, %539, %cst_571 {dimension_numbers = #tpu.dot_dimension_numbers<[1], [0], [0], [1], [0, 0, 1, 1], [], []>} : vector<24x6xf32>, vector<6x12xf32>, vector<24x12xf32> -> vector<24x12xf32>
    %541 = arith.addf %536, %540 : vector<24x12xf32>
    %c144 = arith.constant 144 : index
    %c0_572 = arith.constant 0 : index
    %542 = vector.load %arg13[%c144, %c0_572] : memref<196x6xf32, #tpu.memory_space<vmem>>, vector<24x6xf32>
    %c24_573 = arith.constant 24 : index
    %c0_574 = arith.constant 0 : index
    %c0_575 = arith.constant 0 : index
    %543 = vector.load %arg4[%c24_573, %c0_574, %c0_575] : memref<25x6x12xf32, #tpu.memory_space<vmem>>, vector<1x6x12xf32>
    %544 = vector.shape_cast %543 : vector<1x6x12xf32> to vector<6x12xf32>
    %cst_576 = arith.constant dense<0.000000e+00> : vector<24x12xf32>
    %545 = tpu.matmul %542, %544, %cst_576 {dimension_numbers = #tpu.dot_dimension_numbers<[1], [0], [0], [1], [0, 0, 1, 1], [], []>} : vector<24x6xf32>, vector<6x12xf32>, vector<24x12xf32> -> vector<24x12xf32>
    %546 = arith.addf %541, %545 : vector<24x12xf32>
    %547 = arith.addf %546, %5 : vector<24x12xf32>
    %cst_577 = arith.constant 0.000000e+00 : f32
    %548 = vector.broadcast %cst_577 : f32 to vector<24x12xf32>
    %549 = arith.maximumf %547, %548 : vector<24x12xf32>
    %c0_578 = arith.constant 0 : index
    %c0_579 = arith.constant 0 : index
    %550 = vector.load %arg16[%c0_578, %c0_579] : memref<24x12xf32, #tpu.memory_space<vmem>>, vector<24x12xf32>
    tpu.vector_store %arg16[%c0_578, %c0_579], %549 {strides = array<i32>} : memref<24x12xf32, #tpu.memory_space<vmem>>, vector<24x12xf32>,
    %c0_580 = arith.constant 0 : index
    %c0_581 = arith.constant 0 : index
    %551 = tpu.strided_load %arg16[%c0_580, %c0_581] {strides = array<i32: 2, 1>} : memref<24x12xf32, #tpu.memory_space<vmem>>, vector<5x12xf32>
    %c1_582 = arith.constant 1 : index
    %c0_583 = arith.constant 0 : index
    %552 = tpu.strided_load %arg16[%c1_582, %c0_583] {strides = array<i32: 2, 1>} : memref<24x12xf32, #tpu.memory_space<vmem>>, vector<5x12xf32>
    %553 = arith.maximumf %551, %552 : vector<5x12xf32>
    %c14_584 = arith.constant 14 : index
    %c0_585 = arith.constant 0 : index
    %554 = tpu.strided_load %arg16[%c14_584, %c0_585] {strides = array<i32: 2, 1>} : memref<24x12xf32, #tpu.memory_space<vmem>>, vector<5x12xf32>
    %c15_586 = arith.constant 15 : index
    %c0_587 = arith.constant 0 : index
    %555 = tpu.strided_load %arg16[%c15_586, %c0_587] {strides = array<i32: 2, 1>} : memref<24x12xf32, #tpu.memory_space<vmem>>, vector<5x12xf32>
    %556 = arith.maximumf %554, %555 : vector<5x12xf32>
    %557 = arith.maximumf %553, %556 : vector<5x12xf32>
    %c15_588 = arith.constant 15 : index
    %c0_589 = arith.constant 0 : index
    %558 = vector.load %arg14[%c15_588, %c0_589] : memref<25x12xf32, #tpu.memory_space<vmem>>, vector<5x12xf32>
    tpu.vector_store %arg14[%c15_588, %c0_589], %557 {strides = array<i32>} : memref<25x12xf32, #tpu.memory_space<vmem>>, vector<5x12xf32>,
    %cst_590 = arith.constant 0.000000e+00 : f32
    %559 = vector.broadcast %cst_590 : f32 to vector<24x12xf32>
    %c112_591 = arith.constant 112 : index
    %c0_592 = arith.constant 0 : index
    %560 = vector.load %arg13[%c112_591, %c0_592] : memref<196x6xf32, #tpu.memory_space<vmem>>, vector<24x6xf32>
    %c0_593 = arith.constant 0 : index
    %c0_594 = arith.constant 0 : index
    %c0_595 = arith.constant 0 : index
    %561 = vector.load %arg4[%c0_593, %c0_594, %c0_595] : memref<25x6x12xf32, #tpu.memory_space<vmem>>, vector<1x6x12xf32>
    %562 = vector.shape_cast %561 : vector<1x6x12xf32> to vector<6x12xf32>
    %cst_596 = arith.constant dense<0.000000e+00> : vector<24x12xf32>
    %563 = tpu.matmul %560, %562, %cst_596 {dimension_numbers = #tpu.dot_dimension_numbers<[1], [0], [0], [1], [0, 0, 1, 1], [], []>} : vector<24x6xf32>, vector<6x12xf32>, vector<24x12xf32> -> vector<24x12xf32>
    %564 = arith.addf %559, %563 : vector<24x12xf32>
    %c113_597 = arith.constant 113 : index
    %c0_598 = arith.constant 0 : index
    %565 = vector.load %arg13[%c113_597, %c0_598] : memref<196x6xf32, #tpu.memory_space<vmem>>, vector<24x6xf32>
    %c1_599 = arith.constant 1 : index
    %c0_600 = arith.constant 0 : index
    %c0_601 = arith.constant 0 : index
    %566 = vector.load %arg4[%c1_599, %c0_600, %c0_601] : memref<25x6x12xf32, #tpu.memory_space<vmem>>, vector<1x6x12xf32>
    %567 = vector.shape_cast %566 : vector<1x6x12xf32> to vector<6x12xf32>
    %cst_602 = arith.constant dense<0.000000e+00> : vector<24x12xf32>
    %568 = tpu.matmul %565, %567, %cst_602 {dimension_numbers = #tpu.dot_dimension_numbers<[1], [0], [0], [1], [0, 0, 1, 1], [], []>} : vector<24x6xf32>, vector<6x12xf32>, vector<24x12xf32> -> vector<24x12xf32>
    %569 = arith.addf %564, %568 : vector<24x12xf32>
    %c114_603 = arith.constant 114 : index
    %c0_604 = arith.constant 0 : index
    %570 = vector.load %arg13[%c114_603, %c0_604] : memref<196x6xf32, #tpu.memory_space<vmem>>, vector<24x6xf32>
    %c2_605 = arith.constant 2 : index
    %c0_606 = arith.constant 0 : index
    %c0_607 = arith.constant 0 : index
    %571 = vector.load %arg4[%c2_605, %c0_606, %c0_607] : memref<25x6x12xf32, #tpu.memory_space<vmem>>, vector<1x6x12xf32>
    %572 = vector.shape_cast %571 : vector<1x6x12xf32> to vector<6x12xf32>
    %cst_608 = arith.constant dense<0.000000e+00> : vector<24x12xf32>
    %573 = tpu.matmul %570, %572, %cst_608 {dimension_numbers = #tpu.dot_dimension_numbers<[1], [0], [0], [1], [0, 0, 1, 1], [], []>} : vector<24x6xf32>, vector<6x12xf32>, vector<24x12xf32> -> vector<24x12xf32>
    %574 = arith.addf %569, %573 : vector<24x12xf32>
    %c115_609 = arith.constant 115 : index
    %c0_610 = arith.constant 0 : index
    %575 = vector.load %arg13[%c115_609, %c0_610] : memref<196x6xf32, #tpu.memory_space<vmem>>, vector<24x6xf32>
    %c3_611 = arith.constant 3 : index
    %c0_612 = arith.constant 0 : index
    %c0_613 = arith.constant 0 : index
    %576 = vector.load %arg4[%c3_611, %c0_612, %c0_613] : memref<25x6x12xf32, #tpu.memory_space<vmem>>, vector<1x6x12xf32>
    %577 = vector.shape_cast %576 : vector<1x6x12xf32> to vector<6x12xf32>
    %cst_614 = arith.constant dense<0.000000e+00> : vector<24x12xf32>
    %578 = tpu.matmul %575, %577, %cst_614 {dimension_numbers = #tpu.dot_dimension_numbers<[1], [0], [0], [1], [0, 0, 1, 1], [], []>} : vector<24x6xf32>, vector<6x12xf32>, vector<24x12xf32> -> vector<24x12xf32>
    %579 = arith.addf %574, %578 : vector<24x12xf32>
    %c116_615 = arith.constant 116 : index
    %c0_616 = arith.constant 0 : index
    %580 = vector.load %arg13[%c116_615, %c0_616] : memref<196x6xf32, #tpu.memory_space<vmem>>, vector<24x6xf32>
    %c4_617 = arith.constant 4 : index
    %c0_618 = arith.constant 0 : index
    %c0_619 = arith.constant 0 : index
    %581 = vector.load %arg4[%c4_617, %c0_618, %c0_619] : memref<25x6x12xf32, #tpu.memory_space<vmem>>, vector<1x6x12xf32>
    %582 = vector.shape_cast %581 : vector<1x6x12xf32> to vector<6x12xf32>
    %cst_620 = arith.constant dense<0.000000e+00> : vector<24x12xf32>
    %583 = tpu.matmul %580, %582, %cst_620 {dimension_numbers = #tpu.dot_dimension_numbers<[1], [0], [0], [1], [0, 0, 1, 1], [], []>} : vector<24x6xf32>, vector<6x12xf32>, vector<24x12xf32> -> vector<24x12xf32>
    %584 = arith.addf %579, %583 : vector<24x12xf32>
    %c126_621 = arith.constant 126 : index
    %c0_622 = arith.constant 0 : index
    %585 = vector.load %arg13[%c126_621, %c0_622] : memref<196x6xf32, #tpu.memory_space<vmem>>, vector<24x6xf32>
    %c5_623 = arith.constant 5 : index
    %c0_624 = arith.constant 0 : index
    %c0_625 = arith.constant 0 : index
    %586 = vector.load %arg4[%c5_623, %c0_624, %c0_625] : memref<25x6x12xf32, #tpu.memory_space<vmem>>, vector<1x6x12xf32>
    %587 = vector.shape_cast %586 : vector<1x6x12xf32> to vector<6x12xf32>
    %cst_626 = arith.constant dense<0.000000e+00> : vector<24x12xf32>
    %588 = tpu.matmul %585, %587, %cst_626 {dimension_numbers = #tpu.dot_dimension_numbers<[1], [0], [0], [1], [0, 0, 1, 1], [], []>} : vector<24x6xf32>, vector<6x12xf32>, vector<24x12xf32> -> vector<24x12xf32>
    %589 = arith.addf %584, %588 : vector<24x12xf32>
    %c127_627 = arith.constant 127 : index
    %c0_628 = arith.constant 0 : index
    %590 = vector.load %arg13[%c127_627, %c0_628] : memref<196x6xf32, #tpu.memory_space<vmem>>, vector<24x6xf32>
    %c6_629 = arith.constant 6 : index
    %c0_630 = arith.constant 0 : index
    %c0_631 = arith.constant 0 : index
    %591 = vector.load %arg4[%c6_629, %c0_630, %c0_631] : memref<25x6x12xf32, #tpu.memory_space<vmem>>, vector<1x6x12xf32>
    %592 = vector.shape_cast %591 : vector<1x6x12xf32> to vector<6x12xf32>
    %cst_632 = arith.constant dense<0.000000e+00> : vector<24x12xf32>
    %593 = tpu.matmul %590, %592, %cst_632 {dimension_numbers = #tpu.dot_dimension_numbers<[1], [0], [0], [1], [0, 0, 1, 1], [], []>} : vector<24x6xf32>, vector<6x12xf32>, vector<24x12xf32> -> vector<24x12xf32>
    %594 = arith.addf %589, %593 : vector<24x12xf32>
    %c128_633 = arith.constant 128 : index
    %c0_634 = arith.constant 0 : index
    %595 = vector.load %arg13[%c128_633, %c0_634] : memref<196x6xf32, #tpu.memory_space<vmem>>, vector<24x6xf32>
    %c7_635 = arith.constant 7 : index
    %c0_636 = arith.constant 0 : index
    %c0_637 = arith.constant 0 : index
    %596 = vector.load %arg4[%c7_635, %c0_636, %c0_637] : memref<25x6x12xf32, #tpu.memory_space<vmem>>, vector<1x6x12xf32>
    %597 = vector.shape_cast %596 : vector<1x6x12xf32> to vector<6x12xf32>
    %cst_638 = arith.constant dense<0.000000e+00> : vector<24x12xf32>
    %598 = tpu.matmul %595, %597, %cst_638 {dimension_numbers = #tpu.dot_dimension_numbers<[1], [0], [0], [1], [0, 0, 1, 1], [], []>} : vector<24x6xf32>, vector<6x12xf32>, vector<24x12xf32> -> vector<24x12xf32>
    %599 = arith.addf %594, %598 : vector<24x12xf32>
    %c129_639 = arith.constant 129 : index
    %c0_640 = arith.constant 0 : index
    %600 = vector.load %arg13[%c129_639, %c0_640] : memref<196x6xf32, #tpu.memory_space<vmem>>, vector<24x6xf32>
    %c8_641 = arith.constant 8 : index
    %c0_642 = arith.constant 0 : index
    %c0_643 = arith.constant 0 : index
    %601 = vector.load %arg4[%c8_641, %c0_642, %c0_643] : memref<25x6x12xf32, #tpu.memory_space<vmem>>, vector<1x6x12xf32>
    %602 = vector.shape_cast %601 : vector<1x6x12xf32> to vector<6x12xf32>
    %cst_644 = arith.constant dense<0.000000e+00> : vector<24x12xf32>
    %603 = tpu.matmul %600, %602, %cst_644 {dimension_numbers = #tpu.dot_dimension_numbers<[1], [0], [0], [1], [0, 0, 1, 1], [], []>} : vector<24x6xf32>, vector<6x12xf32>, vector<24x12xf32> -> vector<24x12xf32>
    %604 = arith.addf %599, %603 : vector<24x12xf32>
    %c130_645 = arith.constant 130 : index
    %c0_646 = arith.constant 0 : index
    %605 = vector.load %arg13[%c130_645, %c0_646] : memref<196x6xf32, #tpu.memory_space<vmem>>, vector<24x6xf32>
    %c9_647 = arith.constant 9 : index
    %c0_648 = arith.constant 0 : index
    %c0_649 = arith.constant 0 : index
    %606 = vector.load %arg4[%c9_647, %c0_648, %c0_649] : memref<25x6x12xf32, #tpu.memory_space<vmem>>, vector<1x6x12xf32>
    %607 = vector.shape_cast %606 : vector<1x6x12xf32> to vector<6x12xf32>
    %cst_650 = arith.constant dense<0.000000e+00> : vector<24x12xf32>
    %608 = tpu.matmul %605, %607, %cst_650 {dimension_numbers = #tpu.dot_dimension_numbers<[1], [0], [0], [1], [0, 0, 1, 1], [], []>} : vector<24x6xf32>, vector<6x12xf32>, vector<24x12xf32> -> vector<24x12xf32>
    %609 = arith.addf %604, %608 : vector<24x12xf32>
    %c140_651 = arith.constant 140 : index
    %c0_652 = arith.constant 0 : index
    %610 = vector.load %arg13[%c140_651, %c0_652] : memref<196x6xf32, #tpu.memory_space<vmem>>, vector<24x6xf32>
    %c10_653 = arith.constant 10 : index
    %c0_654 = arith.constant 0 : index
    %c0_655 = arith.constant 0 : index
    %611 = vector.load %arg4[%c10_653, %c0_654, %c0_655] : memref<25x6x12xf32, #tpu.memory_space<vmem>>, vector<1x6x12xf32>
    %612 = vector.shape_cast %611 : vector<1x6x12xf32> to vector<6x12xf32>
    %cst_656 = arith.constant dense<0.000000e+00> : vector<24x12xf32>
    %613 = tpu.matmul %610, %612, %cst_656 {dimension_numbers = #tpu.dot_dimension_numbers<[1], [0], [0], [1], [0, 0, 1, 1], [], []>} : vector<24x6xf32>, vector<6x12xf32>, vector<24x12xf32> -> vector<24x12xf32>
    %614 = arith.addf %609, %613 : vector<24x12xf32>
    %c141_657 = arith.constant 141 : index
    %c0_658 = arith.constant 0 : index
    %615 = vector.load %arg13[%c141_657, %c0_658] : memref<196x6xf32, #tpu.memory_space<vmem>>, vector<24x6xf32>
    %c11_659 = arith.constant 11 : index
    %c0_660 = arith.constant 0 : index
    %c0_661 = arith.constant 0 : index
    %616 = vector.load %arg4[%c11_659, %c0_660, %c0_661] : memref<25x6x12xf32, #tpu.memory_space<vmem>>, vector<1x6x12xf32>
    %617 = vector.shape_cast %616 : vector<1x6x12xf32> to vector<6x12xf32>
    %cst_662 = arith.constant dense<0.000000e+00> : vector<24x12xf32>
    %618 = tpu.matmul %615, %617, %cst_662 {dimension_numbers = #tpu.dot_dimension_numbers<[1], [0], [0], [1], [0, 0, 1, 1], [], []>} : vector<24x6xf32>, vector<6x12xf32>, vector<24x12xf32> -> vector<24x12xf32>
    %619 = arith.addf %614, %618 : vector<24x12xf32>
    %c142_663 = arith.constant 142 : index
    %c0_664 = arith.constant 0 : index
    %620 = vector.load %arg13[%c142_663, %c0_664] : memref<196x6xf32, #tpu.memory_space<vmem>>, vector<24x6xf32>
    %c12_665 = arith.constant 12 : index
    %c0_666 = arith.constant 0 : index
    %c0_667 = arith.constant 0 : index
    %621 = vector.load %arg4[%c12_665, %c0_666, %c0_667] : memref<25x6x12xf32, #tpu.memory_space<vmem>>, vector<1x6x12xf32>
    %622 = vector.shape_cast %621 : vector<1x6x12xf32> to vector<6x12xf32>
    %cst_668 = arith.constant dense<0.000000e+00> : vector<24x12xf32>
    %623 = tpu.matmul %620, %622, %cst_668 {dimension_numbers = #tpu.dot_dimension_numbers<[1], [0], [0], [1], [0, 0, 1, 1], [], []>} : vector<24x6xf32>, vector<6x12xf32>, vector<24x12xf32> -> vector<24x12xf32>
    %624 = arith.addf %619, %623 : vector<24x12xf32>
    %c143_669 = arith.constant 143 : index
    %c0_670 = arith.constant 0 : index
    %625 = vector.load %arg13[%c143_669, %c0_670] : memref<196x6xf32, #tpu.memory_space<vmem>>, vector<24x6xf32>
    %c13_671 = arith.constant 13 : index
    %c0_672 = arith.constant 0 : index
    %c0_673 = arith.constant 0 : index
    %626 = vector.load %arg4[%c13_671, %c0_672, %c0_673] : memref<25x6x12xf32, #tpu.memory_space<vmem>>, vector<1x6x12xf32>
    %627 = vector.shape_cast %626 : vector<1x6x12xf32> to vector<6x12xf32>
    %cst_674 = arith.constant dense<0.000000e+00> : vector<24x12xf32>
    %628 = tpu.matmul %625, %627, %cst_674 {dimension_numbers = #tpu.dot_dimension_numbers<[1], [0], [0], [1], [0, 0, 1, 1], [], []>} : vector<24x6xf32>, vector<6x12xf32>, vector<24x12xf32> -> vector<24x12xf32>
    %629 = arith.addf %624, %628 : vector<24x12xf32>
    %c144_675 = arith.constant 144 : index
    %c0_676 = arith.constant 0 : index
    %630 = vector.load %arg13[%c144_675, %c0_676] : memref<196x6xf32, #tpu.memory_space<vmem>>, vector<24x6xf32>
    %c14_677 = arith.constant 14 : index
    %c0_678 = arith.constant 0 : index
    %c0_679 = arith.constant 0 : index
    %631 = vector.load %arg4[%c14_677, %c0_678, %c0_679] : memref<25x6x12xf32, #tpu.memory_space<vmem>>, vector<1x6x12xf32>
    %632 = vector.shape_cast %631 : vector<1x6x12xf32> to vector<6x12xf32>
    %cst_680 = arith.constant dense<0.000000e+00> : vector<24x12xf32>
    %633 = tpu.matmul %630, %632, %cst_680 {dimension_numbers = #tpu.dot_dimension_numbers<[1], [0], [0], [1], [0, 0, 1, 1], [], []>} : vector<24x6xf32>, vector<6x12xf32>, vector<24x12xf32> -> vector<24x12xf32>
    %634 = arith.addf %629, %633 : vector<24x12xf32>
    %c154 = arith.constant 154 : index
    %c0_681 = arith.constant 0 : index
    %635 = vector.load %arg13[%c154, %c0_681] : memref<196x6xf32, #tpu.memory_space<vmem>>, vector<24x6xf32>
    %c15_682 = arith.constant 15 : index
    %c0_683 = arith.constant 0 : index
    %c0_684 = arith.constant 0 : index
    %636 = vector.load %arg4[%c15_682, %c0_683, %c0_684] : memref<25x6x12xf32, #tpu.memory_space<vmem>>, vector<1x6x12xf32>
    %637 = vector.shape_cast %636 : vector<1x6x12xf32> to vector<6x12xf32>
    %cst_685 = arith.constant dense<0.000000e+00> : vector<24x12xf32>
    %638 = tpu.matmul %635, %637, %cst_685 {dimension_numbers = #tpu.dot_dimension_numbers<[1], [0], [0], [1], [0, 0, 1, 1], [], []>} : vector<24x6xf32>, vector<6x12xf32>, vector<24x12xf32> -> vector<24x12xf32>
    %639 = arith.addf %634, %638 : vector<24x12xf32>
    %c155 = arith.constant 155 : index
    %c0_686 = arith.constant 0 : index
    %640 = vector.load %arg13[%c155, %c0_686] : memref<196x6xf32, #tpu.memory_space<vmem>>, vector<24x6xf32>
    %c16_687 = arith.constant 16 : index
    %c0_688 = arith.constant 0 : index
    %c0_689 = arith.constant 0 : index
    %641 = vector.load %arg4[%c16_687, %c0_688, %c0_689] : memref<25x6x12xf32, #tpu.memory_space<vmem>>, vector<1x6x12xf32>
    %642 = vector.shape_cast %641 : vector<1x6x12xf32> to vector<6x12xf32>
    %cst_690 = arith.constant dense<0.000000e+00> : vector<24x12xf32>
    %643 = tpu.matmul %640, %642, %cst_690 {dimension_numbers = #tpu.dot_dimension_numbers<[1], [0], [0], [1], [0, 0, 1, 1], [], []>} : vector<24x6xf32>, vector<6x12xf32>, vector<24x12xf32> -> vector<24x12xf32>
    %644 = arith.addf %639, %643 : vector<24x12xf32>
    %c156 = arith.constant 156 : index
    %c0_691 = arith.constant 0 : index
    %645 = vector.load %arg13[%c156, %c0_691] : memref<196x6xf32, #tpu.memory_space<vmem>>, vector<24x6xf32>
    %c17_692 = arith.constant 17 : index
    %c0_693 = arith.constant 0 : index
    %c0_694 = arith.constant 0 : index
    %646 = vector.load %arg4[%c17_692, %c0_693, %c0_694] : memref<25x6x12xf32, #tpu.memory_space<vmem>>, vector<1x6x12xf32>
    %647 = vector.shape_cast %646 : vector<1x6x12xf32> to vector<6x12xf32>
    %cst_695 = arith.constant dense<0.000000e+00> : vector<24x12xf32>
    %648 = tpu.matmul %645, %647, %cst_695 {dimension_numbers = #tpu.dot_dimension_numbers<[1], [0], [0], [1], [0, 0, 1, 1], [], []>} : vector<24x6xf32>, vector<6x12xf32>, vector<24x12xf32> -> vector<24x12xf32>
    %649 = arith.addf %644, %648 : vector<24x12xf32>
    %c157 = arith.constant 157 : index
    %c0_696 = arith.constant 0 : index
    %650 = vector.load %arg13[%c157, %c0_696] : memref<196x6xf32, #tpu.memory_space<vmem>>, vector<24x6xf32>
    %c18_697 = arith.constant 18 : index
    %c0_698 = arith.constant 0 : index
    %c0_699 = arith.constant 0 : index
    %651 = vector.load %arg4[%c18_697, %c0_698, %c0_699] : memref<25x6x12xf32, #tpu.memory_space<vmem>>, vector<1x6x12xf32>
    %652 = vector.shape_cast %651 : vector<1x6x12xf32> to vector<6x12xf32>
    %cst_700 = arith.constant dense<0.000000e+00> : vector<24x12xf32>
    %653 = tpu.matmul %650, %652, %cst_700 {dimension_numbers = #tpu.dot_dimension_numbers<[1], [0], [0], [1], [0, 0, 1, 1], [], []>} : vector<24x6xf32>, vector<6x12xf32>, vector<24x12xf32> -> vector<24x12xf32>
    %654 = arith.addf %649, %653 : vector<24x12xf32>
    %c158 = arith.constant 158 : index
    %c0_701 = arith.constant 0 : index
    %655 = vector.load %arg13[%c158, %c0_701] : memref<196x6xf32, #tpu.memory_space<vmem>>, vector<24x6xf32>
    %c19_702 = arith.constant 19 : index
    %c0_703 = arith.constant 0 : index
    %c0_704 = arith.constant 0 : index
    %656 = vector.load %arg4[%c19_702, %c0_703, %c0_704] : memref<25x6x12xf32, #tpu.memory_space<vmem>>, vector<1x6x12xf32>
    %657 = vector.shape_cast %656 : vector<1x6x12xf32> to vector<6x12xf32>
    %cst_705 = arith.constant dense<0.000000e+00> : vector<24x12xf32>
    %658 = tpu.matmul %655, %657, %cst_705 {dimension_numbers = #tpu.dot_dimension_numbers<[1], [0], [0], [1], [0, 0, 1, 1], [], []>} : vector<24x6xf32>, vector<6x12xf32>, vector<24x12xf32> -> vector<24x12xf32>
    %659 = arith.addf %654, %658 : vector<24x12xf32>
    %c168 = arith.constant 168 : index
    %c0_706 = arith.constant 0 : index
    %660 = vector.load %arg13[%c168, %c0_706] : memref<196x6xf32, #tpu.memory_space<vmem>>, vector<24x6xf32>
    %c20_707 = arith.constant 20 : index
    %c0_708 = arith.constant 0 : index
    %c0_709 = arith.constant 0 : index
    %661 = vector.load %arg4[%c20_707, %c0_708, %c0_709] : memref<25x6x12xf32, #tpu.memory_space<vmem>>, vector<1x6x12xf32>
    %662 = vector.shape_cast %661 : vector<1x6x12xf32> to vector<6x12xf32>
    %cst_710 = arith.constant dense<0.000000e+00> : vector<24x12xf32>
    %663 = tpu.matmul %660, %662, %cst_710 {dimension_numbers = #tpu.dot_dimension_numbers<[1], [0], [0], [1], [0, 0, 1, 1], [], []>} : vector<24x6xf32>, vector<6x12xf32>, vector<24x12xf32> -> vector<24x12xf32>
    %664 = arith.addf %659, %663 : vector<24x12xf32>
    %c169 = arith.constant 169 : index
    %c0_711 = arith.constant 0 : index
    %665 = vector.load %arg13[%c169, %c0_711] : memref<196x6xf32, #tpu.memory_space<vmem>>, vector<24x6xf32>
    %c21_712 = arith.constant 21 : index
    %c0_713 = arith.constant 0 : index
    %c0_714 = arith.constant 0 : index
    %666 = vector.load %arg4[%c21_712, %c0_713, %c0_714] : memref<25x6x12xf32, #tpu.memory_space<vmem>>, vector<1x6x12xf32>
    %667 = vector.shape_cast %666 : vector<1x6x12xf32> to vector<6x12xf32>
    %cst_715 = arith.constant dense<0.000000e+00> : vector<24x12xf32>
    %668 = tpu.matmul %665, %667, %cst_715 {dimension_numbers = #tpu.dot_dimension_numbers<[1], [0], [0], [1], [0, 0, 1, 1], [], []>} : vector<24x6xf32>, vector<6x12xf32>, vector<24x12xf32> -> vector<24x12xf32>
    %669 = arith.addf %664, %668 : vector<24x12xf32>
    %c170 = arith.constant 170 : index
    %c0_716 = arith.constant 0 : index
    %670 = vector.load %arg13[%c170, %c0_716] : memref<196x6xf32, #tpu.memory_space<vmem>>, vector<24x6xf32>
    %c22_717 = arith.constant 22 : index
    %c0_718 = arith.constant 0 : index
    %c0_719 = arith.constant 0 : index
    %671 = vector.load %arg4[%c22_717, %c0_718, %c0_719] : memref<25x6x12xf32, #tpu.memory_space<vmem>>, vector<1x6x12xf32>
    %672 = vector.shape_cast %671 : vector<1x6x12xf32> to vector<6x12xf32>
    %cst_720 = arith.constant dense<0.000000e+00> : vector<24x12xf32>
    %673 = tpu.matmul %670, %672, %cst_720 {dimension_numbers = #tpu.dot_dimension_numbers<[1], [0], [0], [1], [0, 0, 1, 1], [], []>} : vector<24x6xf32>, vector<6x12xf32>, vector<24x12xf32> -> vector<24x12xf32>
    %674 = arith.addf %669, %673 : vector<24x12xf32>
    %c171 = arith.constant 171 : index
    %c0_721 = arith.constant 0 : index
    %675 = vector.load %arg13[%c171, %c0_721] : memref<196x6xf32, #tpu.memory_space<vmem>>, vector<24x6xf32>
    %c23_722 = arith.constant 23 : index
    %c0_723 = arith.constant 0 : index
    %c0_724 = arith.constant 0 : index
    %676 = vector.load %arg4[%c23_722, %c0_723, %c0_724] : memref<25x6x12xf32, #tpu.memory_space<vmem>>, vector<1x6x12xf32>
    %677 = vector.shape_cast %676 : vector<1x6x12xf32> to vector<6x12xf32>
    %cst_725 = arith.constant dense<0.000000e+00> : vector<24x12xf32>
    %678 = tpu.matmul %675, %677, %cst_725 {dimension_numbers = #tpu.dot_dimension_numbers<[1], [0], [0], [1], [0, 0, 1, 1], [], []>} : vector<24x6xf32>, vector<6x12xf32>, vector<24x12xf32> -> vector<24x12xf32>
    %679 = arith.addf %674, %678 : vector<24x12xf32>
    %c172 = arith.constant 172 : index
    %c0_726 = arith.constant 0 : index
    %680 = vector.load %arg13[%c172, %c0_726] : memref<196x6xf32, #tpu.memory_space<vmem>>, vector<24x6xf32>
    %c24_727 = arith.constant 24 : index
    %c0_728 = arith.constant 0 : index
    %c0_729 = arith.constant 0 : index
    %681 = vector.load %arg4[%c24_727, %c0_728, %c0_729] : memref<25x6x12xf32, #tpu.memory_space<vmem>>, vector<1x6x12xf32>
    %682 = vector.shape_cast %681 : vector<1x6x12xf32> to vector<6x12xf32>
    %cst_730 = arith.constant dense<0.000000e+00> : vector<24x12xf32>
    %683 = tpu.matmul %680, %682, %cst_730 {dimension_numbers = #tpu.dot_dimension_numbers<[1], [0], [0], [1], [0, 0, 1, 1], [], []>} : vector<24x6xf32>, vector<6x12xf32>, vector<24x12xf32> -> vector<24x12xf32>
    %684 = arith.addf %679, %683 : vector<24x12xf32>
    %685 = arith.addf %684, %5 : vector<24x12xf32>
    %cst_731 = arith.constant 0.000000e+00 : f32
    %686 = vector.broadcast %cst_731 : f32 to vector<24x12xf32>
    %687 = arith.maximumf %685, %686 : vector<24x12xf32>
    %c0_732 = arith.constant 0 : index
    %c0_733 = arith.constant 0 : index
    %688 = vector.load %arg16[%c0_732, %c0_733] : memref<24x12xf32, #tpu.memory_space<vmem>>, vector<24x12xf32>
    tpu.vector_store %arg16[%c0_732, %c0_733], %687 {strides = array<i32>} : memref<24x12xf32, #tpu.memory_space<vmem>>, vector<24x12xf32>,
    %c0_734 = arith.constant 0 : index
    %c0_735 = arith.constant 0 : index
    %689 = tpu.strided_load %arg16[%c0_734, %c0_735] {strides = array<i32: 2, 1>} : memref<24x12xf32, #tpu.memory_space<vmem>>, vector<5x12xf32>
    %c1_736 = arith.constant 1 : index
    %c0_737 = arith.constant 0 : index
    %690 = tpu.strided_load %arg16[%c1_736, %c0_737] {strides = array<i32: 2, 1>} : memref<24x12xf32, #tpu.memory_space<vmem>>, vector<5x12xf32>
    %691 = arith.maximumf %689, %690 : vector<5x12xf32>
    %c14_738 = arith.constant 14 : index
    %c0_739 = arith.constant 0 : index
    %692 = tpu.strided_load %arg16[%c14_738, %c0_739] {strides = array<i32: 2, 1>} : memref<24x12xf32, #tpu.memory_space<vmem>>, vector<5x12xf32>
    %c15_740 = arith.constant 15 : index
    %c0_741 = arith.constant 0 : index
    %693 = tpu.strided_load %arg16[%c15_740, %c0_741] {strides = array<i32: 2, 1>} : memref<24x12xf32, #tpu.memory_space<vmem>>, vector<5x12xf32>
    %694 = arith.maximumf %692, %693 : vector<5x12xf32>
    %695 = arith.maximumf %691, %694 : vector<5x12xf32>
    %c20_742 = arith.constant 20 : index
    %c0_743 = arith.constant 0 : index
    %696 = vector.load %arg14[%c20_742, %c0_743] : memref<25x12xf32, #tpu.memory_space<vmem>>, vector<5x12xf32>
    tpu.vector_store %arg14[%c20_742, %c0_743], %695 {strides = array<i32>} : memref<25x12xf32, #tpu.memory_space<vmem>>, vector<5x12xf32>,
    %cst_744 = arith.constant 0.000000e+00 : f32
    %697 = vector.broadcast %cst_744 : f32 to vector<1x120xf32>
    %c0_745 = arith.constant 0 : index
    %c0_746 = arith.constant 0 : index
    %698 = tpu.strided_load %arg14[%c0_745, %c0_746] {strides = array<i32: 25, 1>} : memref<25x12xf32, #tpu.memory_space<vmem>>, vector<1x12xf32>
    %c0_747 = arith.constant 0 : index
    %c0_748 = arith.constant 0 : index
    %c0_749 = arith.constant 0 : index
    %699 = vector.load %arg6[%c0_747, %c0_748, %c0_749] : memref<25x12x120xf32, #tpu.memory_space<vmem>>, vector<1x12x120xf32>
    %700 = vector.shape_cast %699 : vector<1x12x120xf32> to vector<12x120xf32>
    %cst_750 = arith.constant dense<0.000000e+00> : vector<1x120xf32>
    %701 = tpu.matmul %698, %700, %cst_750 {dimension_numbers = #tpu.dot_dimension_numbers<[1], [0], [0], [1], [0, 0, 1, 1], [], []>} : vector<1x12xf32>, vector<12x120xf32>, vector<1x120xf32> -> vector<1x120xf32>
    %702 = arith.addf %697, %701 : vector<1x120xf32>
    %c1_751 = arith.constant 1 : index
    %c0_752 = arith.constant 0 : index
    %703 = tpu.strided_load %arg14[%c1_751, %c0_752] {strides = array<i32: 25, 1>} : memref<25x12xf32, #tpu.memory_space<vmem>>, vector<1x12xf32>
    %c1_753 = arith.constant 1 : index
    %c0_754 = arith.constant 0 : index
    %c0_755 = arith.constant 0 : index
    %704 = vector.load %arg6[%c1_753, %c0_754, %c0_755] : memref<25x12x120xf32, #tpu.memory_space<vmem>>, vector<1x12x120xf32>
    %705 = vector.shape_cast %704 : vector<1x12x120xf32> to vector<12x120xf32>
    %cst_756 = arith.constant dense<0.000000e+00> : vector<1x120xf32>
    %706 = tpu.matmul %703, %705, %cst_756 {dimension_numbers = #tpu.dot_dimension_numbers<[1], [0], [0], [1], [0, 0, 1, 1], [], []>} : vector<1x12xf32>, vector<12x120xf32>, vector<1x120xf32> -> vector<1x120xf32>
    %707 = arith.addf %702, %706 : vector<1x120xf32>
    %c2_757 = arith.constant 2 : index
    %c0_758 = arith.constant 0 : index
    %708 = tpu.strided_load %arg14[%c2_757, %c0_758] {strides = array<i32: 25, 1>} : memref<25x12xf32, #tpu.memory_space<vmem>>, vector<1x12xf32>
    %c2_759 = arith.constant 2 : index
    %c0_760 = arith.constant 0 : index
    %c0_761 = arith.constant 0 : index
    %709 = vector.load %arg6[%c2_759, %c0_760, %c0_761] : memref<25x12x120xf32, #tpu.memory_space<vmem>>, vector<1x12x120xf32>
    %710 = vector.shape_cast %709 : vector<1x12x120xf32> to vector<12x120xf32>
    %cst_762 = arith.constant dense<0.000000e+00> : vector<1x120xf32>
    %711 = tpu.matmul %708, %710, %cst_762 {dimension_numbers = #tpu.dot_dimension_numbers<[1], [0], [0], [1], [0, 0, 1, 1], [], []>} : vector<1x12xf32>, vector<12x120xf32>, vector<1x120xf32> -> vector<1x120xf32>
    %712 = arith.addf %707, %711 : vector<1x120xf32>
    %c3_763 = arith.constant 3 : index
    %c0_764 = arith.constant 0 : index
    %713 = tpu.strided_load %arg14[%c3_763, %c0_764] {strides = array<i32: 25, 1>} : memref<25x12xf32, #tpu.memory_space<vmem>>, vector<1x12xf32>
    %c3_765 = arith.constant 3 : index
    %c0_766 = arith.constant 0 : index
    %c0_767 = arith.constant 0 : index
    %714 = vector.load %arg6[%c3_765, %c0_766, %c0_767] : memref<25x12x120xf32, #tpu.memory_space<vmem>>, vector<1x12x120xf32>
    %715 = vector.shape_cast %714 : vector<1x12x120xf32> to vector<12x120xf32>
    %cst_768 = arith.constant dense<0.000000e+00> : vector<1x120xf32>
    %716 = tpu.matmul %713, %715, %cst_768 {dimension_numbers = #tpu.dot_dimension_numbers<[1], [0], [0], [1], [0, 0, 1, 1], [], []>} : vector<1x12xf32>, vector<12x120xf32>, vector<1x120xf32> -> vector<1x120xf32>
    %717 = arith.addf %712, %716 : vector<1x120xf32>
    %c4_769 = arith.constant 4 : index
    %c0_770 = arith.constant 0 : index
    %718 = tpu.strided_load %arg14[%c4_769, %c0_770] {strides = array<i32: 25, 1>} : memref<25x12xf32, #tpu.memory_space<vmem>>, vector<1x12xf32>
    %c4_771 = arith.constant 4 : index
    %c0_772 = arith.constant 0 : index
    %c0_773 = arith.constant 0 : index
    %719 = vector.load %arg6[%c4_771, %c0_772, %c0_773] : memref<25x12x120xf32, #tpu.memory_space<vmem>>, vector<1x12x120xf32>
    %720 = vector.shape_cast %719 : vector<1x12x120xf32> to vector<12x120xf32>
    %cst_774 = arith.constant dense<0.000000e+00> : vector<1x120xf32>
    %721 = tpu.matmul %718, %720, %cst_774 {dimension_numbers = #tpu.dot_dimension_numbers<[1], [0], [0], [1], [0, 0, 1, 1], [], []>} : vector<1x12xf32>, vector<12x120xf32>, vector<1x120xf32> -> vector<1x120xf32>
    %722 = arith.addf %717, %721 : vector<1x120xf32>
    %c5_775 = arith.constant 5 : index
    %c0_776 = arith.constant 0 : index
    %723 = tpu.strided_load %arg14[%c5_775, %c0_776] {strides = array<i32: 25, 1>} : memref<25x12xf32, #tpu.memory_space<vmem>>, vector<1x12xf32>
    %c5_777 = arith.constant 5 : index
    %c0_778 = arith.constant 0 : index
    %c0_779 = arith.constant 0 : index
    %724 = vector.load %arg6[%c5_777, %c0_778, %c0_779] : memref<25x12x120xf32, #tpu.memory_space<vmem>>, vector<1x12x120xf32>
    %725 = vector.shape_cast %724 : vector<1x12x120xf32> to vector<12x120xf32>
    %cst_780 = arith.constant dense<0.000000e+00> : vector<1x120xf32>
    %726 = tpu.matmul %723, %725, %cst_780 {dimension_numbers = #tpu.dot_dimension_numbers<[1], [0], [0], [1], [0, 0, 1, 1], [], []>} : vector<1x12xf32>, vector<12x120xf32>, vector<1x120xf32> -> vector<1x120xf32>
    %727 = arith.addf %722, %726 : vector<1x120xf32>
    %c6_781 = arith.constant 6 : index
    %c0_782 = arith.constant 0 : index
    %728 = tpu.strided_load %arg14[%c6_781, %c0_782] {strides = array<i32: 25, 1>} : memref<25x12xf32, #tpu.memory_space<vmem>>, vector<1x12xf32>
    %c6_783 = arith.constant 6 : index
    %c0_784 = arith.constant 0 : index
    %c0_785 = arith.constant 0 : index
    %729 = vector.load %arg6[%c6_783, %c0_784, %c0_785] : memref<25x12x120xf32, #tpu.memory_space<vmem>>, vector<1x12x120xf32>
    %730 = vector.shape_cast %729 : vector<1x12x120xf32> to vector<12x120xf32>
    %cst_786 = arith.constant dense<0.000000e+00> : vector<1x120xf32>
    %731 = tpu.matmul %728, %730, %cst_786 {dimension_numbers = #tpu.dot_dimension_numbers<[1], [0], [0], [1], [0, 0, 1, 1], [], []>} : vector<1x12xf32>, vector<12x120xf32>, vector<1x120xf32> -> vector<1x120xf32>
    %732 = arith.addf %727, %731 : vector<1x120xf32>
    %c7_787 = arith.constant 7 : index
    %c0_788 = arith.constant 0 : index
    %733 = tpu.strided_load %arg14[%c7_787, %c0_788] {strides = array<i32: 25, 1>} : memref<25x12xf32, #tpu.memory_space<vmem>>, vector<1x12xf32>
    %c7_789 = arith.constant 7 : index
    %c0_790 = arith.constant 0 : index
    %c0_791 = arith.constant 0 : index
    %734 = vector.load %arg6[%c7_789, %c0_790, %c0_791] : memref<25x12x120xf32, #tpu.memory_space<vmem>>, vector<1x12x120xf32>
    %735 = vector.shape_cast %734 : vector<1x12x120xf32> to vector<12x120xf32>
    %cst_792 = arith.constant dense<0.000000e+00> : vector<1x120xf32>
    %736 = tpu.matmul %733, %735, %cst_792 {dimension_numbers = #tpu.dot_dimension_numbers<[1], [0], [0], [1], [0, 0, 1, 1], [], []>} : vector<1x12xf32>, vector<12x120xf32>, vector<1x120xf32> -> vector<1x120xf32>
    %737 = arith.addf %732, %736 : vector<1x120xf32>
    %c8_793 = arith.constant 8 : index
    %c0_794 = arith.constant 0 : index
    %738 = tpu.strided_load %arg14[%c8_793, %c0_794] {strides = array<i32: 25, 1>} : memref<25x12xf32, #tpu.memory_space<vmem>>, vector<1x12xf32>
    %c8_795 = arith.constant 8 : index
    %c0_796 = arith.constant 0 : index
    %c0_797 = arith.constant 0 : index
    %739 = vector.load %arg6[%c8_795, %c0_796, %c0_797] : memref<25x12x120xf32, #tpu.memory_space<vmem>>, vector<1x12x120xf32>
    %740 = vector.shape_cast %739 : vector<1x12x120xf32> to vector<12x120xf32>
    %cst_798 = arith.constant dense<0.000000e+00> : vector<1x120xf32>
    %741 = tpu.matmul %738, %740, %cst_798 {dimension_numbers = #tpu.dot_dimension_numbers<[1], [0], [0], [1], [0, 0, 1, 1], [], []>} : vector<1x12xf32>, vector<12x120xf32>, vector<1x120xf32> -> vector<1x120xf32>
    %742 = arith.addf %737, %741 : vector<1x120xf32>
    %c9_799 = arith.constant 9 : index
    %c0_800 = arith.constant 0 : index
    %743 = tpu.strided_load %arg14[%c9_799, %c0_800] {strides = array<i32: 25, 1>} : memref<25x12xf32, #tpu.memory_space<vmem>>, vector<1x12xf32>
    %c9_801 = arith.constant 9 : index
    %c0_802 = arith.constant 0 : index
    %c0_803 = arith.constant 0 : index
    %744 = vector.load %arg6[%c9_801, %c0_802, %c0_803] : memref<25x12x120xf32, #tpu.memory_space<vmem>>, vector<1x12x120xf32>
    %745 = vector.shape_cast %744 : vector<1x12x120xf32> to vector<12x120xf32>
    %cst_804 = arith.constant dense<0.000000e+00> : vector<1x120xf32>
    %746 = tpu.matmul %743, %745, %cst_804 {dimension_numbers = #tpu.dot_dimension_numbers<[1], [0], [0], [1], [0, 0, 1, 1], [], []>} : vector<1x12xf32>, vector<12x120xf32>, vector<1x120xf32> -> vector<1x120xf32>
    %747 = arith.addf %742, %746 : vector<1x120xf32>
    %c10_805 = arith.constant 10 : index
    %c0_806 = arith.constant 0 : index
    %748 = tpu.strided_load %arg14[%c10_805, %c0_806] {strides = array<i32: 25, 1>} : memref<25x12xf32, #tpu.memory_space<vmem>>, vector<1x12xf32>
    %c10_807 = arith.constant 10 : index
    %c0_808 = arith.constant 0 : index
    %c0_809 = arith.constant 0 : index
    %749 = vector.load %arg6[%c10_807, %c0_808, %c0_809] : memref<25x12x120xf32, #tpu.memory_space<vmem>>, vector<1x12x120xf32>
    %750 = vector.shape_cast %749 : vector<1x12x120xf32> to vector<12x120xf32>
    %cst_810 = arith.constant dense<0.000000e+00> : vector<1x120xf32>
    %751 = tpu.matmul %748, %750, %cst_810 {dimension_numbers = #tpu.dot_dimension_numbers<[1], [0], [0], [1], [0, 0, 1, 1], [], []>} : vector<1x12xf32>, vector<12x120xf32>, vector<1x120xf32> -> vector<1x120xf32>
    %752 = arith.addf %747, %751 : vector<1x120xf32>
    %c11_811 = arith.constant 11 : index
    %c0_812 = arith.constant 0 : index
    %753 = tpu.strided_load %arg14[%c11_811, %c0_812] {strides = array<i32: 25, 1>} : memref<25x12xf32, #tpu.memory_space<vmem>>, vector<1x12xf32>
    %c11_813 = arith.constant 11 : index
    %c0_814 = arith.constant 0 : index
    %c0_815 = arith.constant 0 : index
    %754 = vector.load %arg6[%c11_813, %c0_814, %c0_815] : memref<25x12x120xf32, #tpu.memory_space<vmem>>, vector<1x12x120xf32>
    %755 = vector.shape_cast %754 : vector<1x12x120xf32> to vector<12x120xf32>
    %cst_816 = arith.constant dense<0.000000e+00> : vector<1x120xf32>
    %756 = tpu.matmul %753, %755, %cst_816 {dimension_numbers = #tpu.dot_dimension_numbers<[1], [0], [0], [1], [0, 0, 1, 1], [], []>} : vector<1x12xf32>, vector<12x120xf32>, vector<1x120xf32> -> vector<1x120xf32>
    %757 = arith.addf %752, %756 : vector<1x120xf32>
    %c12_817 = arith.constant 12 : index
    %c0_818 = arith.constant 0 : index
    %758 = tpu.strided_load %arg14[%c12_817, %c0_818] {strides = array<i32: 25, 1>} : memref<25x12xf32, #tpu.memory_space<vmem>>, vector<1x12xf32>
    %c12_819 = arith.constant 12 : index
    %c0_820 = arith.constant 0 : index
    %c0_821 = arith.constant 0 : index
    %759 = vector.load %arg6[%c12_819, %c0_820, %c0_821] : memref<25x12x120xf32, #tpu.memory_space<vmem>>, vector<1x12x120xf32>
    %760 = vector.shape_cast %759 : vector<1x12x120xf32> to vector<12x120xf32>
    %cst_822 = arith.constant dense<0.000000e+00> : vector<1x120xf32>
    %761 = tpu.matmul %758, %760, %cst_822 {dimension_numbers = #tpu.dot_dimension_numbers<[1], [0], [0], [1], [0, 0, 1, 1], [], []>} : vector<1x12xf32>, vector<12x120xf32>, vector<1x120xf32> -> vector<1x120xf32>
    %762 = arith.addf %757, %761 : vector<1x120xf32>
    %c13_823 = arith.constant 13 : index
    %c0_824 = arith.constant 0 : index
    %763 = tpu.strided_load %arg14[%c13_823, %c0_824] {strides = array<i32: 25, 1>} : memref<25x12xf32, #tpu.memory_space<vmem>>, vector<1x12xf32>
    %c13_825 = arith.constant 13 : index
    %c0_826 = arith.constant 0 : index
    %c0_827 = arith.constant 0 : index
    %764 = vector.load %arg6[%c13_825, %c0_826, %c0_827] : memref<25x12x120xf32, #tpu.memory_space<vmem>>, vector<1x12x120xf32>
    %765 = vector.shape_cast %764 : vector<1x12x120xf32> to vector<12x120xf32>
    %cst_828 = arith.constant dense<0.000000e+00> : vector<1x120xf32>
    %766 = tpu.matmul %763, %765, %cst_828 {dimension_numbers = #tpu.dot_dimension_numbers<[1], [0], [0], [1], [0, 0, 1, 1], [], []>} : vector<1x12xf32>, vector<12x120xf32>, vector<1x120xf32> -> vector<1x120xf32>
    %767 = arith.addf %762, %766 : vector<1x120xf32>
    %c14_829 = arith.constant 14 : index
    %c0_830 = arith.constant 0 : index
    %768 = tpu.strided_load %arg14[%c14_829, %c0_830] {strides = array<i32: 25, 1>} : memref<25x12xf32, #tpu.memory_space<vmem>>, vector<1x12xf32>
    %c14_831 = arith.constant 14 : index
    %c0_832 = arith.constant 0 : index
    %c0_833 = arith.constant 0 : index
    %769 = vector.load %arg6[%c14_831, %c0_832, %c0_833] : memref<25x12x120xf32, #tpu.memory_space<vmem>>, vector<1x12x120xf32>
    %770 = vector.shape_cast %769 : vector<1x12x120xf32> to vector<12x120xf32>
    %cst_834 = arith.constant dense<0.000000e+00> : vector<1x120xf32>
    %771 = tpu.matmul %768, %770, %cst_834 {dimension_numbers = #tpu.dot_dimension_numbers<[1], [0], [0], [1], [0, 0, 1, 1], [], []>} : vector<1x12xf32>, vector<12x120xf32>, vector<1x120xf32> -> vector<1x120xf32>
    %772 = arith.addf %767, %771 : vector<1x120xf32>
    %c15_835 = arith.constant 15 : index
    %c0_836 = arith.constant 0 : index
    %773 = tpu.strided_load %arg14[%c15_835, %c0_836] {strides = array<i32: 25, 1>} : memref<25x12xf32, #tpu.memory_space<vmem>>, vector<1x12xf32>
    %c15_837 = arith.constant 15 : index
    %c0_838 = arith.constant 0 : index
    %c0_839 = arith.constant 0 : index
    %774 = vector.load %arg6[%c15_837, %c0_838, %c0_839] : memref<25x12x120xf32, #tpu.memory_space<vmem>>, vector<1x12x120xf32>
    %775 = vector.shape_cast %774 : vector<1x12x120xf32> to vector<12x120xf32>
    %cst_840 = arith.constant dense<0.000000e+00> : vector<1x120xf32>
    %776 = tpu.matmul %773, %775, %cst_840 {dimension_numbers = #tpu.dot_dimension_numbers<[1], [0], [0], [1], [0, 0, 1, 1], [], []>} : vector<1x12xf32>, vector<12x120xf32>, vector<1x120xf32> -> vector<1x120xf32>
    %777 = arith.addf %772, %776 : vector<1x120xf32>
    %c16_841 = arith.constant 16 : index
    %c0_842 = arith.constant 0 : index
    %778 = tpu.strided_load %arg14[%c16_841, %c0_842] {strides = array<i32: 25, 1>} : memref<25x12xf32, #tpu.memory_space<vmem>>, vector<1x12xf32>
    %c16_843 = arith.constant 16 : index
    %c0_844 = arith.constant 0 : index
    %c0_845 = arith.constant 0 : index
    %779 = vector.load %arg6[%c16_843, %c0_844, %c0_845] : memref<25x12x120xf32, #tpu.memory_space<vmem>>, vector<1x12x120xf32>
    %780 = vector.shape_cast %779 : vector<1x12x120xf32> to vector<12x120xf32>
    %cst_846 = arith.constant dense<0.000000e+00> : vector<1x120xf32>
    %781 = tpu.matmul %778, %780, %cst_846 {dimension_numbers = #tpu.dot_dimension_numbers<[1], [0], [0], [1], [0, 0, 1, 1], [], []>} : vector<1x12xf32>, vector<12x120xf32>, vector<1x120xf32> -> vector<1x120xf32>
    %782 = arith.addf %777, %781 : vector<1x120xf32>
    %c17_847 = arith.constant 17 : index
    %c0_848 = arith.constant 0 : index
    %783 = tpu.strided_load %arg14[%c17_847, %c0_848] {strides = array<i32: 25, 1>} : memref<25x12xf32, #tpu.memory_space<vmem>>, vector<1x12xf32>
    %c17_849 = arith.constant 17 : index
    %c0_850 = arith.constant 0 : index
    %c0_851 = arith.constant 0 : index
    %784 = vector.load %arg6[%c17_849, %c0_850, %c0_851] : memref<25x12x120xf32, #tpu.memory_space<vmem>>, vector<1x12x120xf32>
    %785 = vector.shape_cast %784 : vector<1x12x120xf32> to vector<12x120xf32>
    %cst_852 = arith.constant dense<0.000000e+00> : vector<1x120xf32>
    %786 = tpu.matmul %783, %785, %cst_852 {dimension_numbers = #tpu.dot_dimension_numbers<[1], [0], [0], [1], [0, 0, 1, 1], [], []>} : vector<1x12xf32>, vector<12x120xf32>, vector<1x120xf32> -> vector<1x120xf32>
    %787 = arith.addf %782, %786 : vector<1x120xf32>
    %c18_853 = arith.constant 18 : index
    %c0_854 = arith.constant 0 : index
    %788 = tpu.strided_load %arg14[%c18_853, %c0_854] {strides = array<i32: 25, 1>} : memref<25x12xf32, #tpu.memory_space<vmem>>, vector<1x12xf32>
    %c18_855 = arith.constant 18 : index
    %c0_856 = arith.constant 0 : index
    %c0_857 = arith.constant 0 : index
    %789 = vector.load %arg6[%c18_855, %c0_856, %c0_857] : memref<25x12x120xf32, #tpu.memory_space<vmem>>, vector<1x12x120xf32>
    %790 = vector.shape_cast %789 : vector<1x12x120xf32> to vector<12x120xf32>
    %cst_858 = arith.constant dense<0.000000e+00> : vector<1x120xf32>
    %791 = tpu.matmul %788, %790, %cst_858 {dimension_numbers = #tpu.dot_dimension_numbers<[1], [0], [0], [1], [0, 0, 1, 1], [], []>} : vector<1x12xf32>, vector<12x120xf32>, vector<1x120xf32> -> vector<1x120xf32>
    %792 = arith.addf %787, %791 : vector<1x120xf32>
    %c19_859 = arith.constant 19 : index
    %c0_860 = arith.constant 0 : index
    %793 = tpu.strided_load %arg14[%c19_859, %c0_860] {strides = array<i32: 25, 1>} : memref<25x12xf32, #tpu.memory_space<vmem>>, vector<1x12xf32>
    %c19_861 = arith.constant 19 : index
    %c0_862 = arith.constant 0 : index
    %c0_863 = arith.constant 0 : index
    %794 = vector.load %arg6[%c19_861, %c0_862, %c0_863] : memref<25x12x120xf32, #tpu.memory_space<vmem>>, vector<1x12x120xf32>
    %795 = vector.shape_cast %794 : vector<1x12x120xf32> to vector<12x120xf32>
    %cst_864 = arith.constant dense<0.000000e+00> : vector<1x120xf32>
    %796 = tpu.matmul %793, %795, %cst_864 {dimension_numbers = #tpu.dot_dimension_numbers<[1], [0], [0], [1], [0, 0, 1, 1], [], []>} : vector<1x12xf32>, vector<12x120xf32>, vector<1x120xf32> -> vector<1x120xf32>
    %797 = arith.addf %792, %796 : vector<1x120xf32>
    %c20_865 = arith.constant 20 : index
    %c0_866 = arith.constant 0 : index
    %798 = tpu.strided_load %arg14[%c20_865, %c0_866] {strides = array<i32: 25, 1>} : memref<25x12xf32, #tpu.memory_space<vmem>>, vector<1x12xf32>
    %c20_867 = arith.constant 20 : index
    %c0_868 = arith.constant 0 : index
    %c0_869 = arith.constant 0 : index
    %799 = vector.load %arg6[%c20_867, %c0_868, %c0_869] : memref<25x12x120xf32, #tpu.memory_space<vmem>>, vector<1x12x120xf32>
    %800 = vector.shape_cast %799 : vector<1x12x120xf32> to vector<12x120xf32>
    %cst_870 = arith.constant dense<0.000000e+00> : vector<1x120xf32>
    %801 = tpu.matmul %798, %800, %cst_870 {dimension_numbers = #tpu.dot_dimension_numbers<[1], [0], [0], [1], [0, 0, 1, 1], [], []>} : vector<1x12xf32>, vector<12x120xf32>, vector<1x120xf32> -> vector<1x120xf32>
    %802 = arith.addf %797, %801 : vector<1x120xf32>
    %c21_871 = arith.constant 21 : index
    %c0_872 = arith.constant 0 : index
    %803 = tpu.strided_load %arg14[%c21_871, %c0_872] {strides = array<i32: 25, 1>} : memref<25x12xf32, #tpu.memory_space<vmem>>, vector<1x12xf32>
    %c21_873 = arith.constant 21 : index
    %c0_874 = arith.constant 0 : index
    %c0_875 = arith.constant 0 : index
    %804 = vector.load %arg6[%c21_873, %c0_874, %c0_875] : memref<25x12x120xf32, #tpu.memory_space<vmem>>, vector<1x12x120xf32>
    %805 = vector.shape_cast %804 : vector<1x12x120xf32> to vector<12x120xf32>
    %cst_876 = arith.constant dense<0.000000e+00> : vector<1x120xf32>
    %806 = tpu.matmul %803, %805, %cst_876 {dimension_numbers = #tpu.dot_dimension_numbers<[1], [0], [0], [1], [0, 0, 1, 1], [], []>} : vector<1x12xf32>, vector<12x120xf32>, vector<1x120xf32> -> vector<1x120xf32>
    %807 = arith.addf %802, %806 : vector<1x120xf32>
    %c22_877 = arith.constant 22 : index
    %c0_878 = arith.constant 0 : index
    %808 = tpu.strided_load %arg14[%c22_877, %c0_878] {strides = array<i32: 25, 1>} : memref<25x12xf32, #tpu.memory_space<vmem>>, vector<1x12xf32>
    %c22_879 = arith.constant 22 : index
    %c0_880 = arith.constant 0 : index
    %c0_881 = arith.constant 0 : index
    %809 = vector.load %arg6[%c22_879, %c0_880, %c0_881] : memref<25x12x120xf32, #tpu.memory_space<vmem>>, vector<1x12x120xf32>
    %810 = vector.shape_cast %809 : vector<1x12x120xf32> to vector<12x120xf32>
    %cst_882 = arith.constant dense<0.000000e+00> : vector<1x120xf32>
    %811 = tpu.matmul %808, %810, %cst_882 {dimension_numbers = #tpu.dot_dimension_numbers<[1], [0], [0], [1], [0, 0, 1, 1], [], []>} : vector<1x12xf32>, vector<12x120xf32>, vector<1x120xf32> -> vector<1x120xf32>
    %812 = arith.addf %807, %811 : vector<1x120xf32>
    %c23_883 = arith.constant 23 : index
    %c0_884 = arith.constant 0 : index
    %813 = tpu.strided_load %arg14[%c23_883, %c0_884] {strides = array<i32: 25, 1>} : memref<25x12xf32, #tpu.memory_space<vmem>>, vector<1x12xf32>
    %c23_885 = arith.constant 23 : index
    %c0_886 = arith.constant 0 : index
    %c0_887 = arith.constant 0 : index
    %814 = vector.load %arg6[%c23_885, %c0_886, %c0_887] : memref<25x12x120xf32, #tpu.memory_space<vmem>>, vector<1x12x120xf32>
    %815 = vector.shape_cast %814 : vector<1x12x120xf32> to vector<12x120xf32>
    %cst_888 = arith.constant dense<0.000000e+00> : vector<1x120xf32>
    %816 = tpu.matmul %813, %815, %cst_888 {dimension_numbers = #tpu.dot_dimension_numbers<[1], [0], [0], [1], [0, 0, 1, 1], [], []>} : vector<1x12xf32>, vector<12x120xf32>, vector<1x120xf32> -> vector<1x120xf32>
    %817 = arith.addf %812, %816 : vector<1x120xf32>
    %c24_889 = arith.constant 24 : index
    %c0_890 = arith.constant 0 : index
    %818 = tpu.strided_load %arg14[%c24_889, %c0_890] {strides = array<i32: 25, 1>} : memref<25x12xf32, #tpu.memory_space<vmem>>, vector<1x12xf32>
    %c24_891 = arith.constant 24 : index
    %c0_892 = arith.constant 0 : index
    %c0_893 = arith.constant 0 : index
    %819 = vector.load %arg6[%c24_891, %c0_892, %c0_893] : memref<25x12x120xf32, #tpu.memory_space<vmem>>, vector<1x12x120xf32>
    %820 = vector.shape_cast %819 : vector<1x12x120xf32> to vector<12x120xf32>
    %cst_894 = arith.constant dense<0.000000e+00> : vector<1x120xf32>
    %821 = tpu.matmul %818, %820, %cst_894 {dimension_numbers = #tpu.dot_dimension_numbers<[1], [0], [0], [1], [0, 0, 1, 1], [], []>} : vector<1x12xf32>, vector<12x120xf32>, vector<1x120xf32> -> vector<1x120xf32>
    %822 = arith.addf %817, %821 : vector<1x120xf32>
    %c0_895 = arith.constant 0 : index
    %c0_896 = arith.constant 0 : index
    %823 = vector.load %arg7[%c0_895, %c0_896] : memref<1x120xf32, #tpu.memory_space<vmem>>, vector<1x120xf32>
    %824 = arith.addf %822, %823 : vector<1x120xf32>
    %cst_897 = arith.constant 0.000000e+00 : f32
    %825 = vector.broadcast %cst_897 : f32 to vector<1x120xf32>
    %826 = arith.maximumf %824, %825 : vector<1x120xf32>
    %c0_898 = arith.constant 0 : index
    %c0_899 = arith.constant 0 : index
    %827 = vector.load %arg8[%c0_898, %c0_899] : memref<120x60xf32, #tpu.memory_space<vmem>>, vector<120x60xf32>
    %cst_900 = arith.constant dense<0.000000e+00> : vector<1x60xf32>
    %828 = tpu.matmul %826, %827, %cst_900 {dimension_numbers = #tpu.dot_dimension_numbers<[1], [0], [0], [1], [0, 0, 1, 1], [], []>} : vector<1x120xf32>, vector<120x60xf32>, vector<1x60xf32> -> vector<1x60xf32>
    %c0_901 = arith.constant 0 : index
    %c0_902 = arith.constant 0 : index
    %829 = vector.load %arg9[%c0_901, %c0_902] : memref<1x60xf32, #tpu.memory_space<vmem>>, vector<1x60xf32>
    %830 = arith.addf %828, %829 : vector<1x60xf32>
    %cst_903 = arith.constant 0.000000e+00 : f32
    %831 = vector.broadcast %cst_903 : f32 to vector<1x60xf32>
    %832 = arith.maximumf %830, %831 : vector<1x60xf32>
    %c0_904 = arith.constant 0 : index
    %c0_905 = arith.constant 0 : index
    %833 = vector.load %arg10[%c0_904, %c0_905] : memref<60x10xf32, #tpu.memory_space<vmem>>, vector<60x10xf32>
    %cst_906 = arith.constant dense<0.000000e+00> : vector<1x10xf32>
    %834 = tpu.matmul %832, %833, %cst_906 {dimension_numbers = #tpu.dot_dimension_numbers<[1], [0], [0], [1], [0, 0, 1, 1], [], []>} : vector<1x60xf32>, vector<60x10xf32>, vector<1x10xf32> -> vector<1x10xf32>
    %c0_907 = arith.constant 0 : index
    %c0_908 = arith.constant 0 : index
    %835 = vector.load %arg11[%c0_907, %c0_908] : memref<1x10xf32, #tpu.memory_space<vmem>>, vector<1x10xf32>
    %836 = arith.addf %834, %835 : vector<1x10xf32>
    %c0_909 = arith.constant 0 : index
    %c0_910 = arith.constant 0 : index
    %c0_911 = arith.constant 0 : index
    %837 = vector.load %arg12[%c0_909, %c0_910, %c0_911] : memref<1x1x10xf32, #tpu.memory_space<vmem>>, vector<1x1x10xf32>
    %838 = vector.shape_cast %837 : vector<1x1x10xf32> to vector<1x10xf32>
    %839 = vector.shape_cast %836 : vector<1x10xf32> to vector<1x1x10xf32>
    tpu.vector_store %arg12[%c0_909, %c0_910, %c0_911], %839 {strides = array<i32>} : memref<1x1x10xf32, #tpu.memory_space<vmem>>, vector<1x1x10xf32>,
    return
  }
  func.func @transform_0(%arg0: i32) -> (i32, i32) {
    %c0_i32 = arith.constant 0 : i32
    %c0_i32_0 = arith.constant 0 : i32
    return %arg0, %c0_i32 : i32, i32
  }
  func.func @transform_1(%arg0: i32) -> (i32, i32, i32) {
    %c0_i32 = arith.constant 0 : i32
    %c0_i32_0 = arith.constant 0 : i32
    %c0_i32_1 = arith.constant 0 : i32
    %c0_i32_2 = arith.constant 0 : i32
    return %c0_i32, %c0_i32_0, %c0_i32_1 : i32, i32, i32
  }
  func.func @transform_2(%arg0: i32) -> (i32, i32) {
    %c0_i32 = arith.constant 0 : i32
    %c0_i32_0 = arith.constant 0 : i32
    %c0_i32_1 = arith.constant 0 : i32
    return %c0_i32, %c0_i32_0 : i32, i32
  }
  func.func @transform_3(%arg0: i32) -> (i32, i32, i32) {
    %c0_i32 = arith.constant 0 : i32
    %c0_i32_0 = arith.constant 0 : i32
    %c0_i32_1 = arith.constant 0 : i32
    %c0_i32_2 = arith.constant 0 : i32
    return %c0_i32, %c0_i32_0, %c0_i32_1 : i32, i32, i32
  }
  func.func @transform_4(%arg0: i32) -> (i32, i32) {
    %c0_i32 = arith.constant 0 : i32
    %c0_i32_0 = arith.constant 0 : i32
    %c0_i32_1 = arith.constant 0 : i32
    return %c0_i32, %c0_i32_0 : i32, i32
  }
  func.func @transform_5(%arg0: i32) -> (i32, i32, i32) {
    %c0_i32 = arith.constant 0 : i32
    %c0_i32_0 = arith.constant 0 : i32
    %c0_i32_1 = arith.constant 0 : i32
    %c0_i32_2 = arith.constant 0 : i32
    return %c0_i32, %c0_i32_0, %c0_i32_1 : i32, i32, i32
  }
  func.func @transform_6(%arg0: i32) -> (i32, i32) {
    %c0_i32 = arith.constant 0 : i32
    %c0_i32_0 = arith.constant 0 : i32
    %c0_i32_1 = arith.constant 0 : i32
    return %c0_i32, %c0_i32_0 : i32, i32
  }
  func.func @transform_7(%arg0: i32) -> (i32, i32) {
    %c0_i32 = arith.constant 0 : i32
    %c0_i32_0 = arith.constant 0 : i32
    %c0_i32_1 = arith.constant 0 : i32
    return %c0_i32, %c0_i32_0 : i32, i32
  }
  func.func @transform_8(%arg0: i32) -> (i32, i32) {
    %c0_i32 = arith.constant 0 : i32
    %c0_i32_0 = arith.constant 0 : i32
    %c0_i32_1 = arith.constant 0 : i32
    return %c0_i32, %c0_i32_0 : i32, i32
  }
  func.func @transform_9(%arg0: i32) -> (i32, i32) {
    %c0_i32 = arith.constant 0 : i32
    %c0_i32_0 = arith.constant 0 : i32
    %c0_i32_1 = arith.constant 0 : i32
    return %c0_i32, %c0_i32_0 : i32, i32
  }
  func.func @transform_10(%arg0: i32) -> (i32, i32) {
    %c0_i32 = arith.constant 0 : i32
    %c0_i32_0 = arith.constant 0 : i32
    %c0_i32_1 = arith.constant 0 : i32
    return %c0_i32, %c0_i32_0 : i32, i32
  }
  func.func @transform_11(%arg0: i32) -> (i32, i32, i32) {
    %c0_i32 = arith.constant 0 : i32
    %c0_i32_0 = arith.constant 0 : i32
    %c0_i32_1 = arith.constant 0 : i32
    return %arg0, %c0_i32, %c0_i32_0 : i32, i32, i32
  }
}

</mosaic_0001>

<bundles_post_ra>
// kernel: lizard_cnn_forward.1
= control target key start
LH: loop header
LB: loop body
LE: loop exit
PB: predicated region body
PF: predicated region fallthrough
CT: control target
= control target key end

     0   :  { %16 = vsyncpa [#allocation7], 0  ;;  %s27323_s0 = inlined_call_operand.vmem [shape: f32[2048,3], index: 0, kind: input, shape index: {}]   ;;  %s27324_s1 = inlined_call_operand.vmem [shape: f32[25,3,6], index: 1, kind: input, shape index: {}]   ;;  %s27325_s2 = inlined_call_operand.vmem [shape: f32[1,6], index: 2, kind: input, shape index: {}]   ;;  %s27326_s3 = inlined_call_operand.vmem [shape: f32[25,6,12], index: 3, kind: input, shape index: {}]   ;;  %s27327_s4 = inlined_call_operand.vmem [shape: f32[1,12], index: 4, kind: input, shape index: {}]   ;;  %s27328_s5 = inlined_call_operand.vmem [shape: f32[25,12,120], index: 5, kind: input, shape index: {}]   ;;  %s27329_s6 = inlined_call_operand.vmem [shape: f32[1,120], index: 6, kind: input, shape index: {}]   ;;  %s27330_s7 = inlined_call_operand.vmem [shape: f32[120,60], index: 7, kind: input, shape index: {}]   ;;  %s27331_s8 = inlined_call_operand.vmem [shape: f32[1,60], index: 8, kind: input, shape index: {}]   ;;  %s27332_s9 = inlined_call_operand.vmem [shape: f32[60,10], index: 9, kind: input, shape index: {}]   ;;  %s27333_s10 = inlined_call_operand.vmem [shape: f32[1,10], index: 10, kind: input, shape index: {}]   ;;  %s27334_s11 = inlined_call_operand.hbm [shape: f32[2,1,10], index: 11, kind: output, shape index: {}]  }
   0x1   :  { %18 = vsyncpa [#allocation7 + $0x1], 0  ;;  %s23243_s17 = smov 0   ;;  %s23245_s18 = smov 0  }
   0x2   :  { %s23247_s19 = smov 0   ;;  %s23249_s20 = smov 0  }
   0x3 LB: > { %27338 = sst [smem:[#allocation9_spill]] %s23170_s19  ;;  %s23264_s21 = sadd.s32 4294967295, %s23174_s20   ;;  %s23174_s20 = sphi %s23249_s20, %s27370_s20   ;;  %s23170_s19 = sphi %s23247_s19, %s27367_s19   ;;  %s23166_s18 = sphi %s23245_s18, %s27369_s18   ;;  %s23162_s17 = sphi %s23243_s17, %s27368_s17  }
   0x4   : > { %s19082_s22 = sadd.s32 4294967294, %s23174_s20   ;;  %s23268_s23 = sadd.s32 1, %s23174_s20  }
   0x5   : > { %s267_s24 = sadd.s32 1, %s23170_s19  ;;  %s264_s25 = ssub.s32 %s23174_s20, %s23268_s23 }
   0x6   : > { %p277_p0 = scmp.ne.s32.totalorder %s23170_s19, %s23166_s18  ;;  %p265_p1 = scmp.eq.s32.totalorder %s264_s25, 0 }
   0x7   : > { %p278_p2 = scmp.eq.s32.totalorder %s23264_s21, 1  ;;  %p283_p3 = scmp.ne.s32.totalorder %s23166_s18, %s23162_s17 }
   0x8   : > { %p284_p4 = scmp.eq.s32.totalorder %s19082_s22, 1  ;;  %p19085_p7 = scmp.ge.s32.totalorder %s23174_s20, 1 }
   0x9   : > { %s23279_s26 = scalar_select %p265_p1, %s23170_s19, %s267_s24  }
   0xa   : > { %p23281_p5 = por %p278_p2, %p277_p0  ;;  %p23285_p6 = por %p284_p4, %p283_p3 }
   0xb   : > { %27339 = sst [smem:[#allocation10_spill]] %s23279_s26  ;;  %p341_p8 = scmp.lt.s32.totalorder %s23174_s20, 3 }
   0xd   : > { %p342_p9 = pnand %p19085_p7, %p341_p8 }
   0xf   : > { %345 = sbr.rel (%p342_p9) target bundleno = 2033 (0x7f1), region = 64 }
  0x14   : > { %s378_s29 = sand.u32 1, %s23166_s18   ;;  %s19086_s30 = sshll.u32 %s23264_s21, 7  ;;  %v23296_v0 = vld [vmem:[%s27325_s2] ss:$0 sm:$0xff] }
  0x15   : > { %27342 = vst [vmem:[#allocation11_spill] sm:$0xff] %v23296_v0  ;;  %v23301_v1 = vld [vmem:[%s27327_s4] ss:$0 sm:$0xff]  ;;  %p381_p10 = scmp.lt.s32.totalorder %s19086_s30, 255  ;;  %s23310_s26 = scalar_lea.vmem [#allocation6], %s378_s29 }
  0x16   : > { %27343 = vst [vmem:[#allocation12_spill] sm:$0xff] %v23301_v1  ;;  %s23312_s19 = smov 0  }
  0x17   : > { %s27372_s30 = smov (!%p381_p10, %s19086_s30), 255 }
  0x18   : > { %s19087_s16 = sshll.u32 %s27372_s30, 3 }
  0x19   : > { %s23306_s25 = scalar_lea.vmem %s27323_s0, %s19087_s16 }
  0x1a LB: >> { %v19100_v2 = vld [vmem:[%s27324_s1 + $0x4] sm:$0x7]  ;;  %vm454_vm0 = vcmask 1042432   ;;  %v416_v3 = vld [vmem:[%s27324_s1] sm:$0x7]  ;;  %s19090_s22 = sshll.u32 %s23178_s19, 6  ;;  %s23178_s19 = sphi %s23312_s19, %s405_s19  }
  0x1b   : >> { %23057 = vmatprep.subr.msk.mxu1 %vm454_vm0, %v19100_v2  ;;  %21105 = vmatprep.subr.msk.mxu0 %vm454_vm0, %v19100_v2  ;;  %v19128_v4 = vld [vmem:[%s27324_s1 + $0x8] sm:$0x7]  ;;  %vm429_vm1 = vcmask 23552   ;;  %s23332_s24 = scalar_lea.vmem %s23306_s25, %s19090_s22  ;;  %v19147_v11 = vld [vmem:[%s27324_s1 + $0xc] sm:$0x7]  ;;  %vm4207_vm2 = vcmask 48128  }
  0x1c   : >> { %23058 = vmatpush3.msk.msra.mxu1 %vm454_vm0, %v19100_v2  ;;  %21106 = vmatpush3.msk.msra.mxu0 %vm454_vm0, %v19100_v2  ;;  %v19092_v5 = vld [vmem:[%s23332_s24 + $0x1] sm:$0xff]  ;;  %v19093_v7 = vld [vmem:[%s23332_s24 + $0x9] sm:$0xff]  ;;  %v19094_v9 = vld [vmem:[%s23332_s24 + $0x11] sm:$0xff]  ;;  %vm4215_vm3 = vcmask 44032   ;;  %vm4241_vm4 = vcmask 46080  }
  0x1d   : >> { %21119 = vmatprep.subr.msk.mxu1 %vm454_vm0, %v416_v3  ;;  %21133 = vmatprep.subr.msk.mxu0 %vm454_vm0, %v19128_v4  ;;  %v23338_v6 = vld [vmem:[%s23332_s24 + $0x21] sm:$0xff]  ;;  %v23345_v8 = vld [vmem:[%s23332_s24 + $0x29] sm:$0xff]  ;;  %v23349_v10 = vld [vmem:[%s23332_s24 + $0x31] sm:$0xff] }
  0x1e   : >> { %21107 = vmatprep.mubr.msk.f32.mxu0 %vm429_vm1, %v19092_v5  ;;  %21113 = vmatprep.mubr.msk.f32.mxu1 %vm429_vm1, %v23338_v6  ;;  %v19166_v12 = vld [vmem:[%s27324_s1 + $0x10] sm:$0x7]  ;;  %v19095_v13 = vld [vmem:[%s23332_s24 + $0x19] sm:$0xff]  ;;  %v19120_v16 = vld [vmem:[%s23332_s24 + $0x2] sm:$0xff] }
  0x1f   : >> { %21108 = vmatmul.mubr.msk.f32.vlgmr.msra.gmra.mxu0 %vm429_vm1, %v19093_v7  ;;  %21114 = vmatmul.mubr.msk.f32.vlgmr.msra.gmra.mxu1 %vm429_vm1, %v23345_v8  ;;  %v19099_v14 = vld [vmem:[%s23332_s24 + $0x39] sm:$0xf]  ;;  %v408_v15 = vld [vmem:[%s23332_s24] sm:$0xff]  ;;  %v409_v17 = vld [vmem:[%s23332_s24 + $0x8] sm:$0xff] }
  0x20   : >> { %21120 = vmatpush3.msk.msra.mxu1 %vm454_vm0, %v416_v3  ;;  %21134 = vmatpush3.msk.msra.mxu0 %vm454_vm0, %v19128_v4  ;;  %v19121_v18 = vld [vmem:[%s23332_s24 + $0xa] sm:$0xff]  ;;  %v19122_v20 = vld [vmem:[%s23332_s24 + $0x12] sm:$0xff]  ;;  %v19123_v24 = vld [vmem:[%s23332_s24 + $0x1a] sm:$0xff] }
  0x21   : >> { %21110 = vmatprep.mubr.msk.f32.mxu0 %vm429_vm1, %v19094_v9  ;;  %21116 = vmatprep.mubr.msk.f32.mxu1 %vm429_vm1, %v23349_v10  ;;  %v410_v19 = vld [vmem:[%s23332_s24 + $0x10] sm:$0xff]  ;;  %v19204_v22 = vld [vmem:[%s27324_s1 + $0x18] sm:$0x7]  ;;  %v412_v25 = vld [vmem:[%s23332_s24 + $0x20] sm:$0xff] }
  0x22   : >> { %21147 = vmatprep.subr.msk.mxu1 %vm454_vm0, %v19147_v11  ;;  %21161 = vmatprep.subr.msk.mxu0 %vm454_vm0, %v19166_v12  ;;  %v19185_v21 = vld [vmem:[%s27324_s1 + $0x14] sm:$0x7]  ;;  %v411_v23 = vld [vmem:[%s23332_s24 + $0x18] sm:$0xff]  ;;  %v23395_v26 = vld [vmem:[%s23332_s24 + $0x22] sm:$0xff] }
  0x23   : >> { %21111 = vmatmul.mubr.msk.f32.gmra.mxu0 %vm429_vm1, %v19095_v13  ;;  %21117 = vmatmul.mubr.msk.f32.gmra.mxu1 %vm429_vm1, %v19099_v14  ;;  %v413_v27 = vld [vmem:[%s23332_s24 + $0x28] sm:$0xff]  ;;  %v414_v29 = vld [vmem:[%s23332_s24 + $0x30] sm:$0xff]  ;;  %v415_v31 = vld [vmem:[%s23332_s24 + $0x38] sm:$0xf] }
  0x24   : >> { %21121 = vmatprep.mubr.msk.f32.mxu1 %vm429_vm1, %v408_v15  ;;  %21135 = vmatprep.mubr.msk.f32.mxu0 %vm429_vm1, %v19120_v16  ;;  %v23406_v28 = vld [vmem:[%s23332_s24 + $0x2a] sm:$0xff]  ;;  %v23410_v30 = vld [vmem:[%s23332_s24 + $0x32] sm:$0xff]  ;;  %v19127_v32 = vld [vmem:[%s23332_s24 + $0x3a] sm:$0xf] }
  0x25   : >> { %v19139_v33 = vld [vmem:[%s23332_s24 + $0x3] sm:$0xff]  ;;  %v19140_v35 = vld [vmem:[%s23332_s24 + $0xb] sm:$0xff]  ;;  %v19141_v37 = vld [vmem:[%s23332_s24 + $0x13] sm:$0xff] }
  0x26   : >> { %v19158_v34 = vld [vmem:[%s23332_s24 + $0x4] sm:$0xff]  ;;  %v19159_v36 = vld [vmem:[%s23332_s24 + $0xc] sm:$0xff]  ;;  %v19160_v38 = vld [vmem:[%s23332_s24 + $0x14] sm:$0xff] }
  0x27   : >> { %21122 = vmatmul.mubr.msk.f32.vlgmr.msra.gmra.mxu1 %vm429_vm1, %v409_v17  ;;  %21136 = vmatmul.mubr.msk.f32.vlgmr.msra.gmra.mxu0 %vm429_vm1, %v19121_v18  ;;  %v19223_v39 = vld [vmem:[%s27324_s1 + $0x1c] sm:$0x7]  ;;  %v19242_v40 = vld [vmem:[%s27324_s1 + $0x20] sm:$0x7]  ;;  %v19143_v43 = vld [vmem:[%s23332_s24 + $0x23] sm:$0xff] }
  0x28   : >> { %21148 = vmatpush3.msk.msra.mxu1 %vm454_vm0, %v19147_v11  ;;  %21162 = vmatpush3.msk.msra.mxu0 %vm454_vm0, %v19166_v12  ;;  %v19142_v41 = vld [vmem:[%s23332_s24 + $0x1b] sm:$0xff]  ;;  %v23446_v44 = vld [vmem:[%s23332_s24 + $0x24] sm:$0xff]  ;;  %v23457_v46 = vld [vmem:[%s23332_s24 + $0x2c] sm:$0xff] }
  0x29   : >> { %21124 = vmatprep.mubr.msk.f32.mxu1 %vm429_vm1, %v410_v19  ;;  %21138 = vmatprep.mubr.msk.f32.mxu0 %vm429_vm1, %v19122_v20  ;;  %v19161_v42 = vld [vmem:[%s23332_s24 + $0x1c] sm:$0xff]  ;;  %v19144_v45 = vld [vmem:[%s23332_s24 + $0x2b] sm:$0xff]  ;;  %v19145_v47 = vld [vmem:[%s23332_s24 + $0x33] sm:$0xff] }
  0x2a   : >> { %21175 = vmatprep.subr.msk.mxu1 %vm454_vm0, %v19185_v21  ;;  %21189 = vmatprep.subr.msk.mxu0 %vm454_vm0, %v19204_v22  ;;  %v23461_v48 = vld [vmem:[%s23332_s24 + $0x34] sm:$0xff]  ;;  %v19165_v50 = vld [vmem:[%s23332_s24 + $0x3c] sm:$0xf]  ;;  %v19261_v51 = vld [vmem:[%s27324_s1 + $0x24] sm:$0x7] }
  0x2b   : >> { %21125 = vmatmul.mubr.msk.f32.gmra.mxu1 %vm429_vm1, %v411_v23  ;;  %21139 = vmatmul.mubr.msk.f32.gmra.mxu0 %vm429_vm1, %v19123_v24  ;;  %v19146_v49 = vld [vmem:[%s23332_s24 + $0x3b] sm:$0xf]  ;;  %v19280_v52 = vld [vmem:[%s27324_s1 + $0x28] sm:$0x7]  ;;  %v19181_v55 = vld [vmem:[%s23332_s24 + $0x40] sm:$0xff] }
  0x2c   : >> { %21127 = vmatprep.mubr.msk.f32.mxu1 %vm429_vm1, %v412_v25  ;;  %21141 = vmatprep.mubr.msk.f32.mxu0 %vm429_vm1, %v23395_v26  ;;  %v19180_v53 = vld [vmem:[%s23332_s24 + $0x38] sm:$0xff]  ;;  %v23494_v56 = vld [vmem:[%s23332_s24 + $0x41] sm:$0xff]  ;;  %v23505_v58 = vld [vmem:[%s23332_s24 + $0x49] sm:$0xff] }
  0x2d   : >> { %v19199_v54 = vld [vmem:[%s23332_s24 + $0x39] sm:$0xff]  ;;  %v19182_v57 = vld [vmem:[%s23332_s24 + $0x48] sm:$0xff]  ;;  %v19183_v59 = vld [vmem:[%s23332_s24 + $0x50] sm:$0xff] }
  0x2e   : >> { %v23509_v60 = vld [vmem:[%s23332_s24 + $0x51] sm:$0xff]  ;;  %v19203_v62 = vld [vmem:[%s23332_s24 + $0x59] sm:$0xf]  ;;  %v19299_v63 = vld [vmem:[%s27324_s1 + $0x2c] sm:$0x7] }
  0x2f   : >> { %21128 = vmatmul.mubr.msk.f32.gmra.mxu1 %vm429_vm1, %v413_v27  ;;  %21142 = vmatmul.mubr.msk.f32.gmra.mxu0 %vm429_vm1, %v23406_v28  ;;  %v19184_v61 = vld [vmem:[%s23332_s24 + $0x58] sm:$0xf]  ;;  %v19318_v2 = vld [vmem:[%s27324_s1 + $0x30] sm:$0x7]  ;;  %v19219_v5 = vld [vmem:[%s23332_s24 + $0x42] sm:$0xff] }
  0x30   : >> { %21130 = vmatprep.mubr.msk.f32.mxu1 %vm429_vm1, %v414_v29  ;;  %21144 = vmatprep.mubr.msk.f32.mxu0 %vm429_vm1, %v23410_v30  ;;  %v19218_v3 = vld [vmem:[%s23332_s24 + $0x3a] sm:$0xff]  ;;  %v19220_v7 = vld [vmem:[%s23332_s24 + $0x4a] sm:$0xff]  ;;  %v19221_v9 = vld [vmem:[%s23332_s24 + $0x52] sm:$0xff] }
  0x31   : >> { %v19237_v4 = vld [vmem:[%s23332_s24 + $0x3b] sm:$0xff]  ;;  %v19337_v13 = vld [vmem:[%s27324_s1 + $0x34] sm:$0x7]  ;;  %v19356_v14 = vld [vmem:[%s27324_s1 + $0x38] sm:$0x7] }
  0x32   : >> { %v19222_v11 = vld [vmem:[%s23332_s24 + $0x5a] sm:$0xf]  ;;  %v19257_v17 = vld [vmem:[%s23332_s24 + $0x44] sm:$0xff]  ;;  %v19258_v19 = vld [vmem:[%s23332_s24 + $0x4c] sm:$0xff] }
  0x33   : >> { %21131 = vmatmul.mubr.msk.f32.gmra.mxu1 %vm429_vm1, %v415_v31  ;;  %21145 = vmatmul.mubr.msk.f32.gmra.mxu0 %vm429_vm1, %v19127_v32  ;;  %v19241_v12 = vld [vmem:[%s23332_s24 + $0x5b] sm:$0xf]  ;;  %v23590_v18 = vld [vmem:[%s23332_s24 + $0x60] sm:$0xff]  ;;  %v23601_v20 = vld [vmem:[%s23332_s24 + $0x68] sm:$0xff] }
  0x34   : >> { %21149 = vmatprep.mubr.msk.f32.mxu1 %vm429_vm1, %v19139_v33  ;;  %21163 = vmatprep.mubr.msk.f32.mxu0 %vm429_vm1, %v19158_v34  ;;  %v19256_v15 = vld [vmem:[%s23332_s24 + $0x3c] sm:$0xff]  ;;  %v19279_v24 = vld [vmem:[%s23332_s24 + $0x78] sm:$0xf]  ;;  %v19296_v31 = vld [vmem:[%s23332_s24 + $0x69] sm:$0xff] }
  0x35   : >> { %v19275_v16 = vld [vmem:[%s23332_s24 + $0x58] sm:$0xff]  ;;  %v23649_v32 = vld [vmem:[%s23332_s24 + $0x6a] sm:$0xff] }
  0x36   : >> { %v19260_v23 = vld [vmem:[%s23332_s24 + $0x5c] sm:$0xf]  ;;  %v19297_v33 = vld [vmem:[%s23332_s24 + $0x71] sm:$0xff] }
  0x37   : >> { %21150 = vmatmul.mubr.msk.f32.vlgmr.msra.gmra.mxu1 %vm429_vm1, %v19140_v35  ;;  %21164 = vmatmul.mubr.msk.f32.vlgmr.msra.gmra.mxu0 %vm429_vm1, %v19159_v36  ;;  %v23653_v34 = vld [vmem:[%s23332_s24 + $0x72] sm:$0xff]  ;;  %v19317_v36 = vld [vmem:[%s23332_s24 + $0x7a] sm:$0xf] }
  0x38   : >> { %21176 = vmatpush3.msk.msra.mxu1 %vm454_vm0, %v19185_v21  ;;  %21190 = vmatpush3.msk.msra.mxu0 %vm454_vm0, %v19204_v22  ;;  %v19259_v21 = vld [vmem:[%s23332_s24 + $0x54] sm:$0xff] }
  0x39   : >> { %21152 = vmatprep.mubr.msk.f32.mxu1 %vm429_vm1, %v19141_v37  ;;  %21166 = vmatprep.mubr.msk.f32.mxu0 %vm429_vm1, %v19160_v38  ;;  %v23605_v22 = vld [vmem:[%s23332_s24 + $0x70] sm:$0xff]  ;;  %v19298_v35 = vld [vmem:[%s23332_s24 + $0x79] sm:$0xf]  ;;  %v19413_v37 = vld [vmem:[%s27324_s1 + $0x44] sm:$0x7] }
  0x3a   : >> { %21203 = vmatprep.subr.msk.mxu1 %vm454_vm0, %v19223_v39  ;;  %21217 = vmatprep.subr.msk.mxu0 %vm454_vm0, %v19242_v40  ;;  %v19432_v38 = vld [vmem:[%s27324_s1 + $0x48] sm:$0x7] }
  0x3b   : >> { %21153 = vmatmul.mubr.msk.f32.gmra.mxu1 %vm429_vm1, %v19142_v41  ;;  %21167 = vmatmul.mubr.msk.f32.gmra.mxu0 %vm429_vm1, %v19161_v42  ;;  %v19333_v41 = vld [vmem:[%s23332_s24 + $0x63] sm:$0xff] }
  0x3c   : >> { %21155 = vmatprep.mubr.msk.f32.mxu1 %vm429_vm1, %v19143_v43  ;;  %21169 = vmatprep.mubr.msk.f32.mxu0 %vm429_vm1, %v23446_v44  ;;  %v23686_v42 = vld [vmem:[%s23332_s24 + $0x64] sm:$0xff] }
  0x3f   : >> { %21156 = vmatmul.mubr.msk.f32.gmra.mxu1 %vm429_vm1, %v19144_v45  ;;  %21170 = vmatmul.mubr.msk.f32.gmra.mxu0 %vm429_vm1, %v23457_v46 }
  0x40   : >> { %21158 = vmatprep.mubr.msk.f32.mxu1 %vm429_vm1, %v19145_v47  ;;  %21172 = vmatprep.mubr.msk.f32.mxu0 %vm429_vm1, %v23461_v48 }
  0x43   : >> { %21159 = vmatmul.mubr.msk.f32.gmra.mxu1 %vm429_vm1, %v19146_v49  ;;  %21173 = vmatmul.mubr.msk.f32.gmra.mxu0 %vm429_vm1, %v19165_v50  ;;  %v19451_v49 = vld [vmem:[%s27324_s1 + $0x4c] sm:$0x7]  ;;  %v19470_v50 = vld [vmem:[%s27324_s1 + $0x50] sm:$0x7] }
  0x44   : >> { %21177 = vmatprep.mubr.msk.f32.mxu1 %vm429_vm1, %v412_v25  ;;  %21191 = vmatprep.mubr.msk.f32.mxu0 %vm429_vm1, %v23338_v6  ;;  %v23542_v6 = vld [vmem:[%s23332_s24 + $0x43] sm:$0xff]  ;;  %v19375_v25 = vld [vmem:[%s27324_s1 + $0x3c] sm:$0x7] }
  0x47   : >> { %21178 = vmatmul.mubr.msk.f32.vlgmr.msra.gmra.mxu1 %vm429_vm1, %v413_v27  ;;  %21192 = vmatmul.mubr.msk.f32.vlgmr.msra.gmra.mxu0 %vm429_vm1, %v23345_v8  ;;  %v23553_v8 = vld [vmem:[%s23332_s24 + $0x4b] sm:$0xff]  ;;  %v19294_v27 = vld [vmem:[%s23332_s24 + $0x59] sm:$0xff] }
  0x48   : >> { %21204 = vmatpush3.msk.msra.mxu1 %vm454_vm0, %v19223_v39  ;;  %21218 = vmatpush3.msk.msra.mxu0 %vm454_vm0, %v19242_v40  ;;  %v19332_v39 = vld [vmem:[%s23332_s24 + $0x5b] sm:$0xff] }
  0x49   : >> { %21180 = vmatprep.mubr.msk.f32.mxu1 %vm429_vm1, %v414_v29  ;;  %21194 = vmatprep.mubr.msk.f32.mxu0 %vm429_vm1, %v23349_v10  ;;  %v23557_v10 = vld [vmem:[%s23332_s24 + $0x53] sm:$0xff]  ;;  %v19295_v29 = vld [vmem:[%s23332_s24 + $0x61] sm:$0xff] }
  0x4a   : >> { %21231 = vmatprep.subr.msk.mxu1 %vm454_vm0, %v19261_v51  ;;  %21245 = vmatprep.subr.msk.mxu0 %vm454_vm0, %v19280_v52  ;;  %v19351_v40 = vld [vmem:[%s23332_s24 + $0x5c] sm:$0xff] }
  0x4b   : >> { %21181 = vmatmul.mubr.msk.f32.gmra.mxu1 %vm429_vm1, %v19180_v53  ;;  %21195 = vmatmul.mubr.msk.f32.gmra.mxu0 %vm429_vm1, %v19199_v54  ;;  %v19371_v53 = vld [vmem:[%s23332_s24 + $0x80] sm:$0xff] }
  0x4c   : >> { %21183 = vmatprep.mubr.msk.f32.mxu1 %vm429_vm1, %v19181_v55  ;;  %21197 = vmatprep.mubr.msk.f32.mxu0 %vm429_vm1, %v23494_v56  ;;  %v23734_v54 = vld [vmem:[%s23332_s24 + $0x81] sm:$0xff] }
  0x4f   : >> { %21184 = vmatmul.mubr.msk.f32.gmra.mxu1 %vm429_vm1, %v19182_v57  ;;  %21198 = vmatmul.mubr.msk.f32.gmra.mxu0 %vm429_vm1, %v23505_v58 }
  0x50   : >> { %21186 = vmatprep.mubr.msk.f32.mxu1 %vm429_vm1, %v19183_v59  ;;  %21200 = vmatprep.mubr.msk.f32.mxu0 %vm429_vm1, %v23509_v60 }
  0x53   : >> { %21187 = vmatmul.mubr.msk.f32.gmra.mxu1 %vm429_vm1, %v19184_v61  ;;  %21201 = vmatmul.mubr.msk.f32.gmra.mxu0 %vm429_vm1, %v19203_v62  ;;  %v19489_v61 = vld [vmem:[%s27324_s1 + $0x54] sm:$0x7]  ;;  %v19508_v62 = vld [vmem:[%s27324_s1 + $0x58] sm:$0x7] }
  0x54   : >> { %21205 = vmatprep.mubr.msk.f32.mxu1 %vm429_vm1, %v23395_v26  ;;  %21219 = vmatprep.mubr.msk.f32.mxu0 %vm429_vm1, %v19143_v43  ;;  %v19394_v26 = vld [vmem:[%s27324_s1 + $0x40] sm:$0x7]  ;;  %v19334_v43 = vld [vmem:[%s23332_s24 + $0x6b] sm:$0xff] }
  0x57   : >> { %21206 = vmatmul.mubr.msk.f32.vlgmr.msra.gmra.mxu1 %vm429_vm1, %v23406_v28  ;;  %21220 = vmatmul.mubr.msk.f32.vlgmr.msra.gmra.mxu0 %vm429_vm1, %v19144_v45  ;;  %v19313_v28 = vld [vmem:[%s23332_s24 + $0x5a] sm:$0xff] }
  0x58   : >> { %21232 = vmatpush3.msk.msra.mxu1 %vm454_vm0, %v19261_v51  ;;  %21246 = vmatpush3.msk.msra.mxu0 %vm454_vm0, %v19280_v52  ;;  %v19335_v45 = vld [vmem:[%s23332_s24 + $0x73] sm:$0xff] }
  0x59   : >> { %21208 = vmatprep.mubr.msk.f32.mxu1 %vm429_vm1, %v23410_v30  ;;  %21222 = vmatprep.mubr.msk.f32.mxu0 %vm429_vm1, %v19145_v47  ;;  %v23638_v30 = vld [vmem:[%s23332_s24 + $0x62] sm:$0xff]  ;;  %v19336_v47 = vld [vmem:[%s23332_s24 + $0x7b] sm:$0xf] }
  0x5a   : >> { %21259 = vmatprep.subr.msk.mxu1 %vm454_vm0, %v19299_v63  ;;  %21273 = vmatprep.subr.msk.mxu0 %vm454_vm0, %v19318_v2  ;;  %v19370_v51 = vld [vmem:[%s23332_s24 + $0x78] sm:$0xff] }
  0x5b   : >> { %21209 = vmatmul.mubr.msk.f32.gmra.mxu1 %vm429_vm1, %v19218_v3  ;;  %21223 = vmatmul.mubr.msk.f32.gmra.mxu0 %vm429_vm1, %v19237_v4  ;;  %v19389_v52 = vld [vmem:[%s23332_s24 + $0x79] sm:$0xff]  ;;  %v19409_v3 = vld [vmem:[%s23332_s24 + $0x82] sm:$0xff] }
  0x5c   : >> { %21211 = vmatprep.mubr.msk.f32.mxu1 %vm429_vm1, %v19219_v5  ;;  %21225 = vmatprep.mubr.msk.f32.mxu0 %vm429_vm1, %v23542_v6  ;;  %v23782_v4 = vld [vmem:[%s23332_s24 + $0x83] sm:$0xff] }
  0x5f   : >> { %21212 = vmatmul.mubr.msk.f32.gmra.mxu1 %vm429_vm1, %v19220_v7  ;;  %21226 = vmatmul.mubr.msk.f32.gmra.mxu0 %vm429_vm1, %v23553_v8 }
  0x60   : >> { %21214 = vmatprep.mubr.msk.f32.mxu1 %vm429_vm1, %v19221_v9  ;;  %21228 = vmatprep.mubr.msk.f32.mxu0 %vm429_vm1, %v23557_v10 }
  0x63   : >> { %21215 = vmatmul.mubr.msk.f32.gmra.mxu1 %vm429_vm1, %v19222_v11  ;;  %21229 = vmatmul.mubr.msk.f32.gmra.mxu0 %vm429_vm1, %v19241_v12  ;;  %v19527_v11 = vld [vmem:[%s27324_s1 + $0x5c] sm:$0x7]  ;;  %v19546_v12 = vld [vmem:[%s27324_s1 + $0x60] sm:$0x7] }
  0x64   : >> { %21233 = vmatprep.mubr.msk.f32.mxu1 %vm429_vm1, %v23446_v44  ;;  %21247 = vmatprep.mubr.msk.f32.mxu0 %vm429_vm1, %v19181_v55  ;;  %v23697_v44 = vld [vmem:[%s23332_s24 + $0x6c] sm:$0xff] }
  0x65   : >> { %v19372_v55 = vld [vmem:[%s23332_s24 + $0x88] sm:$0xff] }
  0x67   : >> { %21234 = vmatmul.mubr.msk.f32.vlgmr.msra.gmra.mxu1 %vm429_vm1, %v23457_v46  ;;  %21248 = vmatmul.mubr.msk.f32.vlgmr.msra.gmra.mxu0 %vm429_vm1, %v19182_v57  ;;  %v23701_v46 = vld [vmem:[%s23332_s24 + $0x74] sm:$0xff] }
  0x68   : >> { %21260 = vmatpush3.msk.msra.mxu1 %vm454_vm0, %v19299_v63  ;;  %21274 = vmatpush3.msk.msra.mxu0 %vm454_vm0, %v19318_v2  ;;  %v19373_v57 = vld [vmem:[%s23332_s24 + $0x90] sm:$0xff]  ;;  %v19408_v63 = vld [vmem:[%s23332_s24 + $0x7a] sm:$0xff] }
  0x69   : >> { %21236 = vmatprep.mubr.msk.f32.mxu1 %vm429_vm1, %v23461_v48  ;;  %21250 = vmatprep.mubr.msk.f32.mxu0 %vm429_vm1, %v19183_v59  ;;  %v19355_v48 = vld [vmem:[%s23332_s24 + $0x7c] sm:$0xf]  ;;  %v19374_v59 = vld [vmem:[%s23332_s24 + $0x98] sm:$0xf] }
  0x6a   : >> { %21287 = vmatprep.subr.msk.mxu1 %vm454_vm0, %v19337_v13  ;;  %21301 = vmatprep.subr.msk.mxu0 %vm454_vm0, %v19356_v14  ;;  %v19427_v2 = vld [vmem:[%s23332_s24 + $0x7b] sm:$0xff] }
  0x6b   : >> { %21237 = vmatmul.mubr.msk.f32.gmra.mxu1 %vm429_vm1, %v19256_v15  ;;  %21251 = vmatmul.mubr.msk.f32.gmra.mxu0 %vm429_vm1, %v19275_v16  ;;  %v19447_v15 = vld [vmem:[%s23332_s24 + $0x84] sm:$0xff] }
  0x6c   : >> { %21239 = vmatprep.mubr.msk.f32.mxu1 %vm429_vm1, %v19257_v17  ;;  %21253 = vmatprep.mubr.msk.f32.mxu0 %vm429_vm1, %v23590_v18  ;;  %v19466_v16 = vld [vmem:[%s23332_s24 + $0xa0] sm:$0xff] }
  0x6f   : >> { %21240 = vmatmul.mubr.msk.f32.gmra.mxu1 %vm429_vm1, %v19258_v19  ;;  %21254 = vmatmul.mubr.msk.f32.gmra.mxu0 %vm429_vm1, %v23601_v20 }
  0x70   : >> { %21242 = vmatprep.mubr.msk.f32.mxu1 %vm429_vm1, %v19259_v21  ;;  %21256 = vmatprep.mubr.msk.f32.mxu0 %vm429_vm1, %v23605_v22 }
  0x73   : >> { %21243 = vmatmul.mubr.msk.f32.gmra.mxu1 %vm429_vm1, %v19260_v23  ;;  %21257 = vmatmul.mubr.msk.f32.gmra.mxu0 %vm429_vm1, %v19279_v24  ;;  %v19484_v23 = vld [vmem:[%s23332_s24 + $0x99] sm:$0xff] }
  0x74   : >> { %21261 = vmatprep.mubr.msk.f32.mxu1 %vm429_vm1, %v23494_v56  ;;  %21275 = vmatprep.mubr.msk.f32.mxu0 %vm429_vm1, %v19219_v5  ;;  %v23745_v56 = vld [vmem:[%s23332_s24 + $0x89] sm:$0xff]  ;;  %v19503_v24 = vld [vmem:[%s23332_s24 + $0x9a] sm:$0xff] }
  0x75   : >> { %v19410_v5 = vld [vmem:[%s23332_s24 + $0x8a] sm:$0xff] }
  0x77   : >> { %21262 = vmatmul.mubr.msk.f32.vlgmr.msra.gmra.mxu1 %vm429_vm1, %v23505_v58  ;;  %21276 = vmatmul.mubr.msk.f32.vlgmr.msra.gmra.mxu0 %vm429_vm1, %v19220_v7  ;;  %v23749_v58 = vld [vmem:[%s23332_s24 + $0x91] sm:$0xff] }
  0x78   : >> { %21288 = vmatpush3.msk.msra.mxu1 %vm454_vm0, %v19337_v13  ;;  %21302 = vmatpush3.msk.msra.mxu0 %vm454_vm0, %v19356_v14  ;;  %v19411_v7 = vld [vmem:[%s23332_s24 + $0x92] sm:$0xff]  ;;  %v19446_v13 = vld [vmem:[%s23332_s24 + $0x7c] sm:$0xff] }
  0x79   : >> { %21264 = vmatprep.mubr.msk.f32.mxu1 %vm429_vm1, %v23509_v60  ;;  %21278 = vmatprep.mubr.msk.f32.mxu0 %vm429_vm1, %v19221_v9  ;;  %v19393_v60 = vld [vmem:[%s23332_s24 + $0x99] sm:$0xf] }
  0x7a   : >> { %21315 = vmatprep.subr.msk.mxu1 %vm454_vm0, %v19375_v25  ;;  %21329 = vmatprep.subr.msk.mxu0 %vm454_vm0, %v19394_v26  ;;  %v19412_v9 = vld [vmem:[%s23332_s24 + $0x9a] sm:$0xf] }
  0x7b   : >> { %21265 = vmatmul.mubr.msk.f32.gmra.mxu1 %vm429_vm1, %v19294_v27  ;;  %21279 = vmatmul.mubr.msk.f32.gmra.mxu0 %vm429_vm1, %v19313_v28  ;;  %v19465_v14 = vld [vmem:[%s23332_s24 + $0x98] sm:$0xff]  ;;  %v19486_v27 = vld [vmem:[%s23332_s24 + $0xa9] sm:$0xff] }
  0x7c   : >> { %21267 = vmatprep.mubr.msk.f32.mxu1 %vm429_vm1, %v19295_v29  ;;  %21281 = vmatprep.mubr.msk.f32.mxu0 %vm429_vm1, %v23638_v30  ;;  %v19505_v28 = vld [vmem:[%s23332_s24 + $0xaa] sm:$0xff] }
  0x7f   : >> { %21268 = vmatmul.mubr.msk.f32.gmra.mxu1 %vm429_vm1, %v19296_v31  ;;  %21282 = vmatmul.mubr.msk.f32.gmra.mxu0 %vm429_vm1, %v23649_v32 }
  0x80   : >> { %21270 = vmatprep.mubr.msk.f32.mxu1 %vm429_vm1, %v19297_v33  ;;  %21284 = vmatprep.mubr.msk.f32.mxu0 %vm429_vm1, %v23653_v34 }
  0x83   : >> { %21271 = vmatmul.mubr.msk.f32.gmra.mxu1 %vm429_vm1, %v19298_v35  ;;  %21285 = vmatmul.mubr.msk.f32.gmra.mxu0 %vm429_vm1, %v19317_v36  ;;  %v19523_v35 = vld [vmem:[%s23332_s24 + $0xa3] sm:$0xff] }
  0x84   : >> { %21289 = vmatprep.mubr.msk.f32.mxu1 %vm429_vm1, %v23542_v6  ;;  %21303 = vmatprep.mubr.msk.f32.mxu0 %vm429_vm1, %v19257_v17  ;;  %v23793_v6 = vld [vmem:[%s23332_s24 + $0x8b] sm:$0xff] }
  0x85   : >> { %v19448_v17 = vld [vmem:[%s23332_s24 + $0x8c] sm:$0xff]  ;;  %v19542_v36 = vld [vmem:[%s23332_s24 + $0xa4] sm:$0xff] }
  0x87   : >> { %21290 = vmatmul.mubr.msk.f32.vlgmr.msra.gmra.mxu1 %vm429_vm1, %v23553_v8  ;;  %21304 = vmatmul.mubr.msk.f32.vlgmr.msra.gmra.mxu0 %vm429_vm1, %v19258_v19  ;;  %v23797_v8 = vld [vmem:[%s23332_s24 + $0x93] sm:$0xff] }
  0x88   : >> { %21316 = vmatpush3.msk.msra.mxu1 %vm454_vm0, %v19375_v25  ;;  %21330 = vmatpush3.msk.msra.mxu0 %vm454_vm0, %v19394_v26  ;;  %v19449_v19 = vld [vmem:[%s23332_s24 + $0x94] sm:$0xff]  ;;  %v19485_v25 = vld [vmem:[%s23332_s24 + $0xa1] sm:$0xff] }
  0x89   : >> { %21292 = vmatprep.mubr.msk.f32.mxu1 %vm429_vm1, %v23557_v10  ;;  %21306 = vmatprep.mubr.msk.f32.mxu0 %vm429_vm1, %v19259_v21  ;;  %v19431_v10 = vld [vmem:[%s23332_s24 + $0x9b] sm:$0xf]  ;;  %v19504_v26 = vld [vmem:[%s23332_s24 + $0xa2] sm:$0xff] }
  0x8a   : >> { %21343 = vmatprep.subr.msk.mxu1 %vm454_vm0, %v19413_v37  ;;  %21357 = vmatprep.subr.msk.mxu0 %vm454_vm0, %v19432_v38  ;;  %v19450_v21 = vld [vmem:[%s23332_s24 + $0x9c] sm:$0xf] }
  0x8b   : >> { %21293 = vmatmul.mubr.msk.f32.gmra.mxu1 %vm429_vm1, %v19332_v39  ;;  %21307 = vmatmul.mubr.msk.f32.gmra.mxu0 %vm429_vm1, %v19351_v40  ;;  %v19525_v39 = vld [vmem:[%s23332_s24 + $0xb3] sm:$0xff] }
  0x8c   : >> { %21295 = vmatprep.mubr.msk.f32.mxu1 %vm429_vm1, %v19333_v41  ;;  %21309 = vmatprep.mubr.msk.f32.mxu0 %vm429_vm1, %v23686_v42  ;;  %v19544_v40 = vld [vmem:[%s23332_s24 + $0xb4] sm:$0xff] }
  0x8f   : >> { %21296 = vmatmul.mubr.msk.f32.gmra.mxu1 %vm429_vm1, %v19334_v43  ;;  %21310 = vmatmul.mubr.msk.f32.gmra.mxu0 %vm429_vm1, %v23697_v44 }
  0x90   : >> { %21298 = vmatprep.mubr.msk.f32.mxu1 %vm429_vm1, %v19335_v45  ;;  %21312 = vmatprep.mubr.msk.f32.mxu0 %vm429_vm1, %v23701_v46 }
  0x93   : >> { %21299 = vmatmul.mubr.msk.f32.gmra.mxu1 %vm429_vm1, %v19336_v47  ;;  %21313 = vmatmul.mubr.msk.f32.gmra.mxu0 %vm429_vm1, %v19355_v48 }
  0x94   : >> { %21317 = vmatprep.mubr.msk.f32.mxu1 %vm429_vm1, %v23590_v18  ;;  %21331 = vmatprep.mubr.msk.f32.mxu0 %vm429_vm1, %v19295_v29  ;;  %v19467_v18 = vld [vmem:[%s23332_s24 + $0xa8] sm:$0xff]  ;;  %v19487_v29 = vld [vmem:[%s23332_s24 + $0xb1] sm:$0xff] }
  0x97   : >> { %21318 = vmatmul.mubr.msk.f32.vlgmr.msra.gmra.mxu1 %vm429_vm1, %v23601_v20  ;;  %21332 = vmatmul.mubr.msk.f32.vlgmr.msra.gmra.mxu0 %vm429_vm1, %v19296_v31  ;;  %v19468_v20 = vld [vmem:[%s23332_s24 + $0xb0] sm:$0xff]  ;;  %v19488_v31 = vld [vmem:[%s23332_s24 + $0xb9] sm:$0xf] }
  0x98   : >> { %21344 = vmatpush3.msk.msra.mxu1 %vm454_vm0, %v19413_v37  ;;  %21358 = vmatpush3.msk.msra.mxu0 %vm454_vm0, %v19432_v38  ;;  %v19524_v37 = vld [vmem:[%s23332_s24 + $0xab] sm:$0xff] }
  0x99   : >> { %21320 = vmatprep.mubr.msk.f32.mxu1 %vm429_vm1, %v23605_v22  ;;  %21334 = vmatprep.mubr.msk.f32.mxu0 %vm429_vm1, %v19297_v33  ;;  %v19469_v22 = vld [vmem:[%s23332_s24 + $0xb8] sm:$0xf]  ;;  %v19543_v38 = vld [vmem:[%s23332_s24 + $0xac] sm:$0xff] }
  0x9a   : >> { %21371 = vmatprep.subr.msk.mxu1 %vm454_vm0, %v19451_v49  ;;  %21385 = vmatprep.subr.msk.mxu0 %vm454_vm0, %v19470_v50  ;;  %v19522_v33 = vld [vmem:[%s23332_s24 + $0x9b] sm:$0xff] }
  0x9b   : >> { %21321 = vmatmul.mubr.msk.f32.gmra.mxu1 %vm429_vm1, %v19370_v51  ;;  %21335 = vmatmul.mubr.msk.f32.gmra.mxu0 %vm429_vm1, %v19389_v52 }
  0x9c   : >> { %21323 = vmatprep.mubr.msk.f32.mxu1 %vm429_vm1, %v19371_v53  ;;  %21337 = vmatprep.mubr.msk.f32.mxu0 %vm429_vm1, %v23734_v54 }
  0x9f   : >> { %21324 = vmatmul.mubr.msk.f32.gmra.mxu1 %vm429_vm1, %v19372_v55  ;;  %21338 = vmatmul.mubr.msk.f32.gmra.mxu0 %vm429_vm1, %v23745_v56 }
  0xa0   : >> { %21326 = vmatprep.mubr.msk.f32.mxu1 %vm429_vm1, %v19373_v57  ;;  %21340 = vmatprep.mubr.msk.f32.mxu0 %vm429_vm1, %v23749_v58 }
  0xa3   : >> { %21327 = vmatmul.mubr.msk.f32.gmra.mxu1 %vm429_vm1, %v19374_v59  ;;  %21341 = vmatmul.mubr.msk.f32.gmra.mxu0 %vm429_vm1, %v19393_v60 }
  0xa4   : >> { %21345 = vmatprep.mubr.msk.f32.mxu1 %vm429_vm1, %v23638_v30  ;;  %21359 = vmatprep.mubr.msk.f32.mxu0 %vm429_vm1, %v19333_v41  ;;  %v19506_v30 = vld [vmem:[%s23332_s24 + $0xb2] sm:$0xff] }
  0xa7   : >> { %21346 = vmatmul.mubr.msk.f32.vlgmr.msra.gmra.mxu1 %vm429_vm1, %v23649_v32  ;;  %21360 = vmatmul.mubr.msk.f32.vlgmr.msra.gmra.mxu0 %vm429_vm1, %v19334_v43  ;;  %v19507_v32 = vld [vmem:[%s23332_s24 + $0xba] sm:$0xf] }
  0xa8   : >> { %21372 = vmatpush3.msk.msra.mxu1 %vm454_vm0, %v19451_v49  ;;  %21386 = vmatpush3.msk.msra.mxu0 %vm454_vm0, %v19470_v50  ;;  %v19526_v43 = vld [vmem:[%s23332_s24 + $0xbb] sm:$0xf] }
  0xa9   : >> { %21348 = vmatprep.mubr.msk.f32.mxu1 %vm429_vm1, %v23653_v34  ;;  %21362 = vmatprep.mubr.msk.f32.mxu0 %vm429_vm1, %v19335_v45  ;;  %v19541_v34 = vld [vmem:[%s23332_s24 + $0x9c] sm:$0xff] }
  0xaa   : >> { %21399 = vmatprep.subr.msk.mxu1 %vm454_vm0, %v19489_v61  ;;  %21413 = vmatprep.subr.msk.mxu0 %vm454_vm0, %v19508_v62 }
  0xab   : >> { %21349 = vmatmul.mubr.msk.f32.gmra.mxu1 %vm429_vm1, %v19408_v63  ;;  %21363 = vmatmul.mubr.msk.f32.gmra.mxu0 %vm429_vm1, %v19427_v2 }
  0xac   : >> { %21351 = vmatprep.mubr.msk.f32.mxu1 %vm429_vm1, %v19409_v3  ;;  %21365 = vmatprep.mubr.msk.f32.mxu0 %vm429_vm1, %v23782_v4 }
  0xaf   : >> { %21352 = vmatmul.mubr.msk.f32.gmra.mxu1 %vm429_vm1, %v19410_v5  ;;  %21366 = vmatmul.mubr.msk.f32.gmra.mxu0 %vm429_vm1, %v23793_v6 }
  0xb0   : >> { %21354 = vmatprep.mubr.msk.f32.mxu1 %vm429_vm1, %v19411_v7  ;;  %21368 = vmatprep.mubr.msk.f32.mxu0 %vm429_vm1, %v23797_v8 }
  0xb3   : >> { %21355 = vmatmul.mubr.msk.f32.gmra.mxu1 %vm429_vm1, %v19412_v9  ;;  %21369 = vmatmul.mubr.msk.f32.gmra.mxu0 %vm429_vm1, %v19431_v10 }
  0xb4   : >> { %21373 = vmatprep.mubr.msk.f32.mxu1 %vm429_vm1, %v23686_v42  ;;  %21387 = vmatprep.mubr.msk.f32.mxu0 %vm429_vm1, %v19371_v53 }
  0xb7   : >> { %21374 = vmatmul.mubr.msk.f32.vlgmr.msra.gmra.mxu1 %vm429_vm1, %v23697_v44  ;;  %21388 = vmatmul.mubr.msk.f32.vlgmr.msra.gmra.mxu0 %vm429_vm1, %v19372_v55  ;;  %v19545_v44 = vld [vmem:[%s23332_s24 + $0xbc] sm:$0xf]  ;;  %s4238_s24 = smul.u32 14, %s23178_s19  ;;  %s405_s19 = sadd.s32 1, %s23178_s19  }
  0xb8   : >> { %21400 = vmatpush3.msk.msra.mxu1 %vm454_vm0, %v19489_v61  ;;  %21414 = vmatpush3.msk.msra.mxu0 %vm454_vm0, %v19508_v62  ;;  %p402_p11 = scmp.ge.s32.totalorder %s405_s19, 14  }
  0xb9   : >> { %21376 = vmatprep.mubr.msk.f32.mxu1 %vm429_vm1, %v23701_v46  ;;  %21390 = vmatprep.mubr.msk.f32.mxu0 %vm429_vm1, %v19373_v57  ;;  %s4239_s30 = scalar_lea.vmem [#allocation2], %s4238_s24  ;;  %vm4262_vm5 = vcmask (%p402_p11), 1045504   ;;  %vm23181_vm6 = vmmov (%p402_p11), 0   ;;  %vm6744_vm7 = vcmask (%p402_p11), 97280   ;;  %vm6758_vm8 = vcmask (%p402_p11), 94208   ;;  %s20277_s19 = sshll.u32 (%p402_p11), %s23264_s21, 4 }
  0xba   : >> { %21427 = vmatprep.subr.msk.mxu1 %vm454_vm0, %v19527_v11  ;;  %21441 = vmatprep.subr.msk.mxu0 %vm454_vm0, %v19546_v12  ;;  %vm16715_vm9 = vcmask (%p402_p11), 1043456   ;;  %vm18770_vm10 = vcmask (%p402_p11), 982016   ;;  %vm18854_vm11 = vcmask (%p402_p11), 490496   ;;  %s18946_s25 = sshll.u32 (%p402_p11), %s23310_s26, 4  ;;  %vm18931_vm12 = vcmask (%p402_p11), 73728   ;;  %s27285_s12 = scalar_lea.hbm (%p402_p11), %s27334_s11, %s20277_s19  ;;  %s18947_s25 = int_to_ptr.vmem [resolvable:$true] %s18946_s25 }
  0xbb   : >> { %21377 = vmatmul.mubr.msk.f32.gmra.mxu1 %vm429_vm1, %v19446_v13  ;;  %21391 = vmatmul.mubr.msk.f32.gmra.mxu0 %vm429_vm1, %v19465_v14  ;;  %s18934_s13 = scalar_lea.sflag (%p402_p11), [#allocation7], %s378_s29  ;;  %s23110_s24 = scalar_lea.vmem (%p402_p11), %s18947_s25, 16 }
  0xbc   : >> { %21379 = vmatprep.mubr.msk.f32.mxu1 %vm429_vm1, %v19447_v15  ;;  %21393 = vmatprep.mubr.msk.f32.mxu0 %vm429_vm1, %v19466_v16  ;;  %p23111_p12 = scmp.ne.s32.totalorder (%p402_p11), %s18947_s25, %s23110_s24  ;;  %s23182_s21 = smov (%p402_p11), [#allocation6]  }
  0xbe   : > { %p23112_p13 = pnand (%p402_p11), %p23111_p12, %p23281_p5 }
  0xbf   : >> { %21380 = vmatmul.mubr.msk.f32.gmra.mxu1 %vm429_vm1, %v19448_v17  ;;  %21394 = vmatmul.mubr.msk.f32.gmra.mxu0 %vm429_vm1, %v19467_v18 }
  0xc0   : >> { %21382 = vmatprep.mubr.msk.f32.mxu1 %vm429_vm1, %v19449_v19  ;;  %21396 = vmatprep.mubr.msk.f32.mxu0 %vm429_vm1, %v19468_v20  ;;  %p23113_p0 = pneg (%p402_p11), %p23112_p13 }
  0xc3   : >> { %21383 = vmatmul.mubr.msk.f32.gmra.mxu1 %vm429_vm1, %v19450_v21  ;;  %21397 = vmatmul.mubr.msk.f32.gmra.mxu0 %vm429_vm1, %v19469_v22 }
  0xc4   : >> { %21401 = vmatprep.mubr.msk.f32.mxu1 %vm429_vm1, %v23734_v54  ;;  %21415 = vmatprep.mubr.msk.f32.mxu0 %vm429_vm1, %v19409_v3 }
  0xc7   : >> { %21402 = vmatmul.mubr.msk.f32.vlgmr.msra.gmra.mxu1 %vm429_vm1, %v23745_v56  ;;  %21416 = vmatmul.mubr.msk.f32.vlgmr.msra.gmra.mxu0 %vm429_vm1, %v19410_v5 }
  0xc8   : >> { %21428 = vmatpush3.msk.msra.mxu1 %vm454_vm0, %v19527_v11  ;;  %21442 = vmatpush3.msk.msra.mxu0 %vm454_vm0, %v19546_v12 }
  0xc9   : >> { %21404 = vmatprep.mubr.msk.f32.mxu1 %vm429_vm1, %v23749_v58  ;;  %21418 = vmatprep.mubr.msk.f32.mxu0 %vm429_vm1, %v19411_v7 }
  0xcb   : >> { %21405 = vmatmul.mubr.msk.f32.gmra.mxu1 %vm429_vm1, %v19484_v23  ;;  %21419 = vmatmul.mubr.msk.f32.gmra.mxu0 %vm429_vm1, %v19503_v24 }
  0xcc   : >> { %21407 = vmatprep.mubr.msk.f32.mxu1 %vm429_vm1, %v19485_v25  ;;  %21421 = vmatprep.mubr.msk.f32.mxu0 %vm429_vm1, %v19504_v26 }
  0xcf   : >> { %21408 = vmatmul.mubr.msk.f32.gmra.mxu1 %vm429_vm1, %v19486_v27  ;;  %21422 = vmatmul.mubr.msk.f32.gmra.mxu0 %vm429_vm1, %v19505_v28 }
  0xd0   : >> { %21410 = vmatprep.mubr.msk.f32.mxu1 %vm429_vm1, %v19487_v29  ;;  %21424 = vmatprep.mubr.msk.f32.mxu0 %vm429_vm1, %v19506_v30 }
  0xd3   : >> { %21411 = vmatmul.mubr.msk.f32.gmra.mxu1 %vm429_vm1, %v19488_v31  ;;  %21425 = vmatmul.mubr.msk.f32.gmra.mxu0 %vm429_vm1, %v19507_v32 }
  0xd4   : >> { %21429 = vmatprep.mubr.msk.f32.mxu1 %vm429_vm1, %v23782_v4  ;;  %21443 = vmatprep.mubr.msk.f32.mxu0 %vm429_vm1, %v19447_v15 }
  0xd7   : >> { %21430 = vmatmul.mubr.msk.f32.vlgmr.msra.gmra.mxu1 %vm429_vm1, %v23793_v6  ;;  %21444 = vmatmul.mubr.msk.f32.vlgmr.msra.gmra.mxu0 %vm429_vm1, %v19448_v17 }
  0xd8   : >> { %21432 = vmatprep.mubr.msk.f32.mxu1 %vm429_vm1, %v23797_v8  ;;  %21446 = vmatprep.mubr.msk.f32.mxu0 %vm429_vm1, %v19449_v19 }
  0xdb   : >> { %21433 = vmatmul.mubr.msk.f32.gmra.mxu1 %vm429_vm1, %v19522_v33  ;;  %21447 = vmatmul.mubr.msk.f32.gmra.mxu0 %vm429_vm1, %v19541_v34 }
  0xdc   : >> { %21435 = vmatprep.mubr.msk.f32.mxu1 %vm429_vm1, %v19523_v35  ;;  %21449 = vmatprep.mubr.msk.f32.mxu0 %vm429_vm1, %v19542_v36 }
  0xdf   : >> { %v21109_v41 = vpop.f32.mrf.mxu0  ;;  %v21115_v42 = vpop.f32.mrf.mxu1  ;;  %21436 = vmatmul.mubr.msk.f32.gmra.mxu1 %vm429_vm1, %v19524_v37  ;;  %21450 = vmatmul.mubr.msk.f32.gmra.mxu0 %vm429_vm1, %v19543_v38 }
  0xe0   : >> { %21438 = vmatprep.mubr.msk.f32.mxu1 %vm429_vm1, %v19525_v39  ;;  %21452 = vmatprep.mubr.msk.f32.mxu0 %vm429_vm1, %v19544_v40 }
  0xe1   : >> { %v524_v45 = vpop.f32.mrf.mxu0  ;;  %v544_v46 = vpop.f32.mrf.mxu1 }
  0xe3   : >> { %v21112_v47 = vpop.f32.mrf.mxu0  ;;  %v21118_v48 = vpop.f32.mrf.mxu1  ;;  %21439 = vmatmul.mubr.msk.f32.gmra.mxu1 %vm429_vm1, %v19526_v43  ;;  %21453 = vmatmul.mubr.msk.f32.gmra.mxu0 %vm429_vm1, %v19545_v44 }
  0xe5   : >> { %v534_v49 = vpop.f32.mrf.mxu0  ;;  %v554_v50 = vpop.f32.mrf.mxu1 }
  0xe7   : >> { %v21123_v51 = vpop.f32.mrf.mxu1  ;;  %v21137_v52 = vpop.f32.mrf.mxu0 }
  0xe8   : >> { %v662_v53 = vadd.f32 %v21123_v51, %v21109_v41 }
  0xe9   : >> { %v656_v54 = vpop.f32.mrf.mxu1  ;;  %v800_v55 = vpop.f32.mrf.mxu0 }
  0xea   : >> { %v840_v56 = vadd.f32 %v21137_v52, %v662_v53  ;;  %v657_v57 = vadd.f32 %v656_v54, %v524_v45 }
  0xeb   : >> { %v21126_v58 = vpop.f32.mrf.mxu1  ;;  %v21140_v59 = vpop.f32.mrf.mxu0 }
  0xec   : >> { %v839_v60 = vadd.f32 %v800_v55, %v657_v57  ;;  %v672_v61 = vadd.f32 %v21126_v58, %v21112_v47 }
  0xed   : >> { %v666_v62 = vpop.f32.mrf.mxu1  ;;  %v810_v63 = vpop.f32.mrf.mxu0 }
  0xee   : >> { %v842_v2 = vadd.f32 %v21140_v59, %v672_v61  ;;  %v667_v3 = vadd.f32 %v666_v62, %v534_v49 }
  0xef   : >> { %v21129_v4 = vpop.f32.mrf.mxu1  ;;  %v21143_v5 = vpop.f32.mrf.mxu0 }
  0xf0   : >> { %v841_v6 = vadd.f32 %v810_v63, %v667_v3  ;;  %v682_v7 = vadd.f32 %v21129_v4, %v21115_v42 }
  0xf1   : >> { %v676_v8 = vpop.f32.mrf.mxu1  ;;  %v820_v9 = vpop.f32.mrf.mxu0 }
  0xf2   : >> { %v844_v10 = vadd.f32 %v21143_v5, %v682_v7  ;;  %v677_v11 = vadd.f32 %v676_v8, %v544_v46 }
  0xf3   : >> { %v21132_v12 = vpop.f32.mrf.mxu1  ;;  %v21146_v13 = vpop.f32.mrf.mxu0 }
  0xf4   : >> { %v843_v14 = vadd.f32 %v820_v9, %v677_v11  ;;  %v692_v15 = vadd.f32 %v21132_v12, %v21118_v48 }
  0xf5   : >> { %v686_v16 = vpop.f32.mrf.mxu1  ;;  %v830_v17 = vpop.f32.mrf.mxu0 }
  0xf6   : >> { %v846_v18 = vadd.f32 %v21146_v13, %v692_v15  ;;  %v687_v19 = vadd.f32 %v686_v16, %v554_v50 }
  0xf7   : >> { %v21151_v20 = vpop.f32.mrf.mxu1  ;;  %v21165_v21 = vpop.f32.mrf.mxu0 }
  0xf8   : >> { %v845_v22 = vadd.f32 %v830_v17, %v687_v19  ;;  %v992_v23 = vadd.f32 %v21151_v20, %v840_v56 }
  0xf9   : >> { %v952_v24 = vpop.f32.mrf.mxu1  ;;  %v1104_v25 = vpop.f32.mrf.mxu0 }
  0xfa   : >> { %v1144_v26 = vadd.f32 %v21165_v21, %v992_v23  ;;  %v991_v27 = vadd.f32 %v952_v24, %v839_v60 }
  0xfb   : >> { %v21154_v28 = vpop.f32.mrf.mxu1  ;;  %v21168_v29 = vpop.f32.mrf.mxu0 }
  0xfc   : >> { %v1143_v30 = vadd.f32 %v1104_v25, %v991_v27  ;;  %v994_v31 = vadd.f32 %v21154_v28, %v842_v2 }
  0xfd   : >> { %v962_v32 = vpop.f32.mrf.mxu1  ;;  %v1114_v33 = vpop.f32.mrf.mxu0 }
  0xfe   : >> { %v1146_v34 = vadd.f32 %v21168_v29, %v994_v31  ;;  %v993_v35 = vadd.f32 %v962_v32, %v841_v6 }
  0xff   : >> { %v21157_v36 = vpop.f32.mrf.mxu1  ;;  %v21171_v37 = vpop.f32.mrf.mxu0 }
 0x100   : >> { %v1145_v38 = vadd.f32 %v1114_v33, %v993_v35  ;;  %v996_v39 = vadd.f32 %v21157_v36, %v844_v10 }
 0x101   : >> { %v972_v40 = vpop.f32.mrf.mxu1  ;;  %v1124_v41 = vpop.f32.mrf.mxu0 }
 0x102   : >> { %v1148_v42 = vadd.f32 %v21171_v37, %v996_v39  ;;  %v995_v43 = vadd.f32 %v972_v40, %v843_v14 }
 0x103   : >> { %v21160_v44 = vpop.f32.mrf.mxu1  ;;  %v21174_v45 = vpop.f32.mrf.mxu0 }
 0x104   : >> { %v1147_v46 = vadd.f32 %v1124_v41, %v995_v43  ;;  %v998_v47 = vadd.f32 %v21160_v44, %v846_v18 }
 0x105   : >> { %v982_v48 = vpop.f32.mrf.mxu1  ;;  %v1134_v49 = vpop.f32.mrf.mxu0 }
 0x106   : >> { %v1150_v50 = vadd.f32 %v21174_v45, %v998_v47  ;;  %v997_v51 = vadd.f32 %v982_v48, %v845_v22 }
 0x107   : >> { %v21179_v52 = vpop.f32.mrf.mxu1  ;;  %v21193_v53 = vpop.f32.mrf.mxu0 }
 0x108   : >> { %v1149_v54 = vadd.f32 %v1134_v49, %v997_v51  ;;  %v1296_v55 = vadd.f32 %v21179_v52, %v1144_v26 }
 0x109   : >> { %v1256_v56 = vpop.f32.mrf.mxu1  ;;  %v1408_v57 = vpop.f32.mrf.mxu0 }
 0x10a   : >> { %v1448_v58 = vadd.f32 %v21193_v53, %v1296_v55  ;;  %v1295_v59 = vadd.f32 %v1256_v56, %v1143_v30 }
 0x10b   : >> { %v21182_v60 = vpop.f32.mrf.mxu1  ;;  %v21196_v61 = vpop.f32.mrf.mxu0 }
 0x10c   : >> { %v1447_v62 = vadd.f32 %v1408_v57, %v1295_v59  ;;  %v1298_v63 = vadd.f32 %v21182_v60, %v1146_v34 }
 0x10d   : >> { %v1266_v2 = vpop.f32.mrf.mxu1  ;;  %v1418_v3 = vpop.f32.mrf.mxu0 }
 0x10e   : >> { %v1450_v4 = vadd.f32 %v21196_v61, %v1298_v63  ;;  %v1297_v5 = vadd.f32 %v1266_v2, %v1145_v38 }
 0x10f   : >> { %v21185_v6 = vpop.f32.mrf.mxu1  ;;  %v21199_v7 = vpop.f32.mrf.mxu0 }
 0x110   : >> { %v1449_v8 = vadd.f32 %v1418_v3, %v1297_v5  ;;  %v1300_v9 = vadd.f32 %v21185_v6, %v1148_v42 }
 0x111   : >> { %v1276_v10 = vpop.f32.mrf.mxu1  ;;  %v1428_v11 = vpop.f32.mrf.mxu0 }
 0x112   : >> { %v1452_v12 = vadd.f32 %v21199_v7, %v1300_v9  ;;  %v1299_v13 = vadd.f32 %v1276_v10, %v1147_v46 }
 0x113   : >> { %v21188_v14 = vpop.f32.mrf.mxu1  ;;  %v21202_v15 = vpop.f32.mrf.mxu0 }
 0x114   : >> { %v1451_v16 = vadd.f32 %v1428_v11, %v1299_v13  ;;  %v1302_v17 = vadd.f32 %v21188_v14, %v1150_v50 }
 0x115   : >> { %v1286_v18 = vpop.f32.mrf.mxu1  ;;  %v1438_v19 = vpop.f32.mrf.mxu0 }
 0x116   : >> { %v1454_v20 = vadd.f32 %v21202_v15, %v1302_v17  ;;  %v1301_v21 = vadd.f32 %v1286_v18, %v1149_v54 }
 0x117   : >> { %v21207_v22 = vpop.f32.mrf.mxu1  ;;  %v21221_v23 = vpop.f32.mrf.mxu0 }
 0x118   : >> { %v1453_v24 = vadd.f32 %v1438_v19, %v1301_v21  ;;  %v1600_v25 = vadd.f32 %v21207_v22, %v1448_v58 }
 0x119   : >> { %v1560_v26 = vpop.f32.mrf.mxu1  ;;  %v1712_v27 = vpop.f32.mrf.mxu0 }
 0x11a   : >> { %v1752_v28 = vadd.f32 %v21221_v23, %v1600_v25  ;;  %v1599_v29 = vadd.f32 %v1560_v26, %v1447_v62 }
 0x11b   : >> { %v21210_v30 = vpop.f32.mrf.mxu1  ;;  %v21224_v31 = vpop.f32.mrf.mxu0 }
 0x11c   : >> { %v1751_v32 = vadd.f32 %v1712_v27, %v1599_v29  ;;  %v1602_v33 = vadd.f32 %v21210_v30, %v1450_v4 }
 0x11d   : >> { %v1570_v34 = vpop.f32.mrf.mxu1  ;;  %v1722_v35 = vpop.f32.mrf.mxu0 }
 0x11e   : >> { %v1754_v36 = vadd.f32 %v21224_v31, %v1602_v33  ;;  %v1601_v37 = vadd.f32 %v1570_v34, %v1449_v8 }
 0x11f   : >> { %v21213_v38 = vpop.f32.mrf.mxu1  ;;  %v21227_v39 = vpop.f32.mrf.mxu0 }
 0x120   : >> { %v1753_v40 = vadd.f32 %v1722_v35, %v1601_v37  ;;  %v1604_v41 = vadd.f32 %v21213_v38, %v1452_v12 }
 0x121   : >> { %v1580_v42 = vpop.f32.mrf.mxu1  ;;  %v1732_v43 = vpop.f32.mrf.mxu0 }
 0x122   : >> { %v1756_v44 = vadd.f32 %v21227_v39, %v1604_v41  ;;  %v1603_v45 = vadd.f32 %v1580_v42, %v1451_v16 }
 0x123   : >> { %v21216_v46 = vpop.f32.mrf.mxu1  ;;  %v21230_v47 = vpop.f32.mrf.mxu0 }
 0x124   : >> { %v1755_v48 = vadd.f32 %v1732_v43, %v1603_v45  ;;  %v1606_v49 = vadd.f32 %v21216_v46, %v1454_v20 }
 0x125   : >> { %v1590_v50 = vpop.f32.mrf.mxu1  ;;  %v1742_v51 = vpop.f32.mrf.mxu0 }
 0x126   : >> { %v1758_v52 = vadd.f32 %v21230_v47, %v1606_v49  ;;  %v1605_v53 = vadd.f32 %v1590_v50, %v1453_v24 }
 0x127   : >> { %v21235_v54 = vpop.f32.mrf.mxu1  ;;  %v21249_v55 = vpop.f32.mrf.mxu0 }
 0x128   : >> { %v1757_v56 = vadd.f32 %v1742_v51, %v1605_v53  ;;  %v1904_v57 = vadd.f32 %v21235_v54, %v1752_v28 }
 0x129   : >> { %v1864_v58 = vpop.f32.mrf.mxu1  ;;  %v2016_v59 = vpop.f32.mrf.mxu0 }
 0x12a   : >> { %v2056_v60 = vadd.f32 %v21249_v55, %v1904_v57  ;;  %v1903_v61 = vadd.f32 %v1864_v58, %v1751_v32 }
 0x12b   : >> { %v21238_v62 = vpop.f32.mrf.mxu1  ;;  %v21252_v63 = vpop.f32.mrf.mxu0 }
 0x12c   : >> { %v2055_v2 = vadd.f32 %v2016_v59, %v1903_v61  ;;  %v1906_v3 = vadd.f32 %v21238_v62, %v1754_v36 }
 0x12d   : >> { %v1874_v4 = vpop.f32.mrf.mxu1  ;;  %v2026_v5 = vpop.f32.mrf.mxu0 }
 0x12e   : >> { %v2058_v6 = vadd.f32 %v21252_v63, %v1906_v3  ;;  %v1905_v7 = vadd.f32 %v1874_v4, %v1753_v40 }
 0x12f   : >> { %v21241_v8 = vpop.f32.mrf.mxu1  ;;  %v21255_v9 = vpop.f32.mrf.mxu0 }
 0x130   : >> { %v2057_v10 = vadd.f32 %v2026_v5, %v1905_v7  ;;  %v1908_v11 = vadd.f32 %v21241_v8, %v1756_v44 }
 0x131   : >> { %v1884_v12 = vpop.f32.mrf.mxu1  ;;  %v2036_v13 = vpop.f32.mrf.mxu0 }
 0x132   : >> { %v2060_v14 = vadd.f32 %v21255_v9, %v1908_v11  ;;  %v1907_v15 = vadd.f32 %v1884_v12, %v1755_v48 }
 0x133   : >> { %v21244_v16 = vpop.f32.mrf.mxu1  ;;  %v21258_v17 = vpop.f32.mrf.mxu0 }
 0x134   : >> { %v2059_v18 = vadd.f32 %v2036_v13, %v1907_v15  ;;  %v1910_v19 = vadd.f32 %v21244_v16, %v1758_v52 }
 0x135   : >> { %v1894_v20 = vpop.f32.mrf.mxu1  ;;  %v2046_v21 = vpop.f32.mrf.mxu0 }
 0x136   : >> { %v2062_v22 = vadd.f32 %v21258_v17, %v1910_v19  ;;  %v1909_v23 = vadd.f32 %v1894_v20, %v1757_v56 }
 0x137   : >> { %v21263_v24 = vpop.f32.mrf.mxu1  ;;  %v21277_v25 = vpop.f32.mrf.mxu0 }
 0x138   : >> { %v2061_v26 = vadd.f32 %v2046_v21, %v1909_v23  ;;  %v2208_v27 = vadd.f32 %v21263_v24, %v2056_v60 }
 0x139   : >> { %v2168_v28 = vpop.f32.mrf.mxu1  ;;  %v2320_v29 = vpop.f32.mrf.mxu0 }
 0x13a   : >> { %v23908_v30 = vadd.f32 %v21277_v25, %v2208_v27  ;;  %v2207_v31 = vadd.f32 %v2168_v28, %v2055_v2 }
 0x13b   : >> { %v21266_v32 = vpop.f32.mrf.mxu1  ;;  %v21280_v33 = vpop.f32.mrf.mxu0 }
 0x13c   : >> { %v23910_v34 = vadd.f32 %v2320_v29, %v2207_v31  ;;  %v2210_v35 = vadd.f32 %v21266_v32, %v2058_v6 }
 0x13d   : >> { %v2178_v36 = vpop.f32.mrf.mxu1  ;;  %v2330_v37 = vpop.f32.mrf.mxu0 }
 0x13e   : >> { %v23912_v38 = vadd.f32 %v21280_v33, %v2210_v35  ;;  %v2209_v39 = vadd.f32 %v2178_v36, %v2057_v10 }
 0x13f   : >> { %v21269_v40 = vpop.f32.mrf.mxu1  ;;  %v21283_v41 = vpop.f32.mrf.mxu0 }
 0x140   : >> { %v23914_v42 = vadd.f32 %v2330_v37, %v2209_v39  ;;  %v2212_v43 = vadd.f32 %v21269_v40, %v2060_v14 }
 0x141   : >> { %v2188_v44 = vpop.f32.mrf.mxu1  ;;  %v2340_v45 = vpop.f32.mrf.mxu0 }
 0x142   : >> { %v23916_v46 = vadd.f32 %v21283_v41, %v2212_v43  ;;  %v2211_v47 = vadd.f32 %v2188_v44, %v2059_v18 }
 0x143   : >> { %v21272_v48 = vpop.f32.mrf.mxu1  ;;  %v21286_v49 = vpop.f32.mrf.mxu0 }
 0x144   : >> { %v23918_v50 = vadd.f32 %v2340_v45, %v2211_v47  ;;  %v2214_v51 = vadd.f32 %v21272_v48, %v2062_v22 }
 0x145   : >> { %v2198_v52 = vpop.f32.mrf.mxu1  ;;  %v2350_v53 = vpop.f32.mrf.mxu0 }
 0x146   : >> { %v23920_v54 = vadd.f32 %v21286_v49, %v2214_v51  ;;  %v2213_v55 = vadd.f32 %v2198_v52, %v2061_v26 }
 0x147   : >> { %v21291_v56 = vpop.f32.mrf.mxu1  ;;  %v21305_v57 = vpop.f32.mrf.mxu0 }
 0x148   : >> { %v23922_v58 = vadd.f32 %v2350_v53, %v2213_v55  ;;  %v2512_v53 = vadd.f32 %v21291_v56, %v23908_v30 }
 0x149   : >> { %v2472_v59 = vpop.f32.mrf.mxu1  ;;  %v2624_v60 = vpop.f32.mrf.mxu0 }
 0x14a   : >> { %v2511_v0 = vadd.f32 %v2472_v59, %v23910_v34 }
 0x14b   : >> { %v21294_v61 = vpop.f32.mrf.mxu1  ;;  %v23924_v62 = vpop.f32.mrf.mxu0 }
 0x14d   : >> { %v2482_v63 = vpop.f32.mrf.mxu1  ;;  %v23926_v2 = vpop.f32.mrf.mxu0 }
 0x14e   : >> { %v2513_v30 = vadd.f32 %v2482_v63, %v23914_v42 }
 0x14f   : >> { %v21297_v3 = vpop.f32.mrf.mxu1  ;;  %v23928_v4 = vpop.f32.mrf.mxu0 }
 0x151   : >> { %v2492_v5 = vpop.f32.mrf.mxu1  ;;  %v23930_v6 = vpop.f32.mrf.mxu0 }
 0x153   : >> { %v23932_v7 = vpop.f32.mrf.mxu1  ;;  %v23934_v8 = vpop.f32.mrf.mxu0 }
 0x155   : >> { %v23936_v9 = vpop.f32.mrf.mxu1  ;;  %v23938_v10 = vpop.f32.mrf.mxu0 }
 0x157   : >> { %v21319_v11 = vpop.f32.mrf.mxu1  ;;  %v21333_v12 = vpop.f32.mrf.mxu0 }
 0x159   : >> { %v2776_v13 = vpop.f32.mrf.mxu1  ;;  %v2928_v14 = vpop.f32.mrf.mxu0 }
 0x15b   : >> { %v21322_v15 = vpop.f32.mrf.mxu1  ;;  %v23940_v16 = vpop.f32.mrf.mxu0 }
 0x15d   : >> { %v2786_v17 = vpop.f32.mrf.mxu1  ;;  %v23942_v18 = vpop.f32.mrf.mxu0 }
 0x15f   : >> { %v21325_v19 = vpop.f32.mrf.mxu1  ;;  %v23944_v20 = vpop.f32.mrf.mxu0 }
 0x161   : >> { %v23946_v21 = vpop.f32.mrf.mxu1  ;;  %v23948_v22 = vpop.f32.mrf.mxu0 }
 0x163   : >> { %v23950_v23 = vpop.f32.mrf.mxu1  ;;  %v23952_v24 = vpop.f32.mrf.mxu0 }
 0x165   : >> { %v23954_v25 = vpop.f32.mrf.mxu1  ;;  %v23956_v26 = vpop.f32.mrf.mxu0 }
 0x166   : >> { %27344 = vst [vmem:[#allocation13_spill] sm:$0xff] %v23956_v26  ;;  %v2516_v26 = vadd.f32 %v21297_v3, %v23916_v46  ;;  %v2518_v46 = vadd.f32 %v23932_v7, %v23920_v54 }
 0x167   : >> { %v21347_v27 = vpop.f32.mrf.mxu1  ;;  %v21361_v28 = vpop.f32.mrf.mxu0 }
 0x168   : >> { %v2668_v63 = vadd.f32 %v23928_v4, %v2516_v26  ;;  %v2670_v54 = vadd.f32 %v23934_v8, %v2518_v46 }
 0x169   : >> { %v3080_v29 = vpop.f32.mrf.mxu1  ;;  %v23958_v31 = vpop.f32.mrf.mxu0 }
 0x16b   : >> { %v21350_v32 = vpop.f32.mrf.mxu1  ;;  %v23960_v33 = vpop.f32.mrf.mxu0 }
 0x16d   : >> { %v23962_v35 = vpop.f32.mrf.mxu1  ;;  %v23964_v36 = vpop.f32.mrf.mxu0 }
 0x16f   : >> { %v23966_v37 = vpop.f32.mrf.mxu1  ;;  %v23968_v39 = vpop.f32.mrf.mxu0 }
 0x170   : >> { %27345 = vst [vmem:[#allocation14_spill] sm:$0xff] %v23968_v39 }
 0x171   : >> { %v23970_v40 = vpop.f32.mrf.mxu1  ;;  %v23972_v41 = vpop.f32.mrf.mxu0 }
 0x172   : >> { %27346 = vst [vmem:[#allocation15_spill] sm:$0xff] %v23972_v41 }
 0x173   : >> { %v23974_v43 = vpop.f32.mrf.mxu1  ;;  %v23976_v44 = vpop.f32.mrf.mxu0 }
 0x174   : >> { %27347 = vst [vmem:[#allocation16_spill] sm:$0xff] %v23974_v43  ;;  %27348 = vst [vmem:[#allocation17_spill] sm:$0xff] %v23976_v44 }
 0x175   : >> { %v23978_v45 = vpop.f32.mrf.mxu1  ;;  %v23980_v47 = vpop.f32.mrf.mxu0 }
 0x176   : >> { %27349 = vst [vmem:[#allocation18_spill] sm:$0xff] %v23978_v45  ;;  %27350 = vst [vmem:[#allocation19_spill] sm:$0xff] %v23980_v47  ;;  %v2664_v45 = vadd.f32 %v21305_v57, %v2512_v53  ;;  %v2514_v47 = vadd.f32 %v21294_v61, %v23912_v38  ;;  %v2515_v57 = vadd.f32 %v2492_v5, %v23918_v50 }
 0x177   : >> { %v21375_v48 = vpop.f32.mrf.mxu1  ;;  %v23982_v49 = vpop.f32.mrf.mxu0 }
 0x178   : >> { %v2816_v56 = vadd.f32 %v21319_v11, %v2664_v45  ;;  %v2666_v59 = vadd.f32 %v23924_v62, %v2514_v47  ;;  %v2667_v5 = vadd.f32 %v23930_v6, %v2515_v57  ;;  %v2517_v45 = vadd.f32 %v23936_v9, %v23922_v58 }
 0x179   : >> { %v3384_v51 = vpop.f32.mrf.mxu1  ;;  %v23984_v52 = vpop.f32.mrf.mxu0  ;;  %v2822_v9 = vadd.f32 %v23950_v23, %v2670_v54  ;;  %v27358_v46 = vld [vmem:[#allocation15_spill] sm:$0xff] }
 0x17a   : >> { %27351 = vst [vmem:[#allocation20_spill] sm:$0xff] %v23984_v52  ;;  %v2663_v52 = vadd.f32 %v2624_v60, %v2511_v0  ;;  %v2665_v0 = vadd.f32 %v23926_v2, %v2513_v30  ;;  %v2968_v60 = vadd.f32 %v21333_v12, %v2816_v56  ;;  %v2818_v42 = vadd.f32 %v21322_v15, %v2666_v59 }
 0x17b   : >> { %v23987_v55 = vpop.f32.mrf.mxu1  ;;  %v23989_v1 = vpop.f32.mrf.mxu0  ;;  %v2820_v2 = vadd.f32 %v21325_v19, %v2668_v63  ;;  %v2819_v7 = vadd.f32 %v23946_v21, %v2667_v5  ;;  %v2669_v6 = vadd.f32 %v23938_v10, %v2517_v45  ;;  %v2974_v23 = vadd.f32 %v23952_v24, %v2822_v9 }
 0x17c   : >> { %27352 = vst [vmem:[#allocation21_spill] sm:$0xff] %v23989_v1  ;;  %v3120_v50 = vadd.f32 %v21347_v27, %v2968_v60  ;;  %v2970_v4 = vadd.f32 %v23940_v16, %v2818_v42 }
 0x17d   : >> { %v23992_v41 = vpop.f32.mrf.mxu1  ;;  %v23994_v44 = vpop.f32.mrf.mxu0  ;;  %v2972_v58 = vadd.f32 %v23944_v20, %v2820_v2  ;;  %v2971_v21 = vadd.f32 %v23948_v22, %v2819_v7  ;;  %v2821_v53 = vadd.f32 %v23954_v25, %v2669_v6  ;;  %v27354_v25 = vld [vmem:[#allocation13_spill] sm:$0xff]  ;;  %v27363_v6 = vld [vmem:[#allocation19_spill] sm:$0xff] }
 0x17e   : >> { %27353 = vst [vmem:[#allocation22_spill] sm:$0xff] %v23994_v44  ;;  %v2815_v44 = vadd.f32 %v2776_v13, %v2663_v52  ;;  %v2817_v13 = vadd.f32 %v2786_v17, %v2665_v0  ;;  %v3272_v17 = vadd.f32 %v21361_v28, %v3120_v50  ;;  %v3122_v27 = vadd.f32 %v21350_v32, %v2970_v4  ;;  %v27356_v0 = vld [vmem:[#allocation16_spill] sm:$0xff]  ;;  %v27361_v4 = vld [vmem:[#allocation17_spill] sm:$0xff] }
 0x17f   : >> { %v23997_v43 = vpop.f32.mrf.mxu1  ;;  %v23999_v39 = vpop.f32.mrf.mxu0  ;;  %v3123_v30 = vadd.f32 %v23970_v40, %v2971_v21  ;;  %v2973_v59 = vadd.f32 %v27354_v25, %v2821_v53  ;;  %v3126_v60 = vadd.f32 %v27356_v0, %v2974_v23 }
 0x180   : >> { %v2967_v62 = vadd.f32 %v2928_v14, %v2815_v44  ;;  %v2969_v14 = vadd.f32 %v23942_v18, %v2817_v13  ;;  %v3124_v18 = vadd.f32 %v23966_v37, %v2972_v58  ;;  %v3274_v10 = vadd.f32 %v23960_v33, %v3122_v27  ;;  %v27355_v37 = vld [vmem:[#allocation14_spill] sm:$0xff] }
 0x181   : >> { %v24003_v1 = vpop.f32.mrf.mxu1  ;;  %v24005_v34 = vpop.f32.mrf.mxu0  ;;  %v27357_v42 = vld [vmem:[#allocation20_spill] sm:$0xff] }
 0x182   : >> { %v3119_v26 = vadd.f32 %v3080_v29, %v2967_v62  ;;  %v3121_v8 = vadd.f32 %v23962_v35, %v2969_v14  ;;  %v3424_v29 = vadd.f32 %v21375_v48, %v3272_v17  ;;  %v3426_v22 = vadd.f32 %v23987_v55, %v3274_v10 }
 0x183   : >> { %v24009_v38 = vpop.f32.mrf.mxu1  ;;  %v24011_v61 = vpop.f32.mrf.mxu0  ;;  %v3276_v57 = vadd.f32 %v27355_v37, %v3124_v18  ;;  %v3275_v62 = vadd.f32 %v27358_v46, %v3123_v30  ;;  %v27360_v5 = vld [vmem:[#allocation21_spill] sm:$0xff] }
 0x184   : >> { %v3271_v16 = vadd.f32 %v23958_v31, %v3119_v26  ;;  %v3273_v35 = vadd.f32 %v23964_v36, %v3121_v8  ;;  %v3576_v48 = vadd.f32 %v23982_v49, %v3424_v29  ;;  %v27359_v36 = vld [vmem:[#allocation18_spill] sm:$0xff]  ;;  %v3578_v45 = vadd.f32 %v27360_v5, %v3426_v22  ;;  %v27364_v22 = vld [vmem:[#allocation11_spill] sm:$0xff] }
 0x185   : >> { %v24017_v3 = vpop.f32.mrf.mxu1  ;;  %v24019_v11 = vpop.f32.mrf.mxu0  ;;  %v3125_v13 = vadd.f32 %v27359_v36, %v2973_v59  ;;  %v3428_v49 = vadd.f32 %v23997_v43, %v3276_v57  ;;  %v3278_v26 = vadd.f32 %v27361_v4, %v3126_v60  ;;  %v3427_v54 = vadd.f32 %v24003_v1, %v3275_v62  ;;  %v27362_v17 = vld [vmem:[#allocation22_spill] sm:$0xff] }
 0x186   : >> { %v3423_v20 = vadd.f32 %v3384_v51, %v3271_v16  ;;  %v3425_v40 = vadd.f32 %v23992_v41, %v3273_v35 }
 0x187   : >> { %v21403_v12 = vpop.f32.mrf.mxu1  ;;  %v21417_v15 = vpop.f32.mrf.mxu0  ;;  %v3277_v58 = vadd.f32 %v27363_v6, %v3125_v13  ;;  %v3580_v9 = vadd.f32 %v23999_v39, %v3428_v49  ;;  %v3430_v43 = vadd.f32 %v24009_v38, %v3278_v26  ;;  %v3579_v53 = vadd.f32 %v24005_v34, %v3427_v54 }
 0x188   : >> { %v3575_v24 = vadd.f32 %v27357_v42, %v3423_v20  ;;  %v3728_v63 = vadd.f32 %v21403_v12, %v3576_v48  ;;  %v3577_v41 = vadd.f32 %v27362_v17, %v3425_v40 }
 0x189   : >> { %v3688_v47 = vpop.f32.mrf.mxu1  ;;  %v3840_v52 = vpop.f32.mrf.mxu0  ;;  %v3429_v1 = vadd.f32 %v24017_v3, %v3277_v58  ;;  %v3582_v30 = vadd.f32 %v24011_v61, %v3430_v43 }
 0x18a   : >> { %v3727_v2 = vadd.f32 %v3688_v47, %v3575_v24  ;;  %v3880_v12 = vadd.f32 %v21417_v15, %v3728_v63 }
 0x18b   : >> { %v21406_v19 = vpop.f32.mrf.mxu1  ;;  %v21420_v44 = vpop.f32.mrf.mxu0  ;;  %v3581_v34 = vadd.f32 %v24019_v11, %v3429_v1 }
 0x18c   : >> { %v3730_v27 = vadd.f32 %v21406_v19, %v3578_v45  ;;  %v3879_v29 = vadd.f32 %v3840_v52, %v3727_v2 }
 0x18d   : >> { %v3698_v28 = vpop.f32.mrf.mxu1  ;;  %v3850_v32 = vpop.f32.mrf.mxu0 }
 0x18e   : >> { %v3729_v47 = vadd.f32 %v3698_v28, %v3577_v41  ;;  %v3882_v15 = vadd.f32 %v21420_v44, %v3730_v27 }
 0x18f   : >> { %v21409_v56 = vpop.f32.mrf.mxu1  ;;  %v21423_v31 = vpop.f32.mrf.mxu0 }
 0x190   : >> { %v3732_v18 = vadd.f32 %v21409_v56, %v3580_v9  ;;  %v3881_v48 = vadd.f32 %v3850_v32, %v3729_v47 }
 0x191   : >> { %v3708_v33 = vpop.f32.mrf.mxu1  ;;  %v3860_v51 = vpop.f32.mrf.mxu0 }
 0x192   : >> { %v3731_v39 = vadd.f32 %v3708_v33, %v3579_v53  ;;  %v3884_v59 = vadd.f32 %v21423_v31, %v3732_v18 }
 0x193   : >> { %v21412_v55 = vpop.f32.mrf.mxu1  ;;  %v21426_v50 = vpop.f32.mrf.mxu0 }
 0x194   : >> { %v3734_v3 = vadd.f32 %v21412_v55, %v3582_v30  ;;  %v3883_v60 = vadd.f32 %v3860_v51, %v3731_v39 }
 0x195   : >> { %v3718_v7 = vpop.f32.mrf.mxu1  ;;  %v3870_v14 = vpop.f32.mrf.mxu0 }
 0x196   : >> { %v3733_v33 = vadd.f32 %v3718_v7, %v3581_v34  ;;  %v3886_v63 = vadd.f32 %v21426_v50, %v3734_v3 }
 0x197   : >> { %v21431_v16 = vpop.f32.mrf.mxu1  ;;  %v21445_v8 = vpop.f32.mrf.mxu0 }
 0x198   : >> { %v4032_v21 = vadd.f32 %v21431_v16, %v3880_v12  ;;  %v3885_v55 = vadd.f32 %v3870_v14, %v3733_v33 }
 0x199   : >> { %v3992_v10 = vpop.f32.mrf.mxu1  ;;  %v4144_v20 = vpop.f32.mrf.mxu0 }
 0x19a   : >> { %v4184_v19 = vadd.f32 %v21445_v8, %v4032_v21  ;;  %v4031_v23 = vadd.f32 %v3992_v10, %v3879_v29 }
 0x19b   : >> { %v21434_v35 = vpop.f32.mrf.mxu1  ;;  %v21448_v38 = vpop.f32.mrf.mxu0 }
 0x19c   : >> { %v4192_v52 = vadd.f32 %v27364_v22, %v4184_v19  ;;  %v4183_v28 = vadd.f32 %v4144_v20, %v4031_v23  ;;  %v4034_v25 = vadd.f32 %v21434_v35, %v3882_v15  ;;  %v19556_v35 = vld [vmem:[%s27326_s3 + $0x8] sm:$0x3f] (%p402_p11) }
 0x19d   : >> { %v4002_v56 = vpop.f32.mrf.mxu1  ;;  %v4154_v37 = vpop.f32.mrf.mxu0 }
 0x19e   : >> { %v4200_v44 = vmax.f32 %v4192_v52, 0.0  ;;  %v4191_v57 = vadd.f32 %v27364_v22, %v4183_v28  ;;  %v4186_v0 = vadd.f32 %v21448_v38, %v4034_v25  ;;  %v4033_v61 = vadd.f32 %v4002_v56, %v3881_v48  ;;  %v19565_v28 = vld [vmem:[%s27326_s3 + $0x10] sm:$0x3f] (%p402_p11) }
 0x19f   : >> { %v21437_v42 = vpop.f32.mrf.mxu1  ;;  %v21451_v32 = vpop.f32.mrf.mxu0  ;;  %v23180_v38 = vmov (%p402_p11), 0.0  }
 0x1a0   : >> { %4209 = vst.msk [vmem:[#allocation4 + $0x8] sm:$0xff] %vm4207_vm2, %v4200_v44  ;;  %v4199_v24 = vmax.f32 %v4191_v57, 0.0  ;;  %v4194_v40 = vadd.f32 %v27364_v22, %v4186_v0  ;;  %v4185_v11 = vadd.f32 %v4154_v37, %v4033_v61  ;;  %v4036_v31 = vadd.f32 %v21437_v42, %v3884_v59  ;;  %21455 = vmatprep.subr.mxu0 (%p402_p11), %v23180_v38  ;;  %v19575_v59 = vld [vmem:[%s27326_s3 + $0x20] sm:$0x3f] (%p402_p11)  ;;  %v19570_v37 = vld [vmem:[%s27326_s3 + $0x18] sm:$0x3f] (%p402_p11) }
 0x1a1   : >> { %v4012_v46 = vpop.f32.mrf.mxu1  ;;  %v4164_v62 = vpop.f32.mrf.mxu0  ;;  %23059 = vmatprep.subr.mxu1 (%p402_p11), %v23180_v38  ;;  %21456 = vmatpush3.msk.msra.mxu0 (%p402_p11), %vm4262_vm5, %v19556_v35 }
 0x1a2   : >> { %4208 = vst.msk [vmem:[#allocation4] sm:$0xff] %vm4207_vm2, %v4199_v24  ;;  %v4202_v36 = vmax.f32 %v4194_v40, 0.0  ;;  %v4193_v13 = vadd.f32 %v27364_v22, %v4185_v11  ;;  %v4188_v49 = vadd.f32 %v21451_v32, %v4036_v31  ;;  %v4035_v51 = vadd.f32 %v4012_v46, %v3883_v60  ;;  %23060 = vmatpush3.msk.msra.mxu1 (%p402_p11), %vm4262_vm5, %v19556_v35  ;;  %v19585_v60 = vld [vmem:[%s27326_s3 + $0x30] sm:$0x3f] (%p402_p11)  ;;  %v19580_v32 = vld [vmem:[%s27326_s3 + $0x28] sm:$0x3f] (%p402_p11) }
 0x1a3   : >> { %v21440_v5 = vpop.f32.mrf.mxu1  ;;  %v21454_v45 = vpop.f32.mrf.mxu0  ;;  %21457 = vmatprep.mubr.msk.f32.mxu0 (%p402_p11), %vm23181_vm6, %v23180_v38  ;;  %21460 = vmatprep.mubr.msk.f32.mxu1 (%p402_p11), %vm23181_vm6, %v23180_v38 }
 0x1a4   : >> { %4211 = vst.msk [vmem:[#allocation4 + $0x18] sm:$0xff] %vm4207_vm2, %v4202_v36  ;;  %v4201_v2 = vmax.f32 %v4193_v13, 0.0  ;;  %v4196_v4 = vadd.f32 %v27364_v22, %v4188_v49  ;;  %v4187_v26 = vadd.f32 %v4164_v62, %v4035_v51  ;;  %v4038_v54 = vadd.f32 %v21440_v5, %v3886_v63  ;;  %21466 = vmatprep.subr.mxu1 (%p402_p11), %v23180_v38  ;;  %v19595_v63 = vld [vmem:[%s27326_s3 + $0x40] sm:$0x3f] (%p402_p11)  ;;  %v19590_v36 = vld [vmem:[%s27326_s3 + $0x38] sm:$0x3f] (%p402_p11) }
 0x1a5   : >> { %v4022_v50 = vpop.f32.mrf.mxu1  ;;  %v4174_v27 = vpop.f32.mrf.mxu0  ;;  %21477 = vmatprep.subr.mxu0 (%p402_p11), %v23180_v38 }
 0x1a6   : >> { %4210 = vst.msk [vmem:[#allocation4 + $0x10] sm:$0xff] %vm4207_vm2, %v4201_v2  ;;  %v4204_v7 = vmax.f32 %v4196_v4, 0.0  ;;  %v4195_v17 = vadd.f32 %v27364_v22, %v4187_v26  ;;  %v4190_v41 = vadd.f32 %v21454_v45, %v4038_v54  ;;  %v4037_v12 = vadd.f32 %v4022_v50, %v3885_v55  ;;  %v19605_v55 = vld [vmem:[%s27326_s3 + $0x50] sm:$0x3f] (%p402_p11)  ;;  %v19600_v45 = vld [vmem:[%s27326_s3 + $0x48] sm:$0x3f] (%p402_p11) }
 0x1a7   : > { %v19615_v50 = vld [vmem:[%s27326_s3 + $0x60] sm:$0x3f] (%p402_p11) }
 0x1a8   : >> { %4213 = vst.msk [vmem:[#allocation4 + $0x28] sm:$0xff] %vm4207_vm2, %v4204_v7  ;;  %v4203_v14 = vmax.f32 %v4195_v17, 0.0  ;;  %v4198_v6 = vadd.f32 %v27364_v22, %v4190_v41  ;;  %v4189_v58 = vadd.f32 %v4174_v27, %v4037_v12  ;;  %v19610_v17 = vld [vmem:[%s27326_s3 + $0x58] sm:$0x3f] (%p402_p11) }
 0x1a9   : >> { %v4217_v8 = vld [vmem:[#allocation4] ss:$2 sm:$0xff]  ;;  %v4221_v29 = vld [vmem:[#allocation4 + $0x1] ss:$2 sm:$0xff] }
 0x1aa   : >> { %4212 = vst.msk [vmem:[#allocation4 + $0x20] sm:$0xff] %vm4207_vm2, %v4203_v14  ;;  %v4206_v9 = vmax.f32 %v4198_v6, 0.0  ;;  %v4197_v43 = vadd.f32 %v27364_v22, %v4189_v58  ;;  %v4224_v53 = vmax.f32 %v4217_v8, %v4221_v29  ;;  %v4246_v22 = vld [vmem:[%s27326_s3] sm:$0x3f] (%p402_p11)  ;;  %v19625_v14 = vld [vmem:[%s27326_s3 + $0x70] sm:$0x3f] (%p402_p11) }
 0x1ab   : > { %v19635_v29 = vld [vmem:[%s27326_s3 + $0x80] sm:$0x3f] (%p402_p11) }
 0x1ac   : >> { %4216 = vst.msk [vmem:[#allocation4 + $0x38] sm:$0xf] %vm4215_vm3, %v4206_v9  ;;  %v4205_v16 = vmax.f32 %v4197_v43, 0.0  ;;  %v19620_v9 = vld [vmem:[%s27326_s3 + $0x68] sm:$0x3f] (%p402_p11) }
 0x1ad   : >> { %v4219_v18 = vld [vmem:[#allocation4 + $0x10] ss:$2 sm:$0x3f]  ;;  %v4223_v10 = vld [vmem:[#allocation4 + $0x11] ss:$2 sm:$0x3f] }
 0x1ae   : >> { %4214 = vst.msk [vmem:[#allocation4 + $0x30] sm:$0xff] %vm4207_vm2, %v4205_v16  ;;  %v4225_v23 = vmax.f32 %v4219_v18, %v4223_v10 }
 0x1b1   : >> { %v4227_v47 = vld [vmem:[#allocation4 + $0x20] ss:$2 sm:$0xff]  ;;  %v4231_v21 = vld [vmem:[#allocation4 + $0x21] ss:$2 sm:$0xff] }
 0x1b2   : >> { %v4234_v1 = vmax.f32 %v4227_v47, %v4231_v21  ;;  %v19630_v21 = vld [vmem:[%s27326_s3 + $0x78] sm:$0x3f] (%p402_p11) }
 0x1b4   : >> { %v4236_v20 = vmax.f32 %v4224_v53, %v4234_v1 }
 0x1b5   : >> { %v4229_v15 = vld [vmem:[#allocation4 + $0x30] ss:$2 sm:$0x3f]  ;;  %v4233_v19 = vld [vmem:[#allocation4 + $0x31] ss:$2 sm:$0x3f] }
 0x1b6   : >> { %4240 = vst.msk [vmem:[%s4239_s30] sm:$0xff] %vm4207_vm2, %v4236_v20  ;;  %v4235_v30 = vmax.f32 %v4229_v15, %v4233_v19  ;;  %404 = sbr.rel (!%p402_p11) target bundleno = 26 (0x1a), region = 238  ;;  %v19645_v20 = vld [vmem:[%s27326_s3 + $0x90] sm:$0x3f] (%p402_p11) }
 0x1b8   : >> { %v4237_v39 = vmax.f32 %v4225_v23, %v4235_v30  ;;  %v19640_v23 = vld [vmem:[%s27326_s3 + $0x88] sm:$0x3f] (%p402_p11) }
 0x1ba   : >> { %4242 = vst.msk [vmem:[%s4239_s30 + $0x8] sm:$0x3f] %vm4241_vm4, %v4237_v39  ;;  %s23114_s30 = sshll.u32 (%p402_p11), %s23182_s21, 4  ;;  %s23115_s30 = int_to_ptr.vmem [resolvable:$false] %s23114_s30 }
 0x1bb   : > { %s23116_s14 = scalar_lea.vmem %s23115_s30, 32  ;;  %p23117_p1 = scmp.lt.s32.totalorder %s18947_s25, %s23115_s30 }
 0x1bc   : > { %p23118_p2 = scmp.lt.s32.totalorder %s23116_s14, %s23110_s24 }
 0x1be   : > { %p23119_p3 = por %p23118_p2, %p23117_p1 }
 0x1c0   : > { %p23120_p4 = pnand %p23119_p3, %p23113_p0 }
 0x1c1   : > { %v4247_v48 = vld [vmem:[#allocation2 + $0x1] sm:$0xff]  ;;  %v4248_v52 = vld [vmem:[#allocation2 + $0x9] sm:$0xff]  ;;  %v24102_v25 = vld [vmem:[#allocation2 + $0x11] sm:$0xff] }
 0x1c2   : > { %21458 = vmatmul.mubr.msk.f32.vlgmr.msra.gmra.mxu0 %vm4207_vm2, %v4247_v48  ;;  %21461 = vmatmul.mubr.msk.f32.vlgmr.msra.gmra.mxu1 %vm4207_vm2, %v4248_v52  ;;  %v4438_v34 = vld [vmem:[#allocation2 + $0x2] sm:$0xff]  ;;  %v4439_v56 = vld [vmem:[#allocation2 + $0xa] sm:$0xff]  ;;  %v24131_v57 = vld [vmem:[#allocation2 + $0x12] sm:$0xff] }
 0x1c3   : > { %21467 = vmatpush3.msk.msra.mxu1 %vm4262_vm5, %v4246_v22  ;;  %21463 = vmatprep.mubr.msk.f32.mxu1 %vm23181_vm6, %v23180_v38  ;;  %v4243_v3 = vld [vmem:[#allocation2] sm:$0xff]  ;;  %v4244_v44 = vld [vmem:[#allocation2 + $0x8] sm:$0xff]  ;;  %v4245_v0 = vld [vmem:[#allocation2 + $0x10] sm:$0xff] }
 0x1c4   : > { %21478 = vmatpush3.msk.msra.mxu0 %vm4262_vm5, %v19565_v28  ;;  %21479 = vmatprep.mubr.msk.f32.mxu0 %vm23181_vm6, %v23180_v38  ;;  %v4638_v61 = vld [vmem:[#allocation2 + $0x4] sm:$0xff]  ;;  %v4639_v42 = vld [vmem:[#allocation2 + $0xc] sm:$0xff]  ;;  %v4640_v40 = vld [vmem:[#allocation2 + $0x14] sm:$0xff] }
 0x1c5   : > { %21488 = vmatprep.subr.mxu1 %v23180_v38  ;;  %21499 = vmatprep.subr.mxu0 %v23180_v38  ;;  %v4538_v33 = vld [vmem:[#allocation2 + $0x3] sm:$0xff]  ;;  %v4539_v24 = vld [vmem:[#allocation2 + $0xb] sm:$0xff]  ;;  %v4540_v11 = vld [vmem:[#allocation2 + $0x13] sm:$0xff] }
 0x1c6   : > { %21464 = vmatmul.mubr.msk.f32.gmra.mxu1 %vm4207_vm2, %v24102_v25  ;;  %21480 = vmatmul.mubr.msk.f32.vlgmr.msra.gmra.mxu0 %vm4207_vm2, %v4438_v34  ;;  %v4838_v31 = vld [vmem:[#allocation2 + $0xf] sm:$0xff]  ;;  %v4839_v62 = vld [vmem:[#allocation2 + $0x17] sm:$0xff]  ;;  %v24191_v49 = vld [vmem:[#allocation2 + $0x1f] sm:$0xff] }
 0x1c7   : > { %21468 = vmatprep.mubr.msk.f32.mxu1 %vm23181_vm6, %v23180_v38  ;;  %21482 = vmatprep.mubr.msk.f32.mxu0 %vm23181_vm6, %v23180_v38  ;;  %v4738_v46 = vld [vmem:[#allocation2 + $0xe] sm:$0xff]  ;;  %v4739_v13 = vld [vmem:[#allocation2 + $0x16] sm:$0xff]  ;;  %v24203_v51 = vld [vmem:[#allocation2 + $0x1e] sm:$0xff] }
 0x1c8   : > { %21500 = vmatpush3.msk.msra.mxu0 %vm4262_vm5, %v19575_v59  ;;  %v5039_v5 = vld [vmem:[#allocation2 + $0x19] sm:$0xff]  ;;  %v5040_v4 = vld [vmem:[#allocation2 + $0x21] sm:$0xff]  ;;  %v24264_v12 = vld [vmem:[#allocation2 + $0x2c] sm:$0xff] }
 0x1c9   : > { %21521 = vmatprep.subr.mxu0 %v23180_v38  ;;  %v4939_v2 = vld [vmem:[#allocation2 + $0x18] sm:$0xff]  ;;  %v24235_v26 = vld [vmem:[#allocation2 + $0x20] sm:$0xff]  ;;  %v24304_v16 = vld [vmem:[#allocation2 + $0x2e] sm:$0xff] }
 0x1ca   : > { %21469 = vmatmul.mubr.msk.f32.vlgmr.msra.gmra.mxu1 %vm4207_vm2, %v4243_v3  ;;  %21483 = vmatmul.mubr.msk.f32.gmra.mxu0 %vm4207_vm2, %v4439_v56  ;;  %v24237_v54 = vld [vmem:[#allocation2 + $0x1c] sm:$0xff]  ;;  %v24250_v7 = vld [vmem:[#allocation2 + $0x24] sm:$0xff]  ;;  %v24317_v8 = vld [vmem:[#allocation2 + $0x2d] sm:$0xff] }
 0x1cb   : > { %21489 = vmatpush3.msk.msra.mxu1 %vm4262_vm5, %v19570_v37  ;;  %21471 = vmatprep.mubr.msk.f32.mxu1 %vm23181_vm6, %v23180_v38  ;;  %v5139_v41 = vld [vmem:[#allocation2 + $0x1a] sm:$0xff]  ;;  %v5140_v27 = vld [vmem:[#allocation2 + $0x22] sm:$0xff]  ;;  %v24346_v1 = vld [vmem:[#allocation2 + $0x30] sm:$0xff] }
 0x1cc   : > { %21485 = vmatprep.mubr.msk.f32.mxu0 %vm23181_vm6, %v23180_v38  ;;  %21510 = vmatprep.subr.mxu1 %v23180_v38  ;;  %v24286_v6 = vld [vmem:[#allocation2 + $0x1d] sm:$0xff]  ;;  %v24288_v58 = vld [vmem:[#allocation2 + $0x26] sm:$0xff]  ;;  %v24359_v18 = vld [vmem:[#allocation2 + $0x2f] sm:$0xff] }
 0x1cd   : > { %v24302_v43 = vld [vmem:[#allocation2 + $0x25] sm:$0xff]  ;;  %v24376_v19 = vld [vmem:[#allocation2 + $0x33] sm:$0xff]  ;;  %v24392_v39 = vld [vmem:[#allocation2 + $0x3b] sm:$0xff] }
 0x1ce   : > { %21472 = vmatmul.mubr.msk.f32.gmra.mxu1 %vm4207_vm2, %v4244_v44  ;;  %21486 = vmatmul.mubr.msk.f32.gmra.mxu0 %vm4207_vm2, %v24131_v57  ;;  %v24330_v47 = vld [vmem:[#allocation2 + $0x28] sm:$0xff]  ;;  %v24390_v30 = vld [vmem:[#allocation2 + $0x32] sm:$0xff]  ;;  %v24405_v35 = vld [vmem:[#allocation2 + $0x3a] sm:$0xff] }
 0x1cf   : > { %21474 = vmatprep.mubr.msk.f32.mxu1 %vm23181_vm6, %v23180_v38  ;;  %21501 = vmatprep.mubr.msk.f32.mxu0 %vm23181_vm6, %v23180_v38  ;;  %v24344_v53 = vld [vmem:[#allocation2 + $0x27] sm:$0xff]  ;;  %v19655_v48 = vld [vmem:[%s27326_s3 + $0xa0] sm:$0x3f]  ;;  %v24418_v52 = vld [vmem:[#allocation2 + $0x35] sm:$0xff] }
 0x1d0   : > { %v24361_v10 = vld [vmem:[#allocation2 + $0x2b] sm:$0xff]  ;;  %v19650_v22 = vld [vmem:[%s27326_s3 + $0x98] sm:$0x3f]  ;;  %v24462_v56 = vld [vmem:[#allocation2 + $0x40] sm:$0xff] }
 0x1d1   : > { %v24374_v15 = vld [vmem:[#allocation2 + $0x2a] sm:$0xff]  ;;  %v24432_v28 = vld [vmem:[#allocation2 + $0x34] sm:$0xff]  ;;  %v24447_v34 = vld [vmem:[#allocation2 + $0x3c] sm:$0xff] }
 0x1d2   : > { %21475 = vmatmul.mubr.msk.f32.gmra.mxu1 %vm4207_vm2, %v4245_v0  ;;  %21502 = vmatmul.mubr.msk.f32.vlgmr.msra.gmra.mxu0 %vm4207_vm2, %v4638_v61  ;;  %v24449_v59 = vld [vmem:[#allocation2 + $0x38] sm:$0xff]  ;;  %v19665_v3 = vld [vmem:[%s27326_s3 + $0xb0] sm:$0x3f]  ;;  %v19660_v37 = vld [vmem:[%s27326_s3 + $0xa8] sm:$0x3f] }
 0x1d3   : > { %21490 = vmatprep.mubr.msk.f32.mxu1 %vm23181_vm6, %v23180_v38  ;;  %21504 = vmatprep.mubr.msk.f32.mxu0 %vm23181_vm6, %v23180_v38  ;;  %v24476_v44 = vld [vmem:[#allocation2 + $0x36] sm:$0xff]  ;;  %v19675_v61 = vld [vmem:[%s27326_s3 + $0xc0] sm:$0x3f] }
 0x1d4   : > { %21522 = vmatpush3.msk.msra.mxu0 %vm4262_vm5, %v19585_v60  ;;  %v24504_v60 = vld [vmem:[#allocation2 + $0x39] sm:$0xff] }
 0x1d5   : > { %21543 = vmatprep.subr.mxu0 %v23180_v38 }
 0x1d6   : > { %21491 = vmatmul.mubr.msk.f32.vlgmr.msra.gmra.mxu1 %vm4207_vm2, %v4538_v33  ;;  %21505 = vmatmul.mubr.msk.f32.gmra.mxu0 %vm4207_vm2, %v4639_v42  ;;  %v24506_v33 = vld [vmem:[#allocation2 + $0x42] sm:$0xff]  ;;  %v19670_v42 = vld [vmem:[%s27326_s3 + $0xb8] sm:$0x3f] }
 0x1d7   : > { %21511 = vmatpush3.msk.msra.mxu1 %vm4262_vm5, %v19580_v32  ;;  %21493 = vmatprep.mubr.msk.f32.mxu1 %vm23181_vm6, %v23180_v38  ;;  %v24520_v32 = vld [vmem:[#allocation2 + $0x41] sm:$0xff] }
 0x1d8   : > { %21507 = vmatprep.mubr.msk.f32.mxu0 %vm23181_vm6, %v23180_v38  ;;  %21532 = vmatprep.subr.mxu1 %v23180_v38 }
 0x1da   : > { %21494 = vmatmul.mubr.msk.f32.gmra.mxu1 %vm4207_vm2, %v4539_v24  ;;  %21508 = vmatmul.mubr.msk.f32.gmra.mxu0 %vm4207_vm2, %v4640_v40  ;;  %v24522_v24 = vld [vmem:[#allocation2 + $0x4a] sm:$0xff] }
 0x1db   : > { %21496 = vmatprep.mubr.msk.f32.mxu1 %vm23181_vm6, %v23180_v38  ;;  %21523 = vmatprep.mubr.msk.f32.mxu0 %vm23181_vm6, %v23180_v38  ;;  %v24535_v40 = vld [vmem:[#allocation2 + $0x49] sm:$0xff] }
 0x1de   : > { %21497 = vmatmul.mubr.msk.f32.gmra.mxu1 %vm4207_vm2, %v4540_v11  ;;  %21524 = vmatmul.mubr.msk.f32.vlgmr.msra.gmra.mxu0 %vm4207_vm2, %v4838_v31  ;;  %v6763_v11 = vld [vmem:[%s27326_s3] sm:$0x3f] }
 0x1df   : > { %21512 = vmatprep.mubr.msk.f32.mxu1 %vm23181_vm6, %v23180_v38  ;;  %21526 = vmatprep.mubr.msk.f32.mxu0 %vm23181_vm6, %v23180_v38  ;;  %v24548_v31 = vld [vmem:[#allocation2 + $0x44] sm:$0xff] }
 0x1e0   : > { %21544 = vmatpush3.msk.msra.mxu0 %vm4262_vm5, %v19595_v63  ;;  %v19680_v63 = vld [vmem:[%s27326_s3 + $0x8] sm:$0x3f] }
 0x1e1   : > { %21565 = vmatprep.subr.mxu0 %v23180_v38 }
 0x1e2   : > { %21513 = vmatmul.mubr.msk.f32.vlgmr.msra.gmra.mxu1 %vm4207_vm2, %v4738_v46  ;;  %21527 = vmatmul.mubr.msk.f32.gmra.mxu0 %vm4207_vm2, %v4839_v62  ;;  %v24562_v46 = vld [vmem:[#allocation2 + $0x43] sm:$0xff]  ;;  %v24564_v62 = vld [vmem:[#allocation2 + $0x4c] sm:$0xff] }
 0x1e3   : > { %21533 = vmatpush3.msk.msra.mxu1 %vm4262_vm5, %v19590_v36  ;;  %21515 = vmatprep.mubr.msk.f32.mxu1 %vm23181_vm6, %v23180_v38  ;;  %v24577_v36 = vld [vmem:[#allocation2 + $0x4b] sm:$0xff] }
 0x1e4   : > { %21529 = vmatprep.mubr.msk.f32.mxu0 %vm23181_vm6, %v23180_v38  ;;  %21554 = vmatprep.subr.mxu1 %v23180_v38 }
 0x1e6   : > { %21516 = vmatmul.mubr.msk.f32.gmra.mxu1 %vm4207_vm2, %v4739_v13  ;;  %21530 = vmatmul.mubr.msk.f32.gmra.mxu0 %vm4207_vm2, %v24191_v49  ;;  %v19694_v13 = vld [vmem:[%s27326_s3 + $0x18] sm:$0x3f] }
 0x1e7   : > { %21518 = vmatprep.mubr.msk.f32.mxu1 %vm23181_vm6, %v23180_v38  ;;  %21545 = vmatprep.mubr.msk.f32.mxu0 %vm23181_vm6, %v23180_v38 }
 0x1ea   : > { %21519 = vmatmul.mubr.msk.f32.gmra.mxu1 %vm4207_vm2, %v24203_v51  ;;  %21546 = vmatmul.mubr.msk.f32.vlgmr.msra.gmra.mxu0 %vm4207_vm2, %v24102_v25  ;;  %v24434_v25 = vld [vmem:[#allocation2 + $0x3d] sm:$0xff] }
 0x1eb   : > { %21534 = vmatprep.mubr.msk.f32.mxu1 %vm23181_vm6, %v23180_v38  ;;  %21548 = vmatprep.mubr.msk.f32.mxu0 %vm23181_vm6, %v23180_v38 }
 0x1ec   : > { %21566 = vmatpush3.msk.msra.mxu0 %vm4262_vm5, %v19605_v55  ;;  %v19689_v55 = vld [vmem:[%s27326_s3 + $0x10] sm:$0x3f] }
 0x1ed   : > { %21587 = vmatprep.subr.mxu0 %v23180_v38 }
 0x1ee   : > { %21535 = vmatmul.mubr.msk.f32.vlgmr.msra.gmra.mxu1 %vm4207_vm2, %v4245_v0  ;;  %21549 = vmatmul.mubr.msk.f32.gmra.mxu0 %vm4207_vm2, %v5039_v5  ;;  %v24491_v0 = vld [vmem:[#allocation2 + $0x3e] sm:$0xff]  ;;  %v19704_v5 = vld [vmem:[%s27326_s3 + $0x28] sm:$0x3f] }
 0x1ef   : > { %21555 = vmatpush3.msk.msra.mxu1 %vm4262_vm5, %v19600_v45  ;;  %21537 = vmatprep.mubr.msk.f32.mxu1 %vm23181_vm6, %v23180_v38  ;;  %v19699_v45 = vld [vmem:[%s27326_s3 + $0x20] sm:$0x3f] }
 0x1f0   : > { %21551 = vmatprep.mubr.msk.f32.mxu0 %vm23181_vm6, %v23180_v38  ;;  %21576 = vmatprep.subr.mxu1 %v23180_v38 }
 0x1f2   : > { %21538 = vmatmul.mubr.msk.f32.gmra.mxu1 %vm4207_vm2, %v4939_v2  ;;  %21552 = vmatmul.mubr.msk.f32.gmra.mxu0 %vm4207_vm2, %v5040_v4  ;;  %v19724_v2 = vld [vmem:[%s27326_s3 + $0x48] sm:$0x3f]  ;;  %v19719_v4 = vld [vmem:[%s27326_s3 + $0x40] sm:$0x3f] }
 0x1f3   : > { %21540 = vmatprep.mubr.msk.f32.mxu1 %vm23181_vm6, %v23180_v38  ;;  %21567 = vmatprep.mubr.msk.f32.mxu0 %vm23181_vm6, %v23180_v38 }
 0x1f6   : > { %21541 = vmatmul.mubr.msk.f32.gmra.mxu1 %vm4207_vm2, %v24235_v26  ;;  %21568 = vmatmul.mubr.msk.f32.vlgmr.msra.gmra.mxu0 %vm4207_vm2, %v24237_v54 }
 0x1f7   : > { %21556 = vmatprep.mubr.msk.f32.mxu1 %vm23181_vm6, %v23180_v38  ;;  %21570 = vmatprep.mubr.msk.f32.mxu0 %vm23181_vm6, %v23180_v38 }
 0x1f8   : > { %21588 = vmatpush3.msk.msra.mxu0 %vm4262_vm5, %v19615_v50 }
 0x1f9   : > { %21609 = vmatprep.subr.mxu0 %v23180_v38 }
 0x1fa   : > { %21557 = vmatmul.mubr.msk.f32.vlgmr.msra.gmra.mxu1 %vm4207_vm2, %v24131_v57  ;;  %21571 = vmatmul.mubr.msk.f32.gmra.mxu0 %vm4207_vm2, %v24250_v7  ;;  %v24478_v57 = vld [vmem:[#allocation2 + $0x48] sm:$0xff] }
 0x1fb   : > { %21577 = vmatpush3.msk.msra.mxu1 %vm4262_vm5, %v19610_v17  ;;  %21559 = vmatprep.mubr.msk.f32.mxu1 %vm23181_vm6, %v23180_v38  ;;  %v19734_v17 = vld [vmem:[%s27326_s3 + $0x58] sm:$0x3f] }
 0x1fc   : > { %21573 = vmatprep.mubr.msk.f32.mxu0 %vm23181_vm6, %v23180_v38  ;;  %21598 = vmatprep.subr.mxu1 %v23180_v38 }
 0x1fe   : > { %21560 = vmatmul.mubr.msk.f32.gmra.mxu1 %vm4207_vm2, %v5139_v41  ;;  %21574 = vmatmul.mubr.msk.f32.gmra.mxu0 %vm4207_vm2, %v24264_v12 }
 0x1ff   : > { %21562 = vmatprep.mubr.msk.f32.mxu1 %vm23181_vm6, %v23180_v38  ;;  %21589 = vmatprep.mubr.msk.f32.mxu0 %vm23181_vm6, %v23180_v38 }
 0x202   : > { %21563 = vmatmul.mubr.msk.f32.gmra.mxu1 %vm4207_vm2, %v5140_v27  ;;  %21590 = vmatmul.mubr.msk.f32.vlgmr.msra.gmra.mxu0 %vm4207_vm2, %v24203_v51 }
 0x203   : > { %21578 = vmatprep.mubr.msk.f32.mxu1 %vm23181_vm6, %v23180_v38  ;;  %21592 = vmatprep.mubr.msk.f32.mxu0 %vm23181_vm6, %v23180_v38 }
 0x204   : > { %21610 = vmatpush3.msk.msra.mxu0 %vm4262_vm5, %v19625_v14 }
 0x205   : > { %21631 = vmatprep.subr.mxu0 %v23180_v38 }
 0x206   : > { %21579 = vmatmul.mubr.msk.f32.vlgmr.msra.gmra.mxu1 %vm4207_vm2, %v24286_v6  ;;  %21593 = vmatmul.mubr.msk.f32.gmra.mxu0 %vm4207_vm2, %v24288_v58 }
 0x207   : > { %21599 = vmatpush3.msk.msra.mxu1 %vm4262_vm5, %v19620_v9  ;;  %21581 = vmatprep.mubr.msk.f32.mxu1 %vm23181_vm6, %v23180_v38 }
 0x208   : > { %21595 = vmatprep.mubr.msk.f32.mxu0 %vm23181_vm6, %v23180_v38  ;;  %21620 = vmatprep.subr.mxu1 %v23180_v38 }
 0x20a   : > { %21582 = vmatmul.mubr.msk.f32.gmra.mxu1 %vm4207_vm2, %v24302_v43  ;;  %21596 = vmatmul.mubr.msk.f32.gmra.mxu0 %vm4207_vm2, %v24304_v16 }
 0x20b   : > { %21584 = vmatprep.mubr.msk.f32.mxu1 %vm23181_vm6, %v23180_v38  ;;  %21611 = vmatprep.mubr.msk.f32.mxu0 %vm23181_vm6, %v23180_v38 }
 0x20e   : > { %21585 = vmatmul.mubr.msk.f32.gmra.mxu1 %vm4207_vm2, %v24317_v8  ;;  %21612 = vmatmul.mubr.msk.f32.vlgmr.msra.gmra.mxu0 %vm4207_vm2, %v24235_v26 }
 0x20f   : > { %21600 = vmatprep.mubr.msk.f32.mxu1 %vm23181_vm6, %v23180_v38  ;;  %21614 = vmatprep.mubr.msk.f32.mxu0 %vm23181_vm6, %v23180_v38 }
 0x210   : > { %21632 = vmatpush3.msk.msra.mxu0 %vm4262_vm5, %v19635_v29 }
 0x211   : > { %21653 = vmatprep.subr.mxu0 %v23180_v38 }
 0x212   : > { %21601 = vmatmul.mubr.msk.f32.vlgmr.msra.gmra.mxu1 %vm4207_vm2, %v24191_v49  ;;  %21615 = vmatmul.mubr.msk.f32.gmra.mxu0 %vm4207_vm2, %v24330_v47 }
 0x213   : > { %21621 = vmatpush3.msk.msra.mxu1 %vm4262_vm5, %v19630_v21  ;;  %21603 = vmatprep.mubr.msk.f32.mxu1 %vm23181_vm6, %v23180_v38 }
 0x214   : > { %21617 = vmatprep.mubr.msk.f32.mxu0 %vm23181_vm6, %v23180_v38  ;;  %21642 = vmatprep.subr.mxu1 %v23180_v38 }
 0x216   : > { %21604 = vmatmul.mubr.msk.f32.gmra.mxu1 %vm4207_vm2, %v24344_v53  ;;  %21618 = vmatmul.mubr.msk.f32.gmra.mxu0 %vm4207_vm2, %v24346_v1 }
 0x217   : > { %21606 = vmatprep.mubr.msk.f32.mxu1 %vm23181_vm6, %v23180_v38  ;;  %21633 = vmatprep.mubr.msk.f32.mxu0 %vm23181_vm6, %v23180_v38 }
 0x21a   : > { %21607 = vmatmul.mubr.msk.f32.gmra.mxu1 %vm4207_vm2, %v24359_v18  ;;  %21634 = vmatmul.mubr.msk.f32.vlgmr.msra.gmra.mxu0 %vm4207_vm2, %v24361_v10 }
 0x21b   : > { %21622 = vmatprep.mubr.msk.f32.mxu1 %vm23181_vm6, %v23180_v38  ;;  %21636 = vmatprep.mubr.msk.f32.mxu0 %vm23181_vm6, %v23180_v38 }
 0x21c   : > { %21654 = vmatpush3.msk.msra.mxu0 %vm4262_vm5, %v19645_v20 }
 0x21d   : > { %21675 = vmatprep.subr.mxu0 %v23180_v38 }
 0x21e   : > { %21623 = vmatmul.mubr.msk.f32.vlgmr.msra.gmra.mxu1 %vm4207_vm2, %v24374_v15  ;;  %21637 = vmatmul.mubr.msk.f32.gmra.mxu0 %vm4207_vm2, %v24376_v19 }
 0x21f   : > { %21643 = vmatpush3.msk.msra.mxu1 %vm4262_vm5, %v19640_v23  ;;  %21625 = vmatprep.mubr.msk.f32.mxu1 %vm23181_vm6, %v23180_v38 }
 0x220   : > { %21639 = vmatprep.mubr.msk.f32.mxu0 %vm23181_vm6, %v23180_v38  ;;  %21664 = vmatprep.subr.mxu1 %v23180_v38 }
 0x222   : > { %21626 = vmatmul.mubr.msk.f32.gmra.mxu1 %vm4207_vm2, %v24390_v30  ;;  %21640 = vmatmul.mubr.msk.f32.gmra.mxu0 %vm4207_vm2, %v24392_v39 }
 0x223   : > { %21628 = vmatprep.mubr.msk.f32.mxu1 %vm23181_vm6, %v23180_v38  ;;  %21655 = vmatprep.mubr.msk.f32.mxu0 %vm23181_vm6, %v23180_v38 }
 0x226   : > { %21629 = vmatmul.mubr.msk.f32.gmra.mxu1 %vm4207_vm2, %v24405_v35  ;;  %21656 = vmatmul.mubr.msk.f32.vlgmr.msra.gmra.mxu0 %vm4207_vm2, %v24317_v8 }
 0x227   : > { %21644 = vmatprep.mubr.msk.f32.mxu1 %vm23181_vm6, %v23180_v38  ;;  %21658 = vmatprep.mubr.msk.f32.mxu0 %vm23181_vm6, %v23180_v38 }
 0x228   : > { %21676 = vmatpush3.msk.msra.mxu0 %vm4262_vm5, %v19655_v48 }
 0x229   : > { %21697 = vmatprep.subr.mxu0 %v23180_v38 }
 0x22a   : > { %21645 = vmatmul.mubr.msk.f32.vlgmr.msra.gmra.mxu1 %vm4207_vm2, %v24264_v12  ;;  %21659 = vmatmul.mubr.msk.f32.gmra.mxu0 %vm4207_vm2, %v24418_v52 }
 0x22b   : > { %21665 = vmatpush3.msk.msra.mxu1 %vm4262_vm5, %v19650_v22  ;;  %21647 = vmatprep.mubr.msk.f32.mxu1 %vm23181_vm6, %v23180_v38 }
 0x22c   : > { %21661 = vmatprep.mubr.msk.f32.mxu0 %vm23181_vm6, %v23180_v38  ;;  %21686 = vmatprep.subr.mxu1 %v23180_v38 }
 0x22e   : > { %21648 = vmatmul.mubr.msk.f32.gmra.mxu1 %vm4207_vm2, %v24432_v28  ;;  %21662 = vmatmul.mubr.msk.f32.gmra.mxu0 %vm4207_vm2, %v24434_v25 }
 0x22f   : > { %21650 = vmatprep.mubr.msk.f32.mxu1 %vm23181_vm6, %v23180_v38  ;;  %21677 = vmatprep.mubr.msk.f32.mxu0 %vm23181_vm6, %v23180_v38 }
 0x232   : > { %21651 = vmatmul.mubr.msk.f32.gmra.mxu1 %vm4207_vm2, %v24447_v34  ;;  %21678 = vmatmul.mubr.msk.f32.vlgmr.msra.gmra.mxu0 %vm4207_vm2, %v24449_v59 }
 0x233   : > { %21666 = vmatprep.mubr.msk.f32.mxu1 %vm23181_vm6, %v23180_v38  ;;  %21680 = vmatprep.mubr.msk.f32.mxu0 %vm23181_vm6, %v23180_v38 }
 0x234   : > { %21698 = vmatpush3.msk.msra.mxu0 %vm4262_vm5, %v19665_v3 }
 0x235   : > { %21719 = vmatprep.subr.mxu0 %v23180_v38 }
 0x236   : > { %21667 = vmatmul.mubr.msk.f32.vlgmr.msra.gmra.mxu1 %vm4207_vm2, %v24304_v16  ;;  %21681 = vmatmul.mubr.msk.f32.gmra.mxu0 %vm4207_vm2, %v24462_v56 }
 0x237   : > { %21687 = vmatpush3.msk.msra.mxu1 %vm4262_vm5, %v19660_v37  ;;  %21669 = vmatprep.mubr.msk.f32.mxu1 %vm23181_vm6, %v23180_v38 }
 0x238   : > { %21683 = vmatprep.mubr.msk.f32.mxu0 %vm23181_vm6, %v23180_v38  ;;  %21708 = vmatprep.subr.mxu1 %v23180_v38 }
 0x23a   : > { %21670 = vmatmul.mubr.msk.f32.gmra.mxu1 %vm4207_vm2, %v24476_v44  ;;  %21684 = vmatmul.mubr.msk.f32.gmra.mxu0 %vm4207_vm2, %v24478_v57 }
 0x23b   : > { %21672 = vmatprep.mubr.msk.f32.mxu1 %vm23181_vm6, %v23180_v38  ;;  %21699 = vmatprep.mubr.msk.f32.mxu0 %vm23181_vm6, %v23180_v38 }
 0x23e   : > { %21673 = vmatmul.mubr.msk.f32.gmra.mxu1 %vm4207_vm2, %v24491_v0  ;;  %21700 = vmatmul.mubr.msk.f32.vlgmr.msra.gmra.mxu0 %vm4207_vm2, %v24405_v35 }
 0x23f   : > { %21688 = vmatprep.mubr.msk.f32.mxu1 %vm23181_vm6, %v23180_v38  ;;  %21702 = vmatprep.mubr.msk.f32.mxu0 %vm23181_vm6, %v23180_v38 }
 0x240   : > { %21720 = vmatpush3.msk.msra.mxu0 %vm4262_vm5, %v19675_v61 }
 0x241   : > { %21741 = vmatprep.subr.mxu0 %v23180_v38 }
 0x242   : > { %21689 = vmatmul.mubr.msk.f32.vlgmr.msra.gmra.mxu1 %vm4207_vm2, %v24504_v60  ;;  %21703 = vmatmul.mubr.msk.f32.gmra.mxu0 %vm4207_vm2, %v24506_v33 }
 0x243   : > { %21709 = vmatpush3.msk.msra.mxu1 %vm4262_vm5, %v19670_v42  ;;  %21691 = vmatprep.mubr.msk.f32.mxu1 %vm23181_vm6, %v23180_v38 }
 0x244   : > { %21705 = vmatprep.mubr.msk.f32.mxu0 %vm23181_vm6, %v23180_v38  ;;  %21730 = vmatprep.subr.mxu1 %v23180_v38 }
 0x246   : > { %21692 = vmatmul.mubr.msk.f32.gmra.mxu1 %vm4207_vm2, %v24520_v32  ;;  %21706 = vmatmul.mubr.msk.f32.gmra.mxu0 %vm4207_vm2, %v24522_v24 }
 0x247   : > { %21694 = vmatprep.mubr.msk.f32.mxu1 %vm23181_vm6, %v23180_v38  ;;  %21721 = vmatprep.mubr.msk.f32.mxu0 %vm23181_vm6, %v23180_v38 }
 0x24a   : > { %21695 = vmatmul.mubr.msk.f32.gmra.mxu1 %vm4207_vm2, %v24535_v40  ;;  %21722 = vmatmul.mubr.msk.f32.vlgmr.msra.gmra.mxu0 %vm4207_vm2, %v24447_v34 }
 0x24b   : > { %21710 = vmatprep.mubr.msk.f32.mxu1 %vm23181_vm6, %v23180_v38  ;;  %21724 = vmatprep.mubr.msk.f32.mxu0 %vm23181_vm6, %v23180_v38 }
 0x24c   : > { %21742 = vmatpush3.msk.msra.mxu0 %vm4262_vm5, %v6763_v11 }
 0x24d   : > { %21763 = vmatprep.subr.mxu0 %v23180_v38 }
 0x24e   : > { %21711 = vmatmul.mubr.msk.f32.vlgmr.msra.gmra.mxu1 %vm4207_vm2, %v24392_v39  ;;  %21725 = vmatmul.mubr.msk.f32.gmra.mxu0 %vm4207_vm2, %v24548_v31 }
 0x24f   : > { %21731 = vmatpush3.msk.msra.mxu1 %vm4262_vm5, %v19680_v63  ;;  %21713 = vmatprep.mubr.msk.f32.mxu1 %vm23181_vm6, %v23180_v38 }
 0x250   : > { %21727 = vmatprep.mubr.msk.f32.mxu0 %vm23181_vm6, %v23180_v38  ;;  %21752 = vmatprep.subr.mxu1 %v23180_v38 }
 0x252   : > { %21714 = vmatmul.mubr.msk.f32.gmra.mxu1 %vm4207_vm2, %v24562_v46  ;;  %21728 = vmatmul.mubr.msk.f32.gmra.mxu0 %vm4207_vm2, %v24564_v62 }
 0x253   : > { %21716 = vmatprep.mubr.msk.f32.mxu1 %vm23181_vm6, %v23180_v38  ;;  %21743 = vmatprep.mubr.msk.f32.mxu0 %vm23181_vm6, %v23180_v38 }
 0x256   : > { %21717 = vmatmul.mubr.msk.f32.gmra.mxu1 %vm4207_vm2, %v24577_v36  ;;  %21744 = vmatmul.mubr.msk.f32.vlgmr.msra.gmra.mxu0 %vm4207_vm2, %v24237_v54 }
 0x257   : > { %21732 = vmatprep.mubr.msk.f32.mxu1 %vm23181_vm6, %v23180_v38  ;;  %21746 = vmatprep.mubr.msk.f32.mxu0 %vm23181_vm6, %v23180_v38 }
 0x258   : > { %21764 = vmatpush3.msk.msra.mxu0 %vm4262_vm5, %v19694_v13  ;;  %v19754_v13 = vld [vmem:[%s27326_s3 + $0x78] sm:$0x3f] }
 0x259   : > { %21785 = vmatprep.subr.mxu0 %v23180_v38 }
 0x25a   : > { %21733 = vmatmul.mubr.msk.f32.vlgmr.msra.gmra.mxu1 %vm4207_vm2, %v24286_v6  ;;  %21747 = vmatmul.mubr.msk.f32.gmra.mxu0 %vm4207_vm2, %v24250_v7  ;;  %v19729_v6 = vld [vmem:[%s27326_s3 + $0x50] sm:$0x3f] }
 0x25b   : > { %21753 = vmatpush3.msk.msra.mxu1 %vm4262_vm5, %v19689_v55  ;;  %21735 = vmatprep.mubr.msk.f32.mxu1 %vm23181_vm6, %v23180_v38 }
 0x25c   : > { %21749 = vmatprep.mubr.msk.f32.mxu0 %vm23181_vm6, %v23180_v38  ;;  %21774 = vmatprep.subr.mxu1 %v23180_v38 }
 0x25e   : > { %21736 = vmatmul.mubr.msk.f32.gmra.mxu1 %vm4207_vm2, %v24302_v43  ;;  %21750 = vmatmul.mubr.msk.f32.gmra.mxu0 %vm4207_vm2, %v24264_v12 }
 0x25f   : > { %21738 = vmatprep.mubr.msk.f32.mxu1 %vm23181_vm6, %v23180_v38  ;;  %21765 = vmatprep.mubr.msk.f32.mxu0 %vm23181_vm6, %v23180_v38 }
 0x262   : > { %21739 = vmatmul.mubr.msk.f32.gmra.mxu1 %vm4207_vm2, %v24317_v8  ;;  %21766 = vmatmul.mubr.msk.f32.vlgmr.msra.gmra.mxu0 %vm4207_vm2, %v24191_v49  ;;  %v19714_v49 = vld [vmem:[%s27326_s3 + $0x38] sm:$0x3f] }
 0x263   : > { %21754 = vmatprep.mubr.msk.f32.mxu1 %vm23181_vm6, %v23180_v38  ;;  %21768 = vmatprep.mubr.msk.f32.mxu0 %vm23181_vm6, %v23180_v38 }
 0x264   : > { %21786 = vmatpush3.msk.msra.mxu0 %vm4262_vm5, %v19704_v5 }
 0x265   : > { %21807 = vmatprep.subr.mxu0 %v23180_v38 }
 0x266   : > { %21755 = vmatmul.mubr.msk.f32.vlgmr.msra.gmra.mxu1 %vm4207_vm2, %v24203_v51  ;;  %21769 = vmatmul.mubr.msk.f32.gmra.mxu0 %vm4207_vm2, %v24344_v53  ;;  %v19709_v51 = vld [vmem:[%s27326_s3 + $0x30] sm:$0x3f] }
 0x267   : > { %21775 = vmatpush3.msk.msra.mxu1 %vm4262_vm5, %v19699_v45  ;;  %21757 = vmatprep.mubr.msk.f32.mxu1 %vm23181_vm6, %v23180_v38 }
 0x268   : > { %21771 = vmatprep.mubr.msk.f32.mxu0 %vm23181_vm6, %v23180_v38  ;;  %21796 = vmatprep.subr.mxu1 %v23180_v38 }
 0x26a   : > { %21758 = vmatmul.mubr.msk.f32.gmra.mxu1 %vm4207_vm2, %v24288_v58  ;;  %21772 = vmatmul.mubr.msk.f32.gmra.mxu0 %vm4207_vm2, %v24359_v18 }
 0x26b   : > { %21760 = vmatprep.mubr.msk.f32.mxu1 %vm23181_vm6, %v23180_v38  ;;  %21787 = vmatprep.mubr.msk.f32.mxu0 %vm23181_vm6, %v23180_v38 }
 0x26e   : > { %21761 = vmatmul.mubr.msk.f32.gmra.mxu1 %vm4207_vm2, %v24304_v16  ;;  %21788 = vmatmul.mubr.msk.f32.vlgmr.msra.gmra.mxu0 %vm4207_vm2, %v24374_v15 }
 0x26f   : > { %21776 = vmatprep.mubr.msk.f32.mxu1 %vm23181_vm6, %v23180_v38  ;;  %21790 = vmatprep.mubr.msk.f32.mxu0 %vm23181_vm6, %v23180_v38 }
 0x270   : > { %21808 = vmatpush3.msk.msra.mxu0 %vm4262_vm5, %v19714_v49 }
 0x271   : > { %21829 = vmatprep.subr.mxu0 %v23180_v38 }
 0x272   : > { %21777 = vmatmul.mubr.msk.f32.vlgmr.msra.gmra.mxu1 %vm4207_vm2, %v24235_v26  ;;  %21791 = vmatmul.mubr.msk.f32.gmra.mxu0 %vm4207_vm2, %v24390_v30 }
 0x273   : > { %21797 = vmatpush3.msk.msra.mxu1 %vm4262_vm5, %v19709_v51  ;;  %21779 = vmatprep.mubr.msk.f32.mxu1 %vm23181_vm6, %v23180_v38 }
 0x274   : > { %21793 = vmatprep.mubr.msk.f32.mxu0 %vm23181_vm6, %v23180_v38  ;;  %21818 = vmatprep.subr.mxu1 %v23180_v38 }
 0x276   : > { %21780 = vmatmul.mubr.msk.f32.gmra.mxu1 %vm4207_vm2, %v24330_v47  ;;  %21794 = vmatmul.mubr.msk.f32.gmra.mxu0 %vm4207_vm2, %v24405_v35 }
 0x277   : > { %21782 = vmatprep.mubr.msk.f32.mxu1 %vm23181_vm6, %v23180_v38  ;;  %21809 = vmatprep.mubr.msk.f32.mxu0 %vm23181_vm6, %v23180_v38 }
 0x27a   : > { %21783 = vmatmul.mubr.msk.f32.gmra.mxu1 %vm4207_vm2, %v24346_v1  ;;  %21810 = vmatmul.mubr.msk.f32.vlgmr.msra.gmra.mxu0 %vm4207_vm2, %v24264_v12 }
 0x27b   : > { %21798 = vmatprep.mubr.msk.f32.mxu1 %vm23181_vm6, %v23180_v38  ;;  %21812 = vmatprep.mubr.msk.f32.mxu0 %vm23181_vm6, %v23180_v38 }
 0x27c   : > { %21830 = vmatpush3.msk.msra.mxu0 %vm4262_vm5, %v19724_v2  ;;  %v19749_v2 = vld [vmem:[%s27326_s3 + $0x70] sm:$0x3f] }
 0x27d   : > { %21851 = vmatprep.subr.mxu0 %v23180_v38 }
 0x27e   : > { %21799 = vmatmul.mubr.msk.f32.vlgmr.msra.gmra.mxu1 %vm4207_vm2, %v24361_v10  ;;  %21813 = vmatmul.mubr.msk.f32.gmra.mxu0 %vm4207_vm2, %v24432_v28  ;;  %v19744_v10 = vld [vmem:[%s27326_s3 + $0x68] sm:$0x3f] }
 0x27f   : > { %21819 = vmatpush3.msk.msra.mxu1 %vm4262_vm5, %v19719_v4  ;;  %21801 = vmatprep.mubr.msk.f32.mxu1 %vm23181_vm6, %v23180_v38 }
 0x280   : > { %21815 = vmatprep.mubr.msk.f32.mxu0 %vm23181_vm6, %v23180_v38  ;;  %21840 = vmatprep.subr.mxu1 %v23180_v38 }
 0x282   : > { %v4332_v26 = vpop.f32.mrf.mxu0  ;;  %v4337_v54 = vpop.f32.mrf.mxu1  ;;  %21802 = vmatmul.mubr.msk.f32.gmra.mxu1 %vm4207_vm2, %v24376_v19  ;;  %21816 = vmatmul.mubr.msk.f32.gmra.mxu0 %vm4207_vm2, %v24447_v34 }
 0x283   : > { %21804 = vmatprep.mubr.msk.f32.mxu1 %vm23181_vm6, %v23180_v38  ;;  %21831 = vmatprep.mubr.msk.f32.mxu0 %vm23181_vm6, %v23180_v38 }
 0x284   : > { %v21459_v50 = vpop.f32.mrf.mxu0  ;;  %v21462_v7 = vpop.f32.mrf.mxu1 }
 0x286   : > { %v4342_v41 = vpop.f32.mrf.mxu1  ;;  %v4521_v12 = vpop.f32.mrf.mxu0  ;;  %21805 = vmatmul.mubr.msk.f32.gmra.mxu1 %vm4207_vm2, %v24392_v39  ;;  %21832 = vmatmul.mubr.msk.f32.vlgmr.msra.gmra.mxu0 %vm4207_vm2, %v24304_v16 }
 0x287   : > { %21820 = vmatprep.mubr.msk.f32.mxu1 %vm23181_vm6, %v23180_v38  ;;  %21834 = vmatprep.mubr.msk.f32.mxu0 %vm23181_vm6, %v23180_v38 }
 0x288   : > { %v21465_v27 = vpop.f32.mrf.mxu1  ;;  %v21481_v14 = vpop.f32.mrf.mxu0  ;;  %21852 = vmatpush3.msk.msra.mxu0 %vm4262_vm5, %v19734_v17 }
 0x289   : > { %21873 = vmatprep.subr.mxu0 %v23180_v38 }
 0x28a   : > { %v4424_v58 = vpop.f32.mrf.mxu1  ;;  %v4526_v9 = vpop.f32.mrf.mxu0  ;;  %21821 = vmatmul.mubr.msk.f32.vlgmr.msra.gmra.mxu1 %vm4207_vm2, %v24317_v8  ;;  %21835 = vmatmul.mubr.msk.f32.gmra.mxu0 %vm4207_vm2, %v24476_v44 }
 0x28b   : > { %v4425_v43 = vadd.f32 %v4424_v58, %v4332_v26  ;;  %21841 = vmatpush3.msk.msra.mxu1 %vm4262_vm5, %v19729_v6  ;;  %21823 = vmatprep.mubr.msk.f32.mxu1 %vm23181_vm6, %v23180_v38  ;;  %v19764_v6 = vld [vmem:[%s27326_s3 + $0x88] sm:$0x3f] }
 0x28c   : > { %v21470_v16 = vpop.f32.mrf.mxu1  ;;  %v21484_v29 = vpop.f32.mrf.mxu0  ;;  %21837 = vmatprep.mubr.msk.f32.mxu0 %vm23181_vm6, %v23180_v38  ;;  %21862 = vmatprep.subr.mxu1 %v23180_v38 }
 0x28d   : > { %v4535_v47 = vadd.f32 %v4521_v12, %v4425_v43  ;;  %v24830_v43 = vld [vmem:[#allocation2 + $0x4e] sm:$0xff] }
 0x28e   : > { %v4429_v21 = vpop.f32.mrf.mxu1  ;;  %v4531_v53 = vpop.f32.mrf.mxu0  ;;  %21824 = vmatmul.mubr.msk.f32.gmra.mxu1 %vm4207_vm2, %v24418_v52  ;;  %21838 = vmatmul.mubr.msk.f32.gmra.mxu0 %vm4207_vm2, %v24491_v0  ;;  %v19739_v52 = vld [vmem:[%s27326_s3 + $0x60] sm:$0x3f] }
 0x28f   : > { %v4430_v8 = vadd.f32 %v4429_v21, %v4337_v54  ;;  %21826 = vmatprep.mubr.msk.f32.mxu1 %vm23181_vm6, %v23180_v38  ;;  %21853 = vmatprep.mubr.msk.f32.mxu0 %vm23181_vm6, %v23180_v38 }
 0x290   : > { %v21473_v1 = vpop.f32.mrf.mxu1  ;;  %v21487_v18 = vpop.f32.mrf.mxu0 }
 0x291   : > { %v4536_v20 = vadd.f32 %v4526_v9, %v4430_v8  ;;  %v24844_v18 = vld [vmem:[#allocation2 + $0x56] sm:$0xff] }
 0x292   : > { %v4434_v15 = vpop.f32.mrf.mxu1  ;;  %v4721_v19 = vpop.f32.mrf.mxu0  ;;  %21827 = vmatmul.mubr.msk.f32.gmra.mxu1 %vm4207_vm2, %v24434_v25  ;;  %21854 = vmatmul.mubr.msk.f32.vlgmr.msra.gmra.mxu0 %vm4207_vm2, %v24504_v60 }
 0x293   : > { %v4435_v23 = vadd.f32 %v4434_v15, %v4342_v41  ;;  %21842 = vmatprep.mubr.msk.f32.mxu1 %vm23181_vm6, %v23180_v38  ;;  %21856 = vmatprep.mubr.msk.f32.mxu0 %vm23181_vm6, %v23180_v38 }
 0x294   : > { %v21476_v30 = vpop.f32.mrf.mxu1  ;;  %v21503_v48 = vpop.f32.mrf.mxu0  ;;  %21874 = vmatpush3.msk.msra.mxu0 %vm4262_vm5, %v19744_v10 }
 0x295   : > { %v4537_v22 = vadd.f32 %v4531_v53, %v4435_v23  ;;  %21895 = vmatprep.subr.mxu0 %v23180_v38 }
 0x296   : > { %v4621_v28 = vpop.f32.mrf.mxu1  ;;  %v4726_v25 = vpop.f32.mrf.mxu0  ;;  %21843 = vmatmul.mubr.msk.f32.vlgmr.msra.gmra.mxu1 %vm4207_vm2, %v24449_v59  ;;  %21857 = vmatmul.mubr.msk.f32.gmra.mxu0 %vm4207_vm2, %v24520_v32 }
 0x297   : > { %v4635_v3 = vadd.f32 %v4621_v28, %v4535_v47  ;;  %21863 = vmatpush3.msk.msra.mxu1 %vm4262_vm5, %v19739_v52  ;;  %21845 = vmatprep.mubr.msk.f32.mxu1 %vm23181_vm6, %v23180_v38  ;;  %v19759_v47 = vld [vmem:[%s27326_s3 + $0x80] sm:$0x3f]  ;;  %v19774_v52 = vld [vmem:[%s27326_s3 + $0x98] sm:$0x3f] }
 0x298   : > { %v21492_v37 = vpop.f32.mrf.mxu1  ;;  %v21506_v44 = vpop.f32.mrf.mxu0  ;;  %21859 = vmatprep.mubr.msk.f32.mxu0 %vm23181_vm6, %v23180_v38  ;;  %21884 = vmatprep.subr.mxu1 %v23180_v38 }
 0x299   : > { %v4735_v0 = vadd.f32 %v4721_v19, %v4635_v3  ;;  %v24874_v3 = vld [vmem:[#allocation2 + $0x47] sm:$0xff]  ;;  %v24876_v37 = vld [vmem:[#allocation2 + $0x50] sm:$0xff] }
 0x29a   : > { %v4626_v61 = vpop.f32.mrf.mxu1  ;;  %v4731_v42 = vpop.f32.mrf.mxu0  ;;  %21846 = vmatmul.mubr.msk.f32.gmra.mxu1 %vm4207_vm2, %v24462_v56  ;;  %21860 = vmatmul.mubr.msk.f32.gmra.mxu0 %vm4207_vm2, %v24535_v40 }
 0x29b   : > { %v4636_v59 = vadd.f32 %v4626_v61, %v4536_v20  ;;  %21848 = vmatprep.mubr.msk.f32.mxu1 %vm23181_vm6, %v23180_v38  ;;  %21875 = vmatprep.mubr.msk.f32.mxu0 %vm23181_vm6, %v23180_v38 }
 0x29c   : > { %v21495_v11 = vpop.f32.mrf.mxu1  ;;  %v21509_v63 = vpop.f32.mrf.mxu0 }
 0x29d   : > { %v4736_v55 = vadd.f32 %v4726_v25, %v4636_v59  ;;  %v24896_v59 = vld [vmem:[#allocation2 + $0x4f] sm:$0xff]  ;;  %v24898_v11 = vld [vmem:[#allocation2 + $0x58] sm:$0xff] }
 0x29e   : > { %v4631_v5 = vpop.f32.mrf.mxu1  ;;  %v4921_v45 = vpop.f32.mrf.mxu0  ;;  %21849 = vmatmul.mubr.msk.f32.gmra.mxu1 %vm4207_vm2, %v24478_v57  ;;  %21876 = vmatmul.mubr.msk.f32.vlgmr.msra.gmra.mxu0 %vm4207_vm2, %v24392_v39 }
 0x29f   : > { %v4637_v56 = vadd.f32 %v4631_v5, %v4537_v22  ;;  %21864 = vmatprep.mubr.msk.f32.mxu1 %vm23181_vm6, %v23180_v38  ;;  %21878 = vmatprep.mubr.msk.f32.mxu0 %vm23181_vm6, %v23180_v38 }
 0x2a0   : > { %v21498_v49 = vpop.f32.mrf.mxu1  ;;  %v21525_v51 = vpop.f32.mrf.mxu0  ;;  %21896 = vmatpush3.msk.msra.mxu0 %vm4262_vm5, %v19754_v13 }
 0x2a1   : > { %v4737_v4 = vadd.f32 %v4731_v42, %v4637_v56  ;;  %21917 = vmatprep.subr.mxu0 %v23180_v38  ;;  %v19784_v51 = vld [vmem:[%s27326_s3 + $0xa8] sm:$0x3f] }
 0x2a2   : > { %v4821_v26 = vpop.f32.mrf.mxu1  ;;  %v4926_v39 = vpop.f32.mrf.mxu0  ;;  %21865 = vmatmul.mubr.msk.f32.vlgmr.msra.gmra.mxu1 %vm4207_vm2, %v24405_v35  ;;  %21879 = vmatmul.mubr.msk.f32.gmra.mxu0 %vm4207_vm2, %v24562_v46  ;;  %v24817_v46 = vld [vmem:[#allocation2 + $0x46] sm:$0xff] }
 0x2a3   : > { %v4835_v54 = vadd.f32 %v4821_v26, %v4735_v0  ;;  %21885 = vmatpush3.msk.msra.mxu1 %vm4262_vm5, %v19749_v2  ;;  %21867 = vmatprep.mubr.msk.f32.mxu1 %vm23181_vm6, %v23180_v38  ;;  %v24932_v26 = vld [vmem:[#allocation2 + $0x52] sm:$0xff] }
 0x2a4   : > { %v21514_v50 = vpop.f32.mrf.mxu1  ;;  %v21528_v7 = vpop.f32.mrf.mxu0  ;;  %21881 = vmatprep.mubr.msk.f32.mxu0 %vm23181_vm6, %v23180_v38  ;;  %21906 = vmatprep.subr.mxu1 %v23180_v38 }
 0x2a5   : > { %v4935_v17 = vadd.f32 %v4921_v45, %v4835_v54  ;;  %v24915_v45 = vld [vmem:[#allocation2 + $0x57] sm:$0xff]  ;;  %v19779_v50 = vld [vmem:[%s27326_s3 + $0xa0] sm:$0x3f] }
 0x2a6   : > { %v4826_v41 = vpop.f32.mrf.mxu1  ;;  %v4931_v12 = vpop.f32.mrf.mxu0  ;;  %21868 = vmatmul.mubr.msk.f32.gmra.mxu1 %vm4207_vm2, %v24506_v33  ;;  %21882 = vmatmul.mubr.msk.f32.gmra.mxu0 %vm4207_vm2, %v24577_v36 }
 0x2a7   : > { %v4836_v35 = vadd.f32 %v4826_v41, %v4736_v55  ;;  %21870 = vmatprep.mubr.msk.f32.mxu1 %vm23181_vm6, %v23180_v38  ;;  %21897 = vmatprep.mubr.msk.f32.mxu0 %vm23181_vm6, %v23180_v38  ;;  %v24952_v41 = vld [vmem:[#allocation2 + $0x5a] sm:$0xff] }
 0x2a8   : > { %v21517_v27 = vpop.f32.mrf.mxu1  ;;  %v21531_v14 = vpop.f32.mrf.mxu0 }
 0x2a9   : > { %v4936_v58 = vadd.f32 %v4926_v39, %v4836_v35 }
 0x2aa   : > { %v4831_v33 = vpop.f32.mrf.mxu1  ;;  %v5121_v9 = vpop.f32.mrf.mxu0  ;;  %21871 = vmatmul.mubr.msk.f32.gmra.mxu1 %vm4207_vm2, %v24522_v24  ;;  %21898 = vmatmul.mubr.msk.f32.vlgmr.msra.gmra.mxu0 %vm4207_vm2, %v24817_v46 }
 0x2ab   : > { %v4837_v36 = vadd.f32 %v4831_v33, %v4737_v4  ;;  %21886 = vmatprep.mubr.msk.f32.mxu1 %vm23181_vm6, %v23180_v38  ;;  %21900 = vmatprep.mubr.msk.f32.mxu0 %vm23181_vm6, %v23180_v38 }
 0x2ac   : > { %v21520_v16 = vpop.f32.mrf.mxu1  ;;  %v21547_v29 = vpop.f32.mrf.mxu0  ;;  %21918 = vmatpush3.msk.msra.mxu0 %vm4262_vm5, %v19764_v6  ;;  %v24969_v6 = vld [vmem:[#allocation2 + $0x59] sm:$0xff] }
 0x2ad   : > { %v4937_v21 = vadd.f32 %v4931_v12, %v4837_v36  ;;  %21939 = vmatprep.subr.mxu0 %v23180_v38  ;;  %v19794_v36 = vld [vmem:[%s27326_s3 + $0xb8] sm:$0x3f] }
 0x2ae   : > { %v5021_v53 = vpop.f32.mrf.mxu1  ;;  %v5126_v8 = vpop.f32.mrf.mxu0  ;;  %21887 = vmatmul.mubr.msk.f32.vlgmr.msra.gmra.mxu1 %vm4207_vm2, %v24447_v34  ;;  %21901 = vmatmul.mubr.msk.f32.gmra.mxu0 %vm4207_vm2, %v24830_v43 }
 0x2af   : > { %v5035_v1 = vadd.f32 %v5021_v53, %v4935_v17  ;;  %21907 = vmatpush3.msk.msra.mxu1 %vm4262_vm5, %v19759_v47  ;;  %21889 = vmatprep.mubr.msk.f32.mxu1 %vm23181_vm6, %v23180_v38  ;;  %v24950_v17 = vld [vmem:[#allocation2 + $0x51] sm:$0xff] }
 0x2b0   : > { %v21536_v10 = vpop.f32.mrf.mxu1  ;;  %v21550_v20 = vpop.f32.mrf.mxu0  ;;  %21903 = vmatprep.mubr.msk.f32.mxu0 %vm23181_vm6, %v23180_v38  ;;  %21928 = vmatprep.subr.mxu1 %v23180_v38  ;;  %v24988_v47 = vld [vmem:[#allocation2 + $0x54] sm:$0xff] }
 0x2b1   : > { %v24849_v15 = vadd.f32 %v5121_v9, %v5035_v1  ;;  %v19789_v1 = vld [vmem:[%s27326_s3 + $0xb0] sm:$0x3f] }
 0x2b2   : > { %v5026_v34 = vpop.f32.mrf.mxu1  ;;  %v5131_v19 = vpop.f32.mrf.mxu0  ;;  %21890 = vmatmul.mubr.msk.f32.gmra.mxu1 %vm4207_vm2, %v24548_v31  ;;  %21904 = vmatmul.mubr.msk.f32.gmra.mxu0 %vm4207_vm2, %v24844_v18 }
 0x2b3   : > { %v5036_v23 = vadd.f32 %v5026_v34, %v4936_v58  ;;  %21892 = vmatprep.mubr.msk.f32.mxu1 %vm23181_vm6, %v23180_v38  ;;  %21919 = vmatprep.mubr.msk.f32.mxu0 %vm23181_vm6, %v23180_v38  ;;  %v24971_v58 = vld [vmem:[#allocation2 + $0x55] sm:$0xff] }
 0x2b4   : > { %v21539_v30 = vpop.f32.mrf.mxu1  ;;  %v21553_v48 = vpop.f32.mrf.mxu0  ;;  %v25008_v34 = vld [vmem:[#allocation2 + $0x5c] sm:$0xff] }
 0x2b5   : > { %v24862_v22 = vadd.f32 %v5126_v8, %v5036_v23 }
 0x2b6   : > { %v5031_v28 = vpop.f32.mrf.mxu1  ;;  %v24864_v31 = vpop.f32.mrf.mxu0  ;;  %21893 = vmatmul.mubr.msk.f32.gmra.mxu1 %vm4207_vm2, %v24564_v62  ;;  %21920 = vmatmul.mubr.msk.f32.vlgmr.msra.gmra.mxu0 %vm4207_vm2, %v24478_v57  ;;  %v19769_v62 = vld [vmem:[%s27326_s3 + $0x90] sm:$0x3f] }
 0x2b7   : > { %v5037_v25 = vadd.f32 %v5031_v28, %v4937_v21  ;;  %21908 = vmatprep.mubr.msk.f32.mxu1 %vm23181_vm6, %v23180_v38  ;;  %21922 = vmatprep.mubr.msk.f32.mxu0 %vm23181_vm6, %v23180_v38  ;;  %v24990_v21 = vld [vmem:[#allocation2 + $0x5d] sm:$0xff] }
 0x2b8   : > { %v21542_v44 = vpop.f32.mrf.mxu1  ;;  %v21569_v0 = vpop.f32.mrf.mxu0  ;;  %21940 = vmatpush3.msk.msra.mxu0 %vm4262_vm5, %v19774_v52  ;;  %v25027_v28 = vld [vmem:[#allocation2 + $0x64] sm:$0xff] }
 0x2b9   : > { %v24882_v57 = vadd.f32 %v5131_v19, %v5037_v25  ;;  %21961 = vmatprep.subr.mxu0 %v23180_v38  ;;  %v25010_v19 = vld [vmem:[#allocation2 + $0x65] sm:$0xff] }
 0x2ba   : > { %v24885_v61 = vpop.f32.mrf.mxu1  ;;  %v24887_v42 = vpop.f32.mrf.mxu0  ;;  %21909 = vmatmul.mubr.msk.f32.vlgmr.msra.gmra.mxu1 %vm4207_vm2, %v24874_v3  ;;  %21923 = vmatmul.mubr.msk.f32.gmra.mxu0 %vm4207_vm2, %v24876_v37  ;;  %v19804_v0 = vld [vmem:[%s27326_s3 + $0x8] sm:$0x3f] }
 0x2bb   : > { %21929 = vmatpush3.msk.msra.mxu1 %vm4262_vm5, %v19769_v62  ;;  %21911 = vmatprep.mubr.msk.f32.mxu1 %vm23181_vm6, %v23180_v38 }
 0x2bc   : > { %v21558_v63 = vpop.f32.mrf.mxu1  ;;  %v21572_v13 = vpop.f32.mrf.mxu0  ;;  %21925 = vmatprep.mubr.msk.f32.mxu0 %vm23181_vm6, %v23180_v38  ;;  %21950 = vmatprep.subr.mxu1 %v23180_v38 }
 0x2bd   : > { %v25044_v13 = vld [vmem:[#allocation2 + $0x5f] sm:$0xff] }
 0x2be   : > { %v24903_v55 = vpop.f32.mrf.mxu1  ;;  %v24905_v5 = vpop.f32.mrf.mxu0  ;;  %21912 = vmatmul.mubr.msk.f32.gmra.mxu1 %vm4207_vm2, %v24896_v59  ;;  %21926 = vmatmul.mubr.msk.f32.gmra.mxu0 %vm4207_vm2, %v24898_v11 }
 0x2bf   : > { %21914 = vmatprep.mubr.msk.f32.mxu1 %vm23181_vm6, %v23180_v38  ;;  %21941 = vmatprep.mubr.msk.f32.mxu0 %vm23181_vm6, %v23180_v38 }
 0x2c0   : > { %v21561_v56 = vpop.f32.mrf.mxu1  ;;  %v21575_v49 = vpop.f32.mrf.mxu0 }
 0x2c2   : > { %v24920_v2 = vpop.f32.mrf.mxu1  ;;  %v24922_v4 = vpop.f32.mrf.mxu0  ;;  %21915 = vmatmul.mubr.msk.f32.gmra.mxu1 %vm4207_vm2, %v24915_v45  ;;  %21942 = vmatmul.mubr.msk.f32.vlgmr.msra.gmra.mxu0 %vm4207_vm2, %v24522_v24 }
 0x2c3   : > { %21930 = vmatprep.mubr.msk.f32.mxu1 %vm23181_vm6, %v23180_v38  ;;  %21944 = vmatprep.mubr.msk.f32.mxu0 %vm23181_vm6, %v23180_v38 }
 0x2c4   : > { %v21564_v39 = vpop.f32.mrf.mxu1  ;;  %v21591_v54 = vpop.f32.mrf.mxu0  ;;  %21962 = vmatpush3.msk.msra.mxu0 %vm4262_vm5, %v19784_v51  ;;  %v19799_v51 = vld [vmem:[%s27326_s3 + $0xc0] sm:$0x3f] }
 0x2c5   : > { %21983 = vmatprep.subr.mxu0 %v23180_v38 }
 0x2c6   : > { %v24939_v7 = vpop.f32.mrf.mxu1  ;;  %v24941_v24 = vpop.f32.mrf.mxu0  ;;  %21931 = vmatmul.mubr.msk.f32.vlgmr.msra.gmra.mxu1 %vm4207_vm2, %v24535_v40  ;;  %21945 = vmatmul.mubr.msk.f32.gmra.mxu0 %vm4207_vm2, %v24932_v26 }
 0x2c7   : > { %21951 = vmatpush3.msk.msra.mxu1 %vm4262_vm5, %v19779_v50  ;;  %21933 = vmatprep.mubr.msk.f32.mxu1 %vm23181_vm6, %v23180_v38  ;;  %v25062_v50 = vld [vmem:[#allocation2 + $0x5e] sm:$0xff] }
 0x2c8   : > { %v21580_v12 = vpop.f32.mrf.mxu1  ;;  %v21594_v35 = vpop.f32.mrf.mxu0  ;;  %21947 = vmatprep.mubr.msk.f32.mxu0 %vm23181_vm6, %v23180_v38  ;;  %21972 = vmatprep.subr.mxu1 %v23180_v38 }
 0x2c9   : > { %v25064_v12 = vld [vmem:[#allocation2 + $0x67] sm:$0xff] }
 0x2ca   : > { %v24957_v27 = vpop.f32.mrf.mxu1  ;;  %v24959_v14 = vpop.f32.mrf.mxu0  ;;  %21934 = vmatmul.mubr.msk.f32.gmra.mxu1 %vm4207_vm2, %v24950_v17  ;;  %21948 = vmatmul.mubr.msk.f32.gmra.mxu0 %vm4207_vm2, %v24952_v41 }
 0x2cb   : > { %21936 = vmatprep.mubr.msk.f32.mxu1 %vm23181_vm6, %v23180_v38  ;;  %21963 = vmatprep.mubr.msk.f32.mxu0 %vm23181_vm6, %v23180_v38 }
 0x2cc   : > { %v21583_v33 = vpop.f32.mrf.mxu1  ;;  %v21597_v9 = vpop.f32.mrf.mxu0 }
 0x2ce   : > { %v24976_v16 = vpop.f32.mrf.mxu1  ;;  %v24978_v29 = vpop.f32.mrf.mxu0  ;;  %21937 = vmatmul.mubr.msk.f32.gmra.mxu1 %vm4207_vm2, %v24969_v6  ;;  %21964 = vmatmul.mubr.msk.f32.vlgmr.msra.gmra.mxu0 %vm4207_vm2, %v24971_v58 }
 0x2cf   : > { %21952 = vmatprep.mubr.msk.f32.mxu1 %vm23181_vm6, %v23180_v38  ;;  %21966 = vmatprep.mubr.msk.f32.mxu0 %vm23181_vm6, %v23180_v38 }
 0x2d0   : > { %v21586_v53 = vpop.f32.mrf.mxu1  ;;  %v21613_v8 = vpop.f32.mrf.mxu0  ;;  %21984 = vmatpush3.msk.msra.mxu0 %vm4262_vm5, %v19794_v36 }
 0x2d1   : > { %22005 = vmatprep.subr.mxu0 %v23180_v38  ;;  %v25081_v53 = vld [vmem:[#allocation2 + $0x66] sm:$0xff] }
 0x2d2   : > { %v24997_v10 = vpop.f32.mrf.mxu1  ;;  %v24999_v20 = vpop.f32.mrf.mxu0  ;;  %21953 = vmatmul.mubr.msk.f32.vlgmr.msra.gmra.mxu1 %vm4207_vm2, %v24988_v47  ;;  %21967 = vmatmul.mubr.msk.f32.gmra.mxu0 %vm4207_vm2, %v24990_v21 }
 0x2d3   : > { %21973 = vmatpush3.msk.msra.mxu1 %vm4262_vm5, %v19789_v1  ;;  %21955 = vmatprep.mubr.msk.f32.mxu1 %vm23181_vm6, %v23180_v38 }
 0x2d4   : > { %v21602_v23 = vpop.f32.mrf.mxu1  ;;  %v21616_v30 = vpop.f32.mrf.mxu0  ;;  %21969 = vmatprep.mubr.msk.f32.mxu0 %vm23181_vm6, %v23180_v38  ;;  %21994 = vmatprep.subr.mxu1 %v23180_v38 }
 0x2d5   : > { %v5235_v23 = vadd.f32 %v24885_v61, %v24849_v15  ;;  %v19813_v30 = vld [vmem:[%s27326_s3 + $0x10] sm:$0x3f] }
 0x2d6   : > { %v25015_v48 = vpop.f32.mrf.mxu1  ;;  %v25017_v52 = vpop.f32.mrf.mxu0  ;;  %21956 = vmatmul.mubr.msk.f32.gmra.mxu1 %vm4207_vm2, %v25008_v34  ;;  %21970 = vmatmul.mubr.msk.f32.gmra.mxu0 %vm4207_vm2, %v25010_v19 }
 0x2d7   : > { %21958 = vmatprep.mubr.msk.f32.mxu1 %vm23181_vm6, %v23180_v38  ;;  %21985 = vmatprep.mubr.msk.f32.mxu0 %vm23181_vm6, %v23180_v38 }
 0x2d8   : > { %v21605_v25 = vpop.f32.mrf.mxu1  ;;  %v21619_v44 = vpop.f32.mrf.mxu0 }
 0x2da   : > { %v25032_v62 = vpop.f32.mrf.mxu1  ;;  %v25034_v63 = vpop.f32.mrf.mxu0  ;;  %21959 = vmatmul.mubr.msk.f32.gmra.mxu1 %vm4207_vm2, %v25027_v28  ;;  %21986 = vmatmul.mubr.msk.f32.vlgmr.msra.gmra.mxu0 %vm4207_vm2, %v24915_v45 }
 0x2db   : > { %21974 = vmatprep.mubr.msk.f32.mxu1 %vm23181_vm6, %v23180_v38  ;;  %21988 = vmatprep.mubr.msk.f32.mxu0 %vm23181_vm6, %v23180_v38 }
 0x2dc   : > { %v21608_v56 = vpop.f32.mrf.mxu1  ;;  %v21635_v49 = vpop.f32.mrf.mxu0  ;;  %22006 = vmatpush3.msk.msra.mxu0 %vm4262_vm5, %v19804_v0  ;;  %v9249_v0 = vld [vmem:[%s27326_s3] sm:$0x3f] }
 0x2dd   : > { %22027 = vmatprep.subr.mxu0 %v23180_v38  ;;  %v5236_v56 = vadd.f32 %v24903_v55, %v24862_v22  ;;  %v5335_v49 = vadd.f32 %v24864_v31, %v5235_v23  ;;  %v25120_v22 = vld [vmem:[#allocation2 + $0x60] sm:$0xff] }
 0x2de   : > { %v25051_v39 = vpop.f32.mrf.mxu1  ;;  %v25053_v54 = vpop.f32.mrf.mxu0  ;;  %21975 = vmatmul.mubr.msk.f32.vlgmr.msra.gmra.mxu1 %vm4207_vm2, %v24844_v18  ;;  %21989 = vmatmul.mubr.msk.f32.gmra.mxu0 %vm4207_vm2, %v25044_v13 }
 0x2df   : > { %21995 = vmatpush3.msk.msra.mxu1 %vm4262_vm5, %v19799_v51  ;;  %21977 = vmatprep.mubr.msk.f32.mxu1 %vm23181_vm6, %v23180_v38 }
 0x2e0   : > { %v21624_v35 = vpop.f32.mrf.mxu1  ;;  %v21638_v33 = vpop.f32.mrf.mxu0  ;;  %21991 = vmatprep.mubr.msk.f32.mxu0 %vm23181_vm6, %v23180_v38  ;;  %22016 = vmatprep.subr.mxu1 %v23180_v38 }
 0x2e1   : > { %v5435_v35 = vadd.f32 %v24939_v7, %v5335_v49  ;;  %v5237_v33 = vadd.f32 %v24920_v2, %v24882_v57  ;;  %v25142_v57 = vld [vmem:[#allocation2 + $0x68] sm:$0xff] }
 0x2e2   : > { %v25069_v9 = vpop.f32.mrf.mxu1  ;;  %v25071_v36 = vpop.f32.mrf.mxu0  ;;  %21978 = vmatmul.mubr.msk.f32.gmra.mxu1 %vm4207_vm2, %v25062_v50  ;;  %21992 = vmatmul.mubr.msk.f32.gmra.mxu0 %vm4207_vm2, %v25064_v12 }
 0x2e3   : > { %21980 = vmatprep.mubr.msk.f32.mxu1 %vm23181_vm6, %v23180_v38  ;;  %22007 = vmatprep.mubr.msk.f32.mxu0 %vm23181_vm6, %v23180_v38  ;;  %v5535_v23 = vadd.f32 %v24922_v4, %v5435_v35 }
 0x2e4   : > { %v21627_v8 = vpop.f32.mrf.mxu1  ;;  %v21641_v1 = vpop.f32.mrf.mxu0 }
 0x2e6   : > { %v25088_v25 = vpop.f32.mrf.mxu1  ;;  %v25090_v44 = vpop.f32.mrf.mxu0  ;;  %21981 = vmatmul.mubr.msk.f32.gmra.mxu1 %vm4207_vm2, %v25081_v53  ;;  %22008 = vmatmul.mubr.msk.f32.vlgmr.msra.gmra.mxu0 %vm4207_vm2, %v24504_v60 }
 0x2e7   : > { %21996 = vmatprep.mubr.msk.f32.mxu1 %vm23181_vm6, %v23180_v38  ;;  %22010 = vmatprep.mubr.msk.f32.mxu0 %vm23181_vm6, %v23180_v38 }
 0x2e8   : > { %v21630_v15 = vpop.f32.mrf.mxu1  ;;  %v21657_v61 = vpop.f32.mrf.mxu0  ;;  %22028 = vmatpush3.msk.msra.mxu0 %vm4262_vm5, %v19813_v30 }
 0x2e9   : > { %22049 = vmatprep.subr.mxu0 %v23180_v38  ;;  %v5337_v15 = vadd.f32 %v24905_v5, %v5237_v33  ;;  %v5635_v61 = vadd.f32 %v24997_v10, %v5535_v23  ;;  %v9246_v5 = vld [vmem:[#allocation2 + $0x38] sm:$0xff]  ;;  %v9439_v10 = vld [vmem:[#allocation2 + $0x42] sm:$0xff] }
 0x2ea   : > { %v25108_v60 = vpop.f32.mrf.mxu1  ;;  %v25110_v51 = vpop.f32.mrf.mxu0  ;;  %21997 = vmatmul.mubr.msk.f32.vlgmr.msra.gmra.mxu1 %vm4207_vm2, %v24898_v11  ;;  %22011 = vmatmul.mubr.msk.f32.gmra.mxu0 %vm4207_vm2, %v24520_v32  ;;  %v5336_v32 = vadd.f32 %v24887_v42, %v5236_v56  ;;  %v9438_v42 = vld [vmem:[#allocation2 + $0x3a] sm:$0xff] }
 0x2eb   : > { %22017 = vmatpush3.msk.msra.mxu1 %vm4262_vm5, %v9249_v0  ;;  %21999 = vmatprep.mubr.msk.f32.mxu1 %vm23181_vm6, %v23180_v38  ;;  %v5437_v0 = vadd.f32 %v24976_v16, %v5337_v15 }
 0x2ec   : > { %v21646_v31 = vpop.f32.mrf.mxu1  ;;  %v21660_v55 = vpop.f32.mrf.mxu0  ;;  %22013 = vmatprep.mubr.msk.f32.mxu0 %vm23181_vm6, %v23180_v38  ;;  %22038 = vmatprep.subr.mxu1 %v23180_v38  ;;  %v5436_v1 = vadd.f32 %v24957_v27, %v5336_v32 }
 0x2ed   : > { %v19818_v31 = vld [vmem:[%s27326_s3 + $0x18] sm:$0x3f]  ;;  %v5537_v32 = vadd.f32 %v24959_v14, %v5437_v0 }
 0x2ee   : > { %v25128_v7 = vpop.f32.mrf.mxu1  ;;  %v25130_v8 = vpop.f32.mrf.mxu0  ;;  %22000 = vmatmul.mubr.msk.f32.gmra.mxu1 %vm4207_vm2, %v25120_v22  ;;  %22014 = vmatmul.mubr.msk.f32.gmra.mxu0 %vm4207_vm2, %v24535_v40  ;;  %v19823_v40 = vld [vmem:[%s27326_s3 + $0x20] sm:$0x3f]  ;;  %v5536_v56 = vadd.f32 %v24941_v24, %v5436_v1  ;;  %v5735_v24 = vadd.f32 %v24978_v29, %v5635_v61  ;;  %v25178_v29 = vld [vmem:[#allocation2 + $0x4a] sm:$0xff] }
 0x2ef   : > { %22002 = vmatprep.mubr.msk.f32.mxu1 %vm23181_vm6, %v23180_v38  ;;  %22029 = vmatprep.mubr.msk.f32.mxu0 %vm23181_vm6, %v23180_v38 }
 0x2f0   : > { %v21649_v2 = vpop.f32.mrf.mxu1  ;;  %v21663_v30 = vpop.f32.mrf.mxu0  ;;  %v5636_v16 = vadd.f32 %v25015_v48, %v5536_v56  ;;  %v5835_v1 = vadd.f32 %v25051_v39, %v5735_v24  ;;  %v9247_v48 = vld [vmem:[#allocation2 + $0x40] sm:$0xff]  ;;  %v19828_v24 = vld [vmem:[%s27326_s3 + $0x28] sm:$0x3f] }
 0x2f1   : > { %v5637_v2 = vadd.f32 %v25032_v62, %v5537_v32  ;;  %v25196_v62 = vld [vmem:[#allocation2 + $0x48] sm:$0xff] }
 0x2f2   : > { %v25149_v4 = vpop.f32.mrf.mxu1  ;;  %v25151_v27 = vpop.f32.mrf.mxu0  ;;  %22003 = vmatmul.mubr.msk.f32.gmra.mxu1 %vm4207_vm2, %v25142_v57  ;;  %22030 = vmatmul.mubr.msk.f32.vlgmr.msra.gmra.mxu0 %vm4207_vm2, %v9438_v42  ;;  %v5736_v14 = vadd.f32 %v24999_v20, %v5636_v16  ;;  %v5935_v61 = vadd.f32 %v25034_v63, %v5835_v1  ;;  %v9636_v20 = vld [vmem:[#allocation2 + $0x3c] sm:$0xff] }
 0x2f3   : > { %22018 = vmatprep.mubr.msk.f32.mxu1 %vm23181_vm6, %v23180_v38  ;;  %22032 = vmatprep.mubr.msk.f32.mxu0 %vm23181_vm6, %v23180_v38  ;;  %v5737_v56 = vadd.f32 %v25017_v52, %v5637_v2  ;;  %v9537_v52 = vld [vmem:[#allocation2 + $0x3b] sm:$0xff] }
 0x2f4   : > { %v21652_v49 = vpop.f32.mrf.mxu1  ;;  %v21679_v35 = vpop.f32.mrf.mxu0  ;;  %22050 = vmatpush3.msk.msra.mxu0 %vm4262_vm5, %v19823_v40  ;;  %v5836_v15 = vadd.f32 %v25069_v9, %v5736_v14  ;;  %v19833_v9 = vld [vmem:[%s27326_s3 + $0x30] sm:$0x3f] }
 0x2f5   : > { %22071 = vmatprep.subr.mxu0 %v23180_v38  ;;  %v5837_v49 = vadd.f32 %v25088_v25, %v5737_v56 }
 0x2f6   : > { %v6221_v55 = vpop.f32.mrf.mxu1  ;;  %v25169_v33 = vpop.f32.mrf.mxu0  ;;  %22019 = vmatmul.mubr.msk.f32.vlgmr.msra.gmra.mxu1 %vm4207_vm2, %v9246_v5  ;;  %22033 = vmatmul.mubr.msk.f32.gmra.mxu0 %vm4207_vm2, %v9439_v10  ;;  %v6035_v5 = vadd.f32 %v25108_v60, %v5935_v61  ;;  %v5936_v35 = vadd.f32 %v25053_v54, %v5836_v15  ;;  %v9637_v60 = vld [vmem:[#allocation2 + $0x44] sm:$0xff] }
 0x2f7   : > { %22039 = vmatpush3.msk.msra.mxu1 %vm4262_vm5, %v19818_v31  ;;  %22021 = vmatprep.mubr.msk.f32.mxu1 %vm23181_vm6, %v23180_v38 }
 0x2f8   : > { %v21668_v23 = vpop.f32.mrf.mxu1  ;;  %v21682_v42 = vpop.f32.mrf.mxu0  ;;  %22035 = vmatprep.mubr.msk.f32.mxu0 %vm23181_vm6, %v23180_v38  ;;  %22060 = vmatprep.subr.mxu1 %v23180_v38  ;;  %v6036_v25 = vadd.f32 %v25128_v7, %v5936_v35  ;;  %v6135_v54 = vadd.f32 %v25090_v44, %v6035_v5  ;;  %v9638_v7 = vld [vmem:[#allocation2 + $0x4c] sm:$0xff]  ;;  %v19843_v5 = vld [vmem:[%s27326_s3 + $0x40] sm:$0x3f] }
 0x2f9   : > { %v9538_v42 = vld [vmem:[#allocation2 + $0x43] sm:$0xff] }
 0x2fa   : > { %v6226_v39 = vpop.f32.mrf.mxu1  ;;  %v25185_v30 = vpop.f32.mrf.mxu0  ;;  %22022 = vmatmul.mubr.msk.f32.gmra.mxu1 %vm4207_vm2, %v9247_v48  ;;  %22036 = vmatmul.mubr.msk.f32.gmra.mxu0 %vm4207_vm2, %v25178_v29  ;;  %v5937_v48 = vadd.f32 %v25071_v36, %v5837_v49  ;;  %v6235_v23 = vadd.f32 %v6221_v55, %v6135_v54  ;;  %v6136_v15 = vadd.f32 %v25110_v51, %v6036_v25 }
 0x2fb   : > { %22024 = vmatprep.mubr.msk.f32.mxu1 %vm23181_vm6, %v23180_v38  ;;  %22051 = vmatprep.mubr.msk.f32.mxu0 %vm23181_vm6, %v23180_v38 }
 0x2fc   : > { %v21671_v40 = vpop.f32.mrf.mxu1  ;;  %v21685_v0 = vpop.f32.mrf.mxu0  ;;  %v6037_v14 = vadd.f32 %v25149_v4, %v5937_v48  ;;  %v6236_v61 = vadd.f32 %v6226_v39, %v6136_v15 }
 0x2fd   : > { %v9539_v40 = vld [vmem:[#allocation2 + $0x4b] sm:$0xff] }
 0x2fe   : > { %v6231_v63 = vpop.f32.mrf.mxu1  ;;  %v6521_v10 = vpop.f32.mrf.mxu0  ;;  %22025 = vmatmul.mubr.msk.f32.gmra.mxu1 %vm4207_vm2, %v25196_v62  ;;  %22052 = vmatmul.mubr.msk.f32.vlgmr.msra.gmra.mxu0 %vm4207_vm2, %v9636_v20  ;;  %v6335_v20 = vadd.f32 %v25151_v27, %v6235_v23  ;;  %v6137_v51 = vadd.f32 %v25130_v8, %v6037_v14  ;;  %v6336_v49 = vadd.f32 %v25169_v33, %v6236_v61 }
 0x2ff   : > { %22040 = vmatprep.mubr.msk.f32.mxu1 %vm23181_vm6, %v23180_v38  ;;  %22054 = vmatprep.mubr.msk.f32.mxu0 %vm23181_vm6, %v23180_v38 }
 0x300   : > { %v21674_v31 = vpop.f32.mrf.mxu1  ;;  %v21701_v16 = vpop.f32.mrf.mxu0  ;;  %22072 = vmatpush3.msk.msra.mxu0 %vm4262_vm5, %v19833_v9  ;;  %v6237_v27 = vadd.f32 %v6231_v63, %v6137_v51 }
 0x301   : > { %22093 = vmatprep.subr.mxu0 %v23180_v38 }
 0x302   : > { %v6421_v32 = vpop.f32.mrf.mxu1  ;;  %v6526_v1 = vpop.f32.mrf.mxu0  ;;  %22041 = vmatmul.mubr.msk.f32.vlgmr.msra.gmra.mxu1 %vm4207_vm2, %v9537_v52  ;;  %22055 = vmatmul.mubr.msk.f32.gmra.mxu0 %vm4207_vm2, %v9637_v60  ;;  %v19838_v52 = vld [vmem:[%s27326_s3 + $0x38] sm:$0x3f]  ;;  %v6337_v63 = vadd.f32 %v25185_v30, %v6237_v27  ;;  %v27365_v30 = vld [vmem:[#allocation12_spill] sm:$0xff] }
 0x303   : > { %22061 = vmatpush3.msk.msra.mxu1 %vm4262_vm5, %v19828_v24  ;;  %22043 = vmatprep.mubr.msk.f32.mxu1 %vm23181_vm6, %v23180_v38  ;;  %v6435_v56 = vadd.f32 %v6421_v32, %v6335_v20 }
 0x304   : > { %v21690_v2 = vpop.f32.mrf.mxu1  ;;  %v21704_v44 = vpop.f32.mrf.mxu0  ;;  %22057 = vmatprep.mubr.msk.f32.mxu0 %vm23181_vm6, %v23180_v38  ;;  %22082 = vmatprep.subr.mxu1 %v23180_v38 }
 0x305   : > { %v6535_v31 = vadd.f32 %v6521_v10, %v6435_v56 }
 0x306   : > { %v6426_v36 = vpop.f32.mrf.mxu1  ;;  %v6531_v55 = vpop.f32.mrf.mxu0  ;;  %22044 = vmatmul.mubr.msk.f32.gmra.mxu1 %vm4207_vm2, %v9538_v42  ;;  %22058 = vmatmul.mubr.msk.f32.gmra.mxu0 %vm4207_vm2, %v9638_v7  ;;  %v10032_v42 = vld [vmem:[#allocation2 + $0x49] sm:$0xff] }
 0x307   : > { %22046 = vmatprep.mubr.msk.f32.mxu1 %vm23181_vm6, %v23180_v38  ;;  %22073 = vmatprep.mubr.msk.f32.mxu0 %vm23181_vm6, %v23180_v38  ;;  %v6436_v60 = vadd.f32 %v6426_v36, %v6336_v49 }
 0x308   : > { %v21693_v0 = vpop.f32.mrf.mxu1  ;;  %v21707_v4 = vpop.f32.mrf.mxu0 }
 0x309   : > { %v6536_v54 = vadd.f32 %v6526_v1, %v6436_v60  ;;  %v19848_v0 = vld [vmem:[%s27326_s3 + $0x48] sm:$0x3f] }
 0x30a   : > { %v6431_v9 = vpop.f32.mrf.mxu1  ;;  %v6721_v39 = vpop.f32.mrf.mxu0  ;;  %22047 = vmatmul.mubr.msk.f32.gmra.mxu1 %vm4207_vm2, %v9539_v40  ;;  %22074 = vmatmul.mubr.msk.f32.vlgmr.msra.gmra.mxu0 %vm4207_vm2, %v24874_v3 }
 0x30b   : > { %22062 = vmatprep.mubr.msk.f32.mxu1 %vm23181_vm6, %v23180_v38  ;;  %22076 = vmatprep.mubr.msk.f32.mxu0 %vm23181_vm6, %v23180_v38  ;;  %v6437_v25 = vadd.f32 %v6431_v9, %v6337_v63 }
 0x30c   : > { %v21696_v8 = vpop.f32.mrf.mxu1  ;;  %v21723_v35 = vpop.f32.mrf.mxu0  ;;  %22094 = vmatpush3.msk.msra.mxu0 %vm4262_vm5, %v19843_v5 }
 0x30d   : > { %22115 = vmatprep.subr.mxu0 %v23180_v38  ;;  %v6537_v14 = vadd.f32 %v6531_v55, %v6437_v25 }
 0x30e   : > { %v6621_v3 = vpop.f32.mrf.mxu1  ;;  %v6726_v33 = vpop.f32.mrf.mxu0  ;;  %22063 = vmatmul.mubr.msk.f32.vlgmr.msra.gmra.mxu1 %vm4207_vm2, %v24817_v46  ;;  %22077 = vmatmul.mubr.msk.f32.gmra.mxu0 %vm4207_vm2, %v24896_v59 }
 0x30f   : > { %v6635_v16 = vadd.f32 %v6621_v3, %v6535_v31  ;;  %22083 = vmatpush3.msk.msra.mxu1 %vm4262_vm5, %v19838_v52  ;;  %22065 = vmatprep.mubr.msk.f32.mxu1 %vm23181_vm6, %v23180_v38  ;;  %v19863_v31 = vld [vmem:[%s27326_s3 + $0x60] sm:$0x3f] }
 0x310   : > { %v21712_v24 = vpop.f32.mrf.mxu1  ;;  %v21726_v10 = vpop.f32.mrf.mxu0  ;;  %22079 = vmatprep.mubr.msk.f32.mxu0 %vm23181_vm6, %v23180_v38  ;;  %22104 = vmatprep.subr.mxu1 %v23180_v38 }
 0x311   : > { %v6735_v46 = vadd.f32 %v6721_v39, %v6635_v16 }
 0x312   : > { %v6626_v32 = vpop.f32.mrf.mxu1  ;;  %v6731_v59 = vpop.f32.mrf.mxu0  ;;  %22066 = vmatmul.mubr.msk.f32.gmra.mxu1 %vm4207_vm2, %v24830_v43  ;;  %22080 = vmatmul.mubr.msk.f32.gmra.mxu0 %vm4207_vm2, %v24915_v45  ;;  %v19853_v43 = vld [vmem:[%s27326_s3 + $0x50] sm:$0x3f] }
 0x313   : > { %v6738_v48 = vadd.f32 %v27365_v30, %v6735_v46  ;;  %v6636_v23 = vadd.f32 %v6626_v32, %v6536_v54  ;;  %22068 = vmatprep.mubr.msk.f32.mxu1 %vm23181_vm6, %v23180_v38  ;;  %22095 = vmatprep.mubr.msk.f32.mxu0 %vm23181_vm6, %v23180_v38 }
 0x314   : > { %v21715_v1 = vpop.f32.mrf.mxu1  ;;  %v21729_v7 = vpop.f32.mrf.mxu0 }
 0x315   : > { %v6741_v2 = vmax.f32 %v6738_v48, 0.0  ;;  %v6736_v44 = vadd.f32 %v6726_v33, %v6636_v23  ;;  %v19858_v33 = vld [vmem:[%s27326_s3 + $0x58] sm:$0x3f] }
 0x316   : > { %v6631_v15 = vpop.f32.mrf.mxu1  ;;  %v6938_v36 = vpop.f32.mrf.mxu0  ;;  %22069 = vmatmul.mubr.msk.f32.gmra.mxu1 %vm4207_vm2, %v24844_v18  ;;  %22096 = vmatmul.mubr.msk.f32.vlgmr.msra.gmra.mxu0 %vm4207_vm2, %v10032_v42 }
 0x317   : > { %6745 = vst.msk [vmem:[#allocation5] sm:$0xff] %vm6744_vm7, %v6741_v2  ;;  %v6739_v61 = vadd.f32 %v27365_v30, %v6736_v44  ;;  %v6637_v20 = vadd.f32 %v6631_v15, %v6537_v14  ;;  %22084 = vmatprep.mubr.msk.f32.mxu1 %vm23181_vm6, %v23180_v38  ;;  %22098 = vmatprep.mubr.msk.f32.mxu0 %vm23181_vm6, %v23180_v38 }
 0x318   : > { %v21718_v55 = vpop.f32.mrf.mxu1  ;;  %v21745_v40 = vpop.f32.mrf.mxu0  ;;  %22116 = vmatpush3.msk.msra.mxu0 %vm4262_vm5, %v19853_v43  ;;  %v19873_v43 = vld [vmem:[%s27326_s3 + $0x70] sm:$0x3f] }
 0x319   : > { %v6742_v4 = vmax.f32 %v6739_v61, 0.0  ;;  %v6737_v51 = vadd.f32 %v6731_v59, %v6637_v20  ;;  %22137 = vmatprep.subr.mxu0 %v23180_v38  ;;  %v19868_v40 = vld [vmem:[%s27326_s3 + $0x68] sm:$0x3f] }
 0x31a   : > { %v6846_v56 = vpop.f32.mrf.mxu1  ;;  %v6943_v5 = vpop.f32.mrf.mxu0  ;;  %22085 = vmatmul.mubr.msk.f32.vlgmr.msra.gmra.mxu1 %vm4207_vm2, %v25196_v62  ;;  %22099 = vmatmul.mubr.msk.f32.gmra.mxu0 %vm4207_vm2, %v24950_v17 }
 0x31b   : > { %6746 = vst.msk [vmem:[#allocation5 + $0x8] sm:$0xff] %vm6744_vm7, %v6742_v4  ;;  %v6740_v9 = vadd.f32 %v27365_v30, %v6737_v51  ;;  %v6939_v39 = vadd.f32 %v6938_v36, %v6846_v56  ;;  %22105 = vmatpush3.msk.msra.mxu1 %vm4262_vm5, %v19848_v0  ;;  %22087 = vmatprep.mubr.msk.f32.mxu1 %vm23181_vm6, %v23180_v38 }
 0x31c   : > { %v21734_v27 = vpop.f32.mrf.mxu1  ;;  %v21748_v49 = vpop.f32.mrf.mxu0  ;;  %22101 = vmatprep.mubr.msk.f32.mxu0 %vm23181_vm6, %v23180_v38  ;;  %22126 = vmatprep.subr.mxu1 %v23180_v38 }
 0x31d   : > { %v6743_v62 = vmax.f32 %v6740_v9, 0.0  ;;  %v19883_v49 = vld [vmem:[%s27326_s3 + $0x80] sm:$0x3f] }
 0x31e   : > { %v6851_v8 = vpop.f32.mrf.mxu1  ;;  %v6948_v17 = vpop.f32.mrf.mxu0  ;;  %22088 = vmatmul.mubr.msk.f32.gmra.mxu1 %vm4207_vm2, %v24876_v37  ;;  %22102 = vmatmul.mubr.msk.f32.gmra.mxu0 %vm4207_vm2, %v24969_v6 }
 0x31f   : > { %6747 = vst.msk [vmem:[#allocation5 + $0x10] sm:$0xff] %vm6744_vm7, %v6743_v62  ;;  %v6944_v35 = vadd.f32 %v6943_v5, %v6851_v8  ;;  %22090 = vmatprep.mubr.msk.f32.mxu1 %vm23181_vm6, %v23180_v38  ;;  %22117 = vmatprep.mubr.msk.f32.mxu0 %vm23181_vm6, %v23180_v38 }
 0x320   : > { %v21737_v52 = vpop.f32.mrf.mxu1  ;;  %v21751_v60 = vpop.f32.mrf.mxu0 }
 0x321   : > { %v19878_v60 = vld [vmem:[%s27326_s3 + $0x78] sm:$0x3f] }
 0x322   : > { %v6856_v3 = vpop.f32.mrf.mxu1  ;;  %v7133_v37 = vpop.f32.mrf.mxu0  ;;  %22091 = vmatmul.mubr.msk.f32.gmra.mxu1 %vm4207_vm2, %v24898_v11  ;;  %22118 = vmatmul.mubr.msk.f32.vlgmr.msra.gmra.mxu0 %vm4207_vm2, %v24988_v47  ;;  %v6748_v24 = vld [vmem:[#allocation5] ss:$2 sm:$0x1f]  ;;  %v6750_v10 = vld [vmem:[#allocation5 + $0x1] ss:$2 sm:$0x1f] }
 0x323   : > { %v6949_v6 = vadd.f32 %v6948_v17, %v6856_v3  ;;  %22106 = vmatprep.mubr.msk.f32.mxu1 %vm23181_vm6, %v23180_v38  ;;  %22120 = vmatprep.mubr.msk.f32.mxu0 %vm23181_vm6, %v23180_v38  ;;  %v6751_v59 = vmax.f32 %v6748_v24, %v6750_v10 }
 0x324   : > { %v21740_v63 = vpop.f32.mrf.mxu1  ;;  %v21767_v16 = vpop.f32.mrf.mxu0  ;;  %22138 = vmatpush3.msk.msra.mxu0 %vm4262_vm5, %v19863_v31 }
 0x325   : > { %22159 = vmatprep.subr.mxu0 %v23180_v38 }
 0x326   : > { %v6753_v47 = vld [vmem:[#allocation5 + $0xe] ss:$2 sm:$0x1f]  ;;  %v6755_v25 = vld [vmem:[#allocation5 + $0xf] ss:$2 sm:$0x1f]  ;;  %v7034_v46 = vpop.f32.mrf.mxu1  ;;  %v7138_v54 = vpop.f32.mrf.mxu0  ;;  %22107 = vmatmul.mubr.msk.f32.vlgmr.msra.gmra.mxu1 %vm4207_vm2, %v25178_v29  ;;  %22121 = vmatmul.mubr.msk.f32.gmra.mxu0 %vm4207_vm2, %v25008_v34 }
 0x327   : > { %v7048_v32 = vadd.f32 %v7034_v46, %v6939_v39  ;;  %22127 = vmatpush3.msk.msra.mxu1 %vm4262_vm5, %v19858_v33  ;;  %22109 = vmatprep.mubr.msk.f32.mxu1 %vm23181_vm6, %v23180_v38  ;;  %v6756_v48 = vmax.f32 %v6753_v47, %v6755_v25  ;;  %v19893_v25 = vld [vmem:[%s27326_s3 + $0x90] sm:$0x3f] }
 0x328   : > { %v21756_v23 = vpop.f32.mrf.mxu1  ;;  %v21770_v42 = vpop.f32.mrf.mxu0  ;;  %22123 = vmatprep.mubr.msk.f32.mxu0 %vm23181_vm6, %v23180_v38  ;;  %22148 = vmatprep.subr.mxu1 %v23180_v38 }
 0x329   : > { %v7147_v29 = vadd.f32 %v7133_v37, %v7048_v32  ;;  %v6757_v1 = vmax.f32 %v6751_v59, %v6756_v48  ;;  %v25428_v32 = vld [vmem:[#allocation2 + $0x62] sm:$0xff]  ;;  %v25430_v59 = vld [vmem:[#allocation2 + $0x6b] sm:$0xff] }
 0x32a   : > { %v7039_v7 = vpop.f32.mrf.mxu1  ;;  %v7143_v34 = vpop.f32.mrf.mxu0  ;;  %22110 = vmatmul.mubr.msk.f32.gmra.mxu1 %vm4207_vm2, %v24932_v26  ;;  %22124 = vmatmul.mubr.msk.f32.gmra.mxu0 %vm4207_vm2, %v25027_v28 }
 0x32b   : > { %v7049_v2 = vadd.f32 %v7039_v7, %v6944_v35  ;;  %22112 = vmatprep.mubr.msk.f32.mxu1 %vm23181_vm6, %v23180_v38  ;;  %22139 = vmatprep.mubr.msk.f32.mxu0 %vm23181_vm6, %v23180_v38  ;;  %6759 = vst.msk [vmem:[#allocation3] sm:$0x1f] %vm6758_vm8, %v6757_v1 }
 0x32c   : > { %v21759_v44 = vpop.f32.mrf.mxu1  ;;  %v21773_v14 = vpop.f32.mrf.mxu0 }
 0x32d   : > { %v7148_v15 = vadd.f32 %v7138_v54, %v7049_v2  ;;  %v25446_v2 = vld [vmem:[#allocation2 + $0x73] sm:$0xff] }
 0x32e   : > { %v7044_v26 = vpop.f32.mrf.mxu1  ;;  %v7331_v36 = vpop.f32.mrf.mxu0  ;;  %22113 = vmatmul.mubr.msk.f32.gmra.mxu1 %vm4207_vm2, %v24952_v41  ;;  %22140 = vmatmul.mubr.msk.f32.vlgmr.msra.gmra.mxu0 %vm4207_vm2, %v24844_v18 }
 0x32f   : > { %v7050_v61 = vadd.f32 %v7044_v26, %v6949_v6  ;;  %22128 = vmatprep.mubr.msk.f32.mxu1 %vm23181_vm6, %v23180_v38  ;;  %22142 = vmatprep.mubr.msk.f32.mxu0 %vm23181_vm6, %v23180_v38 }
 0x330   : > { %v21762_v20 = vpop.f32.mrf.mxu1  ;;  %v21789_v55 = vpop.f32.mrf.mxu0  ;;  %22160 = vmatpush3.msk.msra.mxu0 %vm4262_vm5, %v19873_v43 }
 0x331   : > { %v7149_v0 = vadd.f32 %v7143_v34, %v7050_v61  ;;  %22181 = vmatprep.subr.mxu0 %v23180_v38  ;;  %v25444_v34 = vld [vmem:[#allocation2 + $0x6a] sm:$0xff]  ;;  %v25461_v61 = vld [vmem:[#allocation2 + $0x72] sm:$0xff] }
 0x332   : > { %v7232_v41 = vpop.f32.mrf.mxu1  ;;  %v7336_v18 = vpop.f32.mrf.mxu0  ;;  %22129 = vmatmul.mubr.msk.f32.vlgmr.msra.gmra.mxu1 %vm4207_vm2, %v24971_v58  ;;  %22143 = vmatmul.mubr.msk.f32.gmra.mxu0 %vm4207_vm2, %v25062_v50 }
 0x333   : > { %v7246_v4 = vadd.f32 %v7232_v41, %v7147_v29  ;;  %22149 = vmatpush3.msk.msra.mxu1 %vm4262_vm5, %v19868_v40  ;;  %22131 = vmatprep.mubr.msk.f32.mxu1 %vm23181_vm6, %v23180_v38  ;;  %v19903_v40 = vld [vmem:[%s27326_s3 + $0xa0] sm:$0x3f] }
 0x334   : > { %v21778_v51 = vpop.f32.mrf.mxu1  ;;  %v21792_v56 = vpop.f32.mrf.mxu0  ;;  %22145 = vmatprep.mubr.msk.f32.mxu0 %vm23181_vm6, %v23180_v38  ;;  %22170 = vmatprep.subr.mxu1 %v23180_v38 }
 0x335   : > { %v7345_v5 = vadd.f32 %v7331_v36, %v7246_v4  ;;  %v25478_v51 = vld [vmem:[#allocation2 + $0x6d] sm:$0xff] }
 0x336   : > { %v7237_v9 = vpop.f32.mrf.mxu1  ;;  %v7341_v39 = vpop.f32.mrf.mxu0  ;;  %22132 = vmatmul.mubr.msk.f32.gmra.mxu1 %vm4207_vm2, %v24990_v21  ;;  %22146 = vmatmul.mubr.msk.f32.gmra.mxu0 %vm4207_vm2, %v25081_v53 }
 0x337   : > { %v7247_v58 = vadd.f32 %v7237_v9, %v7148_v15  ;;  %22134 = vmatprep.mubr.msk.f32.mxu1 %vm23181_vm6, %v23180_v38  ;;  %22161 = vmatprep.mubr.msk.f32.mxu0 %vm23181_vm6, %v23180_v38  ;;  %v19898_v9 = vld [vmem:[%s27326_s3 + $0x98] sm:$0x3f] }
 0x338   : > { %v21781_v50 = vpop.f32.mrf.mxu1  ;;  %v21795_v27 = vpop.f32.mrf.mxu0 }
 0x339   : > { %v7346_v62 = vadd.f32 %v7336_v18, %v7247_v58  ;;  %v25498_v50 = vld [vmem:[#allocation2 + $0x6c] sm:$0xff]  ;;  %v25500_v27 = vld [vmem:[#allocation2 + $0x75] sm:$0xff] }
 0x33a   : > { %v7242_v8 = vpop.f32.mrf.mxu1  ;;  %v7529_v17 = vpop.f32.mrf.mxu0  ;;  %22135 = vmatmul.mubr.msk.f32.gmra.mxu1 %vm4207_vm2, %v25010_v19  ;;  %22162 = vmatmul.mubr.msk.f32.vlgmr.msra.gmra.mxu0 %vm4207_vm2, %v24898_v11 }
 0x33b   : > { %v7248_v21 = vadd.f32 %v7242_v8, %v7149_v0  ;;  %22150 = vmatprep.mubr.msk.f32.mxu1 %vm23181_vm6, %v23180_v38  ;;  %22164 = vmatprep.mubr.msk.f32.mxu0 %vm23181_vm6, %v23180_v38 }
 0x33c   : > { %v21784_v35 = vpop.f32.mrf.mxu1  ;;  %v21811_v52 = vpop.f32.mrf.mxu0  ;;  %22182 = vmatpush3.msk.msra.mxu0 %vm4262_vm5, %v19883_v49 }
 0x33d   : > { %v7347_v31 = vadd.f32 %v7341_v39, %v7248_v21  ;;  %22203 = vmatprep.subr.mxu0 %v23180_v38  ;;  %v25519_v21 = vld [vmem:[#allocation2 + $0x70] sm:$0xff] }
 0x33e   : > { %v7430_v3 = vpop.f32.mrf.mxu1  ;;  %v7534_v11 = vpop.f32.mrf.mxu0  ;;  %22151 = vmatmul.mubr.msk.f32.vlgmr.msra.gmra.mxu1 %vm4207_vm2, %v24915_v45  ;;  %22165 = vmatmul.mubr.msk.f32.gmra.mxu0 %vm4207_vm2, %v25120_v22  ;;  %v25415_v22 = vld [vmem:[#allocation2 + $0x63] sm:$0xff] }
 0x33f   : > { %v7444_v37 = vadd.f32 %v7430_v3, %v7345_v5  ;;  %22171 = vmatpush3.msk.msra.mxu1 %vm4262_vm5, %v19878_v60  ;;  %22153 = vmatprep.mubr.msk.f32.mxu1 %vm23181_vm6, %v23180_v38  ;;  %v19913_v60 = vld [vmem:[%s27326_s3 + $0xb0] sm:$0x3f] }
 0x340   : > { %v21800_v6 = vpop.f32.mrf.mxu1  ;;  %v21814_v33 = vpop.f32.mrf.mxu0  ;;  %22167 = vmatprep.mubr.msk.f32.mxu0 %vm23181_vm6, %v23180_v38  ;;  %22192 = vmatprep.subr.mxu1 %v23180_v38 }
 0x341   : > { %v7543_v63 = vadd.f32 %v7529_v17, %v7444_v37  ;;  %v25517_v17 = vld [vmem:[#allocation2 + $0x74] sm:$0xff]  ;;  %v19908_v33 = vld [vmem:[%s27326_s3 + $0xa8] sm:$0x3f] }
 0x342   : > { %v7435_v16 = vpop.f32.mrf.mxu1  ;;  %v7539_v24 = vpop.f32.mrf.mxu0  ;;  %22154 = vmatmul.mubr.msk.f32.gmra.mxu1 %vm4207_vm2, %v25044_v13  ;;  %22168 = vmatmul.mubr.msk.f32.gmra.mxu0 %vm4207_vm2, %v25142_v57 }
 0x343   : > { %v7445_v45 = vadd.f32 %v7435_v16, %v7346_v62  ;;  %22156 = vmatprep.mubr.msk.f32.mxu1 %vm23181_vm6, %v23180_v38  ;;  %22183 = vmatprep.mubr.msk.f32.mxu0 %vm23181_vm6, %v23180_v38 }
 0x344   : > { %v21803_v10 = vpop.f32.mrf.mxu1  ;;  %v21817_v47 = vpop.f32.mrf.mxu0 }
 0x345   : > { %v7544_v46 = vadd.f32 %v7534_v11, %v7445_v45  ;;  %v25536_v11 = vld [vmem:[#allocation2 + $0x78] sm:$0xff]  ;;  %v25556_v45 = vld [vmem:[#allocation2 + $0x80] sm:$0xff] }
 0x346   : > { %v7440_v13 = vpop.f32.mrf.mxu1  ;;  %v7727_v54 = vpop.f32.mrf.mxu0  ;;  %22157 = vmatmul.mubr.msk.f32.gmra.mxu1 %vm4207_vm2, %v25064_v12  ;;  %22184 = vmatmul.mubr.msk.f32.vlgmr.msra.gmra.mxu0 %vm4207_vm2, %v25415_v22  ;;  %v19888_v12 = vld [vmem:[%s27326_s3 + $0x88] sm:$0x3f] }
 0x347   : > { %v7446_v57 = vadd.f32 %v7440_v13, %v7347_v31  ;;  %22172 = vmatprep.mubr.msk.f32.mxu1 %vm23181_vm6, %v23180_v38  ;;  %22186 = vmatprep.mubr.msk.f32.mxu0 %vm23181_vm6, %v23180_v38 }
 0x348   : > { %v21806_v48 = vpop.f32.mrf.mxu1  ;;  %v21833_v23 = vpop.f32.mrf.mxu0  ;;  %22204 = vmatpush3.msk.msra.mxu0 %vm4262_vm5, %v19893_v25 }
 0x349   : > { %v7545_v42 = vadd.f32 %v7539_v24, %v7446_v57  ;;  %22225 = vmatprep.subr.mxu0 %v23180_v38  ;;  %v25554_v24 = vld [vmem:[#allocation2 + $0x6e] sm:$0xff]  ;;  %v19923_v57 = vld [vmem:[%s27326_s3 + $0xc0] sm:$0x3f] }
 0x34a   : > { %v7628_v29 = vpop.f32.mrf.mxu1  ;;  %v7732_v1 = vpop.f32.mrf.mxu0  ;;  %22173 = vmatmul.mubr.msk.f32.vlgmr.msra.gmra.mxu1 %vm4207_vm2, %v25428_v32  ;;  %22187 = vmatmul.mubr.msk.f32.gmra.mxu0 %vm4207_vm2, %v25430_v59 }
 0x34b   : > { %v7642_v7 = vadd.f32 %v7628_v29, %v7543_v63  ;;  %22193 = vmatpush3.msk.msra.mxu1 %vm4262_vm5, %v19888_v12  ;;  %22175 = vmatprep.mubr.msk.f32.mxu1 %vm23181_vm6, %v23180_v38  ;;  %v25590_v12 = vld [vmem:[#allocation2 + $0x71] sm:$0xff] }
 0x34c   : > { %v21822_v44 = vpop.f32.mrf.mxu1  ;;  %v21836_v14 = vpop.f32.mrf.mxu0  ;;  %22189 = vmatprep.mubr.msk.f32.mxu0 %vm23181_vm6, %v23180_v38  ;;  %22214 = vmatprep.subr.mxu1 %v23180_v38 }
 0x34d   : > { %v25451_v43 = vadd.f32 %v7727_v54, %v7642_v7  ;;  %v19918_v7 = vld [vmem:[%s27326_s3 + $0xb8] sm:$0x3f] }
 0x34e   : > { %v7633_v15 = vpop.f32.mrf.mxu1  ;;  %v7737_v26 = vpop.f32.mrf.mxu0  ;;  %22176 = vmatmul.mubr.msk.f32.gmra.mxu1 %vm4207_vm2, %v25444_v34  ;;  %22190 = vmatmul.mubr.msk.f32.gmra.mxu0 %vm4207_vm2, %v25446_v2 }
 0x34f   : > { %v7643_v36 = vadd.f32 %v7633_v15, %v7544_v46  ;;  %22178 = vmatprep.mubr.msk.f32.mxu1 %vm23181_vm6, %v23180_v38  ;;  %22205 = vmatprep.mubr.msk.f32.mxu0 %vm23181_vm6, %v23180_v38  ;;  %v25573_v46 = vld [vmem:[#allocation2 + $0x76] sm:$0xff] }
 0x350   : > { %v21825_v20 = vpop.f32.mrf.mxu1  ;;  %v21839_v55 = vpop.f32.mrf.mxu0  ;;  %v25610_v15 = vld [vmem:[#allocation2 + $0x79] sm:$0xff] }
 0x351   : > { %v25466_v0 = vadd.f32 %v7732_v1, %v7643_v36 }
 0x352   : > { %v7638_v41 = vpop.f32.mrf.mxu1  ;;  %v25468_v18 = vpop.f32.mrf.mxu0  ;;  %22179 = vmatmul.mubr.msk.f32.gmra.mxu1 %vm4207_vm2, %v25461_v61  ;;  %22206 = vmatmul.mubr.msk.f32.vlgmr.msra.gmra.mxu0 %vm4207_vm2, %v25010_v19 }
 0x353   : > { %v7644_v4 = vadd.f32 %v7638_v41, %v7545_v42  ;;  %22194 = vmatprep.mubr.msk.f32.mxu1 %vm23181_vm6, %v23180_v38  ;;  %22208 = vmatprep.mubr.msk.f32.mxu0 %vm23181_vm6, %v23180_v38  ;;  %v25592_v42 = vld [vmem:[#allocation2 + $0x7a] sm:$0xff] }
 0x354   : > { %v21828_v56 = vpop.f32.mrf.mxu1  ;;  %v21855_v5 = vpop.f32.mrf.mxu0  ;;  %22226 = vmatpush3.msk.msra.mxu0 %vm4262_vm5, %v19903_v40  ;;  %v25629_v41 = vld [vmem:[#allocation2 + $0x81] sm:$0xff] }
 0x355   : > { %v25484_v39 = vadd.f32 %v7737_v26, %v7644_v4  ;;  %22247 = vmatprep.subr.mxu0 %v23180_v38  ;;  %v25612_v26 = vld [vmem:[#allocation2 + $0x82] sm:$0xff] }
 0x356   : > { %v25487_v19 = vpop.f32.mrf.mxu1  ;;  %v25489_v58 = vpop.f32.mrf.mxu0  ;;  %22195 = vmatmul.mubr.msk.f32.vlgmr.msra.gmra.mxu1 %vm4207_vm2, %v25027_v28  ;;  %22209 = vmatmul.mubr.msk.f32.gmra.mxu0 %vm4207_vm2, %v25478_v51  ;;  %v11735_v5 = vld [vmem:[%s27326_s3] sm:$0x3f] }
 0x357   : > { %22215 = vmatpush3.msk.msra.mxu1 %vm4262_vm5, %v19898_v9  ;;  %22197 = vmatprep.mubr.msk.f32.mxu1 %vm23181_vm6, %v23180_v38 }
 0x358   : > { %v21844_v49 = vpop.f32.mrf.mxu1  ;;  %v21858_v62 = vpop.f32.mrf.mxu0  ;;  %22211 = vmatprep.mubr.msk.f32.mxu0 %vm23181_vm6, %v23180_v38  ;;  %22236 = vmatprep.subr.mxu1 %v23180_v38 }
 0x359   : > { %v25646_v62 = vld [vmem:[#allocation2 + $0x7c] sm:$0xff] }
 0x35a   : > { %v25505_v28 = vpop.f32.mrf.mxu1  ;;  %v25507_v8 = vpop.f32.mrf.mxu0  ;;  %22198 = vmatmul.mubr.msk.f32.gmra.mxu1 %vm4207_vm2, %v25498_v50  ;;  %22212 = vmatmul.mubr.msk.f32.gmra.mxu0 %vm4207_vm2, %v25500_v27 }
 0x35b   : > { %22200 = vmatprep.mubr.msk.f32.mxu1 %vm23181_vm6, %v23180_v38  ;;  %22227 = vmatprep.mubr.msk.f32.mxu0 %vm23181_vm6, %v23180_v38 }
 0x35c   : > { %v21847_v35 = vpop.f32.mrf.mxu1  ;;  %v21861_v52 = vpop.f32.mrf.mxu0 }
 0x35e   : > { %v25524_v31 = vpop.f32.mrf.mxu1  ;;  %v25526_v3 = vpop.f32.mrf.mxu0  ;;  %22201 = vmatmul.mubr.msk.f32.gmra.mxu1 %vm4207_vm2, %v25517_v17  ;;  %22228 = vmatmul.mubr.msk.f32.vlgmr.msra.gmra.mxu0 %vm4207_vm2, %v25519_v21 }
 0x35f   : > { %22216 = vmatprep.mubr.msk.f32.mxu1 %vm23181_vm6, %v23180_v38  ;;  %22230 = vmatprep.mubr.msk.f32.mxu0 %vm23181_vm6, %v23180_v38 }
 0x360   : > { %v21850_v37 = vpop.f32.mrf.mxu1  ;;  %v21877_v6 = vpop.f32.mrf.mxu0  ;;  %22248 = vmatpush3.msk.msra.mxu0 %vm4262_vm5, %v19913_v60  ;;  %v19928_v60 = vld [vmem:[%s27326_s3 + $0x8] sm:$0x3f] }
 0x361   : > { %22269 = vmatprep.subr.mxu0 %v23180_v38 }
 0x362   : > { %v25543_v63 = vpop.f32.mrf.mxu1  ;;  %v25545_v16 = vpop.f32.mrf.mxu0  ;;  %22217 = vmatmul.mubr.msk.f32.vlgmr.msra.gmra.mxu1 %vm4207_vm2, %v25081_v53  ;;  %22231 = vmatmul.mubr.msk.f32.gmra.mxu0 %vm4207_vm2, %v25536_v11 }
 0x363   : > { %22237 = vmatpush3.msk.msra.mxu1 %vm4262_vm5, %v19908_v33  ;;  %22219 = vmatprep.mubr.msk.f32.mxu1 %vm23181_vm6, %v23180_v38  ;;  %v25664_v33 = vld [vmem:[#allocation2 + $0x7b] sm:$0xff] }
 0x364   : > { %v21866_v10 = vpop.f32.mrf.mxu1  ;;  %v21880_v47 = vpop.f32.mrf.mxu0  ;;  %22233 = vmatprep.mubr.msk.f32.mxu0 %vm23181_vm6, %v23180_v38  ;;  %22258 = vmatprep.subr.mxu1 %v23180_v38 }
 0x365   : > { %v25666_v10 = vld [vmem:[#allocation2 + $0x84] sm:$0xff] }
 0x366   : > { %v25561_v53 = vpop.f32.mrf.mxu1  ;;  %v25563_v25 = vpop.f32.mrf.mxu0  ;;  %22220 = vmatmul.mubr.msk.f32.gmra.mxu1 %vm4207_vm2, %v25554_v24  ;;  %22234 = vmatmul.mubr.msk.f32.gmra.mxu0 %vm4207_vm2, %v25556_v45 }
 0x367   : > { %22222 = vmatprep.mubr.msk.f32.mxu1 %vm23181_vm6, %v23180_v38  ;;  %22249 = vmatprep.mubr.msk.f32.mxu0 %vm23181_vm6, %v23180_v38 }
 0x368   : > { %v21869_v13 = vpop.f32.mrf.mxu1  ;;  %v21883_v54 = vpop.f32.mrf.mxu0 }
 0x36a   : > { %v25578_v48 = vpop.f32.mrf.mxu1  ;;  %v25580_v23 = vpop.f32.mrf.mxu0  ;;  %22223 = vmatmul.mubr.msk.f32.gmra.mxu1 %vm4207_vm2, %v25573_v46  ;;  %22250 = vmatmul.mubr.msk.f32.vlgmr.msra.gmra.mxu0 %vm4207_vm2, %v25461_v61 }
 0x36b   : > { %22238 = vmatprep.mubr.msk.f32.mxu1 %vm23181_vm6, %v23180_v38  ;;  %22252 = vmatprep.mubr.msk.f32.mxu0 %vm23181_vm6, %v23180_v38 }
 0x36c   : > { %v21872_v29 = vpop.f32.mrf.mxu1  ;;  %v21899_v1 = vpop.f32.mrf.mxu0  ;;  %22270 = vmatpush3.msk.msra.mxu0 %vm4262_vm5, %v19923_v57 }
 0x36d   : > { %22291 = vmatprep.subr.mxu0 %v23180_v38  ;;  %v25683_v29 = vld [vmem:[#allocation2 + $0x83] sm:$0xff]  ;;  %v11732_v1 = vld [vmem:[#allocation2 + $0x54] sm:$0xff] }
 0x36e   : > { %v25599_v44 = vpop.f32.mrf.mxu1  ;;  %v25601_v14 = vpop.f32.mrf.mxu0  ;;  %22239 = vmatmul.mubr.msk.f32.vlgmr.msra.gmra.mxu1 %vm4207_vm2, %v25590_v12  ;;  %22253 = vmatmul.mubr.msk.f32.gmra.mxu0 %vm4207_vm2, %v25592_v42 }
 0x36f   : > { %22259 = vmatpush3.msk.msra.mxu1 %vm4262_vm5, %v19918_v7  ;;  %22241 = vmatprep.mubr.msk.f32.mxu1 %vm23181_vm6, %v23180_v38 }
 0x370   : > { %v21888_v36 = vpop.f32.mrf.mxu1  ;;  %v21902_v20 = vpop.f32.mrf.mxu0  ;;  %22255 = vmatprep.mubr.msk.f32.mxu0 %vm23181_vm6, %v23180_v38  ;;  %22280 = vmatprep.subr.mxu1 %v23180_v38 }
 0x371   : > { %v7840_v20 = vadd.f32 %v25487_v19, %v25451_v43  ;;  %v11736_v43 = vld [vmem:[#allocation2 + $0x55] sm:$0xff] }
 0x372   : > { %v25617_v55 = vpop.f32.mrf.mxu1  ;;  %v25619_v40 = vpop.f32.mrf.mxu0  ;;  %22242 = vmatmul.mubr.msk.f32.gmra.mxu1 %vm4207_vm2, %v25610_v15  ;;  %22256 = vmatmul.mubr.msk.f32.gmra.mxu0 %vm4207_vm2, %v25612_v26  ;;  %v11733_v19 = vld [vmem:[#allocation2 + $0x5c] sm:$0xff] }
 0x373   : > { %22244 = vmatprep.mubr.msk.f32.mxu1 %vm23181_vm6, %v23180_v38  ;;  %22271 = vmatprep.mubr.msk.f32.mxu0 %vm23181_vm6, %v23180_v38 }
 0x374   : > { %v21891_v4 = vpop.f32.mrf.mxu1  ;;  %v21905_v56 = vpop.f32.mrf.mxu0 }
 0x375   : > { %v19942_v4 = vld [vmem:[%s27326_s3 + $0x18] sm:$0x3f] }
 0x376   : > { %v25634_v9 = vpop.f32.mrf.mxu1  ;;  %v25636_v49 = vpop.f32.mrf.mxu0  ;;  %22245 = vmatmul.mubr.msk.f32.gmra.mxu1 %vm4207_vm2, %v25629_v41  ;;  %22272 = vmatmul.mubr.msk.f32.vlgmr.msra.gmra.mxu0 %vm4207_vm2, %v25517_v17 }
 0x377   : > { %22260 = vmatprep.mubr.msk.f32.mxu1 %vm23181_vm6, %v23180_v38  ;;  %22274 = vmatprep.mubr.msk.f32.mxu0 %vm23181_vm6, %v23180_v38 }
 0x378   : > { %v21894_v35 = vpop.f32.mrf.mxu1  ;;  %v21921_v52 = vpop.f32.mrf.mxu0  ;;  %22292 = vmatpush3.msk.msra.mxu0 %vm4262_vm5, %v11735_v5 }
 0x379   : > { %22313 = vmatprep.subr.mxu0 %v23180_v38 }
 0x37a   : > { %v25653_v37 = vpop.f32.mrf.mxu1  ;;  %v25655_v6 = vpop.f32.mrf.mxu0  ;;  %22261 = vmatmul.mubr.msk.f32.vlgmr.msra.gmra.mxu1 %vm4207_vm2, %v25446_v2  ;;  %22275 = vmatmul.mubr.msk.f32.gmra.mxu0 %vm4207_vm2, %v25646_v62 }
 0x37b   : > { %22281 = vmatpush3.msk.msra.mxu1 %vm4262_vm5, %v19928_v60  ;;  %22263 = vmatprep.mubr.msk.f32.mxu1 %vm23181_vm6, %v23180_v38  ;;  %v19937_v60 = vld [vmem:[%s27326_s3 + $0x10] sm:$0x3f] }
 0x37c   : > { %v21910_v47 = vpop.f32.mrf.mxu1  ;;  %v21924_v13 = vpop.f32.mrf.mxu0  ;;  %22277 = vmatprep.mubr.msk.f32.mxu0 %vm23181_vm6, %v23180_v38  ;;  %22302 = vmatprep.subr.mxu1 %v23180_v38 }
 0x37d   : > { %v7841_v47 = vadd.f32 %v25505_v28, %v25466_v0  ;;  %v7939_v13 = vadd.f32 %v25468_v18, %v7840_v20  ;;  %v11737_v0 = vld [vmem:[#allocation2 + $0x5d] sm:$0xff] }
 0x37e   : > { %v25671_v54 = vpop.f32.mrf.mxu1  ;;  %v25673_v57 = vpop.f32.mrf.mxu0  ;;  %22264 = vmatmul.mubr.msk.f32.gmra.mxu1 %vm4207_vm2, %v25664_v33  ;;  %22278 = vmatmul.mubr.msk.f32.gmra.mxu0 %vm4207_vm2, %v25666_v10  ;;  %v25719_v28 = vld [vmem:[#allocation2 + $0x64] sm:$0xff] }
 0x37f   : > { %22266 = vmatprep.mubr.msk.f32.mxu1 %vm23181_vm6, %v23180_v38  ;;  %22293 = vmatprep.mubr.msk.f32.mxu0 %vm23181_vm6, %v23180_v38 }
 0x380   : > { %v21913_v7 = vpop.f32.mrf.mxu1  ;;  %v21927_v36 = vpop.f32.mrf.mxu0 }
 0x381   : > { %v8038_v36 = vadd.f32 %v25543_v63, %v7939_v13  ;;  %v7940_v63 = vadd.f32 %v25489_v58, %v7841_v47  ;;  %v12023_v58 = vld [vmem:[#allocation2 + $0x57] sm:$0xff] }
 0x382   : > { %v25690_v56 = vpop.f32.mrf.mxu1  ;;  %v25692_v5 = vpop.f32.mrf.mxu0  ;;  %22267 = vmatmul.mubr.msk.f32.gmra.mxu1 %vm4207_vm2, %v25683_v29  ;;  %22294 = vmatmul.mubr.msk.f32.vlgmr.msra.gmra.mxu0 %vm4207_vm2, %v11732_v1 }
 0x383   : > { %22282 = vmatprep.mubr.msk.f32.mxu1 %vm23181_vm6, %v23180_v38  ;;  %22296 = vmatprep.mubr.msk.f32.mxu0 %vm23181_vm6, %v23180_v38 }
 0x384   : > { %v21916_v35 = vpop.f32.mrf.mxu1  ;;  %v21943_v52 = vpop.f32.mrf.mxu0  ;;  %22314 = vmatpush3.msk.msra.mxu0 %vm4262_vm5, %v19942_v4  ;;  %v7842_v4 = vadd.f32 %v25524_v31, %v25484_v39  ;;  %v25740_v39 = vld [vmem:[#allocation2 + $0x65] sm:$0xff] }
 0x385   : > { %22335 = vmatprep.subr.mxu0 %v23180_v38  ;;  %v8039_v35 = vadd.f32 %v25561_v53, %v7940_v63  ;;  %v8137_v52 = vadd.f32 %v25526_v3, %v8038_v36  ;;  %v19952_v53 = vld [vmem:[%s27326_s3 + $0x28] sm:$0x3f]  ;;  %v19947_v63 = vld [vmem:[%s27326_s3 + $0x20] sm:$0x3f] }
 0x386   : > { %v25709_v1 = vpop.f32.mrf.mxu1  ;;  %v25711_v7 = vpop.f32.mrf.mxu0  ;;  %22283 = vmatmul.mubr.msk.f32.vlgmr.msra.gmra.mxu1 %vm4207_vm2, %v11736_v43  ;;  %22297 = vmatmul.mubr.msk.f32.gmra.mxu0 %vm4207_vm2, %v11733_v19  ;;  %v7941_v47 = vadd.f32 %v25507_v8, %v7842_v4  ;;  %v11924_v8 = vld [vmem:[#allocation2 + $0x56] sm:$0xff] }
 0x387   : > { %22303 = vmatpush3.msk.msra.mxu1 %vm4262_vm5, %v19937_v60  ;;  %22285 = vmatprep.mubr.msk.f32.mxu1 %vm23181_vm6, %v23180_v38  ;;  %v8236_v13 = vadd.f32 %v25599_v44, %v8137_v52  ;;  %v12024_v44 = vld [vmem:[#allocation2 + $0x5f] sm:$0xff] }
 0x388   : > { %v21932_v18 = vpop.f32.mrf.mxu1  ;;  %v21946_v20 = vpop.f32.mrf.mxu0  ;;  %22299 = vmatprep.mubr.msk.f32.mxu0 %vm23181_vm6, %v23180_v38  ;;  %22324 = vmatprep.subr.mxu1 %v23180_v38 }
 0x389   : > { %v8138_v18 = vadd.f32 %v25545_v16, %v8039_v35  ;;  %v8335_v16 = vadd.f32 %v25580_v23, %v8236_v13  ;;  %v12025_v23 = vld [vmem:[#allocation2 + $0x67] sm:$0xff] }
 0x38a   : > { %v25727_v43 = vpop.f32.mrf.mxu1  ;;  %v25729_v19 = vpop.f32.mrf.mxu0  ;;  %22286 = vmatmul.mubr.msk.f32.gmra.mxu1 %vm4207_vm2, %v11737_v0  ;;  %22300 = vmatmul.mubr.msk.f32.gmra.mxu0 %vm4207_vm2, %v25719_v28  ;;  %v8040_v0 = vadd.f32 %v25578_v48, %v7941_v47 }
 0x38b   : > { %22288 = vmatprep.mubr.msk.f32.mxu1 %vm23181_vm6, %v23180_v38  ;;  %22315 = vmatprep.mubr.msk.f32.mxu0 %vm23181_vm6, %v23180_v38  ;;  %v8237_v48 = vadd.f32 %v25617_v55, %v8138_v18  ;;  %v11925_v55 = vld [vmem:[#allocation2 + $0x5e] sm:$0xff] }
 0x38c   : > { %v21935_v31 = vpop.f32.mrf.mxu1  ;;  %v21949_v60 = vpop.f32.mrf.mxu0 }
 0x38d   : > { %v8434_v31 = vadd.f32 %v25653_v37, %v8335_v16 }
 0x38e   : > { %v25747_v3 = vpop.f32.mrf.mxu1  ;;  %v25749_v36 = vpop.f32.mrf.mxu0  ;;  %22289 = vmatmul.mubr.msk.f32.gmra.mxu1 %vm4207_vm2, %v25740_v39  ;;  %22316 = vmatmul.mubr.msk.f32.vlgmr.msra.gmra.mxu0 %vm4207_vm2, %v12023_v58  ;;  %v8139_v58 = vadd.f32 %v25563_v25, %v8040_v0  ;;  %v8336_v25 = vadd.f32 %v25601_v14, %v8237_v48 }
 0x38f   : > { %22304 = vmatprep.mubr.msk.f32.mxu1 %vm23181_vm6, %v23180_v38  ;;  %22318 = vmatprep.mubr.msk.f32.mxu0 %vm23181_vm6, %v23180_v38  ;;  %v8533_v18 = vadd.f32 %v25636_v49, %v8434_v31 }
 0x390   : > { %v21938_v20 = vpop.f32.mrf.mxu1  ;;  %v21965_v4 = vpop.f32.mrf.mxu0  ;;  %22336 = vmatpush3.msk.msra.mxu0 %vm4262_vm5, %v19952_v53  ;;  %v8238_v13 = vadd.f32 %v25634_v9, %v8139_v58  ;;  %v8435_v0 = vadd.f32 %v25671_v54, %v8336_v25  ;;  %v25791_v9 = vld [vmem:[#allocation2 + $0x66] sm:$0xff]  ;;  %v19962_v54 = vld [vmem:[%s27326_s3 + $0x38] sm:$0x3f]  ;;  %v19957_v58 = vld [vmem:[%s27326_s3 + $0x30] sm:$0x3f] }
 0x391   : > { %22357 = vmatprep.subr.mxu0 %v23180_v38  ;;  %v8632_v20 = vadd.f32 %v25709_v1, %v8533_v18 }
 0x392   : > { %v8816_v35 = vpop.f32.mrf.mxu1  ;;  %v25767_v52 = vpop.f32.mrf.mxu0  ;;  %22305 = vmatmul.mubr.msk.f32.vlgmr.msra.gmra.mxu1 %vm4207_vm2, %v11924_v8  ;;  %22319 = vmatmul.mubr.msk.f32.gmra.mxu0 %vm4207_vm2, %v12024_v44  ;;  %v8337_v44 = vadd.f32 %v25619_v40, %v8238_v13  ;;  %v8534_v48 = vadd.f32 %v25655_v6, %v8435_v0  ;;  %v12122_v40 = vld [vmem:[#allocation2 + $0x58] sm:$0xff]  ;;  %v12124_v0 = vld [vmem:[#allocation2 + $0x68] sm:$0xff] }
 0x393   : > { %22325 = vmatpush3.msk.msra.mxu1 %vm4262_vm5, %v19947_v63  ;;  %22307 = vmatprep.mubr.msk.f32.mxu1 %vm23181_vm6, %v23180_v38 }
 0x394   : > { %v21954_v60 = vpop.f32.mrf.mxu1  ;;  %v21968_v47 = vpop.f32.mrf.mxu0  ;;  %22321 = vmatprep.mubr.msk.f32.mxu0 %vm23181_vm6, %v23180_v38  ;;  %22346 = vmatprep.subr.mxu1 %v23180_v38  ;;  %v8436_v63 = vadd.f32 %v25690_v56, %v8337_v44  ;;  %v8731_v56 = vadd.f32 %v25692_v5, %v8632_v20 }
 0x396   : > { %v8821_v53 = vpop.f32.mrf.mxu1  ;;  %v25781_v37 = vpop.f32.mrf.mxu0  ;;  %22308 = vmatmul.mubr.msk.f32.gmra.mxu1 %vm4207_vm2, %v11925_v55  ;;  %22322 = vmatmul.mubr.msk.f32.gmra.mxu0 %vm4207_vm2, %v12025_v23  ;;  %v8535_v55 = vadd.f32 %v25673_v57, %v8436_v63  ;;  %v8830_v23 = vadd.f32 %v8816_v35, %v8731_v56  ;;  %v19967_v63 = vld [vmem:[%s27326_s3 + $0x40] sm:$0x3f] }
 0x397   : > { %22310 = vmatprep.mubr.msk.f32.mxu1 %vm23181_vm6, %v23180_v38  ;;  %22337 = vmatprep.mubr.msk.f32.mxu0 %vm23181_vm6, %v23180_v38 }
 0x398   : > { %v21957_v14 = vpop.f32.mrf.mxu1  ;;  %v21971_v8 = vpop.f32.mrf.mxu0  ;;  %v8634_v47 = vadd.f32 %v25747_v3, %v8535_v55  ;;  %v8929_v25 = vadd.f32 %v25749_v36, %v8830_v23 }
 0x399   : > { %v19972_v8 = vld [vmem:[%s27326_s3 + $0x48] sm:$0x3f] }
 0x39a   : > { %v8826_v4 = vpop.f32.mrf.mxu1  ;;  %v9113_v49 = vpop.f32.mrf.mxu0  ;;  %22311 = vmatmul.mubr.msk.f32.gmra.mxu1 %vm4207_vm2, %v25791_v9  ;;  %22338 = vmatmul.mubr.msk.f32.vlgmr.msra.gmra.mxu0 %vm4207_vm2, %v25428_v32  ;;  %v8633_v32 = vadd.f32 %v25727_v43, %v8534_v48  ;;  %v12123_v43 = vld [vmem:[#allocation2 + $0x60] sm:$0xff] }
 0x39b   : > { %22326 = vmatprep.mubr.msk.f32.mxu1 %vm23181_vm6, %v23180_v38  ;;  %22340 = vmatprep.mubr.msk.f32.mxu0 %vm23181_vm6, %v23180_v38 }
 0x39c   : > { %v21960_v1 = vpop.f32.mrf.mxu1  ;;  %v21987_v16 = vpop.f32.mrf.mxu0  ;;  %22358 = vmatpush3.msk.msra.mxu0 %vm4262_vm5, %v19962_v54 }
 0x39d   : > { %22379 = vmatprep.subr.mxu0 %v23180_v38 }
 0x39e   : > { %v9014_v6 = vpop.f32.mrf.mxu1  ;;  %v9118_v31 = vpop.f32.mrf.mxu0  ;;  %22327 = vmatmul.mubr.msk.f32.vlgmr.msra.gmra.mxu1 %vm4207_vm2, %v12122_v40  ;;  %22341 = vmatmul.mubr.msk.f32.gmra.mxu0 %vm4207_vm2, %v25444_v34  ;;  %v8732_v34 = vadd.f32 %v25711_v7, %v8633_v32  ;;  %v8733_v7 = vadd.f32 %v25729_v19, %v8634_v47 }
 0x39f   : > { %22347 = vmatpush3.msk.msra.mxu1 %vm4262_vm5, %v19957_v58  ;;  %22329 = vmatprep.mubr.msk.f32.mxu1 %vm23181_vm6, %v23180_v38  ;;  %v9028_v14 = vadd.f32 %v9014_v6, %v8929_v25 }
 0x3a0   : > { %v21976_v60 = vpop.f32.mrf.mxu1  ;;  %v21990_v5 = vpop.f32.mrf.mxu0  ;;  %22343 = vmatprep.mubr.msk.f32.mxu0 %vm23181_vm6, %v23180_v38  ;;  %22368 = vmatprep.subr.mxu1 %v23180_v38  ;;  %v8831_v35 = vadd.f32 %v8821_v53, %v8732_v34  ;;  %v8832_v36 = vadd.f32 %v8826_v4, %v8733_v7 }
 0x3a1   : > { %v9127_v40 = vadd.f32 %v9113_v49, %v9028_v14 }
 0x3a2   : > { %v9019_v13 = vpop.f32.mrf.mxu1  ;;  %v9123_v57 = vpop.f32.mrf.mxu0  ;;  %22330 = vmatmul.mubr.msk.f32.gmra.mxu1 %vm4207_vm2, %v12123_v43  ;;  %22344 = vmatmul.mubr.msk.f32.gmra.mxu0 %vm4207_vm2, %v25461_v61  ;;  %v8930_v20 = vadd.f32 %v25767_v52, %v8831_v35  ;;  %v8931_v4 = vadd.f32 %v25781_v37, %v8832_v36  ;;  %v19977_v35 = vld [vmem:[%s27326_s3 + $0x50] sm:$0x3f] }
 0x3a3   : > { %22332 = vmatprep.mubr.msk.f32.mxu1 %vm23181_vm6, %v23180_v38  ;;  %22359 = vmatprep.mubr.msk.f32.mxu0 %vm23181_vm6, %v23180_v38 }
 0x3a4   : > { %v21979_v3 = vpop.f32.mrf.mxu1  ;;  %v21993_v18 = vpop.f32.mrf.mxu0  ;;  %v9029_v48 = vadd.f32 %v9019_v13, %v8930_v20  ;;  %v19992_v20 = vld [vmem:[%s27326_s3 + $0x68] sm:$0x3f] }
 0x3a6   : > { %v9024_v44 = vpop.f32.mrf.mxu1  ;;  %v25839_v53 = vpop.f32.mrf.mxu0  ;;  %22333 = vmatmul.mubr.msk.f32.gmra.mxu1 %vm4207_vm2, %v12124_v0  ;;  %22360 = vmatmul.mubr.msk.f32.vlgmr.msra.gmra.mxu0 %vm4207_vm2, %v25719_v28  ;;  %v9128_v32 = vadd.f32 %v9118_v31, %v9029_v48 }
 0x3a7   : > { %22348 = vmatprep.mubr.msk.f32.mxu1 %vm23181_vm6, %v23180_v38  ;;  %22362 = vmatprep.mubr.msk.f32.mxu0 %vm23181_vm6, %v23180_v38  ;;  %v9030_v58 = vadd.f32 %v9024_v44, %v8931_v4 }
 0x3a8   : > { %v21982_v19 = vpop.f32.mrf.mxu1  ;;  %v22009_v54 = vpop.f32.mrf.mxu0  ;;  %22380 = vmatpush3.msk.msra.mxu0 %vm4262_vm5, %v19972_v8 }
 0x3a9   : > { %22401 = vmatprep.subr.mxu0 %v23180_v38  ;;  %v9129_v43 = vadd.f32 %v9123_v57, %v9030_v58 }
 0x3aa   : > { %v9212_v28 = vpop.f32.mrf.mxu1  ;;  %v9337_v52 = vpop.f32.mrf.mxu0  ;;  %22349 = vmatmul.mubr.msk.f32.vlgmr.msra.gmra.mxu1 %vm4207_vm2, %v25415_v22  ;;  %22363 = vmatmul.mubr.msk.f32.gmra.mxu0 %vm4207_vm2, %v25498_v50 }
 0x3ab   : > { %v9226_v1 = vadd.f32 %v9212_v28, %v9127_v40  ;;  %22369 = vmatpush3.msk.msra.mxu1 %vm4262_vm5, %v19967_v63  ;;  %22351 = vmatprep.mubr.msk.f32.mxu1 %vm23181_vm6, %v23180_v38 }
 0x3ac   : > { %v21998_v16 = vpop.f32.mrf.mxu1  ;;  %v22012_v49 = vpop.f32.mrf.mxu0  ;;  %22365 = vmatprep.mubr.msk.f32.mxu0 %vm23181_vm6, %v23180_v38  ;;  %22390 = vmatprep.subr.mxu1 %v23180_v38 }
 0x3ad   : > { %v9229_v22 = vadd.f32 %v27365_v30, %v9226_v1 }
 0x3ae   : > { %v9217_v50 = vpop.f32.mrf.mxu1  ;;  %v9342_v56 = vpop.f32.mrf.mxu0  ;;  %22352 = vmatmul.mubr.msk.f32.gmra.mxu1 %vm4207_vm2, %v25430_v59  ;;  %22366 = vmatmul.mubr.msk.f32.gmra.mxu0 %vm4207_vm2, %v25517_v17  ;;  %v19982_v59 = vld [vmem:[%s27326_s3 + $0x58] sm:$0x3f] }
 0x3af   : > { %v9232_v37 = vmax.f32 %v9229_v22, 0.0  ;;  %v9227_v6 = vadd.f32 %v9217_v50, %v9128_v32  ;;  %22354 = vmatprep.mubr.msk.f32.mxu1 %vm23181_vm6, %v23180_v38  ;;  %22381 = vmatprep.mubr.msk.f32.mxu0 %vm23181_vm6, %v23180_v38 }
 0x3b0   : > { %v22001_v55 = vpop.f32.mrf.mxu1  ;;  %v22015_v23 = vpop.f32.mrf.mxu0 }
 0x3b1   : > { %9235 = vst.msk [vmem:[#allocation5] sm:$0xff] %vm6744_vm7, %v9232_v37  ;;  %v9230_v31 = vadd.f32 %v27365_v30, %v9227_v6 }
 0x3b2   : > { %v9222_v60 = vpop.f32.mrf.mxu1  ;;  %v9520_v5 = vpop.f32.mrf.mxu0  ;;  %22355 = vmatmul.mubr.msk.f32.gmra.mxu1 %vm4207_vm2, %v25446_v2  ;;  %22382 = vmatmul.mubr.msk.f32.vlgmr.msra.gmra.mxu0 %vm4207_vm2, %v25791_v9 }
 0x3b3   : > { %v9233_v47 = vmax.f32 %v9230_v31, 0.0  ;;  %v9228_v34 = vadd.f32 %v9222_v60, %v9129_v43  ;;  %22370 = vmatprep.mubr.msk.f32.mxu1 %vm23181_vm6, %v23180_v38  ;;  %22384 = vmatprep.mubr.msk.f32.mxu0 %vm23181_vm6, %v23180_v38  ;;  %v20002_v31 = vld [vmem:[%s27326_s3 + $0x78] sm:$0x3f] }
 0x3b4   : > { %v22004_v13 = vpop.f32.mrf.mxu1  ;;  %v22031_v57 = vpop.f32.mrf.mxu0  ;;  %22402 = vmatpush3.msk.msra.mxu0 %vm4262_vm5, %v19982_v59 }
 0x3b5   : > { %9236 = vst.msk [vmem:[#allocation5 + $0x8] sm:$0xff] %vm6744_vm7, %v9233_v47  ;;  %v9231_v9 = vadd.f32 %v27365_v30, %v9228_v34  ;;  %22423 = vmatprep.subr.mxu0 %v23180_v38  ;;  %v19997_v34 = vld [vmem:[%s27326_s3 + $0x70] sm:$0x3f] }
 0x3b6   : > { %v9424_v25 = vpop.f32.mrf.mxu1  ;;  %v9525_v0 = vpop.f32.mrf.mxu0  ;;  %22371 = vmatmul.mubr.msk.f32.vlgmr.msra.gmra.mxu1 %vm4207_vm2, %v25740_v39  ;;  %22385 = vmatmul.mubr.msk.f32.gmra.mxu0 %vm4207_vm2, %v25554_v24 }
 0x3b7   : > { %v9234_v3 = vmax.f32 %v9231_v9, 0.0  ;;  %v9425_v18 = vadd.f32 %v9424_v25, %v25839_v53  ;;  %22391 = vmatpush3.msk.msra.mxu1 %vm4262_vm5, %v19977_v35  ;;  %22373 = vmatprep.mubr.msk.f32.mxu1 %vm23181_vm6, %v23180_v38 }
 0x3b8   : > { %v22020_v7 = vpop.f32.mrf.mxu1  ;;  %v22034_v14 = vpop.f32.mrf.mxu0  ;;  %22387 = vmatprep.mubr.msk.f32.mxu0 %vm23181_vm6, %v23180_v38  ;;  %22412 = vmatprep.subr.mxu1 %v23180_v38 }
 0x3b9   : > { %9237 = vst.msk [vmem:[#allocation5 + $0x10] sm:$0xff] %vm6744_vm7, %v9234_v3  ;;  %v9534_v39 = vadd.f32 %v9520_v5, %v9425_v18 }
 0x3ba   : > { %v9429_v8 = vpop.f32.mrf.mxu1  ;;  %v9530_v24 = vpop.f32.mrf.mxu0  ;;  %22374 = vmatmul.mubr.msk.f32.gmra.mxu1 %vm4207_vm2, %v25478_v51  ;;  %22388 = vmatmul.mubr.msk.f32.gmra.mxu0 %vm4207_vm2, %v25573_v46 }
 0x3bb   : > { %v9430_v44 = vadd.f32 %v9429_v8, %v9337_v52  ;;  %22376 = vmatprep.mubr.msk.f32.mxu1 %vm23181_vm6, %v23180_v38  ;;  %22403 = vmatprep.mubr.msk.f32.mxu0 %vm23181_vm6, %v23180_v38  ;;  %v19987_v52 = vld [vmem:[%s27326_s3 + $0x60] sm:$0x3f] }
 0x3bc   : > { %v22023_v53 = vpop.f32.mrf.mxu1  ;;  %v22037_v36 = vpop.f32.mrf.mxu0  ;;  %v9238_v46 = vld [vmem:[#allocation5] ss:$2 sm:$0x1f]  ;;  %v9239_v48 = vld [vmem:[#allocation5 + $0x1] ss:$2 sm:$0x1f] }
 0x3bd   : > { %v9535_v19 = vadd.f32 %v9525_v0, %v9430_v44  ;;  %v9240_v49 = vmax.f32 %v9238_v46, %v9239_v48  ;;  %v25996_v44 = vld [vmem:[#allocation2 + $0x86] sm:$0xff]  ;;  %v26010_v46 = vld [vmem:[#allocation2 + $0x8e] sm:$0xff] }
 0x3be   : > { %v9434_v54 = vpop.f32.mrf.mxu1  ;;  %v9718_v63 = vpop.f32.mrf.mxu0  ;;  %22377 = vmatmul.mubr.msk.f32.gmra.mxu1 %vm4207_vm2, %v25500_v27  ;;  %22404 = vmatmul.mubr.msk.f32.vlgmr.msra.gmra.mxu0 %vm4207_vm2, %v25590_v12 }
 0x3bf   : > { %v9435_v51 = vadd.f32 %v9434_v54, %v9342_v56  ;;  %22392 = vmatprep.mubr.msk.f32.mxu1 %vm23181_vm6, %v23180_v38  ;;  %22406 = vmatprep.mubr.msk.f32.mxu0 %vm23181_vm6, %v23180_v38 }
 0x3c0   : > { %v22026_v40 = vpop.f32.mrf.mxu1  ;;  %v22053_v28 = vpop.f32.mrf.mxu0  ;;  %22424 = vmatpush3.msk.msra.mxu0 %vm4262_vm5, %v19992_v20  ;;  %v9241_v27 = vld [vmem:[#allocation5 + $0xe] ss:$2 sm:$0x1f]  ;;  %v9242_v12 = vld [vmem:[#allocation5 + $0xf] ss:$2 sm:$0x1f] }
 0x3c1   : > { %v9536_v4 = vadd.f32 %v9530_v24, %v9435_v51  ;;  %22445 = vmatprep.subr.mxu0 %v23180_v38  ;;  %v9243_v58 = vmax.f32 %v9241_v27, %v9242_v12  ;;  %v20007_v20 = vld [vmem:[%s27326_s3 + $0x80] sm:$0x3f] }
 0x3c2   : > { %v9619_v1 = vpop.f32.mrf.mxu1  ;;  %v9723_v16 = vpop.f32.mrf.mxu0  ;;  %22393 = vmatmul.mubr.msk.f32.vlgmr.msra.gmra.mxu1 %vm4207_vm2, %v25519_v21  ;;  %22407 = vmatmul.mubr.msk.f32.gmra.mxu0 %vm4207_vm2, %v25610_v15 }
 0x3c3   : > { %v9633_v22 = vadd.f32 %v9619_v1, %v9534_v39  ;;  %22413 = vmatpush3.msk.msra.mxu1 %vm4262_vm5, %v19987_v52  ;;  %22395 = vmatprep.mubr.msk.f32.mxu1 %vm23181_vm6, %v23180_v38  ;;  %v9244_v56 = vmax.f32 %v9240_v49, %v9243_v58  ;;  %v20012_v39 = vld [vmem:[%s27326_s3 + $0x88] sm:$0x3f]  ;;  %v20022_v1 = vld [vmem:[%s27326_s3 + $0x98] sm:$0x3f] }
 0x3c4   : > { %v22042_v32 = vpop.f32.mrf.mxu1  ;;  %v22056_v50 = vpop.f32.mrf.mxu0  ;;  %22409 = vmatprep.mubr.msk.f32.mxu0 %vm23181_vm6, %v23180_v38  ;;  %22434 = vmatprep.subr.mxu1 %v23180_v38 }
 0x3c5   : > { %v9732_v21 = vadd.f32 %v9718_v63, %v9633_v22  ;;  %9245 = vst.msk [vmem:[#allocation3 + $0x5] sm:$0x1f] %vm6758_vm8, %v9244_v56  ;;  %v26040_v22 = vld [vmem:[#allocation2 + $0x7f] sm:$0xff]  ;;  %v26042_v32 = vld [vmem:[#allocation2 + $0x88] sm:$0xff] }
 0x3c6   : > { %v9624_v37 = vpop.f32.mrf.mxu1  ;;  %v9728_v6 = vpop.f32.mrf.mxu0  ;;  %22396 = vmatmul.mubr.msk.f32.gmra.mxu1 %vm4207_vm2, %v25536_v11  ;;  %22410 = vmatmul.mubr.msk.f32.gmra.mxu0 %vm4207_vm2, %v25629_v41 }
 0x3c7   : > { %v9634_v15 = vadd.f32 %v9624_v37, %v9535_v19  ;;  %22398 = vmatprep.mubr.msk.f32.mxu1 %vm23181_vm6, %v23180_v38  ;;  %22425 = vmatprep.mubr.msk.f32.mxu0 %vm23181_vm6, %v23180_v38 }
 0x3c8   : > { %v22045_v55 = vpop.f32.mrf.mxu1  ;;  %v22059_v23 = vpop.f32.mrf.mxu0 }
 0x3c9   : > { %v9733_v43 = vadd.f32 %v9723_v16, %v9634_v15  ;;  %v26064_v15 = vld [vmem:[#allocation2 + $0x90] sm:$0xff] }
 0x3ca   : > { %v9629_v11 = vpop.f32.mrf.mxu1  ;;  %v9916_v59 = vpop.f32.mrf.mxu0  ;;  %22399 = vmatmul.mubr.msk.f32.gmra.mxu1 %vm4207_vm2, %v25556_v45  ;;  %22426 = vmatmul.mubr.msk.f32.vlgmr.msra.gmra.mxu0 %vm4207_vm2, %v25446_v2 }
 0x3cb   : > { %v9635_v60 = vadd.f32 %v9629_v11, %v9536_v4  ;;  %22414 = vmatprep.mubr.msk.f32.mxu1 %vm23181_vm6, %v23180_v38  ;;  %22428 = vmatprep.mubr.msk.f32.mxu0 %vm23181_vm6, %v23180_v38  ;;  %v26081_v11 = vld [vmem:[#allocation2 + $0x8f] sm:$0xff] }
 0x3cc   : > { %v22048_v5 = vpop.f32.mrf.mxu1  ;;  %v22075_v47 = vpop.f32.mrf.mxu0  ;;  %22446 = vmatpush3.msk.msra.mxu0 %vm4262_vm5, %v20002_v31 }
 0x3cd   : > { %v9734_v13 = vadd.f32 %v9728_v6, %v9635_v60  ;;  %22467 = vmatprep.subr.mxu0 %v23180_v38  ;;  %v26062_v6 = vld [vmem:[#allocation2 + $0x87] sm:$0xff] }
 0x3ce   : > { %v9817_v57 = vpop.f32.mrf.mxu1  ;;  %v9921_v2 = vpop.f32.mrf.mxu0  ;;  %22415 = vmatmul.mubr.msk.f32.vlgmr.msra.gmra.mxu1 %vm4207_vm2, %v25461_v61  ;;  %22429 = vmatmul.mubr.msk.f32.gmra.mxu0 %vm4207_vm2, %v25664_v33  ;;  %v25983_v33 = vld [vmem:[#allocation2 + $0x7e] sm:$0xff]  ;;  %v20032_v5 = vld [vmem:[%s27326_s3 + $0xa8] sm:$0x3f] }
 0x3cf   : > { %v9831_v35 = vadd.f32 %v9817_v57, %v9732_v21  ;;  %22435 = vmatpush3.msk.msra.mxu1 %vm4262_vm5, %v19997_v34  ;;  %22417 = vmatprep.mubr.msk.f32.mxu1 %vm23181_vm6, %v23180_v38 }
 0x3d0   : > { %v22064_v9 = vpop.f32.mrf.mxu1  ;;  %v22078_v25 = vpop.f32.mrf.mxu0  ;;  %22431 = vmatprep.mubr.msk.f32.mxu0 %vm23181_vm6, %v23180_v38  ;;  %22456 = vmatprep.subr.mxu1 %v23180_v38 }
 0x3d1   : > { %v9930_v0 = vadd.f32 %v9916_v59, %v9831_v35  ;;  %v20027_v35 = vld [vmem:[%s27326_s3 + $0xa0] sm:$0x3f]  ;;  %v26116_v25 = vld [vmem:[#allocation2 + $0x89] sm:$0xff] }
 0x3d2   : > { %v9822_v3 = vpop.f32.mrf.mxu1  ;;  %v9926_v18 = vpop.f32.mrf.mxu0  ;;  %22418 = vmatmul.mubr.msk.f32.gmra.mxu1 %vm4207_vm2, %v25592_v42  ;;  %22432 = vmatmul.mubr.msk.f32.gmra.mxu0 %vm4207_vm2, %v25683_v29 }
 0x3d3   : > { %v9832_v61 = vadd.f32 %v9822_v3, %v9733_v43  ;;  %22420 = vmatprep.mubr.msk.f32.mxu1 %vm23181_vm6, %v23180_v38  ;;  %22447 = vmatprep.mubr.msk.f32.mxu0 %vm23181_vm6, %v23180_v38 }
 0x3d4   : > { %v22067_v7 = vpop.f32.mrf.mxu1  ;;  %v22081_v14 = vpop.f32.mrf.mxu0 }
 0x3d5   : > { %v9931_v8 = vadd.f32 %v9921_v2, %v9832_v61  ;;  %v26135_v7 = vld [vmem:[#allocation2 + $0x91] sm:$0xff] }
 0x3d6   : > { %v9827_v42 = vpop.f32.mrf.mxu1  ;;  %v10114_v24 = vpop.f32.mrf.mxu0  ;;  %22421 = vmatmul.mubr.msk.f32.gmra.mxu1 %vm4207_vm2, %v25612_v26  ;;  %22448 = vmatmul.mubr.msk.f32.vlgmr.msra.gmra.mxu0 %vm4207_vm2, %v25983_v33  ;;  %v26137_v14 = vld [vmem:[#allocation2 + $0x8d] sm:$0xff] }
 0x3d7   : > { %v9833_v29 = vadd.f32 %v9827_v42, %v9734_v13  ;;  %22436 = vmatprep.mubr.msk.f32.mxu1 %vm23181_vm6, %v23180_v38  ;;  %22450 = vmatprep.mubr.msk.f32.mxu0 %vm23181_vm6, %v23180_v38  ;;  %v26098_v13 = vld [vmem:[#allocation2 + $0x8a] sm:$0xff]  ;;  %v20042_v42 = vld [vmem:[%s27326_s3 + $0xb8] sm:$0x3f] }
 0x3d8   : > { %v22070_v53 = vpop.f32.mrf.mxu1  ;;  %v22097_v36 = vpop.f32.mrf.mxu0  ;;  %22468 = vmatpush3.msk.msra.mxu0 %vm4262_vm5, %v20012_v39 }
 0x3d9   : > { %v9932_v19 = vadd.f32 %v9926_v18, %v9833_v29  ;;  %22489 = vmatprep.subr.mxu0 %v23180_v38  ;;  %v26154_v53 = vld [vmem:[#allocation2 + $0x8c] sm:$0xff]  ;;  %v26156_v36 = vld [vmem:[#allocation2 + $0x95] sm:$0xff] }
 0x3da   : > { %v10015_v54 = vpop.f32.mrf.mxu1  ;;  %v10119_v63 = vpop.f32.mrf.mxu0  ;;  %22437 = vmatmul.mubr.msk.f32.vlgmr.msra.gmra.mxu1 %vm4207_vm2, %v25517_v17  ;;  %22451 = vmatmul.mubr.msk.f32.gmra.mxu0 %vm4207_vm2, %v25996_v44 }
 0x3db   : > { %v10029_v51 = vadd.f32 %v10015_v54, %v9930_v0  ;;  %22457 = vmatpush3.msk.msra.mxu1 %vm4262_vm5, %v20007_v20  ;;  %22439 = vmatprep.mubr.msk.f32.mxu1 %vm23181_vm6, %v23180_v38  ;;  %v26118_v0 = vld [vmem:[#allocation2 + $0x92] sm:$0xff] }
 0x3dc   : > { %v22086_v48 = vpop.f32.mrf.mxu1  ;;  %v22100_v40 = vpop.f32.mrf.mxu0  ;;  %22453 = vmatprep.mubr.msk.f32.mxu0 %vm23181_vm6, %v23180_v38  ;;  %22478 = vmatprep.subr.mxu1 %v23180_v38  ;;  %v20037_v54 = vld [vmem:[%s27326_s3 + $0xb0] sm:$0x3f] }
 0x3dd   : > { %v26015_v28 = vadd.f32 %v10114_v24, %v10029_v51  ;;  %v26174_v48 = vld [vmem:[#allocation2 + $0x94] sm:$0xff]  ;;  %v26176_v40 = vld [vmem:[#allocation2 + $0x9d] sm:$0xff] }
 0x3de   : > { %v10020_v17 = vpop.f32.mrf.mxu1  ;;  %v10124_v52 = vpop.f32.mrf.mxu0  ;;  %22440 = vmatmul.mubr.msk.f32.gmra.mxu1 %vm4207_vm2, %v25646_v62  ;;  %22454 = vmatmul.mubr.msk.f32.gmra.mxu0 %vm4207_vm2, %v26010_v46 }
 0x3df   : > { %v10030_v27 = vadd.f32 %v10020_v17, %v9931_v8  ;;  %22442 = vmatprep.mubr.msk.f32.mxu1 %vm23181_vm6, %v23180_v38  ;;  %22469 = vmatprep.mubr.msk.f32.mxu0 %vm23181_vm6, %v23180_v38 }
 0x3e0   : > { %v22089_v4 = vpop.f32.mrf.mxu1  ;;  %v22103_v12 = vpop.f32.mrf.mxu0 }
 0x3e1   : > { %v26028_v16 = vadd.f32 %v10119_v63, %v10030_v27  ;;  %v26193_v12 = vld [vmem:[#allocation2 + $0x9c] sm:$0xff] }
 0x3e2   : > { %v10025_v49 = vpop.f32.mrf.mxu1  ;;  %v26030_v62 = vpop.f32.mrf.mxu0  ;;  %22443 = vmatmul.mubr.msk.f32.gmra.mxu1 %vm4207_vm2, %v25666_v10  ;;  %22470 = vmatmul.mubr.msk.f32.vlgmr.msra.gmra.mxu0 %vm4207_vm2, %v25556_v45  ;;  %v20017_v10 = vld [vmem:[%s27326_s3 + $0x90] sm:$0x3f] }
 0x3e3   : > { %v10031_v58 = vadd.f32 %v10025_v49, %v9932_v19  ;;  %22458 = vmatprep.mubr.msk.f32.mxu1 %vm23181_vm6, %v23180_v38  ;;  %22472 = vmatprep.mubr.msk.f32.mxu0 %vm23181_vm6, %v23180_v38 }
 0x3e4   : > { %v22092_v50 = vpop.f32.mrf.mxu1  ;;  %v22119_v56 = vpop.f32.mrf.mxu0  ;;  %22490 = vmatpush3.msk.msra.mxu0 %vm4262_vm5, %v20022_v1 }
 0x3e5   : > { %v26048_v45 = vadd.f32 %v10124_v52, %v10031_v58  ;;  %22511 = vmatprep.subr.mxu0 %v23180_v38  ;;  %v20052_v58 = vld [vmem:[%s27326_s3 + $0x8] sm:$0x3f] }
 0x3e6   : > { %v26051_v21 = vpop.f32.mrf.mxu1  ;;  %v26053_v37 = vpop.f32.mrf.mxu0  ;;  %22459 = vmatmul.mubr.msk.f32.vlgmr.msra.gmra.mxu1 %vm4207_vm2, %v26040_v22  ;;  %22473 = vmatmul.mubr.msk.f32.gmra.mxu0 %vm4207_vm2, %v26042_v32 }
 0x3e7   : > { %22479 = vmatpush3.msk.msra.mxu1 %vm4262_vm5, %v20017_v10  ;;  %22461 = vmatprep.mubr.msk.f32.mxu1 %vm23181_vm6, %v23180_v38  ;;  %v26210_v10 = vld [vmem:[#allocation2 + $0x97] sm:$0xff] }
 0x3e8   : > { %v22108_v55 = vpop.f32.mrf.mxu1  ;;  %v22122_v23 = vpop.f32.mrf.mxu0  ;;  %22475 = vmatprep.mubr.msk.f32.mxu0 %vm23181_vm6, %v23180_v38  ;;  %22500 = vmatprep.subr.mxu1 %v23180_v38 }
 0x3ea   : > { %v26069_v31 = vpop.f32.mrf.mxu1  ;;  %v26071_v43 = vpop.f32.mrf.mxu0  ;;  %22462 = vmatmul.mubr.msk.f32.gmra.mxu1 %vm4207_vm2, %v26062_v6  ;;  %22476 = vmatmul.mubr.msk.f32.gmra.mxu0 %vm4207_vm2, %v26064_v15 }
 0x3eb   : > { %22464 = vmatprep.mubr.msk.f32.mxu1 %vm23181_vm6, %v23180_v38  ;;  %22491 = vmatprep.mubr.msk.f32.mxu0 %vm23181_vm6, %v23180_v38 }
 0x3ec   : > { %v22111_v59 = vpop.f32.mrf.mxu1  ;;  %v22125_v60 = vpop.f32.mrf.mxu0 }
 0x3ed   : > { %v20047_v59 = vld [vmem:[%s27326_s3 + $0xc0] sm:$0x3f] }
 0x3ee   : > { %v26086_v47 = vpop.f32.mrf.mxu1  ;;  %v26088_v34 = vpop.f32.mrf.mxu0  ;;  %22465 = vmatmul.mubr.msk.f32.gmra.mxu1 %vm4207_vm2, %v26081_v11  ;;  %22492 = vmatmul.mubr.msk.f32.vlgmr.msra.gmra.mxu0 %vm4207_vm2, %v25612_v26 }
 0x3ef   : > { %22480 = vmatprep.mubr.msk.f32.mxu1 %vm23181_vm6, %v23180_v38  ;;  %22494 = vmatprep.mubr.msk.f32.mxu0 %vm23181_vm6, %v23180_v38 }
 0x3f0   : > { %v22114_v57 = vpop.f32.mrf.mxu1  ;;  %v22141_v2 = vpop.f32.mrf.mxu0  ;;  %22512 = vmatpush3.msk.msra.mxu0 %vm4262_vm5, %v20032_v5 }
 0x3f1   : > { %22533 = vmatprep.subr.mxu0 %v23180_v38  ;;  %v26228_v57 = vld [vmem:[#allocation2 + $0x96] sm:$0xff]  ;;  %v26230_v2 = vld [vmem:[#allocation2 + $0x9f] sm:$0xff] }
 0x3f2   : > { %v26105_v9 = vpop.f32.mrf.mxu1  ;;  %v26107_v26 = vpop.f32.mrf.mxu0  ;;  %22481 = vmatmul.mubr.msk.f32.vlgmr.msra.gmra.mxu1 %vm4207_vm2, %v25629_v41  ;;  %22495 = vmatmul.mubr.msk.f32.gmra.mxu0 %vm4207_vm2, %v26098_v13 }
 0x3f3   : > { %22501 = vmatpush3.msk.msra.mxu1 %vm4262_vm5, %v20027_v35  ;;  %22483 = vmatprep.mubr.msk.f32.mxu1 %vm23181_vm6, %v23180_v38 }
 0x3f4   : > { %v22130_v3 = vpop.f32.mrf.mxu1  ;;  %v22144_v18 = vpop.f32.mrf.mxu0  ;;  %22497 = vmatprep.mubr.msk.f32.mxu0 %vm23181_vm6, %v23180_v38  ;;  %22522 = vmatprep.subr.mxu1 %v23180_v38 }
 0x3f6   : > { %v26123_v41 = vpop.f32.mrf.mxu1  ;;  %v26125_v61 = vpop.f32.mrf.mxu0  ;;  %22484 = vmatmul.mubr.msk.f32.gmra.mxu1 %vm4207_vm2, %v26116_v25  ;;  %22498 = vmatmul.mubr.msk.f32.gmra.mxu0 %vm4207_vm2, %v26118_v0 }
 0x3f7   : > { %22486 = vmatprep.mubr.msk.f32.mxu1 %vm23181_vm6, %v23180_v38  ;;  %22513 = vmatprep.mubr.msk.f32.mxu0 %vm23181_vm6, %v23180_v38 }
 0x3f8   : > { %v22133_v39 = vpop.f32.mrf.mxu1  ;;  %v22147_v8 = vpop.f32.mrf.mxu0 }
 0x3f9   : > { %v26247_v8 = vld [vmem:[#allocation2 + $0x9e] sm:$0xff] }
 0x3fa   : > { %v26142_v24 = vpop.f32.mrf.mxu1  ;;  %v26144_v29 = vpop.f32.mrf.mxu0  ;;  %22487 = vmatmul.mubr.msk.f32.gmra.mxu1 %vm4207_vm2, %v26135_v7  ;;  %22514 = vmatmul.mubr.msk.f32.vlgmr.msra.gmra.mxu0 %vm4207_vm2, %v26137_v14 }
 0x3fb   : > { %22502 = vmatprep.mubr.msk.f32.mxu1 %vm23181_vm6, %v23180_v38  ;;  %22516 = vmatprep.mubr.msk.f32.mxu0 %vm23181_vm6, %v23180_v38 }
 0x3fc   : > { %v22136_v20 = vpop.f32.mrf.mxu1  ;;  %v22163_v19 = vpop.f32.mrf.mxu0  ;;  %22534 = vmatpush3.msk.msra.mxu0 %vm4262_vm5, %v20042_v42  ;;  %v14222_v42 = vld [vmem:[#allocation2 + $0x71] sm:$0xff] }
 0x3fd   : > { %22555 = vmatprep.subr.mxu0 %v23180_v38 }
 0x3fe   : > { %v26163_v63 = vpop.f32.mrf.mxu1  ;;  %v26165_v51 = vpop.f32.mrf.mxu0  ;;  %22503 = vmatmul.mubr.msk.f32.vlgmr.msra.gmra.mxu1 %vm4207_vm2, %v26154_v53  ;;  %22517 = vmatmul.mubr.msk.f32.gmra.mxu0 %vm4207_vm2, %v26156_v36 }
 0x3ff   : > { %22523 = vmatpush3.msk.msra.mxu1 %vm4262_vm5, %v20037_v54  ;;  %22505 = vmatprep.mubr.msk.f32.mxu1 %vm23181_vm6, %v23180_v38  ;;  %v10227_v54 = vadd.f32 %v26051_v21, %v26015_v28  ;;  %v14223_v28 = vld [vmem:[#allocation2 + $0x79] sm:$0xff] }
 0x400   : > { %v22152_v17 = vpop.f32.mrf.mxu1  ;;  %v22166_v52 = vpop.f32.mrf.mxu0  ;;  %22519 = vmatprep.mubr.msk.f32.mxu0 %vm23181_vm6, %v23180_v38  ;;  %22544 = vmatprep.subr.mxu1 %v23180_v38 }
 0x401   : > { %v20061_v17 = vld [vmem:[%s27326_s3 + $0x10] sm:$0x3f] }
 0x402   : > { %v26181_v27 = vpop.f32.mrf.mxu1  ;;  %v26183_v4 = vpop.f32.mrf.mxu0  ;;  %22506 = vmatmul.mubr.msk.f32.gmra.mxu1 %vm4207_vm2, %v26174_v48  ;;  %22520 = vmatmul.mubr.msk.f32.gmra.mxu0 %vm4207_vm2, %v26176_v40 }
 0x403   : > { %22508 = vmatprep.mubr.msk.f32.mxu1 %vm23181_vm6, %v23180_v38  ;;  %22535 = vmatprep.mubr.msk.f32.mxu0 %vm23181_vm6, %v23180_v38 }
 0x404   : > { %v22155_v1 = vpop.f32.mrf.mxu1  ;;  %v22169_v49 = vpop.f32.mrf.mxu0 }
 0x406   : > { %v26198_v50 = vpop.f32.mrf.mxu1  ;;  %v26200_v56 = vpop.f32.mrf.mxu0  ;;  %22509 = vmatmul.mubr.msk.f32.gmra.mxu1 %vm4207_vm2, %v26193_v12  ;;  %22536 = vmatmul.mubr.msk.f32.vlgmr.msra.gmra.mxu0 %vm4207_vm2, %v26081_v11 }
 0x407   : > { %22524 = vmatprep.mubr.msk.f32.mxu1 %vm23181_vm6, %v23180_v38  ;;  %22538 = vmatprep.mubr.msk.f32.mxu0 %vm23181_vm6, %v23180_v38 }
 0x408   : > { %v22158_v55 = vpop.f32.mrf.mxu1  ;;  %v22185_v23 = vpop.f32.mrf.mxu0  ;;  %22556 = vmatpush3.msk.msra.mxu0 %vm4262_vm5, %v20052_v58  ;;  %v14221_v58 = vld [vmem:[%s27326_s3] sm:$0x3f] }
 0x409   : > { %22577 = vmatprep.subr.mxu0 %v23180_v38  ;;  %v10228_v55 = vadd.f32 %v26069_v31, %v26028_v16  ;;  %v10326_v23 = vadd.f32 %v26030_v62, %v10227_v54  ;;  %v26284_v16 = vld [vmem:[#allocation2 + $0x98] sm:$0xff]  ;;  %v26286_v62 = vld [vmem:[#allocation2 + $0x81] sm:$0xff] }
 0x40a   : > { %v26217_v60 = vpop.f32.mrf.mxu1  ;;  %v26219_v5 = vpop.f32.mrf.mxu0  ;;  %22525 = vmatmul.mubr.msk.f32.vlgmr.msra.gmra.mxu1 %vm4207_vm2, %v26010_v46  ;;  %22539 = vmatmul.mubr.msk.f32.gmra.mxu0 %vm4207_vm2, %v26210_v10 }
 0x40b   : > { %22545 = vmatpush3.msk.msra.mxu1 %vm4262_vm5, %v20047_v59  ;;  %22527 = vmatprep.mubr.msk.f32.mxu1 %vm23181_vm6, %v23180_v38 }
 0x40c   : > { %v22174_v35 = vpop.f32.mrf.mxu1  ;;  %v22188_v3 = vpop.f32.mrf.mxu0  ;;  %22541 = vmatprep.mubr.msk.f32.mxu0 %vm23181_vm6, %v23180_v38  ;;  %22566 = vmatprep.subr.mxu1 %v23180_v38 }
 0x40d   : > { %v10425_v3 = vadd.f32 %v26105_v9, %v10326_v23  ;;  %v10327_v9 = vadd.f32 %v26053_v37, %v10228_v55  ;;  %v14410_v37 = vld [vmem:[#allocation2 + $0x72] sm:$0xff] }
 0x40e   : > { %v26235_v18 = vpop.f32.mrf.mxu1  ;;  %v26237_v39 = vpop.f32.mrf.mxu0  ;;  %22528 = vmatmul.mubr.msk.f32.gmra.mxu1 %vm4207_vm2, %v26228_v57  ;;  %22542 = vmatmul.mubr.msk.f32.gmra.mxu0 %vm4207_vm2, %v26230_v2 }
 0x40f   : > { %22530 = vmatprep.mubr.msk.f32.mxu1 %vm23181_vm6, %v23180_v38  ;;  %22557 = vmatprep.mubr.msk.f32.mxu0 %vm23181_vm6, %v23180_v38 }
 0x410   : > { %v22177_v20 = vpop.f32.mrf.mxu1  ;;  %v22191_v19 = vpop.f32.mrf.mxu0 }
 0x411   : > { %v10229_v20 = vadd.f32 %v26086_v47, %v26048_v45  ;;  %v26308_v45 = vld [vmem:[#allocation2 + $0xa0] sm:$0xff] }
 0x412   : > { %v26254_v52 = vpop.f32.mrf.mxu1  ;;  %v26256_v1 = vpop.f32.mrf.mxu0  ;;  %22531 = vmatmul.mubr.msk.f32.gmra.mxu1 %vm4207_vm2, %v26247_v8  ;;  %22558 = vmatmul.mubr.msk.f32.vlgmr.msra.gmra.mxu0 %vm4207_vm2, %v14222_v42 }
 0x413   : > { %22546 = vmatprep.mubr.msk.f32.mxu1 %vm23181_vm6, %v23180_v38  ;;  %22560 = vmatprep.mubr.msk.f32.mxu0 %vm23181_vm6, %v23180_v38 }
 0x414   : > { %v22180_v21 = vpop.f32.mrf.mxu1  ;;  %v22207_v49 = vpop.f32.mrf.mxu0  ;;  %22578 = vmatpush3.msk.msra.mxu0 %vm4262_vm5, %v20061_v17  ;;  %v10426_v17 = vadd.f32 %v26123_v41, %v10327_v9  ;;  %v20071_v41 = vld [vmem:[%s27326_s3 + $0x20] sm:$0x3f] }
 0x415   : > { %22599 = vmatprep.subr.mxu0 %v23180_v38  ;;  %v10328_v49 = vadd.f32 %v26071_v43, %v10229_v20  ;;  %v14218_v43 = vld [vmem:[#allocation2 + $0x70] sm:$0xff]  ;;  %v20066_v20 = vld [vmem:[%s27326_s3 + $0x18] sm:$0x3f] }
 0x416   : > { %v26273_v59 = vpop.f32.mrf.mxu1  ;;  %v26275_v35 = vpop.f32.mrf.mxu0  ;;  %22547 = vmatmul.mubr.msk.f32.vlgmr.msra.gmra.mxu1 %vm4207_vm2, %v26064_v15  ;;  %22561 = vmatmul.mubr.msk.f32.gmra.mxu0 %vm4207_vm2, %v14223_v28  ;;  %v10524_v28 = vadd.f32 %v26088_v34, %v10425_v3  ;;  %v10525_v3 = vadd.f32 %v26107_v26, %v10426_v17 }
 0x417   : > { %22567 = vmatpush3.msk.msra.mxu1 %vm4262_vm5, %v14221_v58  ;;  %22549 = vmatprep.mubr.msk.f32.mxu1 %vm23181_vm6, %v23180_v38  ;;  %v10427_v23 = vadd.f32 %v26142_v24, %v10328_v49 }
 0x418   : > { %v22196_v31 = vpop.f32.mrf.mxu1  ;;  %v22210_v42 = vpop.f32.mrf.mxu0  ;;  %22563 = vmatprep.mubr.msk.f32.mxu0 %vm23181_vm6, %v23180_v38  ;;  %22588 = vmatprep.subr.mxu1 %v23180_v38  ;;  %v10623_v58 = vadd.f32 %v26163_v63, %v10524_v28  ;;  %v14411_v63 = vld [vmem:[#allocation2 + $0x7a] sm:$0xff]  ;;  %v10624_v24 = vadd.f32 %v26181_v27, %v10525_v3 }
 0x419   : > { %v10526_v28 = vadd.f32 %v26125_v61, %v10427_v23  ;;  %v14219_v27 = vld [vmem:[#allocation2 + $0x78] sm:$0xff] }
 0x41a   : > { %v26294_v19 = vpop.f32.mrf.mxu1  ;;  %v26296_v54 = vpop.f32.mrf.mxu0  ;;  %22550 = vmatmul.mubr.msk.f32.gmra.mxu1 %vm4207_vm2, %v26284_v16  ;;  %22564 = vmatmul.mubr.msk.f32.gmra.mxu0 %vm4207_vm2, %v26286_v62  ;;  %v10722_v26 = vadd.f32 %v26144_v29, %v10623_v58  ;;  %v26344_v29 = vld [vmem:[#allocation2 + $0x82] sm:$0xff]  ;;  %v10723_v61 = vadd.f32 %v26165_v51, %v10624_v24  ;;  %v14608_v51 = vld [vmem:[#allocation2 + $0x74] sm:$0xff] }
 0x41b   : > { %22552 = vmatprep.mubr.msk.f32.mxu1 %vm23181_vm6, %v23180_v38  ;;  %22579 = vmatprep.mubr.msk.f32.mxu0 %vm23181_vm6, %v23180_v38  ;;  %v10625_v49 = vadd.f32 %v26198_v50, %v10526_v28  ;;  %v26362_v50 = vld [vmem:[#allocation2 + $0x80] sm:$0xff] }
 0x41c   : > { %v22199_v47 = vpop.f32.mrf.mxu1  ;;  %v22213_v21 = vpop.f32.mrf.mxu0 }
 0x41e   : > { %v26315_v34 = vpop.f32.mrf.mxu1  ;;  %v26317_v55 = vpop.f32.mrf.mxu0  ;;  %22553 = vmatmul.mubr.msk.f32.gmra.mxu1 %vm4207_vm2, %v26308_v45  ;;  %22580 = vmatmul.mubr.msk.f32.vlgmr.msra.gmra.mxu0 %vm4207_vm2, %v14410_v37  ;;  %v10821_v37 = vadd.f32 %v26217_v60, %v10722_v26 }
 0x41f   : > { %22568 = vmatprep.mubr.msk.f32.mxu1 %vm23181_vm6, %v23180_v38  ;;  %22582 = vmatprep.mubr.msk.f32.mxu0 %vm23181_vm6, %v23180_v38 }
 0x420   : > { %v22202_v31 = vpop.f32.mrf.mxu1  ;;  %v22229_v42 = vpop.f32.mrf.mxu0  ;;  %22600 = vmatpush3.msk.msra.mxu0 %vm4262_vm5, %v20071_v41  ;;  %v10822_v41 = vadd.f32 %v26235_v18, %v10723_v61  ;;  %v10920_v23 = vadd.f32 %v26200_v56, %v10821_v37  ;;  %v20081_v18 = vld [vmem:[%s27326_s3 + $0x30] sm:$0x3f]  ;;  %v20076_v37 = vld [vmem:[%s27326_s3 + $0x28] sm:$0x3f]  ;;  %v14510_v61 = vld [vmem:[#allocation2 + $0x7b] sm:$0xff] }
 0x421   : > { %22621 = vmatprep.subr.mxu0 %v23180_v38 }
 0x422   : > { %v11203_v9 = vpop.f32.mrf.mxu1  ;;  %v26335_v17 = vpop.f32.mrf.mxu0  ;;  %22569 = vmatmul.mubr.msk.f32.vlgmr.msra.gmra.mxu1 %vm4207_vm2, %v14218_v43  ;;  %22583 = vmatmul.mubr.msk.f32.gmra.mxu0 %vm4207_vm2, %v14411_v63  ;;  %v10724_v63 = vadd.f32 %v26183_v4, %v10625_v49  ;;  %v11019_v31 = vadd.f32 %v26273_v59, %v10920_v23  ;;  %v10921_v24 = vadd.f32 %v26219_v5, %v10822_v41  ;;  %v14509_v4 = vld [vmem:[#allocation2 + $0x73] sm:$0xff]  ;;  %v14609_v59 = vld [vmem:[#allocation2 + $0x7c] sm:$0xff] }
 0x423   : > { %22589 = vmatpush3.msk.msra.mxu1 %vm4262_vm5, %v20066_v20  ;;  %22571 = vmatprep.mubr.msk.f32.mxu1 %vm23181_vm6, %v23180_v38 }
 0x424   : > { %v22218_v47 = vpop.f32.mrf.mxu1  ;;  %v22232_v21 = vpop.f32.mrf.mxu0  ;;  %22585 = vmatprep.mubr.msk.f32.mxu0 %vm23181_vm6, %v23180_v38  ;;  %22610 = vmatprep.subr.mxu1 %v23180_v38  ;;  %v10823_v20 = vadd.f32 %v26254_v52, %v10724_v63  ;;  %v11020_v52 = vadd.f32 %v26294_v19, %v10921_v24  ;;  %v11118_v5 = vadd.f32 %v26256_v1, %v11019_v31  ;;  %v14610_v19 = vld [vmem:[#allocation2 + $0x84] sm:$0xff] }
 0x425   : > { %v14511_v63 = vld [vmem:[#allocation2 + $0x83] sm:$0xff] }
 0x426   : > { %v11208_v60 = vpop.f32.mrf.mxu1  ;;  %v26351_v58 = vpop.f32.mrf.mxu0  ;;  %22572 = vmatmul.mubr.msk.f32.gmra.mxu1 %vm4207_vm2, %v14219_v27  ;;  %22586 = vmatmul.mubr.msk.f32.gmra.mxu0 %vm4207_vm2, %v26344_v29  ;;  %v10922_v21 = vadd.f32 %v26237_v39, %v10823_v20  ;;  %v11217_v49 = vadd.f32 %v11203_v9, %v11118_v5  ;;  %v20091_v20 = vld [vmem:[%s27326_s3 + $0x40] sm:$0x3f] }
 0x427   : > { %22574 = vmatprep.mubr.msk.f32.mxu1 %vm23181_vm6, %v23180_v38  ;;  %22601 = vmatprep.mubr.msk.f32.mxu0 %vm23181_vm6, %v23180_v38 }
 0x428   : > { %v22221_v3 = vpop.f32.mrf.mxu1  ;;  %v22235_v43 = vpop.f32.mrf.mxu0  ;;  %v11021_v23 = vadd.f32 %v26315_v34, %v10922_v21 }
 0x429   : > { %v11316_v43 = vadd.f32 %v26317_v55, %v11217_v49 }
 0x42a   : > { %v11213_v56 = vpop.f32.mrf.mxu1  ;;  %v11500_v42 = vpop.f32.mrf.mxu0  ;;  %22575 = vmatmul.mubr.msk.f32.gmra.mxu1 %vm4207_vm2, %v26362_v50  ;;  %22602 = vmatmul.mubr.msk.f32.vlgmr.msra.gmra.mxu0 %vm4207_vm2, %v14608_v51  ;;  %v11119_v51 = vadd.f32 %v26275_v35, %v11020_v52  ;;  %v11120_v35 = vadd.f32 %v26296_v54, %v11021_v23 }
 0x42b   : > { %22590 = vmatprep.mubr.msk.f32.mxu1 %vm23181_vm6, %v23180_v38  ;;  %22604 = vmatprep.mubr.msk.f32.mxu0 %vm23181_vm6, %v23180_v38 }
 0x42c   : > { %v22224_v26 = vpop.f32.mrf.mxu1  ;;  %v22251_v28 = vpop.f32.mrf.mxu0  ;;  %22622 = vmatpush3.msk.msra.mxu0 %vm4262_vm5, %v20081_v18  ;;  %v11218_v3 = vadd.f32 %v11208_v60, %v11119_v51  ;;  %v11219_v55 = vadd.f32 %v11213_v56, %v11120_v35 }
 0x42d   : > { %22643 = vmatprep.subr.mxu0 %v23180_v38  ;;  %v20086_v26 = vld [vmem:[%s27326_s3 + $0x38] sm:$0x3f] }
 0x42e   : > { %v11401_v27 = vpop.f32.mrf.mxu1  ;;  %v11505_v47 = vpop.f32.mrf.mxu0  ;;  %22591 = vmatmul.mubr.msk.f32.vlgmr.msra.gmra.mxu1 %vm4207_vm2, %v14509_v4  ;;  %22605 = vmatmul.mubr.msk.f32.gmra.mxu0 %vm4207_vm2, %v14609_v59  ;;  %v11317_v4 = vadd.f32 %v26335_v17, %v11218_v3  ;;  %v11318_v56 = vadd.f32 %v26351_v58, %v11219_v55 }
 0x42f   : > { %22611 = vmatpush3.msk.msra.mxu1 %vm4262_vm5, %v20076_v37  ;;  %22593 = vmatprep.mubr.msk.f32.mxu1 %vm23181_vm6, %v23180_v38  ;;  %v11415_v18 = vadd.f32 %v11401_v27, %v11316_v43 }
 0x430   : > { %v22240_v41 = vpop.f32.mrf.mxu1  ;;  %v22254_v1 = vpop.f32.mrf.mxu0  ;;  %22607 = vmatprep.mubr.msk.f32.mxu0 %vm23181_vm6, %v23180_v38  ;;  %22632 = vmatprep.subr.mxu1 %v23180_v38 }
 0x431   : > { %v11514_v37 = vadd.f32 %v11500_v42, %v11415_v18 }
 0x432   : > { %v11406_v39 = vpop.f32.mrf.mxu1  ;;  %v11510_v9 = vpop.f32.mrf.mxu0  ;;  %22594 = vmatmul.mubr.msk.f32.gmra.mxu1 %vm4207_vm2, %v14510_v61  ;;  %22608 = vmatmul.mubr.msk.f32.gmra.mxu0 %vm4207_vm2, %v14610_v19 }
 0x433   : > { %22596 = vmatprep.mubr.msk.f32.mxu1 %vm23181_vm6, %v23180_v38  ;;  %22623 = vmatprep.mubr.msk.f32.mxu0 %vm23181_vm6, %v23180_v38  ;;  %v11416_v28 = vadd.f32 %v11406_v39, %v11317_v4 }
 0x434   : > { %v22243_v31 = vpop.f32.mrf.mxu1  ;;  %v22257_v34 = vpop.f32.mrf.mxu0 }
 0x435   : > { %v11515_v21 = vadd.f32 %v11505_v47, %v11416_v28  ;;  %v20096_v31 = vld [vmem:[%s27326_s3 + $0x48] sm:$0x3f]  ;;  %v20111_v28 = vld [vmem:[%s27326_s3 + $0x60] sm:$0x3f] }
 0x436   : > { %v11411_v24 = vpop.f32.mrf.mxu1  ;;  %v11698_v60 = vpop.f32.mrf.mxu0  ;;  %22597 = vmatmul.mubr.msk.f32.gmra.mxu1 %vm4207_vm2, %v14511_v63  ;;  %22624 = vmatmul.mubr.msk.f32.vlgmr.msra.gmra.mxu0 %vm4207_vm2, %v26040_v22 }
 0x437   : > { %22612 = vmatprep.mubr.msk.f32.mxu1 %vm23181_vm6, %v23180_v38  ;;  %22626 = vmatprep.mubr.msk.f32.mxu0 %vm23181_vm6, %v23180_v38  ;;  %v11417_v27 = vadd.f32 %v11411_v24, %v11318_v56 }
 0x438   : > { %v22246_v54 = vpop.f32.mrf.mxu1  ;;  %v22273_v59 = vpop.f32.mrf.mxu0  ;;  %22644 = vmatpush3.msk.msra.mxu0 %vm4262_vm5, %v20091_v20 }
 0x439   : > { %22665 = vmatprep.subr.mxu0 %v23180_v38  ;;  %v11516_v23 = vadd.f32 %v11510_v9, %v11417_v27 }
 0x43a   : > { %v11599_v22 = vpop.f32.mrf.mxu1  ;;  %v11703_v17 = vpop.f32.mrf.mxu0  ;;  %22613 = vmatmul.mubr.msk.f32.vlgmr.msra.gmra.mxu1 %vm4207_vm2, %v25983_v33  ;;  %22627 = vmatmul.mubr.msk.f32.gmra.mxu0 %vm4207_vm2, %v26062_v6 }
 0x43b   : > { %v11613_v52 = vadd.f32 %v11599_v22, %v11514_v37  ;;  %22633 = vmatpush3.msk.msra.mxu1 %vm4262_vm5, %v20086_v26  ;;  %22615 = vmatprep.mubr.msk.f32.mxu1 %vm23181_vm6, %v23180_v38  ;;  %v20106_v22 = vld [vmem:[%s27326_s3 + $0x58] sm:$0x3f] }
 0x43c   : > { %v22262_v5 = vpop.f32.mrf.mxu1  ;;  %v22276_v42 = vpop.f32.mrf.mxu0  ;;  %22629 = vmatprep.mubr.msk.f32.mxu0 %vm23181_vm6, %v23180_v38  ;;  %22654 = vmatprep.subr.mxu1 %v23180_v38 }
 0x43d   : > { %v11712_v33 = vadd.f32 %v11698_v60, %v11613_v52 }
 0x43e   : > { %v11604_v49 = vpop.f32.mrf.mxu1  ;;  %v11708_v6 = vpop.f32.mrf.mxu0  ;;  %22616 = vmatmul.mubr.msk.f32.gmra.mxu1 %vm4207_vm2, %v25996_v44  ;;  %22630 = vmatmul.mubr.msk.f32.gmra.mxu0 %vm4207_vm2, %v26081_v11  ;;  %v20101_v44 = vld [vmem:[%s27326_s3 + $0x50] sm:$0x3f] }
 0x43f   : > { %v11715_v58 = vadd.f32 %v27365_v30, %v11712_v33  ;;  %v11614_v61 = vadd.f32 %v11604_v49, %v11515_v21  ;;  %22618 = vmatprep.mubr.msk.f32.mxu1 %vm23181_vm6, %v23180_v38  ;;  %22645 = vmatprep.mubr.msk.f32.mxu0 %vm23181_vm6, %v23180_v38 }
 0x440   : > { %v22265_v19 = vpop.f32.mrf.mxu1  ;;  %v22279_v41 = vpop.f32.mrf.mxu0 }
 0x441   : > { %v11718_v47 = vmax.f32 %v11715_v58, 0.0  ;;  %v11713_v1 = vadd.f32 %v11703_v17, %v11614_v61 }
 0x442   : > { %v11609_v51 = vpop.f32.mrf.mxu1  ;;  %v11910_v39 = vpop.f32.mrf.mxu0  ;;  %22619 = vmatmul.mubr.msk.f32.gmra.mxu1 %vm4207_vm2, %v26010_v46  ;;  %22646 = vmatmul.mubr.msk.f32.vlgmr.msra.gmra.mxu0 %vm4207_vm2, %v26286_v62 }
 0x443   : > { %11721 = vst.msk [vmem:[#allocation5] sm:$0xff] %vm6744_vm7, %v11718_v47  ;;  %v11716_v3 = vadd.f32 %v27365_v30, %v11713_v1  ;;  %v11615_v43 = vadd.f32 %v11609_v51, %v11516_v23  ;;  %22634 = vmatprep.mubr.msk.f32.mxu1 %vm23181_vm6, %v23180_v38  ;;  %22648 = vmatprep.mubr.msk.f32.mxu0 %vm23181_vm6, %v23180_v38 }
 0x444   : > { %v22268_v9 = vpop.f32.mrf.mxu1  ;;  %v22295_v63 = vpop.f32.mrf.mxu0  ;;  %22666 = vmatpush3.msk.msra.mxu0 %vm4262_vm5, %v20101_v44  ;;  %v20121_v44 = vld [vmem:[%s27326_s3 + $0x70] sm:$0x3f] }
 0x445   : > { %v11719_v62 = vmax.f32 %v11716_v3, 0.0  ;;  %v11714_v34 = vadd.f32 %v11708_v6, %v11615_v43  ;;  %22687 = vmatprep.subr.mxu0 %v23180_v38  ;;  %v20116_v63 = vld [vmem:[%s27326_s3 + $0x68] sm:$0x3f] }
 0x446   : > { %v11818_v35 = vpop.f32.mrf.mxu1  ;;  %v11915_v18 = vpop.f32.mrf.mxu0  ;;  %22635 = vmatmul.mubr.msk.f32.vlgmr.msra.gmra.mxu1 %vm4207_vm2, %v26362_v50  ;;  %22649 = vmatmul.mubr.msk.f32.gmra.mxu0 %vm4207_vm2, %v26116_v25 }
 0x447   : > { %v11717_v20 = vadd.f32 %v27365_v30, %v11714_v34  ;;  %11722 = vst.msk [vmem:[#allocation5 + $0x8] sm:$0xff] %vm6744_vm7, %v11719_v62  ;;  %v11911_v24 = vadd.f32 %v11910_v39, %v11818_v35  ;;  %22655 = vmatpush3.msk.msra.mxu1 %vm4262_vm5, %v20096_v31  ;;  %22637 = vmatprep.mubr.msk.f32.mxu1 %vm23181_vm6, %v23180_v38 }
 0x448   : > { %v22284_v60 = vpop.f32.mrf.mxu1  ;;  %v22298_v55 = vpop.f32.mrf.mxu0  ;;  %22651 = vmatprep.mubr.msk.f32.mxu0 %vm23181_vm6, %v23180_v38  ;;  %22676 = vmatprep.subr.mxu1 %v23180_v38 }
 0x449   : > { %v11720_v50 = vmax.f32 %v11717_v20, 0.0  ;;  %v20131_v55 = vld [vmem:[%s27326_s3 + $0x80] sm:$0x3f] }
 0x44a   : > { %v11823_v4 = vpop.f32.mrf.mxu1  ;;  %v11920_v25 = vpop.f32.mrf.mxu0  ;;  %22638 = vmatmul.mubr.msk.f32.gmra.mxu1 %vm4207_vm2, %v26042_v32  ;;  %22652 = vmatmul.mubr.msk.f32.gmra.mxu0 %vm4207_vm2, %v26135_v7 }
 0x44b   : > { %11723 = vst.msk [vmem:[#allocation5 + $0x10] sm:$0xff] %vm6744_vm7, %v11720_v50  ;;  %v11916_v54 = vadd.f32 %v11915_v18, %v11823_v4  ;;  %22640 = vmatprep.mubr.msk.f32.mxu1 %vm23181_vm6, %v23180_v38  ;;  %22667 = vmatprep.mubr.msk.f32.mxu0 %vm23181_vm6, %v23180_v38 }
 0x44c   : > { %v22287_v59 = vpop.f32.mrf.mxu1  ;;  %v22301_v26 = vpop.f32.mrf.mxu0 }
 0x44d   : > { %v20126_v26 = vld [vmem:[%s27326_s3 + $0x78] sm:$0x3f] }
 0x44e   : > { %v11828_v37 = vpop.f32.mrf.mxu1  ;;  %v12105_v32 = vpop.f32.mrf.mxu0  ;;  %22641 = vmatmul.mubr.msk.f32.gmra.mxu1 %vm4207_vm2, %v26064_v15  ;;  %22668 = vmatmul.mubr.msk.f32.vlgmr.msra.gmra.mxu0 %vm4207_vm2, %v26154_v53  ;;  %v11724_v52 = vld [vmem:[#allocation5] ss:$2 sm:$0x1f]  ;;  %v11725_v5 = vld [vmem:[#allocation5 + $0x1] ss:$2 sm:$0x1f] }
 0x44f   : > { %v11921_v7 = vadd.f32 %v11920_v25, %v11828_v37  ;;  %22656 = vmatprep.mubr.msk.f32.mxu1 %vm23181_vm6, %v23180_v38  ;;  %22670 = vmatprep.mubr.msk.f32.mxu0 %vm23181_vm6, %v23180_v38  ;;  %v11726_v49 = vmax.f32 %v11724_v52, %v11725_v5 }
 0x450   : > { %v22290_v17 = vpop.f32.mrf.mxu1  ;;  %v22317_v56 = vpop.f32.mrf.mxu0  ;;  %22688 = vmatpush3.msk.msra.mxu0 %vm4262_vm5, %v20111_v28 }
 0x451   : > { %22709 = vmatprep.subr.mxu0 %v23180_v38 }
 0x452   : > { %v12006_v53 = vpop.f32.mrf.mxu1  ;;  %v12110_v42 = vpop.f32.mrf.mxu0  ;;  %22657 = vmatmul.mubr.msk.f32.vlgmr.msra.gmra.mxu1 %vm4207_vm2, %v26344_v29  ;;  %22671 = vmatmul.mubr.msk.f32.gmra.mxu0 %vm4207_vm2, %v26174_v48  ;;  %v11727_v27 = vld [vmem:[#allocation5 + $0xe] ss:$2 sm:$0x1f]  ;;  %v11728_v33 = vld [vmem:[#allocation5 + $0xf] ss:$2 sm:$0x1f] }
 0x453   : > { %v12020_v21 = vadd.f32 %v12006_v53, %v11911_v24  ;;  %22677 = vmatpush3.msk.msra.mxu1 %vm4262_vm5, %v20106_v22  ;;  %22659 = vmatprep.mubr.msk.f32.mxu1 %vm23181_vm6, %v23180_v38  ;;  %v11729_v6 = vmax.f32 %v11727_v27, %v11728_v33 }
 0x454   : > { %v22306_v58 = vpop.f32.mrf.mxu1  ;;  %v22320_v61 = vpop.f32.mrf.mxu0  ;;  %22673 = vmatprep.mubr.msk.f32.mxu0 %vm23181_vm6, %v23180_v38  ;;  %22698 = vmatprep.subr.mxu1 %v23180_v38 }
 0x455   : > { %v12119_v29 = vadd.f32 %v12105_v32, %v12020_v21  ;;  %v11730_v19 = vmax.f32 %v11726_v49, %v11729_v6  ;;  %v15697_v21 = vld [vmem:[#allocation2 + $0x9a] sm:$0xff]  ;;  %v15797_v49 = vld [vmem:[#allocation2 + $0xa3] sm:$0xff] }
 0x456   : > { %v12011_v48 = vpop.f32.mrf.mxu1  ;;  %v12115_v41 = vpop.f32.mrf.mxu0  ;;  %22660 = vmatmul.mubr.msk.f32.gmra.mxu1 %vm4207_vm2, %v26098_v13  ;;  %22674 = vmatmul.mubr.msk.f32.gmra.mxu0 %vm4207_vm2, %v26193_v12  ;;  %v20136_v61 = vld [vmem:[%s27326_s3 + $0x88] sm:$0x3f] }
 0x457   : > { %v12021_v47 = vadd.f32 %v12011_v48, %v11916_v54  ;;  %22662 = vmatprep.mubr.msk.f32.mxu1 %vm23181_vm6, %v23180_v38  ;;  %22689 = vmatprep.mubr.msk.f32.mxu0 %vm23181_vm6, %v23180_v38  ;;  %11731 = vst.msk [vmem:[#allocation3 + $0xa] sm:$0x1f] %vm6758_vm8, %v11730_v19 }
 0x458   : > { %v22309_v1 = vpop.f32.mrf.mxu1  ;;  %v22323_v23 = vpop.f32.mrf.mxu0 }
 0x459   : > { %v12120_v51 = vadd.f32 %v12110_v42, %v12021_v47  ;;  %v20141_v42 = vld [vmem:[%s27326_s3 + $0x90] sm:$0x3f] }
 0x45a   : > { %v12016_v13 = vpop.f32.mrf.mxu1  ;;  %v12303_v39 = vpop.f32.mrf.mxu0  ;;  %22663 = vmatmul.mubr.msk.f32.gmra.mxu1 %vm4207_vm2, %v26118_v0  ;;  %22690 = vmatmul.mubr.msk.f32.vlgmr.msra.gmra.mxu0 %vm4207_vm2, %v26010_v46  ;;  %v26602_v47 = vld [vmem:[#allocation2 + $0xab] sm:$0xff] }
 0x45b   : > { %v12022_v3 = vadd.f32 %v12016_v13, %v11921_v7  ;;  %22678 = vmatprep.mubr.msk.f32.mxu1 %vm23181_vm6, %v23180_v38  ;;  %22692 = vmatprep.mubr.msk.f32.mxu0 %vm23181_vm6, %v23180_v38 }
 0x45c   : > { %v22312_v43 = vpop.f32.mrf.mxu1  ;;  %v22339_v9 = vpop.f32.mrf.mxu0  ;;  %22710 = vmatpush3.msk.msra.mxu0 %vm4262_vm5, %v20121_v44 }
 0x45d   : > { %v12121_v31 = vadd.f32 %v12115_v41, %v12022_v3  ;;  %22731 = vmatprep.subr.mxu0 %v23180_v38  ;;  %v15698_v41 = vld [vmem:[#allocation2 + $0xa2] sm:$0xff]  ;;  %v26616_v3 = vld [vmem:[#allocation2 + $0xaa] sm:$0xff] }
 0x45e   : > { %v12204_v0 = vpop.f32.mrf.mxu1  ;;  %v12308_v46 = vpop.f32.mrf.mxu0  ;;  %22679 = vmatmul.mubr.msk.f32.vlgmr.msra.gmra.mxu1 %vm4207_vm2, %v26137_v14  ;;  %22693 = vmatmul.mubr.msk.f32.gmra.mxu0 %vm4207_vm2, %v26228_v57 }
 0x45f   : > { %v12218_v62 = vadd.f32 %v12204_v0, %v12119_v29  ;;  %22699 = vmatpush3.msk.msra.mxu1 %vm4262_vm5, %v20116_v63  ;;  %22681 = vmatprep.mubr.msk.f32.mxu1 %vm23181_vm6, %v23180_v38  ;;  %v20151_v63 = vld [vmem:[%s27326_s3 + $0xa0] sm:$0x3f] }
 0x460   : > { %v22328_v34 = vpop.f32.mrf.mxu1  ;;  %v22342_v35 = vpop.f32.mrf.mxu0  ;;  %22695 = vmatprep.mubr.msk.f32.mxu0 %vm23181_vm6, %v23180_v38  ;;  %22720 = vmatprep.subr.mxu1 %v23180_v38 }
 0x461   : > { %v12317_v18 = vadd.f32 %v12303_v39, %v12218_v62  ;;  %v15995_v34 = vld [vmem:[#allocation2 + $0xa5] sm:$0xff] }
 0x462   : > { %v12209_v20 = vpop.f32.mrf.mxu1  ;;  %v12313_v24 = vpop.f32.mrf.mxu0  ;;  %22682 = vmatmul.mubr.msk.f32.gmra.mxu1 %vm4207_vm2, %v26156_v36  ;;  %22696 = vmatmul.mubr.msk.f32.gmra.mxu0 %vm4207_vm2, %v26247_v8 }
 0x463   : > { %v12219_v14 = vadd.f32 %v12209_v20, %v12120_v51  ;;  %22684 = vmatprep.mubr.msk.f32.mxu1 %vm23181_vm6, %v23180_v38  ;;  %22711 = vmatprep.mubr.msk.f32.mxu0 %vm23181_vm6, %v23180_v38  ;;  %v20146_v20 = vld [vmem:[%s27326_s3 + $0x98] sm:$0x3f] }
 0x464   : > { %v22331_v57 = vpop.f32.mrf.mxu1  ;;  %v22345_v60 = vpop.f32.mrf.mxu0 }
 0x465   : > { %v12318_v50 = vadd.f32 %v12308_v46, %v12219_v14  ;;  %v15896_v57 = vld [vmem:[#allocation2 + $0xa4] sm:$0xff]  ;;  %v15996_v60 = vld [vmem:[#allocation2 + $0xad] sm:$0xff] }
 0x466   : > { %v12214_v4 = vpop.f32.mrf.mxu1  ;;  %v12501_v25 = vpop.f32.mrf.mxu0  ;;  %22685 = vmatmul.mubr.msk.f32.gmra.mxu1 %vm4207_vm2, %v26176_v40  ;;  %22712 = vmatmul.mubr.msk.f32.vlgmr.msra.gmra.mxu0 %vm4207_vm2, %v26064_v15 }
 0x467   : > { %v12220_v36 = vadd.f32 %v12214_v4, %v12121_v31  ;;  %22700 = vmatprep.mubr.msk.f32.mxu1 %vm23181_vm6, %v23180_v38  ;;  %22714 = vmatprep.mubr.msk.f32.mxu0 %vm23181_vm6, %v23180_v38 }
 0x468   : > { %v22334_v54 = vpop.f32.mrf.mxu1  ;;  %v22361_v59 = vpop.f32.mrf.mxu0  ;;  %22732 = vmatpush3.msk.msra.mxu0 %vm4262_vm5, %v20131_v55 }
 0x469   : > { %v12319_v28 = vadd.f32 %v12313_v24, %v12220_v36  ;;  %22753 = vmatprep.subr.mxu0 %v23180_v38  ;;  %v16192_v36 = vld [vmem:[#allocation2 + $0xa8] sm:$0xff] }
 0x46a   : > { %v12402_v37 = vpop.f32.mrf.mxu1  ;;  %v12506_v15 = vpop.f32.mrf.mxu0  ;;  %22701 = vmatmul.mubr.msk.f32.vlgmr.msra.gmra.mxu1 %vm4207_vm2, %v26081_v11  ;;  %22715 = vmatmul.mubr.msk.f32.gmra.mxu0 %vm4207_vm2, %v26284_v16  ;;  %v15796_v16 = vld [vmem:[#allocation2 + $0x9b] sm:$0xff] }
 0x46b   : > { %v12416_v32 = vadd.f32 %v12402_v37, %v12317_v18  ;;  %22721 = vmatpush3.msk.msra.mxu1 %vm4262_vm5, %v20126_v26  ;;  %22703 = vmatprep.mubr.msk.f32.mxu1 %vm23181_vm6, %v23180_v38  ;;  %v20161_v26 = vld [vmem:[%s27326_s3 + $0xb0] sm:$0x3f] }
 0x46c   : > { %v22350_v7 = vpop.f32.mrf.mxu1  ;;  %v22364_v22 = vpop.f32.mrf.mxu0  ;;  %22717 = vmatprep.mubr.msk.f32.mxu0 %vm23181_vm6, %v23180_v38  ;;  %22742 = vmatprep.subr.mxu1 %v23180_v38 }
 0x46d   : > { %v12515_v17 = vadd.f32 %v12501_v25, %v12416_v32  ;;  %v20156_v22 = vld [vmem:[%s27326_s3 + $0xa8] sm:$0x3f] }
 0x46e   : > { %v12407_v56 = vpop.f32.mrf.mxu1  ;;  %v12511_v52 = vpop.f32.mrf.mxu0  ;;  %22704 = vmatmul.mubr.msk.f32.gmra.mxu1 %vm4207_vm2, %v26210_v10  ;;  %22718 = vmatmul.mubr.msk.f32.gmra.mxu0 %vm4207_vm2, %v26308_v45 }
 0x46f   : > { %v12417_v11 = vadd.f32 %v12407_v56, %v12318_v50  ;;  %22706 = vmatprep.mubr.msk.f32.mxu1 %vm23181_vm6, %v23180_v38  ;;  %22733 = vmatprep.mubr.msk.f32.mxu0 %vm23181_vm6, %v23180_v38 }
 0x470   : > { %v22353_v5 = vpop.f32.mrf.mxu1  ;;  %v22367_v53 = vpop.f32.mrf.mxu0 }
 0x471   : > { %v12516_v27 = vadd.f32 %v12506_v15, %v12417_v11  ;;  %v16193_v15 = vld [vmem:[#allocation2 + $0xb0] sm:$0xff]  ;;  %v16194_v11 = vld [vmem:[#allocation2 + $0xb8] sm:$0xff] }
 0x472   : > { %v12412_v33 = vpop.f32.mrf.mxu1  ;;  %v12699_v10 = vpop.f32.mrf.mxu0  ;;  %22707 = vmatmul.mubr.msk.f32.gmra.mxu1 %vm4207_vm2, %v26230_v2  ;;  %22734 = vmatmul.mubr.msk.f32.vlgmr.msra.gmra.mxu0 %vm4207_vm2, %v15796_v16 }
 0x473   : > { %v12418_v45 = vadd.f32 %v12412_v33, %v12319_v28  ;;  %22722 = vmatprep.mubr.msk.f32.mxu1 %vm23181_vm6, %v23180_v38  ;;  %22736 = vmatprep.mubr.msk.f32.mxu0 %vm23181_vm6, %v23180_v38 }
 0x474   : > { %v22356_v6 = vpop.f32.mrf.mxu1  ;;  %v22383_v58 = vpop.f32.mrf.mxu0  ;;  %22754 = vmatpush3.msk.msra.mxu0 %vm4262_vm5, %v20141_v42 }
 0x475   : > { %v12517_v2 = vadd.f32 %v12511_v52, %v12418_v45  ;;  %22775 = vmatprep.subr.mxu0 %v23180_v38  ;;  %v16094_v52 = vld [vmem:[#allocation2 + $0xa6] sm:$0xff]  ;;  %v16391_v6 = vld [vmem:[#allocation2 + $0xb2] sm:$0xff] }
 0x476   : > { %v12600_v29 = vpop.f32.mrf.mxu1  ;;  %v12704_v19 = vpop.f32.mrf.mxu0  ;;  %22723 = vmatmul.mubr.msk.f32.vlgmr.msra.gmra.mxu1 %vm4207_vm2, %v15697_v21  ;;  %22737 = vmatmul.mubr.msk.f32.gmra.mxu0 %vm4207_vm2, %v15797_v49  ;;  %v16291_v49 = vld [vmem:[#allocation2 + $0xa9] sm:$0xff] }
 0x477   : > { %v12614_v48 = vadd.f32 %v12600_v29, %v12515_v17  ;;  %22743 = vmatpush3.msk.msra.mxu1 %vm4262_vm5, %v20136_v61  ;;  %22725 = vmatprep.mubr.msk.f32.mxu1 %vm23181_vm6, %v23180_v38 }
 0x478   : > { %v22372_v1 = vpop.f32.mrf.mxu1  ;;  %v22386_v23 = vpop.f32.mrf.mxu0  ;;  %22739 = vmatprep.mubr.msk.f32.mxu0 %vm23181_vm6, %v23180_v38  ;;  %22764 = vmatprep.subr.mxu1 %v23180_v38 }
 0x479   : > { %v26607_v44 = vadd.f32 %v12699_v10, %v12614_v48  ;;  %v20171_v10 = vld [vmem:[%s27326_s3 + $0xc0] sm:$0x3f]  ;;  %v16292_v48 = vld [vmem:[#allocation2 + $0xb1] sm:$0xff] }
 0x47a   : > { %v12605_v51 = vpop.f32.mrf.mxu1  ;;  %v12709_v13 = vpop.f32.mrf.mxu0  ;;  %22726 = vmatmul.mubr.msk.f32.gmra.mxu1 %vm4207_vm2, %v15698_v41  ;;  %22740 = vmatmul.mubr.msk.f32.gmra.mxu0 %vm4207_vm2, %v26602_v47  ;;  %v16392_v41 = vld [vmem:[#allocation2 + $0xba] sm:$0xff] }
 0x47b   : > { %v12615_v39 = vadd.f32 %v12605_v51, %v12516_v27  ;;  %22728 = vmatprep.mubr.msk.f32.mxu1 %vm23181_vm6, %v23180_v38  ;;  %22755 = vmatprep.mubr.msk.f32.mxu0 %vm23181_vm6, %v23180_v38 }
 0x47c   : > { %v22375_v43 = vpop.f32.mrf.mxu1  ;;  %v22389_v9 = vpop.f32.mrf.mxu0 }
 0x47d   : > { %v26621_v31 = vadd.f32 %v12704_v19, %v12615_v39  ;;  %v16293_v39 = vld [vmem:[#allocation2 + $0xb9] sm:$0xff] }
 0x47e   : > { %v12610_v0 = vpop.f32.mrf.mxu1  ;;  %v26623_v46 = vpop.f32.mrf.mxu0  ;;  %22729 = vmatmul.mubr.msk.f32.gmra.mxu1 %vm4207_vm2, %v26616_v3  ;;  %22756 = vmatmul.mubr.msk.f32.vlgmr.msra.gmra.mxu0 %vm4207_vm2, %v26176_v40  ;;  %v20187_v9 = vld [vmem:[%s27328_s5 + $0x38] sm:$0xf] }
 0x47f   : > { %v12616_v62 = vadd.f32 %v12610_v0, %v12517_v2  ;;  %22744 = vmatprep.mubr.msk.f32.mxu1 %vm23181_vm6, %v23180_v38  ;;  %22758 = vmatprep.mubr.msk.f32.mxu0 %vm23181_vm6, %v23180_v38  ;;  %v20166_v2 = vld [vmem:[%s27326_s3 + $0xb8] sm:$0x3f] }
 0x480   : > { %v22378_v35 = vpop.f32.mrf.mxu1  ;;  %v22405_v18 = vpop.f32.mrf.mxu0  ;;  %22776 = vmatpush3.msk.msra.mxu0 %vm4262_vm5, %v20151_v63 }
 0x481   : > { %v26637_v24 = vadd.f32 %v12709_v13, %v12616_v62  ;;  %22797 = vmatprep.subr.mxu0 %v23180_v38  ;;  %v16589_v62 = vld [vmem:[#allocation2 + $0xb4] sm:$0xff] }
 0x482   : > { %v26640_v40 = vpop.f32.mrf.mxu1  ;;  %v26642_v14 = vpop.f32.mrf.mxu0  ;;  %22745 = vmatmul.mubr.msk.f32.vlgmr.msra.gmra.mxu1 %vm4207_vm2, %v26193_v12  ;;  %22759 = vmatmul.mubr.msk.f32.gmra.mxu0 %vm4207_vm2, %v15995_v34  ;;  %v26663_v12 = vld [vmem:[#allocation2 + $0xac] sm:$0xff] }
 0x483   : > { %22765 = vmatpush3.msk.msra.mxu1 %vm4262_vm5, %v20146_v20  ;;  %22747 = vmatprep.mubr.msk.f32.mxu1 %vm23181_vm6, %v23180_v38  ;;  %v20186_v18 = vld [vmem:[%s27328_s5 + $0x30] sm:$0xff]  ;;  %v20177_v20 = vld [vmem:[%s27328_s5 + $0x18] sm:$0xf] }
 0x484   : > { %v22394_v55 = vpop.f32.mrf.mxu1  ;;  %v22408_v50 = vpop.f32.mrf.mxu0  ;;  %22761 = vmatprep.mubr.msk.f32.mxu0 %vm23181_vm6, %v23180_v38  ;;  %22786 = vmatprep.subr.mxu1 %v23180_v38 }
 0x485   : > { %v16490_v55 = vld [vmem:[#allocation2 + $0xb3] sm:$0xff]  ;;  %v16590_v50 = vld [vmem:[#allocation2 + $0xbc] sm:$0xff] }
 0x486   : > { %v26653_v4 = vpop.f32.mrf.mxu1  ;;  %v26655_v25 = vpop.f32.mrf.mxu0  ;;  %22748 = vmatmul.mubr.msk.f32.gmra.mxu1 %vm4207_vm2, %v15896_v57  ;;  %22762 = vmatmul.mubr.msk.f32.gmra.mxu0 %vm4207_vm2, %v15996_v60 }
 0x487   : > { %22750 = vmatprep.mubr.msk.f32.mxu1 %vm23181_vm6, %v23180_v38  ;;  %22777 = vmatprep.mubr.msk.f32.mxu0 %vm23181_vm6, %v23180_v38 }
 0x488   : > { %v22397_v54 = vpop.f32.mrf.mxu1  ;;  %v22411_v59 = vpop.f32.mrf.mxu0 }
 0x48a   : > { %v26668_v28 = vpop.f32.mrf.mxu1  ;;  %v26670_v37 = vpop.f32.mrf.mxu0  ;;  %22751 = vmatmul.mubr.msk.f32.gmra.mxu1 %vm4207_vm2, %v26663_v12  ;;  %22778 = vmatmul.mubr.msk.f32.vlgmr.msra.gmra.mxu0 %vm4207_vm2, %v16192_v36 }
 0x48b   : > { %22766 = vmatprep.mubr.msk.f32.mxu1 %vm23181_vm6, %v23180_v38  ;;  %22780 = vmatprep.mubr.msk.f32.mxu0 %vm23181_vm6, %v23180_v38 }
 0x48c   : > { %v22400_v32 = vpop.f32.mrf.mxu1  ;;  %v22427_v7 = vpop.f32.mrf.mxu0  ;;  %22798 = vmatpush3.msk.msra.mxu0 %vm4262_vm5, %v20161_v26  ;;  %v16491_v26 = vld [vmem:[#allocation2 + $0xbb] sm:$0xff] }
 0x48d   : > { %22819 = vmatprep.subr.mxu0 %v23180_v38  ;;  %v20195_v7 = vld [vmem:[%s27328_s5 + $0x58] sm:$0xf] }
 0x48e   : > { %v26684_v17 = vpop.f32.mrf.mxu1  ;;  %v26686_v56 = vpop.f32.mrf.mxu0  ;;  %22767 = vmatmul.mubr.msk.f32.vlgmr.msra.gmra.mxu1 %vm4207_vm2, %v26247_v8  ;;  %22781 = vmatmul.mubr.msk.f32.gmra.mxu0 %vm4207_vm2, %v16193_v15  ;;  %v16095_v8 = vld [vmem:[#allocation2 + $0xae] sm:$0xff] }
 0x48f   : > { %22787 = vmatpush3.msk.msra.mxu1 %vm4262_vm5, %v20156_v22  ;;  %22769 = vmatprep.mubr.msk.f32.mxu1 %vm23181_vm6, %v23180_v38  ;;  %v12812_v22 = vadd.f32 %v26640_v40, %v26607_v44 }
 0x490   : > { %v22416_v16 = vpop.f32.mrf.mxu1  ;;  %v22430_v5 = vpop.f32.mrf.mxu0  ;;  %22783 = vmatprep.mubr.msk.f32.mxu0 %vm23181_vm6, %v23180_v38  ;;  %22808 = vmatprep.subr.mxu1 %v23180_v38 }
 0x491   : > { %v20194_v5 = vld [vmem:[%s27328_s5 + $0x50] sm:$0xff] }
 0x492   : > { %v26697_v53 = vpop.f32.mrf.mxu1  ;;  %v26699_v42 = vpop.f32.mrf.mxu0  ;;  %22770 = vmatmul.mubr.msk.f32.gmra.mxu1 %vm4207_vm2, %v16094_v52  ;;  %22784 = vmatmul.mubr.msk.f32.gmra.mxu0 %vm4207_vm2, %v16194_v11  ;;  %v16948_v52 = vld [vmem:[#allocation3 + $0x3] ss:$25 sm:$0x1] }
 0x493   : > { %22772 = vmatprep.mubr.msk.f32.mxu1 %vm23181_vm6, %v23180_v38  ;;  %22799 = vmatprep.mubr.msk.f32.mxu0 %vm23181_vm6, %v23180_v38 }
 0x494   : > { %v22419_v27 = vpop.f32.mrf.mxu1  ;;  %v22433_v33 = vpop.f32.mrf.mxu0 }
 0x495   : > { %v16706_v27 = vld [vmem:[%s27328_s5 + $0x8] sm:$0xf]  ;;  %v12813_v33 = vadd.f32 %v26653_v4, %v26621_v31  ;;  %v16705_v31 = vld [vmem:[%s27328_s5] sm:$0xff]  ;;  %v20202_v4 = vld [vmem:[%s27328_s5 + $0x70] sm:$0xff] }
 0x496   : > { %v26710_v45 = vpop.f32.mrf.mxu1  ;;  %v26712_v21 = vpop.f32.mrf.mxu0  ;;  %22773 = vmatmul.mubr.msk.f32.gmra.mxu1 %vm4207_vm2, %v16095_v8  ;;  %22800 = vmatmul.mubr.msk.f32.vlgmr.msra.gmra.mxu0 %vm4207_vm2, %v26616_v3  ;;  %v16708_v8 = vld [vmem:[#allocation3 + $0x1] ss:$25 sm:$0x1] }
 0x497   : > { %22788 = vmatprep.mubr.msk.f32.mxu1 %vm23181_vm6, %v23180_v38  ;;  %22802 = vmatprep.mubr.msk.f32.mxu0 %vm23181_vm6, %v23180_v38 }
 0x498   : > { %v22422_v58 = vpop.f32.mrf.mxu1  ;;  %v22449_v61 = vpop.f32.mrf.mxu0  ;;  %22820 = vmatpush3.msk.msra.mxu0 %vm4262_vm5, %v20171_v10  ;;  %v12911_v10 = vadd.f32 %v26623_v46, %v12812_v22  ;;  %v20218_v22 = vld [vmem:[%s27328_s5 + $0xb0] sm:$0xff] }
 0x499   : > { %22851 = vmatprep.subr.mxu0 %v23180_v38 }
 0x49a   : > { %v26726_v29 = vpop.f32.mrf.mxu1  ;;  %v26728_v19 = vpop.f32.mrf.mxu0  ;;  %22789 = vmatmul.mubr.msk.f32.vlgmr.msra.gmra.mxu1 %vm4207_vm2, %v16291_v49  ;;  %22803 = vmatmul.mubr.msk.f32.gmra.mxu0 %vm4207_vm2, %v16391_v6  ;;  %v17112_v49 = vld [vmem:[#allocation3 + $0x5] ss:$25 sm:$0x1]  ;;  %v20203_v6 = vld [vmem:[%s27328_s5 + $0x78] sm:$0xf]  ;;  %v13010_v46 = vadd.f32 %v26684_v17, %v12911_v10 }
 0x49b   : > { %22809 = vmatpush3.msk.msra.mxu1 %vm4262_vm5, %v20166_v2  ;;  %22791 = vmatprep.mubr.msk.f32.mxu1 %vm23181_vm6, %v23180_v38  ;;  %v20227_v10 = vld [vmem:[%s27328_s5 + $0xd8] sm:$0xf] }
 0x49c   : > { %v22438_v1 = vpop.f32.mrf.mxu1  ;;  %v22452_v23 = vpop.f32.mrf.mxu0  ;;  %22805 = vmatprep.mubr.msk.f32.mxu0 %vm23181_vm6, %v23180_v38  ;;  %22830 = vmatprep.subr.mxu1 %v23180_v38 }
 0x49d   : > { %v12912_v1 = vadd.f32 %v26642_v14, %v12813_v33  ;;  %v13109_v14 = vadd.f32 %v26670_v37, %v13010_v46  ;;  %v20182_v37 = vld [vmem:[%s27328_s5 + $0x20] sm:$0xff]  ;;  %v17604_v33 = vld [vmem:[#allocation3 + $0xb] ss:$25 sm:$0x1] }
 0x49e   : > { %v26738_v51 = vpop.f32.mrf.mxu1  ;;  %v26740_v13 = vpop.f32.mrf.mxu0  ;;  %22792 = vmatmul.mubr.msk.f32.gmra.mxu1 %vm4207_vm2, %v16292_v48  ;;  %22806 = vmatmul.mubr.msk.f32.gmra.mxu0 %vm4207_vm2, %v16392_v41  ;;  %v12814_v41 = vadd.f32 %v26668_v28, %v26637_v24  ;;  %v17276_v28 = vld [vmem:[#allocation3 + $0x7] ss:$25 sm:$0x1]  ;;  %v20226_v46 = vld [vmem:[%s27328_s5 + $0xd0] sm:$0xff] }
 0x49f   : > { %22794 = vmatprep.mubr.msk.f32.mxu1 %vm23181_vm6, %v23180_v38  ;;  %22821 = vmatprep.mubr.msk.f32.mxu0 %vm23181_vm6, %v23180_v38  ;;  %v13011_v24 = vadd.f32 %v26697_v53, %v12912_v1 }
 0x4a0   : > { %v22441_v3 = vpop.f32.mrf.mxu1  ;;  %v22455_v43 = vpop.f32.mrf.mxu0  ;;  %v12913_v53 = vadd.f32 %v26655_v25, %v12814_v41  ;;  %v20207_v41 = vld [vmem:[%s27328_s5 + $0x88] sm:$0xf] }
 0x4a1   : > { %v20183_v3 = vld [vmem:[%s27328_s5 + $0x28] sm:$0xf]  ;;  %v20211_v43 = vld [vmem:[%s27328_s5 + $0x98] sm:$0xf] }
 0x4a2   : > { %v26751_v63 = vpop.f32.mrf.mxu1  ;;  %v26753_v0 = vpop.f32.mrf.mxu0  ;;  %22795 = vmatmul.mubr.msk.f32.gmra.mxu1 %vm4207_vm2, %v16293_v39  ;;  %22822 = vmatmul.mubr.msk.f32.vlgmr.msra.gmra.mxu0 %vm4207_vm2, %v26663_v12  ;;  %v16704_v39 = vld [vmem:[#allocation3] ss:$25 sm:$0x1]  ;;  %v13012_v25 = vadd.f32 %v26710_v45, %v12913_v53 }
 0x4a3   : > { %22810 = vmatprep.mubr.msk.f32.mxu1 %vm23181_vm6, %v23180_v38  ;;  %22824 = vmatprep.mubr.msk.f32.mxu0 %vm23181_vm6, %v23180_v38 }
 0x4a4   : > { %v22444_v34 = vpop.f32.mrf.mxu1  ;;  %v22471_v35 = vpop.f32.mrf.mxu0  ;;  %22852 = vmatpush3.msk.msra.mxu0 %vm16715_vm9, %v20187_v9 }
 0x4a5   : > { %22853 = vmatprep.subr.mxu0 %v23180_v38  ;;  %v13208_v34 = vadd.f32 %v26726_v29, %v13109_v14  ;;  %v20210_v35 = vld [vmem:[%s27328_s5 + $0x90] sm:$0xff]  ;;  %v13110_v29 = vadd.f32 %v26686_v56, %v13011_v24  ;;  %v20206_v24 = vld [vmem:[%s27328_s5 + $0x80] sm:$0xff] }
 0x4a6   : > { %v26770_v57 = vpop.f32.mrf.mxu1  ;;  %v26772_v60 = vpop.f32.mrf.mxu0  ;;  %22811 = vmatmul.mubr.msk.f32.vlgmr.msra.gmra.mxu1 %vm4207_vm2, %v26602_v47  ;;  %22825 = vmatmul.mubr.msk.f32.gmra.mxu0 %vm4207_vm2, %v16589_v62  ;;  %v20176_v47 = vld [vmem:[%s27328_s5 + $0x10] sm:$0xff] }
 0x4a7   : > { %22813 = vmatprep.mubr.msk.f32.mxu1 %vm23181_vm6, %v23180_v38  ;;  %22827 = vmatprep.mubr.msk.f32.mxu0 %vm23181_vm6, %v23180_v38  ;;  %v13307_v45 = vadd.f32 %v26712_v21, %v13208_v34  ;;  %v17440_v56 = vld [vmem:[#allocation3 + $0x9] ss:$25 sm:$0x1]  ;;  %v17358_v34 = vld [vmem:[#allocation3 + $0x8] ss:$25 sm:$0x1] }
 0x4a8   : > { %v22460_v12 = vpop.f32.mrf.mxu1  ;;  %v22474_v36 = vpop.f32.mrf.mxu0  ;;  %22854 = vmatpush3.msra.mxu0 %v20186_v18  ;;  %22831 = vmatpush3.msk.msra.mxu1 %vm16715_vm9, %v20177_v20 }
 0x4a9   : > { %22865 = vmatprep.subr.mxu0 %v23180_v38  ;;  %22832 = vmatprep.subr.mxu1 %v23180_v38 }
 0x4aa   : > { %v26787_v54 = vpop.f32.mrf.mxu1  ;;  %v26789_v59 = vpop.f32.mrf.mxu0  ;;  %22814 = vmatmul.mubr.msk.f32.gmra.mxu1 %vm4207_vm2, %v16490_v55  ;;  %22828 = vmatmul.mubr.msk.f32.gmra.mxu0 %vm4207_vm2, %v16590_v50  ;;  %v16866_v55 = vld [vmem:[#allocation3 + $0x2] ss:$25 sm:$0x1] }
 0x4ab   : > { %22816 = vmatprep.mubr.msk.f32.mxu1 %vm23181_vm6, %v23180_v38  ;;  %22855 = vmatprep.mubr.msk.f32.mxu0 %vm23181_vm6, %v23180_v38  ;;  %v20191_v50 = vld [vmem:[%s27328_s5 + $0x48] sm:$0xf] }
 0x4ac   : > { %v22463_v15 = vpop.f32.mrf.mxu1  ;;  %v22477_v32 = vpop.f32.mrf.mxu0  ;;  %22833 = vmatpush3.msra.mxu1 %v20176_v47  ;;  %v13209_v47 = vadd.f32 %v26738_v51, %v13110_v29  ;;  %v20190_v51 = vld [vmem:[%s27328_s5 + $0x40] sm:$0xff] }
 0x4ad   : > { %22837 = vmatprep.subr.mxu1 %v23180_v38  ;;  %v13111_v32 = vadd.f32 %v26699_v42, %v13012_v25 }
 0x4ae   : > { %v26803_v11 = vpop.f32.mrf.mxu1  ;;  %v26805_v16 = vpop.f32.mrf.mxu0  ;;  %22817 = vmatmul.mubr.msk.f32.gmra.mxu1 %vm4207_vm2, %v16491_v26  ;;  %22856 = vmatmul.mubr.msk.f32.vlgmr.msra.gmra.mxu0 %vm6744_vm7, %v16948_v52  ;;  %v20219_v26 = vld [vmem:[%s27328_s5 + $0xb8] sm:$0xf]  ;;  %v13308_v42 = vadd.f32 %v26728_v19, %v13209_v47 }
 0x4af   : > { %22866 = vmatpush3.msk.msra.mxu0 %vm16715_vm9, %v20195_v7  ;;  %22834 = vmatprep.mubr.msk.f32.mxu1 %vm23181_vm6, %v23180_v38  ;;  %v13406_v7 = vadd.f32 %v26770_v57, %v13307_v45  ;;  %v17030_v57 = vld [vmem:[#allocation3 + $0x4] ss:$25 sm:$0x1] }
 0x4b0   : > { %v22466_v44 = vpop.f32.mrf.mxu1  ;;  %v22493_v40 = vpop.f32.mrf.mxu0  ;;  %22867 = vmatprep.subr.mxu0 %v23180_v38  ;;  %22869 = vmatprep.mubr.msk.f32.mxu0 %vm23181_vm6, %v23180_v38 }
 0x4b1   : > { %22868 = vmatpush3.msra.mxu0 %v20194_v5  ;;  %v13210_v44 = vadd.f32 %v26751_v63, %v13111_v32  ;;  %v20199_v40 = vld [vmem:[%s27328_s5 + $0x68] sm:$0xf]  ;;  %v13407_v63 = vadd.f32 %v26787_v54, %v13308_v42  ;;  %v13505_v19 = vadd.f32 %v26753_v0, %v13406_v7  ;;  %v20198_v54 = vld [vmem:[%s27328_s5 + $0x60] sm:$0xff] }
 0x4b2   : > { %v26827_v58 = vpop.f32.mrf.mxu1  ;;  %v26829_v61 = vpop.f32.mrf.mxu0  ;;  %22835 = vmatmul.mubr.msk.f32.vlgmr.msra.gmra.mxu1 %vm6744_vm7, %v16708_v8  ;;  %22870 = vmatmul.mubr.msk.f32.vlgmr.msra.gmra.mxu0 %vm6744_vm7, %v17112_v49  ;;  %v20231_v32 = vld [vmem:[%s27328_s5 + $0xe8] sm:$0xf] }
 0x4b3   : > { %22879 = vmatprep.subr.mxu0 %v23180_v38  ;;  %22838 = vmatpush3.msk.msra.mxu1 %vm16715_vm9, %v16706_v27 }
 0x4b4   : > { %22880 = vmatpush3.msk.msra.mxu0 %vm16715_vm9, %v20203_v6  ;;  %v22482_v2 = vpop.f32.mrf.mxu1  ;;  %v22496_v48 = vpop.f32.mrf.mxu0  ;;  %22839 = vmatprep.subr.mxu1 %v23180_v38  ;;  %v13309_v6 = vadd.f32 %v26740_v13, %v13210_v44  ;;  %v13506_v13 = vadd.f32 %v26772_v60, %v13407_v63  ;;  %v17768_v60 = vld [vmem:[#allocation3 + $0xd] ss:$25 sm:$0x1] }
 0x4b5   : > { %22881 = vmatprep.subr.mxu0 %v23180_v38  ;;  %22840 = vmatpush3.msra.mxu1 %v16705_v31  ;;  %v13604_v31 = vadd.f32 %v26827_v58, %v13505_v19  ;;  %v17194_v58 = vld [vmem:[#allocation3 + $0x6] ss:$25 sm:$0x1] }
 0x4b6   : > { %22841 = vmatprep.mubr.msk.f32.mxu1 %vm23181_vm6, %v23180_v38  ;;  %22882 = vmatpush3.msra.mxu0 %v20202_v4  ;;  %v26850_v17 = vpop.f32.mrf.mxu1  ;;  %v26852_v23 = vpop.f32.mrf.mxu0  ;;  %v13408_v48 = vadd.f32 %v26803_v11, %v13309_v6 }
 0x4b7   : > { %22883 = vmatprep.mubr.msk.f32.mxu0 %vm23181_vm6, %v23180_v38  ;;  %22842 = vmatmul.mubr.msk.f32.vlgmr.msra.gmra.mxu1 %vm6744_vm7, %v16704_v39  ;;  %v13703_v11 = vadd.f32 %v26805_v16, %v13604_v31  ;;  %v20235_v16 = vld [vmem:[%s27328_s5 + $0xf8] sm:$0xf]  ;;  %v20238_v31 = vld [vmem:[%s27328_s5 + $0x100] sm:$0xff] }
 0x4b8   : > { %22844 = vmatprep.subr.mxu1 %v23180_v38  ;;  %22884 = vmatmul.mubr.msk.f32.vlgmr.msra.gmra.mxu0 %vm6744_vm7, %v17276_v28  ;;  %v22485_v9 = vpop.f32.mrf.mxu1  ;;  %v22499_v62 = vpop.f32.mrf.mxu0 }
 0x4b9   : > { %22893 = vmatprep.subr.mxu0 %v23180_v38  ;;  %22845 = vmatpush3.msk.msra.mxu1 %vm16715_vm9, %v20183_v3  ;;  %v13605_v3 = vadd.f32 %v26850_v17, %v13506_v13  ;;  %v13507_v17 = vadd.f32 %v26789_v59, %v13408_v48  ;;  %v20215_v9 = vld [vmem:[%s27328_s5 + $0xa8] sm:$0xf] }
 0x4ba   : > { %22894 = vmatpush3.msk.msra.mxu0 %vm16715_vm9, %v20211_v43  ;;  %22846 = vmatprep.subr.mxu1 %v23180_v38  ;;  %v26879_v18 = vpop.f32.mrf.mxu1  ;;  %v26881_v20 = vpop.f32.mrf.mxu0 }
 0x4bb   : > { %22895 = vmatprep.subr.mxu0 %v23180_v38  ;;  %22847 = vmatpush3.msra.mxu1 %v20182_v37  ;;  %v13606_v53 = vadd.f32 %v26879_v18, %v13507_v17  ;;  %v13704_v59 = vadd.f32 %v26829_v61, %v13605_v3  ;;  %v20234_v18 = vld [vmem:[%s27328_s5 + $0xf0] sm:$0xff] }
 0x4bc   : > { %22848 = vmatprep.mubr.msk.f32.mxu1 %vm23181_vm6, %v23180_v38  ;;  %22896 = vmatpush3.msra.mxu0 %v20210_v35  ;;  %v22488_v12 = vpop.f32.mrf.mxu1  ;;  %v22515_v36 = vpop.f32.mrf.mxu0  ;;  %v20214_v35 = vld [vmem:[%s27328_s5 + $0xa0] sm:$0xff] }
 0x4bd   : > { %22897 = vmatprep.mubr.msk.f32.mxu0 %vm23181_vm6, %v23180_v38  ;;  %22849 = vmatmul.mubr.msk.f32.vlgmr.msra.gmra.mxu1 %vm6744_vm7, %v16866_v55  ;;  %v13705_v47 = vadd.f32 %v26852_v23, %v13606_v53 }
 0x4be   : > { %22858 = vmatprep.subr.mxu1 %v23180_v38  ;;  %22898 = vmatmul.mubr.msk.f32.vlgmr.msra.gmra.mxu0 %vm6744_vm7, %v17440_v56  ;;  %v26904_v15 = vpop.f32.mrf.mxu1  ;;  %v26906_v21 = vpop.f32.mrf.mxu0  ;;  %v17522_v56 = vld [vmem:[#allocation3 + $0xa] ss:$25 sm:$0x1] }
 0x4bf   : > { %22907 = vmatprep.subr.mxu0 %v23180_v38  ;;  %22859 = vmatpush3.msk.msra.mxu1 %vm16715_vm9, %v20191_v50  ;;  %v13802_v43 = vadd.f32 %v26904_v15, %v13703_v11  ;;  %v20223_v50 = vld [vmem:[%s27328_s5 + $0xc8] sm:$0xf] }
 0x4c0   : > { %22908 = vmatpush3.msk.msra.mxu0 %vm16715_vm9, %v20219_v26  ;;  %22860 = vmatprep.subr.mxu1 %v23180_v38  ;;  %v22504_v52 = vpop.f32.mrf.mxu1  ;;  %v22518_v5 = vpop.f32.mrf.mxu0 }
 0x4c1   : > { %22909 = vmatprep.subr.mxu0 %v23180_v38  ;;  %22861 = vmatpush3.msra.mxu1 %v20190_v51  ;;  %v13901_v55 = vadd.f32 %v26881_v20, %v13802_v43  ;;  %v20222_v20 = vld [vmem:[%s27328_s5 + $0xc0] sm:$0xff]  ;;  %v17686_v5 = vld [vmem:[#allocation3 + $0xc] ss:$25 sm:$0x1] }
 0x4c2   : > { %22862 = vmatprep.mubr.msk.f32.mxu1 %vm23181_vm6, %v23180_v38  ;;  %22910 = vmatpush3.msra.mxu0 %v20218_v22  ;;  %v26925_v8 = vpop.f32.mrf.mxu1  ;;  %v26927_v27 = vpop.f32.mrf.mxu0 }
 0x4c3   : > { %22911 = vmatprep.mubr.msk.f32.mxu0 %vm23181_vm6, %v23180_v38  ;;  %22863 = vmatmul.mubr.msk.f32.vlgmr.msra.gmra.mxu1 %vm6744_vm7, %v17030_v57  ;;  %v13803_v61 = vadd.f32 %v26925_v8, %v13704_v59 }
 0x4c4   : > { %22872 = vmatprep.subr.mxu1 %v23180_v38  ;;  %22912 = vmatmul.mubr.msk.f32.vlgmr.msra.gmra.mxu0 %vm6744_vm7, %v17604_v33  ;;  %v22507_v49 = vpop.f32.mrf.mxu1  ;;  %v22521_v0 = vpop.f32.mrf.mxu0  ;;  %v20239_v33 = vld [vmem:[%s27328_s5 + $0x108] sm:$0xf] }
 0x4c5   : > { %22921 = vmatprep.subr.mxu0 %v23180_v38  ;;  %22873 = vmatpush3.msk.msra.mxu1 %vm16715_vm9, %v20199_v40  ;;  %v13902_v23 = vadd.f32 %v26906_v21, %v13803_v61  ;;  %v20230_v21 = vld [vmem:[%s27328_s5 + $0xe0] sm:$0xff] }
 0x4c6   : > { %22922 = vmatpush3.msk.msra.mxu0 %vm16715_vm9, %v20227_v10  ;;  %22874 = vmatprep.subr.mxu1 %v23180_v38  ;;  %v13798_v4 = vpop.f32.mrf.mxu1  ;;  %v26951_v2 = vpop.f32.mrf.mxu0 }
 0x4c7   : > { %22923 = vmatprep.subr.mxu0 %v23180_v38  ;;  %22875 = vmatpush3.msra.mxu1 %v20198_v54  ;;  %v13804_v15 = vadd.f32 %v13798_v4, %v13705_v47  ;;  %v17850_v54 = vld [vmem:[#allocation3 + $0xe] ss:$25 sm:$0x1] }
 0x4c8   : > { %22876 = vmatprep.mubr.msk.f32.mxu1 %vm23181_vm6, %v23180_v38  ;;  %22924 = vmatpush3.msra.mxu0 %v20226_v46  ;;  %v22510_v1 = vpop.f32.mrf.mxu1  ;;  %v22537_v39 = vpop.f32.mrf.mxu0 }
 0x4c9   : > { %22925 = vmatprep.mubr.msk.f32.mxu0 %vm23181_vm6, %v23180_v38  ;;  %22877 = vmatmul.mubr.msk.f32.vlgmr.msra.gmra.mxu1 %vm6744_vm7, %v17194_v58  ;;  %v13903_v40 = vadd.f32 %v26927_v27, %v13804_v15 }
 0x4ca   : > { %22886 = vmatprep.subr.mxu1 %v23180_v38  ;;  %22926 = vmatmul.mubr.msk.f32.vlgmr.msra.gmra.mxu0 %vm6744_vm7, %v17768_v60  ;;  %v13986_v14 = vpop.f32.mrf.mxu1  ;;  %v26971_v28 = vpop.f32.mrf.mxu0 }
 0x4cb   : > { %22887 = vmatpush3.msk.msra.mxu1 %vm16715_vm9, %v20207_v41  ;;  %22890 = vmatprep.mubr.msk.f32.mxu1 %vm23181_vm6, %v23180_v38  ;;  %v14000_v45 = vadd.f32 %v13986_v14, %v13901_v55 }
 0x4cc   : > { %22888 = vmatprep.subr.mxu1 %v23180_v38  ;;  %v22526_v62 = vpop.f32.mrf.mxu1  ;;  %v22540_v37 = vpop.f32.mrf.mxu0  ;;  %22935 = vmatprep.subr.mxu0 %v23180_v38 }
 0x4cd   : > { %22889 = vmatpush3.msra.mxu1 %v20206_v24  ;;  %22936 = vmatpush3.msk.msra.mxu0 %vm16715_vm9, %v20235_v16  ;;  %v14099_v44 = vadd.f32 %v26951_v2, %v14000_v45 }
 0x4ce   : > { %22891 = vmatmul.mubr.msk.f32.vlgmr.msra.gmra.mxu1 %vm6744_vm7, %v17358_v34  ;;  %22900 = vmatprep.subr.mxu1 %v23180_v38  ;;  %v13991_v25 = vpop.f32.mrf.mxu1  ;;  %v26994_v29 = vpop.f32.mrf.mxu0 }
 0x4cf   : > { %22901 = vmatpush3.msk.msra.mxu1 %vm16715_vm9, %v20215_v9  ;;  %22904 = vmatprep.mubr.msk.f32.mxu1 %vm23181_vm6, %v23180_v38  ;;  %v14001_v52 = vadd.f32 %v13991_v25, %v13902_v23 }
 0x4d0   : > { %22902 = vmatprep.subr.mxu1 %v23180_v38  ;;  %v22529_v12 = vpop.f32.mrf.mxu1  ;;  %v22543_v36 = vpop.f32.mrf.mxu0  ;;  %22937 = vmatprep.subr.mxu0 %v23180_v38 }
 0x4d1   : > { %22903 = vmatpush3.msra.mxu1 %v20214_v35  ;;  %22938 = vmatpush3.msra.mxu0 %v20234_v18  ;;  %v14100_v0 = vadd.f32 %v26971_v28, %v14001_v52 }
 0x4d2   : > { %22905 = vmatmul.mubr.msk.f32.vlgmr.msra.gmra.mxu1 %vm6744_vm7, %v17522_v56  ;;  %22914 = vmatprep.subr.mxu1 %v23180_v38  ;;  %v13996_v26 = vpop.f32.mrf.mxu1  ;;  %v14304_v51 = vpop.f32.mrf.mxu0 }
 0x4d3   : > { %22915 = vmatpush3.msk.msra.mxu1 %vm16715_vm9, %v20223_v50  ;;  %22918 = vmatprep.mubr.msk.f32.mxu1 %vm23181_vm6, %v23180_v38  ;;  %v14002_v10 = vadd.f32 %v13996_v26, %v13903_v40 }
 0x4d4   : > { %22916 = vmatprep.subr.mxu1 %v23180_v38  ;;  %v22532_v7 = vpop.f32.mrf.mxu1  ;;  %v22559_v22 = vpop.f32.mrf.mxu0  ;;  %22939 = vmatprep.mubr.msk.f32.mxu0 %vm23181_vm6, %v23180_v38 }
 0x4d5   : > { %22917 = vmatpush3.msra.mxu1 %v20222_v20  ;;  %22949 = vmatprep.subr.mxu0 %v23180_v38  ;;  %v14101_v58 = vadd.f32 %v26994_v29, %v14002_v10  ;;  %v20247_v10 = vld [vmem:[%s27328_s5 + $0x128] sm:$0xf] }
 0x4d6   : > { %22919 = vmatmul.mubr.msk.f32.vlgmr.msra.gmra.mxu1 %vm6744_vm7, %v17686_v5  ;;  %22928 = vmatprep.subr.mxu1 %v23180_v38  ;;  %v14184_v42 = vpop.f32.mrf.mxu1  ;;  %v14309_v57 = vpop.f32.mrf.mxu0 }
 0x4d7   : > { %22929 = vmatpush3.msk.msra.mxu1 %vm16715_vm9, %v20231_v32  ;;  %22932 = vmatprep.mubr.msk.f32.mxu1 %vm23181_vm6, %v23180_v38  ;;  %v14198_v8 = vadd.f32 %v14184_v42, %v14099_v44 }
 0x4d8   : > { %22930 = vmatprep.subr.mxu1 %v23180_v38  ;;  %v22548_v63 = vpop.f32.mrf.mxu1  ;;  %v22562_v19 = vpop.f32.mrf.mxu0 }
 0x4d9   : > { %22931 = vmatpush3.msra.mxu1 %v20230_v21  ;;  %v14201_v49 = vadd.f32 %v27365_v30, %v14198_v8 }
 0x4da   : > { %22933 = vmatmul.mubr.msk.f32.vlgmr.msra.gmra.mxu1 %vm6744_vm7, %v17850_v54  ;;  %v14189_v6 = vpop.f32.mrf.mxu1  ;;  %v14314_v27 = vpop.f32.mrf.mxu0  ;;  %22942 = vmatprep.subr.mxu1 %v23180_v38 }
 0x4db   : > { %v14204_v46 = vmax.f32 %v14201_v49, 0.0  ;;  %v14199_v4 = vadd.f32 %v14189_v6, %v14100_v0  ;;  %22943 = vmatpush3.msk.msra.mxu1 %vm16715_vm9, %v20239_v33  ;;  %22946 = vmatprep.mubr.msk.f32.mxu1 %vm23181_vm6, %v23180_v38  ;;  %v20243_v33 = vld [vmem:[%s27328_s5 + $0x118] sm:$0xf] }
 0x4dc   : > { %v22551_v2 = vpop.f32.mrf.mxu1  ;;  %v22565_v48 = vpop.f32.mrf.mxu0  ;;  %22944 = vmatprep.subr.mxu1 %v23180_v38 }
 0x4dd   : > { %14207 = vst.msk [vmem:[#allocation5] sm:$0xff] %vm6744_vm7, %v14204_v46  ;;  %v14202_v13 = vadd.f32 %v27365_v30, %v14199_v4  ;;  %22945 = vmatpush3.msra.mxu1 %v20238_v31  ;;  %v20246_v2 = vld [vmem:[%s27328_s5 + $0x120] sm:$0xff] }
 0x4de   : > { %v14194_v41 = vpop.f32.mrf.mxu1  ;;  %v14492_v1 = vpop.f32.mrf.mxu0  ;;  %22956 = vmatprep.subr.mxu1 %v23180_v38 }
 0x4df   : > { %v14205_v39 = vmax.f32 %v14202_v13, 0.0  ;;  %v14200_v3 = vadd.f32 %v14194_v41, %v14101_v58  ;;  %v20251_v41 = vld [vmem:[%s27328_s5 + $0x138] sm:$0xf] }
 0x4e0   : > { %v22554_v11 = vpop.f32.mrf.mxu1  ;;  %v22581_v60 = vpop.f32.mrf.mxu0 }
 0x4e1   : > { %14208 = vst.msk [vmem:[#allocation5 + $0x8] sm:$0xff] %vm6744_vm7, %v14205_v39  ;;  %v14203_v24 = vadd.f32 %v27365_v30, %v14200_v3 }
 0x4e2   : > { %v14396_v14 = vpop.f32.mrf.mxu1  ;;  %v14497_v28 = vpop.f32.mrf.mxu0 }
 0x4e3   : > { %v14206_v16 = vmax.f32 %v14203_v24, 0.0  ;;  %v14397_v17 = vadd.f32 %v14396_v14, %v14304_v51  ;;  %v20250_v14 = vld [vmem:[%s27328_s5 + $0x130] sm:$0xff] }
 0x4e4   : > { %v22570_v43 = vpop.f32.mrf.mxu1  ;;  %v22584_v9 = vpop.f32.mrf.mxu0 }
 0x4e5   : > { %14209 = vst.msk [vmem:[#allocation5 + $0x10] sm:$0xff] %vm6744_vm7, %v14206_v16  ;;  %v14506_v62 = vadd.f32 %v14492_v1, %v14397_v17 }
 0x4e6   : > { %v14401_v37 = vpop.f32.mrf.mxu1  ;;  %v14502_v53 = vpop.f32.mrf.mxu0 }
 0x4e7   : > { %v14402_v59 = vadd.f32 %v14401_v37, %v14309_v57 }
 0x4e8   : > { %v22573_v34 = vpop.f32.mrf.mxu1  ;;  %v22587_v35 = vpop.f32.mrf.mxu0  ;;  %v14210_v61 = vld [vmem:[#allocation5] ss:$2 sm:$0x1f]  ;;  %v14211_v55 = vld [vmem:[#allocation5 + $0x1] ss:$2 sm:$0x1f] }
 0x4e9   : > { %v14507_v25 = vadd.f32 %v14497_v28, %v14402_v59  ;;  %v14212_v20 = vmax.f32 %v14210_v61, %v14211_v55 }
 0x4ea   : > { %v14406_v29 = vpop.f32.mrf.mxu1  ;;  %v14690_v18 = vpop.f32.mrf.mxu0 }
 0x4eb   : > { %v14407_v50 = vadd.f32 %v14406_v29, %v14314_v27  ;;  %v20242_v27 = vld [vmem:[%s27328_s5 + $0x110] sm:$0xff] }
 0x4ec   : > { %v22576_v12 = vpop.f32.mrf.mxu1  ;;  %v22603_v36 = vpop.f32.mrf.mxu0  ;;  %v14213_v47 = vld [vmem:[#allocation5 + $0xe] ss:$2 sm:$0x1f]  ;;  %v14214_v45 = vld [vmem:[#allocation5 + $0xf] ss:$2 sm:$0x1f] }
 0x4ed   : > { %v14508_v56 = vadd.f32 %v14502_v53, %v14407_v50  ;;  %v14215_v26 = vmax.f32 %v14213_v47, %v14214_v45 }
 0x4ee   : > { %v14591_v51 = vpop.f32.mrf.mxu1  ;;  %v14695_v15 = vpop.f32.mrf.mxu0 }
 0x4ef   : > { %v14605_v23 = vadd.f32 %v14591_v51, %v14506_v62  ;;  %v14216_v32 = vmax.f32 %v14212_v20, %v14215_v26 }
 0x4f0   : > { %v22592_v7 = vpop.f32.mrf.mxu1  ;;  %v22606_v22 = vpop.f32.mrf.mxu0 }
 0x4f1   : > { %14217 = vst.msk [vmem:[#allocation3 + $0xf] sm:$0x1f] %vm6758_vm8, %v14216_v32  ;;  %v14704_v52 = vadd.f32 %v14690_v18, %v14605_v23  ;;  %v20259_v23 = vld [vmem:[%s27328_s5 + $0x158] sm:$0xf] }
 0x4f2   : > { %v14596_v5 = vpop.f32.mrf.mxu1  ;;  %v14700_v44 = vpop.f32.mrf.mxu0 }
 0x4f3   : > { %v14606_v21 = vadd.f32 %v14596_v5, %v14507_v25  ;;  %v20258_v5 = vld [vmem:[%s27328_s5 + $0x150] sm:$0xff] }
 0x4f4   : > { %v22595_v42 = vpop.f32.mrf.mxu1  ;;  %v22609_v57 = vpop.f32.mrf.mxu0 }
 0x4f5   : > { %v14705_v40 = vadd.f32 %v14695_v15, %v14606_v21  ;;  %v20255_v15 = vld [vmem:[%s27328_s5 + $0x148] sm:$0xf] }
 0x4f6   : > { %v14601_v8 = vpop.f32.mrf.mxu1  ;;  %v14888_v63 = vpop.f32.mrf.mxu0 }
 0x4f7   : > { %v14607_v19 = vadd.f32 %v14601_v8, %v14508_v56 }
 0x4f8   : > { %v22598_v54 = vpop.f32.mrf.mxu1  ;;  %v22625_v49 = vpop.f32.mrf.mxu0  ;;  %v17932_v0 = vld [vmem:[#allocation3 + $0xf] ss:$25 sm:$0x1]  ;;  %v18014_v6 = vld [vmem:[#allocation3 + $0x10] ss:$25 sm:$0x1] }
 0x4f9   : > { %22940 = vmatmul.mubr.msk.f32.vlgmr.msra.gmra.mxu0 %vm6744_vm7, %v17932_v0  ;;  %22947 = vmatmul.mubr.msk.f32.vlgmr.msra.gmra.mxu1 %vm6744_vm7, %v18014_v6  ;;  %v14706_v31 = vadd.f32 %v14700_v44, %v14607_v19  ;;  %v18096_v1 = vld [vmem:[#allocation3 + $0x11] ss:$25 sm:$0x1]  ;;  %v18178_v39 = vld [vmem:[#allocation3 + $0x12] ss:$25 sm:$0x1] }
 0x4fa   : > { %v14789_v46 = vpop.f32.mrf.mxu1  ;;  %v14893_v4 = vpop.f32.mrf.mxu0  ;;  %22950 = vmatpush3.msk.msra.mxu0 %vm16715_vm9, %v20243_v33  ;;  %22957 = vmatpush3.msk.msra.mxu1 %vm16715_vm9, %v20247_v10  ;;  %v18260_v43 = vld [vmem:[#allocation3 + $0x13] ss:$25 sm:$0x1] }
 0x4fb   : > { %v14803_v48 = vadd.f32 %v14789_v46, %v14704_v52  ;;  %22951 = vmatprep.subr.mxu0 %v23180_v38  ;;  %22958 = vmatprep.subr.mxu1 %v23180_v38  ;;  %v20254_v52 = vld [vmem:[%s27328_s5 + $0x140] sm:$0xff] }
 0x4fc   : > { %v22614_v13 = vpop.f32.mrf.mxu1  ;;  %v22628_v58 = vpop.f32.mrf.mxu0  ;;  %22952 = vmatpush3.msra.mxu0 %v20242_v27  ;;  %22953 = vmatprep.mubr.msk.f32.mxu0 %vm23181_vm6, %v23180_v38 }
 0x4fd   : > { %22959 = vmatpush3.msra.mxu1 %v20246_v2  ;;  %22960 = vmatprep.mubr.msk.f32.mxu1 %vm23181_vm6, %v23180_v38  ;;  %v14902_v3 = vadd.f32 %v14888_v63, %v14803_v48 }
 0x4fe   : > { %22954 = vmatmul.mubr.msk.f32.vlgmr.msra.gmra.mxu0 %vm6744_vm7, %v18096_v1  ;;  %22961 = vmatmul.mubr.msk.f32.vlgmr.msra.gmra.mxu1 %vm6744_vm7, %v18178_v39  ;;  %v14794_v11 = vpop.f32.mrf.mxu1  ;;  %v14898_v60 = vpop.f32.mrf.mxu0 }
 0x4ff   : > { %22963 = vmatprep.subr.mxu0 %v23180_v38  ;;  %v14804_v24 = vadd.f32 %v14794_v11, %v14705_v40  ;;  %22967 = vmatprep.mubr.msk.f32.mxu0 %vm23181_vm6, %v23180_v38 }
 0x500   : > { %22964 = vmatpush3.msk.msra.mxu0 %vm16715_vm9, %v20251_v41  ;;  %v22617_v28 = vpop.f32.mrf.mxu1  ;;  %v22631_v16 = vpop.f32.mrf.mxu0  ;;  %22970 = vmatprep.subr.mxu1 %v23180_v38 }
 0x501   : > { %22965 = vmatprep.subr.mxu0 %v23180_v38  ;;  %v14903_v17 = vadd.f32 %v14893_v4, %v14804_v24  ;;  %22974 = vmatprep.mubr.msk.f32.mxu1 %vm23181_vm6, %v23180_v38 }
 0x502   : > { %22966 = vmatpush3.msra.mxu0 %v20250_v14  ;;  %v14799_v9 = vpop.f32.mrf.mxu1  ;;  %v15086_v62 = vpop.f32.mrf.mxu0  ;;  %22971 = vmatpush3.msk.msra.mxu1 %vm16715_vm9, %v20255_v15 }
 0x503   : > { %22968 = vmatmul.mubr.msk.f32.vlgmr.msra.gmra.mxu0 %vm6744_vm7, %v18260_v43  ;;  %v14805_v37 = vadd.f32 %v14799_v9, %v14706_v31  ;;  %22977 = vmatprep.subr.mxu0 %v23180_v38 }
 0x504   : > { %v22620_v53 = vpop.f32.mrf.mxu1  ;;  %v22647_v59 = vpop.f32.mrf.mxu0  ;;  %22981 = vmatprep.mubr.msk.f32.mxu0 %vm23181_vm6, %v23180_v38  ;;  %22978 = vmatpush3.msk.msra.mxu0 %vm16715_vm9, %v20259_v23 }
 0x505   : > { %v14904_v34 = vadd.f32 %v14898_v60, %v14805_v37  ;;  %22972 = vmatprep.subr.mxu1 %v23180_v38  ;;  %22979 = vmatprep.subr.mxu0 %v23180_v38 }
 0x506   : > { %v14987_v35 = vpop.f32.mrf.mxu1  ;;  %v15091_v25 = vpop.f32.mrf.mxu0  ;;  %22973 = vmatpush3.msra.mxu1 %v20254_v52  ;;  %22980 = vmatpush3.msra.mxu0 %v20258_v5 }
 0x507   : > { %v15001_v29 = vadd.f32 %v14987_v35, %v14902_v3  ;;  %22984 = vmatprep.subr.mxu1 %v23180_v38  ;;  %22991 = vmatprep.subr.mxu0 %v23180_v38 }
 0x508   : > { %v22636_v18 = vpop.f32.mrf.mxu1  ;;  %v22650_v61 = vpop.f32.mrf.mxu0 }
 0x509   : > { %v27101_v55 = vadd.f32 %v15086_v62, %v15001_v29 }
 0x50a   : > { %v14992_v50 = vpop.f32.mrf.mxu1  ;;  %v15096_v12 = vpop.f32.mrf.mxu0 }
 0x50b   : > { %v15002_v36 = vadd.f32 %v14992_v50, %v14903_v17 }
 0x50c   : > { %v22639_v47 = vpop.f32.mrf.mxu1  ;;  %v22653_v45 = vpop.f32.mrf.mxu0 }
 0x50d   : > { %v27103_v56 = vadd.f32 %v15091_v25, %v15002_v36 }
 0x50e   : > { %v14997_v20 = vpop.f32.mrf.mxu1  ;;  %v27105_v26 = vpop.f32.mrf.mxu0 }
 0x50f   : > { %v15003_v51 = vadd.f32 %v14997_v20, %v14904_v34 }
 0x510   : > { %v22642_v32 = vpop.f32.mrf.mxu1  ;;  %v22669_v7 = vpop.f32.mrf.mxu0 }
 0x511   : > { %v27115_v22 = vadd.f32 %v15096_v12, %v15003_v51 }
 0x512   : > { %v15185_v44 = vpop.f32.mrf.mxu1  ;;  %v15289_v21 = vpop.f32.mrf.mxu0 }
 0x513   : > { %v15199_v61 = vadd.f32 %v15185_v44, %v27101_v55 }
 0x514   : > { %v22658_v42 = vpop.f32.mrf.mxu1  ;;  %v22672_v57 = vpop.f32.mrf.mxu0 }
 0x515   : > { %v15298_v20 = vadd.f32 %v27105_v26, %v15199_v61 }
 0x516   : > { %v15190_v40 = vpop.f32.mrf.mxu1  ;;  %v15294_v8 = vpop.f32.mrf.mxu0 }
 0x517   : > { %v15200_v45 = vadd.f32 %v15190_v40, %v27103_v56 }
 0x518   : > { %v22661_v63 = vpop.f32.mrf.mxu1  ;;  %v22675_v19 = vpop.f32.mrf.mxu0 }
 0x519   : > { %v15299_v5 = vadd.f32 %v15289_v21, %v15200_v45 }
 0x51a   : > { %v15195_v33 = vpop.f32.mrf.mxu1  ;;  %v15482_v10 = vpop.f32.mrf.mxu0 }
 0x51b   : > { %v15201_v52 = vadd.f32 %v15195_v33, %v27115_v22 }
 0x51c   : > { %v22664_v54 = vpop.f32.mrf.mxu1  ;;  %v22691_v49 = vpop.f32.mrf.mxu0 }
 0x51d   : > { %v15300_v54 = vadd.f32 %v15294_v8, %v15201_v52 }
 0x51e   : > { %v15383_v0 = vpop.f32.mrf.mxu1  ;;  %v15487_v6 = vpop.f32.mrf.mxu0 }
 0x51f   : > { %v15397_v23 = vadd.f32 %v15383_v0, %v15298_v20 }
 0x520   : > { %v22680_v27 = vpop.f32.mrf.mxu1  ;;  %v22694_v31 = vpop.f32.mrf.mxu0 }
 0x521   : > { %v15496_v55 = vadd.f32 %v15482_v10, %v15397_v23 }
 0x522   : > { %v15388_v46 = vpop.f32.mrf.mxu1  ;;  %v15492_v4 = vpop.f32.mrf.mxu0 }
 0x523   : > { %v15398_v63 = vadd.f32 %v15388_v46, %v15299_v5 }
 0x524   : > { %v22683_v2 = vpop.f32.mrf.mxu1  ;;  %v22697_v48 = vpop.f32.mrf.mxu0 }
 0x525   : > { %v15497_v26 = vadd.f32 %v15487_v6, %v15398_v63 }
 0x526   : > { %v15393_v13 = vpop.f32.mrf.mxu1  ;;  %v15680_v58 = vpop.f32.mrf.mxu0 }
 0x527   : > { %v15399_v40 = vadd.f32 %v15393_v13, %v15300_v54 }
 0x528   : > { %v22686_v41 = vpop.f32.mrf.mxu1  ;;  %v22713_v1 = vpop.f32.mrf.mxu0 }
 0x529   : > { %v15498_v22 = vadd.f32 %v15492_v4, %v15399_v40 }
 0x52a   : > { %v15581_v39 = vpop.f32.mrf.mxu1  ;;  %v15685_v3 = vpop.f32.mrf.mxu0 }
 0x52b   : > { %v15595_v49 = vadd.f32 %v15581_v39, %v15496_v55 }
 0x52c   : > { %v22702_v11 = vpop.f32.mrf.mxu1  ;;  %v22716_v60 = vpop.f32.mrf.mxu0 }
 0x52d   : > { %v15694_v48 = vadd.f32 %v15680_v58, %v15595_v49 }
 0x52e   : > { %v15586_v24 = vpop.f32.mrf.mxu1  ;;  %v15690_v14 = vpop.f32.mrf.mxu0 }
 0x52f   : > { %v15596_v0 = vadd.f32 %v15586_v24, %v15497_v26 }
 0x530   : > { %v22705_v28 = vpop.f32.mrf.mxu1  ;;  %v22719_v16 = vpop.f32.mrf.mxu0 }
 0x531   : > { %v15695_v10 = vadd.f32 %v15685_v3, %v15596_v0 }
 0x532   : > { %v15591_v17 = vpop.f32.mrf.mxu1  ;;  %v15878_v43 = vpop.f32.mrf.mxu0 }
 0x533   : > { %v15597_v46 = vadd.f32 %v15591_v17, %v15498_v22 }
 0x534   : > { %v22708_v9 = vpop.f32.mrf.mxu1  ;;  %v22735_v62 = vpop.f32.mrf.mxu0 }
 0x535   : > { %v15696_v13 = vadd.f32 %v15690_v14, %v15597_v46 }
 0x536   : > { %v15779_v37 = vpop.f32.mrf.mxu1  ;;  %v15883_v53 = vpop.f32.mrf.mxu0 }
 0x537   : > { %v15793_v21 = vadd.f32 %v15779_v37, %v15694_v48 }
 0x538   : > { %v22724_v59 = vpop.f32.mrf.mxu1  ;;  %v22738_v34 = vpop.f32.mrf.mxu0 }
 0x539   : > { %v15892_v39 = vadd.f32 %v15878_v43, %v15793_v21 }
 0x53a   : > { %v15784_v35 = vpop.f32.mrf.mxu1  ;;  %v15888_v25 = vpop.f32.mrf.mxu0 }
 0x53b   : > { %v15794_v8 = vadd.f32 %v15784_v35, %v15695_v10 }
 0x53c   : > { %v22727_v29 = vpop.f32.mrf.mxu1  ;;  %v22741_v18 = vpop.f32.mrf.mxu0 }
 0x53d   : > { %v15893_v58 = vadd.f32 %v15883_v53, %v15794_v8 }
 0x53e   : > { %v15789_v50 = vpop.f32.mrf.mxu1  ;;  %v16076_v12 = vpop.f32.mrf.mxu0 }
 0x53f   : > { %v15795_v24 = vadd.f32 %v15789_v50, %v15696_v13 }
 0x540   : > { %v22730_v36 = vpop.f32.mrf.mxu1  ;;  %v22757_v47 = vpop.f32.mrf.mxu0 }
 0x541   : > { %v15894_v17 = vadd.f32 %v15888_v25, %v15795_v24 }
 0x542   : > { %v15977_v51 = vpop.f32.mrf.mxu1  ;;  %v16081_v15 = vpop.f32.mrf.mxu0 }
 0x543   : > { %v15991_v6 = vadd.f32 %v15977_v51, %v15892_v39 }
 0x544   : > { %v22746_v32 = vpop.f32.mrf.mxu1  ;;  %v22760_v7 = vpop.f32.mrf.mxu0 }
 0x545   : > { %v16090_v37 = vadd.f32 %v16076_v12, %v15991_v6 }
 0x546   : > { %v15982_v42 = vpop.f32.mrf.mxu1  ;;  %v16086_v57 = vpop.f32.mrf.mxu0 }
 0x547   : > { %v15992_v4 = vadd.f32 %v15982_v42, %v15893_v58 }
 0x548   : > { %v22749_v44 = vpop.f32.mrf.mxu1  ;;  %v22763_v19 = vpop.f32.mrf.mxu0 }
 0x549   : > { %v16091_v43 = vadd.f32 %v16081_v15, %v15992_v4 }
 0x54a   : > { %v15987_v27 = vpop.f32.mrf.mxu1  ;;  %v16274_v56 = vpop.f32.mrf.mxu0 }
 0x54b   : > { %v15993_v35 = vadd.f32 %v15987_v27, %v15894_v17 }
 0x54c   : > { %v22752_v31 = vpop.f32.mrf.mxu1  ;;  %v22779_v2 = vpop.f32.mrf.mxu0 }
 0x54d   : > { %v16092_v50 = vadd.f32 %v16086_v57, %v15993_v35 }
 0x54e   : > { %v16175_v41 = vpop.f32.mrf.mxu1  ;;  %v16279_v1 = vpop.f32.mrf.mxu0 }
 0x54f   : > { %v16189_v3 = vadd.f32 %v16175_v41, %v16090_v37 }
 0x550   : > { %v22768_v33 = vpop.f32.mrf.mxu1  ;;  %v22782_v11 = vpop.f32.mrf.mxu0 }
 0x551   : > { %v16288_v51 = vadd.f32 %v16274_v56, %v16189_v3 }
 0x552   : > { %v16180_v60 = vpop.f32.mrf.mxu1  ;;  %v16284_v28 = vpop.f32.mrf.mxu0 }
 0x553   : > { %v16190_v14 = vadd.f32 %v16180_v60, %v16091_v43 }
 0x554   : > { %v22771_v16 = vpop.f32.mrf.mxu1  ;;  %v22785_v9 = vpop.f32.mrf.mxu0 }
 0x555   : > { %v16289_v12 = vadd.f32 %v16279_v1, %v16190_v14 }
 0x556   : > { %v16185_v62 = vpop.f32.mrf.mxu1  ;;  %v16472_v59 = vpop.f32.mrf.mxu0 }
 0x557   : > { %v16191_v5 = vadd.f32 %v16185_v62, %v16092_v50 }
 0x558   : > { %v22774_v34 = vpop.f32.mrf.mxu1  ;;  %v22801_v29 = vpop.f32.mrf.mxu0 }
 0x559   : > { %v16290_v54 = vadd.f32 %v16284_v28, %v16191_v5  ;;  %v20263_v5 = vld [vmem:[%s27328_s5 + $0x168] sm:$0xf] }
 0x55a   : > { %v16373_v18 = vpop.f32.mrf.mxu1  ;;  %v16477_v61 = vpop.f32.mrf.mxu0 }
 0x55b   : > { %v16387_v53 = vadd.f32 %v16373_v18, %v16288_v51 }
 0x55c   : > { %v22790_v36 = vpop.f32.mrf.mxu1  ;;  %v22804_v47 = vpop.f32.mrf.mxu0 }
 0x55d   : > { %v16486_v55 = vadd.f32 %v16472_v59, %v16387_v53 }
 0x55e   : > { %v16378_v45 = vpop.f32.mrf.mxu1  ;;  %v16482_v20 = vpop.f32.mrf.mxu0 }
 0x55f   : > { %v16388_v25 = vadd.f32 %v16378_v45, %v16289_v12  ;;  %v20267_v12 = vld [vmem:[%s27328_s5 + $0x178] sm:$0xf] }
 0x560   : > { %v22793_v23 = vpop.f32.mrf.mxu1  ;;  %v22807_v32 = vpop.f32.mrf.mxu0 }
 0x561   : > { %v16487_v26 = vadd.f32 %v16477_v61, %v16388_v25 }
 0x562   : > { %v16383_v7 = vpop.f32.mrf.mxu1  ;;  %v16670_v52 = vpop.f32.mrf.mxu0 }
 0x563   : > { %v16389_v40 = vadd.f32 %v16383_v7, %v16290_v54 }
 0x564   : > { %v22796_v42 = vpop.f32.mrf.mxu1  ;;  %v22823_v63 = vpop.f32.mrf.mxu0 }
 0x565   : > { %v16488_v21 = vadd.f32 %v16482_v20, %v16389_v40  ;;  %v20271_v40 = vld [vmem:[%s27328_s5 + $0x188] sm:$0xf] }
 0x566   : > { %v16571_v44 = vpop.f32.mrf.mxu1  ;;  %v16675_v19 = vpop.f32.mrf.mxu0 }
 0x567   : > { %v16585_v15 = vadd.f32 %v16571_v44, %v16486_v55 }
 0x568   : > { %v22812_v49 = vpop.f32.mrf.mxu1  ;;  %v22826_v27 = vpop.f32.mrf.mxu0 }
 0x569   : > { %v16684_v56 = vadd.f32 %v16670_v52, %v16585_v15  ;;  %v20266_v49 = vld [vmem:[%s27328_s5 + $0x170] sm:$0xff] }
 0x56a   : > { %v16576_v31 = vpop.f32.mrf.mxu1  ;;  %v16680_v57 = vpop.f32.mrf.mxu0 }
 0x56b   : > { %v16687_v2 = vadd.f32 %v27365_v30, %v16684_v56  ;;  %v16586_v0 = vadd.f32 %v16576_v31, %v16487_v26 }
 0x56c   : > { %v22815_v48 = vpop.f32.mrf.mxu1  ;;  %v22829_v41 = vpop.f32.mrf.mxu0 }
 0x56d   : > { %v16690_v1 = vmax.f32 %v16687_v2, 0.0  ;;  %v16685_v22 = vadd.f32 %v16675_v19, %v16586_v0  ;;  %v20262_v19 = vld [vmem:[%s27328_s5 + $0x160] sm:$0xff]  ;;  %v18768_v2 = vld [vmem:[%s27330_s7 + $0x70] sm:$0xff] }
 0x56e   : > { %v16581_v33 = vpop.f32.mrf.mxu1  ;;  %v17024_v11 = vpop.f32.mrf.mxu0  ;;  %v20270_v48 = vld [vmem:[%s27328_s5 + $0x180] sm:$0xff] }
 0x56f   : > { %16693 = vst.msk [vmem:[#allocation5] sm:$0xff] %vm6744_vm7, %v16690_v1  ;;  %v16688_v46 = vadd.f32 %v27365_v30, %v16685_v22  ;;  %v16587_v10 = vadd.f32 %v16581_v33, %v16488_v21  ;;  %v18767_v1 = vld [vmem:[%s27330_s7 + $0x68] sm:$0xff] }
 0x570   : > { %v22818_v60 = vpop.f32.mrf.mxu1  ;;  %v22857_v28 = vpop.f32.mrf.mxu0 }
 0x571   : > { %v16691_v8 = vmax.f32 %v16688_v46, 0.0  ;;  %v16686_v39 = vadd.f32 %v16680_v57, %v16587_v10  ;;  %v18765_v60 = vld [vmem:[%s27330_s7 + $0x58] sm:$0xff] }
 0x572   : > { %v16785_v16 = vpop.f32.mrf.mxu1  ;;  %v17188_v9 = vpop.f32.mrf.mxu0 }
 0x573   : > { %16694 = vst.msk [vmem:[#allocation5 + $0x8] sm:$0xff] %vm6744_vm7, %v16691_v8  ;;  %v16689_v13 = vadd.f32 %v27365_v30, %v16686_v39  ;;  %v18764_v39 = vld [vmem:[%s27330_s7 + $0x50] sm:$0xff] }
 0x574   : > { %v22836_v6 = vpop.f32.mrf.mxu1  ;;  %v22871_v62 = vpop.f32.mrf.mxu0 }
 0x575   : > { %v16692_v59 = vmax.f32 %v16689_v13, 0.0  ;;  %v18763_v13 = vld [vmem:[%s27330_s7 + $0x48] sm:$0xff] }
 0x577   : > { %16695 = vst.msk [vmem:[#allocation5 + $0x10] sm:$0xff] %vm6744_vm7, %v16692_v59  ;;  %v16861_v24 = vpop.f32.mrf.mxu1  ;;  %v18762_v59 = vld [vmem:[%s27330_s7 + $0x40] sm:$0xff] }
 0x578   : > { %v16862_v58 = vadd.f32 %v16861_v24, %v16785_v16  ;;  %v17352_v34 = vpop.f32.mrf.mxu0 }
 0x579   : > { %v22843_v29 = vpop.f32.mrf.mxu1 }
 0x57a   : > { %v22885_v4 = vpop.f32.mrf.mxu0  ;;  %v16696_v37 = vld [vmem:[#allocation5] ss:$2 sm:$0x1f]  ;;  %v16697_v18 = vld [vmem:[#allocation5 + $0x1] ss:$2 sm:$0x1f] }
 0x57b   : > { %v16698_v43 = vmax.f32 %v16696_v37, %v16697_v18 }
 0x57d   : > { %v16942_v61 = vpop.f32.mrf.mxu1 }
 0x57e   : > { %v16946_v17 = vadd.f32 %v16942_v61, %v16862_v58  ;;  %v17516_v3 = vpop.f32.mrf.mxu0  ;;  %v16699_v36 = vld [vmem:[#allocation5 + $0xe] ss:$2 sm:$0x1f]  ;;  %v16700_v47 = vld [vmem:[#allocation5 + $0xf] ss:$2 sm:$0x1f] }
 0x57f   : > { %v22850_v35 = vpop.f32.mrf.mxu1  ;;  %v16701_v30 = vmax.f32 %v16699_v36, %v16700_v47 }
 0x580   : > { %v22899_v45 = vpop.f32.mrf.mxu0  ;;  %v17028_v20 = vadd.f32 %v17024_v11, %v16946_v17  ;;  %v18766_v11 = vld [vmem:[%s27330_s7 + $0x60] sm:$0xff] }
 0x581   : > { %v16702_v14 = vmax.f32 %v16698_v43, %v16701_v30  ;;  %v18761_v45 = vld [vmem:[%s27330_s7 + $0x38] sm:$0xff] }
 0x583   : > { %v17106_v51 = vpop.f32.mrf.mxu1  ;;  %16703 = vst.msk [vmem:[#allocation3 + $0x14] sm:$0x1f] %vm6758_vm8, %v16702_v14  ;;  %v18759_v14 = vld [vmem:[%s27330_s7 + $0x28] sm:$0xff] }
 0x584   : > { %v17110_v23 = vadd.f32 %v17106_v51, %v17028_v20  ;;  %v17680_v32 = vpop.f32.mrf.mxu0  ;;  %v18760_v20 = vld [vmem:[%s27330_s7 + $0x30] sm:$0xff]  ;;  %v18758_v51 = vld [vmem:[%s27330_s7 + $0x20] sm:$0xff] }
 0x585   : > { %v22864_v50 = vpop.f32.mrf.mxu1 }
 0x586   : > { %v22913_v53 = vpop.f32.mrf.mxu0  ;;  %v17192_v7 = vadd.f32 %v17188_v9, %v17110_v23  ;;  %v18757_v23 = vld [vmem:[%s27330_s7 + $0x18] sm:$0xff]  ;;  %v18755_v50 = vld [vmem:[%s27330_s7 + $0x8] sm:$0xff] }
 0x587   : > { %v18852_v53 = vld [vmem:[%s27332_s9 + $0x38] sm:$0xf] }
 0x589   : > { %v17270_v52 = vpop.f32.mrf.mxu1 }
 0x58a   : > { %v17274_v42 = vadd.f32 %v17270_v52, %v17192_v7  ;;  %v17844_v63 = vpop.f32.mrf.mxu0  ;;  %v18342_v25 = vld [vmem:[#allocation3 + $0x14] ss:$25 sm:$0x1]  ;;  %v18424_v55 = vld [vmem:[#allocation3 + $0x15] ss:$25 sm:$0x1] }
 0x58b   : > { %v22878_v44 = vpop.f32.mrf.mxu1  ;;  %22975 = vmatmul.mubr.msk.f32.vlgmr.msra.gmra.mxu1 %vm6744_vm7, %v18342_v25  ;;  %22982 = vmatmul.mubr.msk.f32.vlgmr.msra.gmra.mxu0 %vm6744_vm7, %v18424_v55  ;;  %v18506_v26 = vld [vmem:[#allocation3 + $0x16] ss:$25 sm:$0x1]  ;;  %v18588_v31 = vld [vmem:[#allocation3 + $0x17] ss:$25 sm:$0x1] }
 0x58c   : > { %v22927_v54 = vpop.f32.mrf.mxu0  ;;  %v17356_v15 = vadd.f32 %v17352_v34, %v17274_v42  ;;  %22985 = vmatpush3.msk.msra.mxu1 %vm16715_vm9, %v20263_v5  ;;  %22992 = vmatpush3.msk.msra.mxu0 %vm16715_vm9, %v20267_v12  ;;  %v18670_v33 = vld [vmem:[#allocation3 + $0x18] ss:$25 sm:$0x1]  ;;  %v18851_v7 = vld [vmem:[%s27332_s9 + $0x30] sm:$0xff]  ;;  %v18850_v5 = vld [vmem:[%s27332_s9 + $0x28] sm:$0xff] }
 0x58d   : > { %22986 = vmatprep.subr.mxu1 %v23180_v38  ;;  %22993 = vmatprep.subr.mxu0 %v23180_v38  ;;  %v18754_v52 = vld [vmem:[%s27330_s7] sm:$0xff]  ;;  %v18848_v42 = vld [vmem:[%s27332_s9 + $0x18] sm:$0xff] }
 0x58e   : > { %v17434_v27 = vpop.f32.mrf.mxu1  ;;  %22987 = vmatpush3.msra.mxu1 %v20262_v19  ;;  %22988 = vmatprep.mubr.msk.f32.mxu1 %vm23181_vm6, %v23180_v38  ;;  %v18849_v12 = vld [vmem:[%s27332_s9 + $0x20] sm:$0xff] }
 0x58f   : > { %v17438_v56 = vadd.f32 %v17434_v27, %v17356_v15  ;;  %22994 = vmatpush3.msra.mxu0 %v20266_v49  ;;  %22995 = vmatprep.mubr.msk.f32.mxu0 %vm23181_vm6, %v23180_v38 }
 0x590   : > { %v22892_v57 = vpop.f32.mrf.mxu1  ;;  %22989 = vmatmul.mubr.msk.f32.vlgmr.msra.gmra.mxu1 %vm6744_vm7, %v18506_v26  ;;  %22996 = vmatmul.mubr.msk.f32.vlgmr.msra.gmra.mxu0 %vm6744_vm7, %v18588_v31 }
 0x591   : > { %v17520_v0 = vadd.f32 %v17516_v3, %v17438_v56  ;;  %22998 = vmatprep.subr.mxu1 %v23180_v38  ;;  %23002 = vmatprep.mubr.msk.f32.mxu1 %vm23181_vm6, %v23180_v38  ;;  %v18751_v57 = vld [vmem:[%s27329_s6] sm:$0x1] }
 0x592   : > { %v17598_v41 = vpop.f32.mrf.mxu1  ;;  %22999 = vmatpush3.msk.msra.mxu1 %vm16715_vm9, %v20271_v40  ;;  %23005 = vmatprep.subr.mxu0 %v23180_v38 }
 0x593   : > { %v17602_v22 = vadd.f32 %v17598_v41, %v17520_v0  ;;  %23000 = vmatprep.subr.mxu1 %v23180_v38  ;;  %23006 = vmatpush3.msra.mxu0 %v18768_v2 }
 0x594   : > { %v22906_v21 = vpop.f32.mrf.mxu1  ;;  %23001 = vmatpush3.msra.mxu1 %v20270_v48  ;;  %23007 = vmatprep.subr.mxu0 %v23180_v38 }
 0x595   : > { %v17684_v46 = vadd.f32 %v17680_v32, %v17602_v22  ;;  %23003 = vmatmul.mubr.msk.f32.vlgmr.msra.gmra.mxu1 %vm6744_vm7, %v18670_v33  ;;  %23008 = vmatpush3.msra.mxu0 %v18767_v1  ;;  %v18756_v32 = vld [vmem:[%s27330_s7 + $0x10] sm:$0xff]  ;;  %v18846_v22 = vld [vmem:[%s27332_s9 + $0x8] sm:$0xff]  ;;  %v18845_v21 = vld [vmem:[%s27332_s9] sm:$0xff] }
 0x596   : > { %v17762_v10 = vpop.f32.mrf.mxu1  ;;  %23009 = vmatprep.subr.mxu0 %v23180_v38  ;;  %23035 = vmatprep.mubr.msk.f32.mxu0 %vm23181_vm6, %v23180_v38  ;;  %v18847_v1 = vld [vmem:[%s27332_s9 + $0x10] sm:$0xff]  ;;  %v18769_v33 = vld [vmem:[%s27331_s8] sm:$0x1] }
 0x597   : > { %v17766_v28 = vadd.f32 %v17762_v10, %v17684_v46  ;;  %23010 = vmatpush3.msra.mxu0 %v18766_v11  ;;  %23038 = vmatprep.subr.mxu1 %v23180_v38 }
 0x598   : > { %v22920_v8 = vpop.f32.mrf.mxu1  ;;  %23011 = vmatprep.subr.mxu0 %v23180_v38  ;;  %23054 = vmatprep.mubr.msk.f32.mxu1 %vm23181_vm6, %v23180_v38 }
 0x599   : > { %v17848_v16 = vadd.f32 %v17844_v63, %v17766_v28  ;;  %23012 = vmatpush3.msra.mxu0 %v18765_v60  ;;  %23039 = vmatpush3.msk.msra.mxu1 %vm16715_vm9, %v18852_v53  ;;  %v18853_v28 = vld [vmem:[%s27333_s10] sm:$0x1] }
 0x59a   : > { %v17926_v9 = vpop.f32.mrf.mxu1  ;;  %23013 = vmatprep.subr.mxu0 %v23180_v38  ;;  %23040 = vmatprep.subr.mxu1 %v23180_v38 }
 0x59b   : > { %v17930_v6 = vadd.f32 %v17926_v9, %v17848_v16  ;;  %23014 = vmatpush3.msra.mxu0 %v18764_v39  ;;  %23041 = vmatpush3.msra.mxu1 %v18851_v7 }
 0x59c   : > { %v22934_v62 = vpop.f32.mrf.mxu1  ;;  %23015 = vmatprep.subr.mxu0 %v23180_v38  ;;  %23042 = vmatprep.subr.mxu1 %v23180_v38 }
 0x59d   : > { %23016 = vmatpush3.msra.mxu0 %v18763_v13  ;;  %23043 = vmatpush3.msra.mxu1 %v18850_v5 }
 0x59e   : > { %23017 = vmatprep.subr.mxu0 %v23180_v38  ;;  %23044 = vmatprep.subr.mxu1 %v23180_v38 }
 0x59f   : > { %23018 = vmatpush3.msra.mxu0 %v18762_v59  ;;  %23045 = vmatpush3.msra.mxu1 %v18849_v12 }
 0x5a0   : > { %23019 = vmatprep.subr.mxu0 %v23180_v38  ;;  %23046 = vmatprep.subr.mxu1 %v23180_v38 }
 0x5a1   : > { %23020 = vmatpush3.msra.mxu0 %v18761_v45  ;;  %23047 = vmatpush3.msra.mxu1 %v18848_v42 }
 0x5a2   : > { %23021 = vmatprep.subr.mxu0 %v23180_v38  ;;  %23048 = vmatprep.subr.mxu1 %v23180_v38 }
 0x5a3   : > { %23022 = vmatpush3.msra.mxu0 %v18760_v20  ;;  %23049 = vmatpush3.msra.mxu1 %v18847_v1 }
 0x5a4   : > { %23023 = vmatprep.subr.mxu0 %v23180_v38  ;;  %23050 = vmatprep.subr.mxu1 %v23180_v38 }
 0x5a5   : > { %23024 = vmatpush3.msra.mxu0 %v18759_v14  ;;  %23051 = vmatpush3.msra.mxu1 %v18846_v22 }
 0x5a6   : > { %23025 = vmatprep.subr.mxu0 %v23180_v38  ;;  %23052 = vmatprep.subr.mxu1 %v23180_v38 }
 0x5a7   : > { %23026 = vmatpush3.msra.mxu0 %v18758_v51  ;;  %23053 = vmatpush3.msra.mxu1 %v18845_v21 }
 0x5a8   : > { %23027 = vmatprep.subr.mxu0 %v23180_v38 }
 0x5a9   : > { %23028 = vmatpush3.msra.mxu0 %v18757_v23 }
 0x5aa   : > { %23029 = vmatprep.subr.mxu0 %v23180_v38 }
 0x5ab   : > { %23030 = vmatpush3.msra.mxu0 %v18756_v32 }
 0x5ac   : > { %23031 = vmatprep.subr.mxu0 %v23180_v38 }
 0x5ad   : > { %23032 = vmatpush3.msra.mxu0 %v18755_v50 }
 0x5ae   : > { %23033 = vmatprep.subr.mxu0 %v23180_v38 }
 0x5af   : > { %23034 = vmatpush3.msra.mxu0 %v18754_v52 }
 0x5b9   : > { %v18008_v24 = vpop.f32.mrf.mxu0  ;;  %v18090_v58 = vpop.f32.mrf.mxu1 }
 0x5ba   : > { %v18012_v34 = vadd.f32 %v18008_v24, %v17930_v6 }
 0x5bb   : > { %v22941_v29 = vpop.f32.mrf.mxu0  ;;  %v22948_v4 = vpop.f32.mrf.mxu1 }
 0x5bc   : > { %v18094_v37 = vadd.f32 %v18090_v58, %v18012_v34 }
 0x5be   : > { %v18172_v18 = vpop.f32.mrf.mxu0  ;;  %v18254_v61 = vpop.f32.mrf.mxu1 }
 0x5bf   : > { %v18176_v17 = vadd.f32 %v18172_v18, %v18094_v37 }
 0x5c0   : > { %v22955_v3 = vpop.f32.mrf.mxu0  ;;  %v22962_v36 = vpop.f32.mrf.mxu1 }
 0x5c1   : > { %v18258_v47 = vadd.f32 %v18254_v61, %v18176_v17 }
 0x5c3   : > { %v18336_v35 = vpop.f32.mrf.mxu0 }
 0x5c4   : > { %v18340_v43 = vadd.f32 %v18336_v35, %v18258_v47 }
 0x5c5   : > { %v22969_v30 = vpop.f32.mrf.mxu0 }
 0x64b   : > { %v18418_v63 = vpop.f32.mrf.mxu1  ;;  %v18500_v25 = vpop.f32.mrf.mxu0 }
 0x64c   : > { %v18422_v55 = vadd.f32 %v18418_v63, %v18340_v43 }
 0x64d   : > { %v22976_v44 = vpop.f32.mrf.mxu1  ;;  %v22983_v19 = vpop.f32.mrf.mxu0 }
 0x64e   : > { %v18504_v54 = vadd.f32 %v18500_v25, %v18422_v55 }
 0x650   : > { %v18582_v15 = vpop.f32.mrf.mxu1  ;;  %v18664_v49 = vpop.f32.mrf.mxu0 }
 0x651   : > { %v18586_v27 = vadd.f32 %v18582_v15, %v18504_v54 }
 0x652   : > { %v22990_v40 = vpop.f32.mrf.mxu1  ;;  %v22997_v56 = vpop.f32.mrf.mxu0 }
 0x653   : > { %v18668_v26 = vadd.f32 %v18664_v49, %v18586_v27 }
 0x655   : > { %v18746_v31 = vpop.f32.mrf.mxu1 }
 0x656   : > { %v18750_v2 = vadd.f32 %v18746_v31, %v18668_v26 }
 0x657   : > { %v23004_v0 = vpop.f32.mrf.mxu1 }
 0x658   : > { %v18752_v48 = vadd.f32 %v18751_v57, %v18750_v2 }
 0x65a   : > { %v18753_v41 = vmax.f32 %v18752_v48, 0.0 }
 0x65c   : > { %23036 = vmatmul.mubr.msk.f32.vlgmr.msra.gmra.mxu0 %vm18770_vm10, %v18753_v41 }
 0x71c   : > { %v18840_v11 = vpop.f32.mrf.mxu0 }
 0x71d   : > { %v18841_v46 = vadd.f32 %v18840_v11, %v18769_v33 }
 0x71e   : > { %v23037_v10 = vpop.f32.mrf.mxu0 }
 0x71f   : > { %v18844_v60 = vmax.f32 %v18841_v46, 0.0 }
 0x721   : > { %23055 = vmatmul.mubr.msk.f32.vlgmr.msra.gmra.mxu1 %vm18854_vm11, %v18844_v60 }
 0x7e1   : > { %v18927_v38 = vpop.f32.mrf.mxu1 }
 0x7e2   : > { %v18928_v8 = vadd.f32 %v18927_v38, %v18853_v28 }
 0x7e3   : > { %v23056_v39 = vpop.f32.mrf.mxu1 }
 0x7e4   : > { %18932 = vst.msk [vmem:[%s23310_s26] sm:$0x1] %vm18931_vm12, %v18928_v8 }
 0x7e5   : > { %23123 = shalt.err (!%p23120_p4)
}
 0x7e6   : > { %s23124_s26 = scalar_lea.hbm %s27285_s12, 16  ;;  %s23128_s19 = scalar_lea.hbm %s27334_s11, 32 }
 0x7e7   : > { %p23125_p7 = scmp.ne.s32.totalorder %s27285_s12, %s23124_s26  ;;  %p23129_p10 = scmp.lt.s32.totalorder %s27285_s12, %s27334_s11 }
 0x7e8   : > { %p23130_p11 = scmp.lt.s32.totalorder %s23128_s19, %s23124_s26 }
 0x7e9   : > { %p23126_p8 = pnand %p23125_p7, %p23281_p5 }
 0x7ea   : > { %p23131_p12 = por %p23130_p11, %p23129_p10 }
 0x7eb   : > { %p23127_p9 = pneg %p23126_p8 }
 0x7ed   : > { %p23132_p13 = pnand %p23131_p12, %p23127_p9 }
 0x7ef   : > { %23135 = shalt.err (!%p23132_p13)
}
 0x7f0   : > { %23061 = dma.vmem_to_hbm [thread:$0]  (%p23281_p5), %s18947_s25, 16, %s27285_s12, %s18934_s13  }
 0x7f1 PF: > { %p23067_p0 = scmp.ge.s32.totalorder %s23174_s20, 2  ;;  %s18958_s24 = sand.u32 1, %s23162_s17  }
 0x7f2   : > { %s18959_s21 = scalar_lea.sflag [#allocation7], %s18958_s24 }
 0x7f3   : > { %p23064_p1 = pnand %p23067_p0, %p23285_p6 }
 0x7f5   : > { %p23065_p2 = pneg %p23064_p1 }
 0x7f7   : > { %23157 = dma.done.wait (%p23065_p2), %s18959_s21, 16  }
 0x7f8   : > { %23159 = vsyncadd (%p23065_p2), %s18959_s21, 4294967280  ;;  %s27366_s30 = sld [smem:[#allocation9_spill]]  ;;  %p21_p3 = scmp.ge.s32.totalorder %s23268_s23, 4  }
 0x7f9   : > { %s27367_s19 = sld [smem:[#allocation10_spill]]  ;;  %s27368_s17 = smov %s23166_s18 }
 0x7fa   : > { %s27370_s20 = smov %s23268_s23  ;;  %23 = sbr.rel (!%p21_p3) target bundleno = 3 (0x3), region = 249 }
 0x7fe   : > { %s27369_s18 = smov %s27366_s30 }
 0x7ff   :  { %18963 = vsyncpa [#allocation7], 1 }
 0x800   :  { %18965 = vsyncpa [#allocation7 + $0x1], 1 }

</bundles_post_ra>
